<compile_context>
chip_gen: v5e
topology: v5e:2x2
jax: 0.10.0
libtpu: 0.0.40
codegen_flags: <defaults>
</compile_context>

<pallas_src>
import math
import numpy as np
import jax
import jax.numpy as jnp
from jax.experimental import pallas as pl
from jax.experimental.pallas import tpu as pltpu

# ----------------------- configuration (small, module-consistent) -----------------------
B = 2            # batch
C = 64           # channels (module default is 256; scaled down)
H_SP = 8         # feature map height
W_SP = 8         # feature map width
S = H_SP * W_SP  # sequence length
BS = B * S       # batch folded into rows
NHEAD = 8
HEAD_DIM = C // NHEAD
FF = 128         # feed-forward hidden dim (scaled-down analog of 2048)
EPS = 1e-5       # LayerNorm eps (PyTorch default)


def _tpu_kind():
    try:
        return jax.devices()[0].device_kind.lower()
    except Exception:
        return ""


_KIND = _tpu_kind()
# bf16 VPU/EUP exists on v6e/v7x; keep f32 exp on v5e (and anything unrecognized).
USE_BF16_EXP = any(t in _KIND for t in ("v6", "v7", "7x"))
# v7x has 2 TensorCores per chip -> shard the batch over a parallel grid axis there;
# on 1-TC chips keep a single grid step (avoids per-step overhead).
GRID_OVER_BATCH = any(t in _KIND for t in ("v7", "7x"))


# ----------------------------------- Pallas kernel --------------------------------------
def make_encoder_kernel(nb, use_bf16_exp):
    """nb = number of batches folded into the row axis of one grid step."""

    def kernel(pos_ref, x_ref,
               wqkv_ref, bqkv_ref,          # (C, 3C) bf16 fused [Wq*s | Wk | Wv], (1, 3C) f32
               wo_ref, bo_ref,              # (C, C) bf16, (1, C) f32
               g1_ref, bn1_ref,             # LayerNorm1 gamma/beta (1, C) f32
               w1_ref, bf1_ref,             # (C, FF) bf16, (1, FF) f32
               w2_ref, bf2_ref,             # (FF, C) bf16, (1, C) f32
               g2_ref, bn2_ref,             # LayerNorm2 gamma/beta (1, C) f32
               o_ref):
        # src = pos + x (pos is added before the encoder and is part of the residual stream)
        x = x_ref[...] + pos_ref[...]                       # (rows, C) f32
        x_bf = x.astype(jnp.bfloat16)

        # ---- fused QKV projection: one bf16 MXU pass over all heads ----
        qkv = jnp.dot(x_bf, wqkv_ref[...],
                      preferred_element_type=jnp.float32) + bqkv_ref[...]   # (rows, 3C)
        qkv_bf = qkv.astype(jnp.bfloat16)

        # ---- multi-head self-attention (Q = K = V = src) ----
        ctx_heads = []                                      # per-head (rows, D) bf16
        for h in range(NHEAD):                              # static unroll over heads
            qh = qkv_bf[:, h * HEAD_DIM:(h + 1) * HEAD_DIM]
            kh = qkv_bf[:, C + h * HEAD_DIM:C + (h + 1) * HEAD_DIM]
            vh = qkv_bf[:, 2 * C + h * HEAD_DIM:2 * C + (h + 1) * HEAD_DIM]
            ctx_rows = []
            for b in range(nb):                             # attention is per-batch (static)
                r0 = b * S
                qb = qh[r0:r0 + S]                          # sublane (row) slices -> cheap
                kb = kh[r0:r0 + S]
                vb = vh[r0:r0 + S]
                # q @ k^T with no materialized transpose (contract the shared D axis),
                # bf16 operands, f32 accumulation.
                s = jax.lax.dot_general(
                    qb, kb, dimension_numbers=(((1,), (1,)), ((), ())),
                    preferred_element_type=jnp.float32)     # (S, S) f32
                s = s - jnp.max(s, axis=-1, keepdims=True)
                if use_bf16_exp:
                    e = jnp.exp(s.astype(jnp.bfloat16))     # bf16 EUP (v6e/v7x)
                    denom = jnp.sum(e.astype(jnp.float32), axis=-1, keepdims=True)
                else:
                    e32 = jnp.exp(s)                        # f32 EUP (v5e)
                    denom = jnp.sum(e32, axis=-1, keepdims=True)
                    e = e32.astype(jnp.bfloat16)
                inv = pl.reciprocal(denom, approx=True)
                # normalize AFTER the PV matmul: the divide touches (S,D) not (S,S)
                ctx = jnp.dot(e, vb, preferred_element_type=jnp.float32) * inv   # (S, D)
                ctx_rows.append(ctx)
            ctx_h = ctx_rows[0] if nb == 1 else jnp.concatenate(ctx_rows, axis=0)
            ctx_heads.append(ctx_h.astype(jnp.bfloat16))
        # lane-stack heads -> single bf16 K=64 output projection (one MXU pass)
        ctx_all = jnp.concatenate(ctx_heads, axis=-1)       # (rows, C) bf16
        attn = jnp.dot(ctx_all, wo_ref[...],
                       preferred_element_type=jnp.float32) + bo_ref[...]

        # ---- residual + LayerNorm 1 (f32) ----
        y = x + attn
        mu = jnp.mean(y, axis=-1, keepdims=True)
        var = jnp.mean((y - mu) ** 2, axis=-1, keepdims=True)
        y = (y - mu) * jax.lax.rsqrt(var + EPS) * g1_ref[...] + bn1_ref[...]

        # ---- feed-forward (bf16 MXU, f32 accumulation) ----
        h1 = jnp.maximum(
            jnp.dot(y.astype(jnp.bfloat16), w1_ref[...],
                    preferred_element_type=jnp.float32) + bf1_ref[...], 0.0)
        ff = jnp.dot(h1.astype(jnp.bfloat16), w2_ref[...],
                     preferred_element_type=jnp.float32) + bf2_ref[...]

        # ---- residual + LayerNorm 2 (f32) ----
        z = y + ff
        mu2 = jnp.mean(z, axis=-1, keepdims=True)
        var2 = jnp.mean((z - mu2) ** 2, axis=-1, keepdims=True)
        z = (z - mu2) * jax.lax.rsqrt(var2 + EPS) * g2_ref[...] + bn2_ref[...]

        o_ref[...] = z.astype(o_ref.dtype)

    return kernel


def _full_spec(shape):
    n = len(shape)
    return pl.BlockSpec(shape, lambda i, _n=n: (0,) * _n)


def encoder_layer_pallas(x_flat, pos_sc, kp):
    """x_flat: (B*S, C) f32; pos_sc: (S, C) f32; kp: kernel-prepped parameters."""
    rows = S if GRID_OVER_BATCH else BS       # rows per grid step
    nb = BS // rows // 1 and (1 if GRID_OVER_BATCH else B)
    grid = (BS // rows,)
    pos_block = pos_sc if rows == S else jnp.tile(pos_sc, (rows // S, 1))

    in_specs = [
        _full_spec((rows, C)),                       # pos (same block every step)
        pl.BlockSpec((rows, C), lambda i: (i, 0)),   # x
        _full_spec((C, 3 * C)),                      # fused [Wq*scale | Wk | Wv] (bf16)
        _full_spec((1, 3 * C)),                      # fused bias (bq*scale | 0 | bv)
        _full_spec((C, C)),                          # Wo (bf16)
        _full_spec((1, C)),                          # bo
        _full_spec((1, C)), _full_spec((1, C)),      # LN1 gamma/beta
        _full_spec((C, FF)), _full_spec((1, FF)),    # W1, b1
        _full_spec((FF, C)), _full_spec((1, C)),     # W2, b2
        _full_spec((1, C)), _full_spec((1, C)),      # LN2 gamma/beta
    ]
    flops = (2 * BS * C * 3 * C                       # fused QKV projection
             + 2 * 2 * B * NHEAD * S * S * HEAD_DIM   # scores + context
             + 2 * BS * C * C                         # output projection
             + 2 * 2 * BS * C * FF)                   # FFN
    bytes_accessed = (3 * BS * C * 4                  # x, pos, out (f32)
                      + (3 * C * C + C * C + 2 * C * FF) * 2   # bf16 weights
                      + (3 * C + 2 * C + FF + 5 * C) * 4)      # biases / LN params
    return pl.pallas_call(
        make_encoder_kernel(nb, USE_BF16_EXP),
        out_shape=jax.ShapeDtypeStruct((BS, C), jnp.float32),
        grid_spec=pltpu.PrefetchScalarGridSpec(
            num_scalar_prefetch=0,
            grid=grid,
            in_specs=in_specs,
            out_specs=pl.BlockSpec((rows, C), lambda i: (i, 0)),
        ),
        compiler_params=pltpu.CompilerParams(
            dimension_semantics=("parallel",) if GRID_OVER_BATCH else ("arbitrary",)),
        cost_estimate=pl.CostEstimate(
            flops=flops,
            transcendentals=B * NHEAD * S * S + 3 * BS,
            bytes_accessed=bytes_accessed),
    )(pos_block, x_flat,
      kp["wqkv"], kp["bqkv"], kp["wo"], kp["bo"],
      kp["g1"], kp["bn1"],
      kp["w1"], kp["bf1"], kp["w2"], kp["bf2"],
      kp["g2"], kp["bn2"])


# ------------------------------------ glue / wrapper -------------------------------------
def build_pos(row_embed, col_embed, h, w):
    # mirrors: cat([col(i) repeat over rows, row(j) repeat over cols], -1).permute(2,0,1)
    x_emb = col_embed[jnp.arange(w)]                              # (w, C/2)
    y_emb = row_embed[jnp.arange(h)]                              # (h, C/2)
    pos = jnp.concatenate(
        [jnp.broadcast_to(x_emb[None, :, :], (h, w, C // 2)),
         jnp.broadcast_to(y_emb[:, None, :], (h, w, C // 2))], axis=-1)  # (h, w, C)
    return jnp.transpose(pos, (2, 0, 1))                          # (C, h, w)


def prep_kernel_params(p):
    """One-time transform of module params into the kernel's fused / bf16 layout."""
    scale = 1.0 / math.sqrt(HEAD_DIM)
    # fused [Wq*scale | Wk | Wv] so QKV is a single bf16 MXU pass
    wqkv = jnp.concatenate([p["wq_t"] * scale, p["wk_t"], p["wv_t"]], axis=1)   # (C, 3C)
    # bk is mathematically dead: softmax over keys is invariant to per-query constants,
    # and k is not used elsewhere -> fused bias carries zeros in the K segment.
    bqkv = jnp.concatenate([p["bq"] * scale, jnp.zeros_like(p["bk"]), p["bv"]], axis=1)
    return {
        "wqkv": wqkv.astype(jnp.bfloat16),
        "bqkv": bqkv,
        "wo": p["wo_t"].astype(jnp.bfloat16),
        "bo": p["bo"],
        "g1": p["g1"], "bn1": p["bn1"],
        "w1": p["w1_t"].astype(jnp.bfloat16), "bf1": p["bf1"],
        "w2": p["w2_t"].astype(jnp.bfloat16), "bf2": p["bf2"],
        "g2": p["g2"], "bn2": p["bn2"],
    }


def adjust_transformer_forward(x_f, params):
    """x_f: (B, C, H, W) NCHW, as in the PyTorch module."""
    b, c, h, w = x_f.shape
    pos = build_pos(params["row_embed"], params["col_embed"], h, w)    # (C, H, W)
    pos_sc = pos.reshape(c, h * w).T                                   # (S, C)
    x_flat = jnp.transpose(x_f.reshape(b, c, h * w), (0, 2, 1)).reshape(b * h * w, c)
    kp = prep_kernel_params(params)
    out_flat = encoder_layer_pallas(x_flat, pos_sc, kp)                # (B*S, C)
    out_bsc = out_flat.reshape(b, h * w, c)                            # (B, S, C)
    return jnp.transpose(out_bsc, (0, 2, 1)).reshape(b, c, h, w)       # (B, C, H, W)


# --------------------------------- pure-JAX reference ------------------------------------
def reference_forward(x_f, params):
    b, c, h, w = x_f.shape
    pos = build_pos(params["row_embed"], params["col_embed"], h, w)
    x = jnp.transpose((pos[None] + x_f).reshape(b, c, h * w), (0, 2, 1))  # (B, S, C)

    q = x @ params["wq_t"] + params["bq"]
    k = x @ params["wk_t"] + params["bk"]
    v = x @ params["wv_t"] + params["bv"]
    qh = q.reshape(b, S, NHEAD, HEAD_DIM).transpose(0, 2, 1, 3)
    kh = k.reshape(b, S, NHEAD, HEAD_DIM).transpose(0, 2, 1, 3)
    vh = v.reshape(b, S, NHEAD, HEAD_DIM).transpose(0, 2, 1, 3)
    sc = jnp.einsum("bhqd,bhkd->bhqk", qh / math.sqrt(HEAD_DIM), kh)
    p = jax.nn.softmax(sc, axis=-1)
    ctx = jnp.einsum("bhqk,bhkd->bhqd", p, vh).transpose(0, 2, 1, 3).reshape(b, S, C)
    attn = ctx @ params["wo_t"] + params["bo"]

    def ln(t, g, be):
        mu = jnp.mean(t, axis=-1, keepdims=True)
        var = jnp.mean((t - mu) ** 2, axis=-1, keepdims=True)
        return (t - mu) * jax.lax.rsqrt(var + EPS) * g + be

    y = ln(x + attn, params["g1"], params["bn1"])
    ff = jnp.maximum(y @ params["w1_t"] + params["bf1"], 0.0) @ params["w2_t"] + params["bf2"]
    z = ln(y + ff, params["g2"], params["bn2"])
    return jnp.transpose(z, (0, 2, 1)).reshape(b, c, h, w)


# ----------------------------------------- main ------------------------------------------
def init_params(key):
    ks = jax.random.split(key, 16)
    sd = 0.02
    return {
        # nn.Embedding(50, C//2) with uniform_() init
        "row_embed": jax.random.uniform(ks[0], (50, C // 2), jnp.float32),
        "col_embed": jax.random.uniform(ks[1], (50, C // 2), jnp.float32),
        # attention in-proj / out-proj (stored pre-transposed: x @ W^T -> x @ w_t)
        "wq_t": jax.random.normal(ks[2], (C, C), jnp.float32) * sd,
        "wk_t": jax.random.normal(ks[3], (C, C), jnp.float32) * sd,
        "wv_t": jax.random.normal(ks[4], (C, C), jnp.float32) * sd,
        "bq": jax.random.normal(ks[5], (1, C), jnp.float32) * sd,
        "bk": jax.random.normal(ks[6], (1, C), jnp.float32) * sd,   # exercised: dropped in-kernel
        "bv": jax.random.normal(ks[7], (1, C), jnp.float32) * sd,
        "wo_t": jax.random.normal(ks[8], (C, C), jnp.float32) * sd,
        "bo": jax.random.normal(ks[9], (1, C), jnp.float32) * sd,
        # LayerNorm 1
        "g1": jnp.ones((1, C), jnp.float32),
        "bn1": jnp.zeros((1, C), jnp.float32),
        # FFN
        "w1_t": jax.random.normal(ks[10], (C, FF), jnp.float32) * sd,
        "bf1": jax.random.normal(ks[11], (1, FF), jnp.float32) * sd,
        "w2_t": jax.random.normal(ks[12], (FF, C), jnp.float32) * sd,
        "bf2": jax.random.normal(ks[13], (1, C), jnp.float32) * sd,
        # LayerNorm 2
        "g2": jnp.ones((1, C), jnp.float32),
        "bn2": jnp.zeros((1, C), jnp.float32),
    }


if __name__ == "__main__":
    key = jax.random.PRNGKey(0)
    k_in, k_par = jax.random.split(key)
    params = init_params(k_par)
    x_f = jax.random.normal(k_in, (B, C, H_SP, W_SP), jnp.float32)   # NCHW input

    fwd = jax.jit(adjust_transformer_forward)
    out = jax.block_until_ready(fwd(x_f, params))

    ref = jax.block_until_ready(reference_forward(x_f, params))
    assert out.shape == (B, C, H_SP, W_SP)
    # bf16 MXU operands (QKV/scores/PV/Wo/FFN) + approx reciprocal (+ bf16 exp on v6e/v7x)
    # => compare against the f32 reference with a relaxed but meaningful tolerance
    # (outputs are O(1) after the final LayerNorm).
    np.testing.assert_allclose(np.asarray(out), np.asarray(ref), rtol=1e-2, atol=1e-2)

    print("KERNEL_OK")
</pallas_src>

<mosaic_0001>
module attributes {stable_mosaic.version = 11 : i64} {
  func.func @kernel(%arg0: i32, %arg1: memref<128x64xf32, #tpu.memory_space<vmem>>, %arg2: memref<128x64xf32, #tpu.memory_space<vmem>>, %arg3: memref<64x192xbf16, #tpu.memory_space<vmem>>, %arg4: memref<1x192xf32, #tpu.memory_space<vmem>>, %arg5: memref<64x64xbf16, #tpu.memory_space<vmem>>, %arg6: memref<1x64xf32, #tpu.memory_space<vmem>>, %arg7: memref<1x64xf32, #tpu.memory_space<vmem>>, %arg8: memref<1x64xf32, #tpu.memory_space<vmem>>, %arg9: memref<64x128xbf16, #tpu.memory_space<vmem>>, %arg10: memref<1x128xf32, #tpu.memory_space<vmem>>, %arg11: memref<128x64xbf16, #tpu.memory_space<vmem>>, %arg12: memref<1x64xf32, #tpu.memory_space<vmem>>, %arg13: memref<1x64xf32, #tpu.memory_space<vmem>>, %arg14: memref<1x64xf32, #tpu.memory_space<vmem>>, %arg15: memref<128x64xf32, #tpu.memory_space<vmem>>) attributes {dimension_semantics = [#tpu.dimension_semantics<arbitrary>], iteration_bounds = array<i64: 1>, scalar_prefetch = 0 : i64, scratch_operands = 0 : i64, tpu.core_type = #tpu.core_type<tc>, window_params = [{pipeline_mode = #tpu.pipeline_mode<synchronous>, transform_indices = @transform_0, window_bounds = array<i64: 128, 64>}, {transform_indices = @transform_1, window_bounds = array<i64: 128, 64>}, {pipeline_mode = #tpu.pipeline_mode<synchronous>, transform_indices = @transform_2, window_bounds = array<i64: 64, 192>}, {pipeline_mode = #tpu.pipeline_mode<synchronous>, transform_indices = @transform_3, window_bounds = array<i64: 1, 192>}, {pipeline_mode = #tpu.pipeline_mode<synchronous>, transform_indices = @transform_4, window_bounds = array<i64: 64, 64>}, {pipeline_mode = #tpu.pipeline_mode<synchronous>, transform_indices = @transform_5, window_bounds = array<i64: 1, 64>}, {pipeline_mode = #tpu.pipeline_mode<synchronous>, transform_indices = @transform_6, window_bounds = array<i64: 1, 64>}, {pipeline_mode = #tpu.pipeline_mode<synchronous>, transform_indices = @transform_7, window_bounds = array<i64: 1, 64>}, {pipeline_mode = #tpu.pipeline_mode<synchronous>, transform_indices = @transform_8, window_bounds = array<i64: 64, 128>}, {pipeline_mode = #tpu.pipeline_mode<synchronous>, transform_indices = @transform_9, window_bounds = array<i64: 1, 128>}, {pipeline_mode = #tpu.pipeline_mode<synchronous>, transform_indices = @transform_10, window_bounds = array<i64: 128, 64>}, {pipeline_mode = #tpu.pipeline_mode<synchronous>, transform_indices = @transform_11, window_bounds = array<i64: 1, 64>}, {pipeline_mode = #tpu.pipeline_mode<synchronous>, transform_indices = @transform_12, window_bounds = array<i64: 1, 64>}, {pipeline_mode = #tpu.pipeline_mode<synchronous>, transform_indices = @transform_13, window_bounds = array<i64: 1, 64>}, {transform_indices = @transform_14, window_bounds = array<i64: 128, 64>}]} {
    %c0 = arith.constant 0 : index
    %c0_0 = arith.constant 0 : index
    %0 = vector.load %arg2[%c0, %c0_0] : memref<128x64xf32, #tpu.memory_space<vmem>>, vector<128x64xf32>
    %c0_1 = arith.constant 0 : index
    %c0_2 = arith.constant 0 : index
    %1 = vector.load %arg1[%c0_1, %c0_2] : memref<128x64xf32, #tpu.memory_space<vmem>>, vector<128x64xf32>
    %2 = arith.addf %0, %1 : vector<128x64xf32>
    %3 = arith.truncf %2 : vector<128x64xf32> to vector<128x64xbf16>
    %c0_3 = arith.constant 0 : index
    %c0_4 = arith.constant 0 : index
    %4 = vector.load %arg3[%c0_3, %c0_4] : memref<64x192xbf16, #tpu.memory_space<vmem>>, vector<64x192xbf16>
    %cst = arith.constant dense<0.000000e+00> : vector<128x192xf32>
    %5 = tpu.matmul %3, %4, %cst {dimension_numbers = #tpu.dot_dimension_numbers<[1], [0], [0], [1], [0, 0, 1, 1], [], []>} : vector<128x64xbf16>, vector<64x192xbf16>, vector<128x192xf32> -> vector<128x192xf32>
    %c0_5 = arith.constant 0 : index
    %c0_6 = arith.constant 0 : index
    %6 = vector.load %arg4[%c0_5, %c0_6] : memref<1x192xf32, #tpu.memory_space<vmem>>, vector<1x192xf32>
    %7 = vector.broadcast %6 : vector<1x192xf32> to vector<128x192xf32>
    %8 = arith.addf %5, %7 : vector<128x192xf32>
    %9 = arith.truncf %8 : vector<128x192xf32> to vector<128x192xbf16>
    %10 = vector.extract_strided_slice %9 {offsets = [0, 0], sizes = [128, 8], strides = [1, 1]} : vector<128x192xbf16> to vector<128x8xbf16>
    %11 = vector.extract_strided_slice %9 {offsets = [0, 64], sizes = [128, 8], strides = [1, 1]} : vector<128x192xbf16> to vector<128x8xbf16>
    %12 = vector.extract_strided_slice %9 {offsets = [0, 128], sizes = [128, 8], strides = [1, 1]} : vector<128x192xbf16> to vector<128x8xbf16>
    %13 = vector.extract_strided_slice %10 {offsets = [0, 0], sizes = [64, 8], strides = [1, 1]} : vector<128x8xbf16> to vector<64x8xbf16>
    %14 = vector.extract_strided_slice %11 {offsets = [0, 0], sizes = [64, 8], strides = [1, 1]} : vector<128x8xbf16> to vector<64x8xbf16>
    %15 = vector.extract_strided_slice %12 {offsets = [0, 0], sizes = [64, 8], strides = [1, 1]} : vector<128x8xbf16> to vector<64x8xbf16>
    %cst_7 = arith.constant dense<0.000000e+00> : vector<64x64xf32>
    %16 = tpu.matmul %13, %14, %cst_7 {dimension_numbers = #tpu.dot_dimension_numbers<[1], [1], [0], [0], [0, 0, 1, 0], [], []>} : vector<64x8xbf16>, vector<64x8xbf16>, vector<64x64xf32> -> vector<64x64xf32>
    %cst_8 = arith.constant dense<0xFF800000> : vector<64xf32>
    %17 = vector.multi_reduction <maximumf>, %16, %cst_8 [1] : vector<64x64xf32> to vector<64xf32>
    %18 = vector.shape_cast %17 : vector<64xf32> to vector<64x1xf32>
    %19 = vector.broadcast %18 : vector<64x1xf32> to vector<64x64xf32>
    %20 = arith.subf %16, %19 : vector<64x64xf32>
    %21 = math.exp %20 : vector<64x64xf32>
    %cst_9 = arith.constant dense<0.000000e+00> : vector<64xf32>
    %22 = vector.multi_reduction <add>, %21, %cst_9 [1] : vector<64x64xf32> to vector<64xf32>
    %23 = vector.shape_cast %22 : vector<64xf32> to vector<64x1xf32>
    %24 = arith.truncf %21 : vector<64x64xf32> to vector<64x64xbf16>
    %25 = tpu.reciprocal %23 {approx = true} : vector<64x1xf32> -> vector<64x1xf32>
    %cst_10 = arith.constant dense<0.000000e+00> : vector<64x8xf32>
    %26 = tpu.matmul %24, %15, %cst_10 {dimension_numbers = #tpu.dot_dimension_numbers<[1], [0], [0], [1], [0, 0, 1, 1], [], []>} : vector<64x64xbf16>, vector<64x8xbf16>, vector<64x8xf32> -> vector<64x8xf32>
    %27 = vector.broadcast %25 : vector<64x1xf32> to vector<64x8xf32>
    %28 = arith.mulf %26, %27 : vector<64x8xf32>
    %29 = vector.extract_strided_slice %10 {offsets = [64, 0], sizes = [64, 8], strides = [1, 1]} : vector<128x8xbf16> to vector<64x8xbf16>
    %30 = vector.extract_strided_slice %11 {offsets = [64, 0], sizes = [64, 8], strides = [1, 1]} : vector<128x8xbf16> to vector<64x8xbf16>
    %31 = vector.extract_strided_slice %12 {offsets = [64, 0], sizes = [64, 8], strides = [1, 1]} : vector<128x8xbf16> to vector<64x8xbf16>
    %cst_11 = arith.constant dense<0.000000e+00> : vector<64x64xf32>
    %32 = tpu.matmul %29, %30, %cst_11 {dimension_numbers = #tpu.dot_dimension_numbers<[1], [1], [0], [0], [0, 0, 1, 0], [], []>} : vector<64x8xbf16>, vector<64x8xbf16>, vector<64x64xf32> -> vector<64x64xf32>
    %cst_12 = arith.constant dense<0xFF800000> : vector<64xf32>
    %33 = vector.multi_reduction <maximumf>, %32, %cst_12 [1] : vector<64x64xf32> to vector<64xf32>
    %34 = vector.shape_cast %33 : vector<64xf32> to vector<64x1xf32>
    %35 = vector.broadcast %34 : vector<64x1xf32> to vector<64x64xf32>
    %36 = arith.subf %32, %35 : vector<64x64xf32>
    %37 = math.exp %36 : vector<64x64xf32>
    %cst_13 = arith.constant dense<0.000000e+00> : vector<64xf32>
    %38 = vector.multi_reduction <add>, %37, %cst_13 [1] : vector<64x64xf32> to vector<64xf32>
    %39 = vector.shape_cast %38 : vector<64xf32> to vector<64x1xf32>
    %40 = arith.truncf %37 : vector<64x64xf32> to vector<64x64xbf16>
    %41 = tpu.reciprocal %39 {approx = true} : vector<64x1xf32> -> vector<64x1xf32>
    %cst_14 = arith.constant dense<0.000000e+00> : vector<64x8xf32>
    %42 = tpu.matmul %40, %31, %cst_14 {dimension_numbers = #tpu.dot_dimension_numbers<[1], [0], [0], [1], [0, 0, 1, 1], [], []>} : vector<64x64xbf16>, vector<64x8xbf16>, vector<64x8xf32> -> vector<64x8xf32>
    %43 = vector.broadcast %41 : vector<64x1xf32> to vector<64x8xf32>
    %44 = arith.mulf %42, %43 : vector<64x8xf32>
    %45 = tpu.concatenate %28, %44 in 0 : vector<64x8xf32>, vector<64x8xf32> -> vector<128x8xf32>
    %46 = arith.truncf %45 : vector<128x8xf32> to vector<128x8xbf16>
    %47 = vector.extract_strided_slice %9 {offsets = [0, 8], sizes = [128, 8], strides = [1, 1]} : vector<128x192xbf16> to vector<128x8xbf16>
    %48 = vector.extract_strided_slice %9 {offsets = [0, 72], sizes = [128, 8], strides = [1, 1]} : vector<128x192xbf16> to vector<128x8xbf16>
    %49 = vector.extract_strided_slice %9 {offsets = [0, 136], sizes = [128, 8], strides = [1, 1]} : vector<128x192xbf16> to vector<128x8xbf16>
    %50 = vector.extract_strided_slice %47 {offsets = [0, 0], sizes = [64, 8], strides = [1, 1]} : vector<128x8xbf16> to vector<64x8xbf16>
    %51 = vector.extract_strided_slice %48 {offsets = [0, 0], sizes = [64, 8], strides = [1, 1]} : vector<128x8xbf16> to vector<64x8xbf16>
    %52 = vector.extract_strided_slice %49 {offsets = [0, 0], sizes = [64, 8], strides = [1, 1]} : vector<128x8xbf16> to vector<64x8xbf16>
    %cst_15 = arith.constant dense<0.000000e+00> : vector<64x64xf32>
    %53 = tpu.matmul %50, %51, %cst_15 {dimension_numbers = #tpu.dot_dimension_numbers<[1], [1], [0], [0], [0, 0, 1, 0], [], []>} : vector<64x8xbf16>, vector<64x8xbf16>, vector<64x64xf32> -> vector<64x64xf32>
    %cst_16 = arith.constant dense<0xFF800000> : vector<64xf32>
    %54 = vector.multi_reduction <maximumf>, %53, %cst_16 [1] : vector<64x64xf32> to vector<64xf32>
    %55 = vector.shape_cast %54 : vector<64xf32> to vector<64x1xf32>
    %56 = vector.broadcast %55 : vector<64x1xf32> to vector<64x64xf32>
    %57 = arith.subf %53, %56 : vector<64x64xf32>
    %58 = math.exp %57 : vector<64x64xf32>
    %cst_17 = arith.constant dense<0.000000e+00> : vector<64xf32>
    %59 = vector.multi_reduction <add>, %58, %cst_17 [1] : vector<64x64xf32> to vector<64xf32>
    %60 = vector.shape_cast %59 : vector<64xf32> to vector<64x1xf32>
    %61 = arith.truncf %58 : vector<64x64xf32> to vector<64x64xbf16>
    %62 = tpu.reciprocal %60 {approx = true} : vector<64x1xf32> -> vector<64x1xf32>
    %cst_18 = arith.constant dense<0.000000e+00> : vector<64x8xf32>
    %63 = tpu.matmul %61, %52, %cst_18 {dimension_numbers = #tpu.dot_dimension_numbers<[1], [0], [0], [1], [0, 0, 1, 1], [], []>} : vector<64x64xbf16>, vector<64x8xbf16>, vector<64x8xf32> -> vector<64x8xf32>
    %64 = vector.broadcast %62 : vector<64x1xf32> to vector<64x8xf32>
    %65 = arith.mulf %63, %64 : vector<64x8xf32>
    %66 = vector.extract_strided_slice %47 {offsets = [64, 0], sizes = [64, 8], strides = [1, 1]} : vector<128x8xbf16> to vector<64x8xbf16>
    %67 = vector.extract_strided_slice %48 {offsets = [64, 0], sizes = [64, 8], strides = [1, 1]} : vector<128x8xbf16> to vector<64x8xbf16>
    %68 = vector.extract_strided_slice %49 {offsets = [64, 0], sizes = [64, 8], strides = [1, 1]} : vector<128x8xbf16> to vector<64x8xbf16>
    %cst_19 = arith.constant dense<0.000000e+00> : vector<64x64xf32>
    %69 = tpu.matmul %66, %67, %cst_19 {dimension_numbers = #tpu.dot_dimension_numbers<[1], [1], [0], [0], [0, 0, 1, 0], [], []>} : vector<64x8xbf16>, vector<64x8xbf16>, vector<64x64xf32> -> vector<64x64xf32>
    %cst_20 = arith.constant dense<0xFF800000> : vector<64xf32>
    %70 = vector.multi_reduction <maximumf>, %69, %cst_20 [1] : vector<64x64xf32> to vector<64xf32>
    %71 = vector.shape_cast %70 : vector<64xf32> to vector<64x1xf32>
    %72 = vector.broadcast %71 : vector<64x1xf32> to vector<64x64xf32>
    %73 = arith.subf %69, %72 : vector<64x64xf32>
    %74 = math.exp %73 : vector<64x64xf32>
    %cst_21 = arith.constant dense<0.000000e+00> : vector<64xf32>
    %75 = vector.multi_reduction <add>, %74, %cst_21 [1] : vector<64x64xf32> to vector<64xf32>
    %76 = vector.shape_cast %75 : vector<64xf32> to vector<64x1xf32>
    %77 = arith.truncf %74 : vector<64x64xf32> to vector<64x64xbf16>
    %78 = tpu.reciprocal %76 {approx = true} : vector<64x1xf32> -> vector<64x1xf32>
    %cst_22 = arith.constant dense<0.000000e+00> : vector<64x8xf32>
    %79 = tpu.matmul %77, %68, %cst_22 {dimension_numbers = #tpu.dot_dimension_numbers<[1], [0], [0], [1], [0, 0, 1, 1], [], []>} : vector<64x64xbf16>, vector<64x8xbf16>, vector<64x8xf32> -> vector<64x8xf32>
    %80 = vector.broadcast %78 : vector<64x1xf32> to vector<64x8xf32>
    %81 = arith.mulf %79, %80 : vector<64x8xf32>
    %82 = tpu.concatenate %65, %81 in 0 : vector<64x8xf32>, vector<64x8xf32> -> vector<128x8xf32>
    %83 = arith.truncf %82 : vector<128x8xf32> to vector<128x8xbf16>
    %84 = vector.extract_strided_slice %9 {offsets = [0, 16], sizes = [128, 8], strides = [1, 1]} : vector<128x192xbf16> to vector<128x8xbf16>
    %85 = vector.extract_strided_slice %9 {offsets = [0, 80], sizes = [128, 8], strides = [1, 1]} : vector<128x192xbf16> to vector<128x8xbf16>
    %86 = vector.extract_strided_slice %9 {offsets = [0, 144], sizes = [128, 8], strides = [1, 1]} : vector<128x192xbf16> to vector<128x8xbf16>
    %87 = vector.extract_strided_slice %84 {offsets = [0, 0], sizes = [64, 8], strides = [1, 1]} : vector<128x8xbf16> to vector<64x8xbf16>
    %88 = vector.extract_strided_slice %85 {offsets = [0, 0], sizes = [64, 8], strides = [1, 1]} : vector<128x8xbf16> to vector<64x8xbf16>
    %89 = vector.extract_strided_slice %86 {offsets = [0, 0], sizes = [64, 8], strides = [1, 1]} : vector<128x8xbf16> to vector<64x8xbf16>
    %cst_23 = arith.constant dense<0.000000e+00> : vector<64x64xf32>
    %90 = tpu.matmul %87, %88, %cst_23 {dimension_numbers = #tpu.dot_dimension_numbers<[1], [1], [0], [0], [0, 0, 1, 0], [], []>} : vector<64x8xbf16>, vector<64x8xbf16>, vector<64x64xf32> -> vector<64x64xf32>
    %cst_24 = arith.constant dense<0xFF800000> : vector<64xf32>
    %91 = vector.multi_reduction <maximumf>, %90, %cst_24 [1] : vector<64x64xf32> to vector<64xf32>
    %92 = vector.shape_cast %91 : vector<64xf32> to vector<64x1xf32>
    %93 = vector.broadcast %92 : vector<64x1xf32> to vector<64x64xf32>
    %94 = arith.subf %90, %93 : vector<64x64xf32>
    %95 = math.exp %94 : vector<64x64xf32>
    %cst_25 = arith.constant dense<0.000000e+00> : vector<64xf32>
    %96 = vector.multi_reduction <add>, %95, %cst_25 [1] : vector<64x64xf32> to vector<64xf32>
    %97 = vector.shape_cast %96 : vector<64xf32> to vector<64x1xf32>
    %98 = arith.truncf %95 : vector<64x64xf32> to vector<64x64xbf16>
    %99 = tpu.reciprocal %97 {approx = true} : vector<64x1xf32> -> vector<64x1xf32>
    %cst_26 = arith.constant dense<0.000000e+00> : vector<64x8xf32>
    %100 = tpu.matmul %98, %89, %cst_26 {dimension_numbers = #tpu.dot_dimension_numbers<[1], [0], [0], [1], [0, 0, 1, 1], [], []>} : vector<64x64xbf16>, vector<64x8xbf16>, vector<64x8xf32> -> vector<64x8xf32>
    %101 = vector.broadcast %99 : vector<64x1xf32> to vector<64x8xf32>
    %102 = arith.mulf %100, %101 : vector<64x8xf32>
    %103 = vector.extract_strided_slice %84 {offsets = [64, 0], sizes = [64, 8], strides = [1, 1]} : vector<128x8xbf16> to vector<64x8xbf16>
    %104 = vector.extract_strided_slice %85 {offsets = [64, 0], sizes = [64, 8], strides = [1, 1]} : vector<128x8xbf16> to vector<64x8xbf16>
    %105 = vector.extract_strided_slice %86 {offsets = [64, 0], sizes = [64, 8], strides = [1, 1]} : vector<128x8xbf16> to vector<64x8xbf16>
    %cst_27 = arith.constant dense<0.000000e+00> : vector<64x64xf32>
    %106 = tpu.matmul %103, %104, %cst_27 {dimension_numbers = #tpu.dot_dimension_numbers<[1], [1], [0], [0], [0, 0, 1, 0], [], []>} : vector<64x8xbf16>, vector<64x8xbf16>, vector<64x64xf32> -> vector<64x64xf32>
    %cst_28 = arith.constant dense<0xFF800000> : vector<64xf32>
    %107 = vector.multi_reduction <maximumf>, %106, %cst_28 [1] : vector<64x64xf32> to vector<64xf32>
    %108 = vector.shape_cast %107 : vector<64xf32> to vector<64x1xf32>
    %109 = vector.broadcast %108 : vector<64x1xf32> to vector<64x64xf32>
    %110 = arith.subf %106, %109 : vector<64x64xf32>
    %111 = math.exp %110 : vector<64x64xf32>
    %cst_29 = arith.constant dense<0.000000e+00> : vector<64xf32>
    %112 = vector.multi_reduction <add>, %111, %cst_29 [1] : vector<64x64xf32> to vector<64xf32>
    %113 = vector.shape_cast %112 : vector<64xf32> to vector<64x1xf32>
    %114 = arith.truncf %111 : vector<64x64xf32> to vector<64x64xbf16>
    %115 = tpu.reciprocal %113 {approx = true} : vector<64x1xf32> -> vector<64x1xf32>
    %cst_30 = arith.constant dense<0.000000e+00> : vector<64x8xf32>
    %116 = tpu.matmul %114, %105, %cst_30 {dimension_numbers = #tpu.dot_dimension_numbers<[1], [0], [0], [1], [0, 0, 1, 1], [], []>} : vector<64x64xbf16>, vector<64x8xbf16>, vector<64x8xf32> -> vector<64x8xf32>
    %117 = vector.broadcast %115 : vector<64x1xf32> to vector<64x8xf32>
    %118 = arith.mulf %116, %117 : vector<64x8xf32>
    %119 = tpu.concatenate %102, %118 in 0 : vector<64x8xf32>, vector<64x8xf32> -> vector<128x8xf32>
    %120 = arith.truncf %119 : vector<128x8xf32> to vector<128x8xbf16>
    %121 = vector.extract_strided_slice %9 {offsets = [0, 24], sizes = [128, 8], strides = [1, 1]} : vector<128x192xbf16> to vector<128x8xbf16>
    %122 = vector.extract_strided_slice %9 {offsets = [0, 88], sizes = [128, 8], strides = [1, 1]} : vector<128x192xbf16> to vector<128x8xbf16>
    %123 = vector.extract_strided_slice %9 {offsets = [0, 152], sizes = [128, 8], strides = [1, 1]} : vector<128x192xbf16> to vector<128x8xbf16>
    %124 = vector.extract_strided_slice %121 {offsets = [0, 0], sizes = [64, 8], strides = [1, 1]} : vector<128x8xbf16> to vector<64x8xbf16>
    %125 = vector.extract_strided_slice %122 {offsets = [0, 0], sizes = [64, 8], strides = [1, 1]} : vector<128x8xbf16> to vector<64x8xbf16>
    %126 = vector.extract_strided_slice %123 {offsets = [0, 0], sizes = [64, 8], strides = [1, 1]} : vector<128x8xbf16> to vector<64x8xbf16>
    %cst_31 = arith.constant dense<0.000000e+00> : vector<64x64xf32>
    %127 = tpu.matmul %124, %125, %cst_31 {dimension_numbers = #tpu.dot_dimension_numbers<[1], [1], [0], [0], [0, 0, 1, 0], [], []>} : vector<64x8xbf16>, vector<64x8xbf16>, vector<64x64xf32> -> vector<64x64xf32>
    %cst_32 = arith.constant dense<0xFF800000> : vector<64xf32>
    %128 = vector.multi_reduction <maximumf>, %127, %cst_32 [1] : vector<64x64xf32> to vector<64xf32>
    %129 = vector.shape_cast %128 : vector<64xf32> to vector<64x1xf32>
    %130 = vector.broadcast %129 : vector<64x1xf32> to vector<64x64xf32>
    %131 = arith.subf %127, %130 : vector<64x64xf32>
    %132 = math.exp %131 : vector<64x64xf32>
    %cst_33 = arith.constant dense<0.000000e+00> : vector<64xf32>
    %133 = vector.multi_reduction <add>, %132, %cst_33 [1] : vector<64x64xf32> to vector<64xf32>
    %134 = vector.shape_cast %133 : vector<64xf32> to vector<64x1xf32>
    %135 = arith.truncf %132 : vector<64x64xf32> to vector<64x64xbf16>
    %136 = tpu.reciprocal %134 {approx = true} : vector<64x1xf32> -> vector<64x1xf32>
    %cst_34 = arith.constant dense<0.000000e+00> : vector<64x8xf32>
    %137 = tpu.matmul %135, %126, %cst_34 {dimension_numbers = #tpu.dot_dimension_numbers<[1], [0], [0], [1], [0, 0, 1, 1], [], []>} : vector<64x64xbf16>, vector<64x8xbf16>, vector<64x8xf32> -> vector<64x8xf32>
    %138 = vector.broadcast %136 : vector<64x1xf32> to vector<64x8xf32>
    %139 = arith.mulf %137, %138 : vector<64x8xf32>
    %140 = vector.extract_strided_slice %121 {offsets = [64, 0], sizes = [64, 8], strides = [1, 1]} : vector<128x8xbf16> to vector<64x8xbf16>
    %141 = vector.extract_strided_slice %122 {offsets = [64, 0], sizes = [64, 8], strides = [1, 1]} : vector<128x8xbf16> to vector<64x8xbf16>
    %142 = vector.extract_strided_slice %123 {offsets = [64, 0], sizes = [64, 8], strides = [1, 1]} : vector<128x8xbf16> to vector<64x8xbf16>
    %cst_35 = arith.constant dense<0.000000e+00> : vector<64x64xf32>
    %143 = tpu.matmul %140, %141, %cst_35 {dimension_numbers = #tpu.dot_dimension_numbers<[1], [1], [0], [0], [0, 0, 1, 0], [], []>} : vector<64x8xbf16>, vector<64x8xbf16>, vector<64x64xf32> -> vector<64x64xf32>
    %cst_36 = arith.constant dense<0xFF800000> : vector<64xf32>
    %144 = vector.multi_reduction <maximumf>, %143, %cst_36 [1] : vector<64x64xf32> to vector<64xf32>
    %145 = vector.shape_cast %144 : vector<64xf32> to vector<64x1xf32>
    %146 = vector.broadcast %145 : vector<64x1xf32> to vector<64x64xf32>
    %147 = arith.subf %143, %146 : vector<64x64xf32>
    %148 = math.exp %147 : vector<64x64xf32>
    %cst_37 = arith.constant dense<0.000000e+00> : vector<64xf32>
    %149 = vector.multi_reduction <add>, %148, %cst_37 [1] : vector<64x64xf32> to vector<64xf32>
    %150 = vector.shape_cast %149 : vector<64xf32> to vector<64x1xf32>
    %151 = arith.truncf %148 : vector<64x64xf32> to vector<64x64xbf16>
    %152 = tpu.reciprocal %150 {approx = true} : vector<64x1xf32> -> vector<64x1xf32>
    %cst_38 = arith.constant dense<0.000000e+00> : vector<64x8xf32>
    %153 = tpu.matmul %151, %142, %cst_38 {dimension_numbers = #tpu.dot_dimension_numbers<[1], [0], [0], [1], [0, 0, 1, 1], [], []>} : vector<64x64xbf16>, vector<64x8xbf16>, vector<64x8xf32> -> vector<64x8xf32>
    %154 = vector.broadcast %152 : vector<64x1xf32> to vector<64x8xf32>
    %155 = arith.mulf %153, %154 : vector<64x8xf32>
    %156 = tpu.concatenate %139, %155 in 0 : vector<64x8xf32>, vector<64x8xf32> -> vector<128x8xf32>
    %157 = arith.truncf %156 : vector<128x8xf32> to vector<128x8xbf16>
    %158 = vector.extract_strided_slice %9 {offsets = [0, 32], sizes = [128, 8], strides = [1, 1]} : vector<128x192xbf16> to vector<128x8xbf16>
    %159 = vector.extract_strided_slice %9 {offsets = [0, 96], sizes = [128, 8], strides = [1, 1]} : vector<128x192xbf16> to vector<128x8xbf16>
    %160 = vector.extract_strided_slice %9 {offsets = [0, 160], sizes = [128, 8], strides = [1, 1]} : vector<128x192xbf16> to vector<128x8xbf16>
    %161 = vector.extract_strided_slice %158 {offsets = [0, 0], sizes = [64, 8], strides = [1, 1]} : vector<128x8xbf16> to vector<64x8xbf16>
    %162 = vector.extract_strided_slice %159 {offsets = [0, 0], sizes = [64, 8], strides = [1, 1]} : vector<128x8xbf16> to vector<64x8xbf16>
    %163 = vector.extract_strided_slice %160 {offsets = [0, 0], sizes = [64, 8], strides = [1, 1]} : vector<128x8xbf16> to vector<64x8xbf16>
    %cst_39 = arith.constant dense<0.000000e+00> : vector<64x64xf32>
    %164 = tpu.matmul %161, %162, %cst_39 {dimension_numbers = #tpu.dot_dimension_numbers<[1], [1], [0], [0], [0, 0, 1, 0], [], []>} : vector<64x8xbf16>, vector<64x8xbf16>, vector<64x64xf32> -> vector<64x64xf32>
    %cst_40 = arith.constant dense<0xFF800000> : vector<64xf32>
    %165 = vector.multi_reduction <maximumf>, %164, %cst_40 [1] : vector<64x64xf32> to vector<64xf32>
    %166 = vector.shape_cast %165 : vector<64xf32> to vector<64x1xf32>
    %167 = vector.broadcast %166 : vector<64x1xf32> to vector<64x64xf32>
    %168 = arith.subf %164, %167 : vector<64x64xf32>
    %169 = math.exp %168 : vector<64x64xf32>
    %cst_41 = arith.constant dense<0.000000e+00> : vector<64xf32>
    %170 = vector.multi_reduction <add>, %169, %cst_41 [1] : vector<64x64xf32> to vector<64xf32>
    %171 = vector.shape_cast %170 : vector<64xf32> to vector<64x1xf32>
    %172 = arith.truncf %169 : vector<64x64xf32> to vector<64x64xbf16>
    %173 = tpu.reciprocal %171 {approx = true} : vector<64x1xf32> -> vector<64x1xf32>
    %cst_42 = arith.constant dense<0.000000e+00> : vector<64x8xf32>
    %174 = tpu.matmul %172, %163, %cst_42 {dimension_numbers = #tpu.dot_dimension_numbers<[1], [0], [0], [1], [0, 0, 1, 1], [], []>} : vector<64x64xbf16>, vector<64x8xbf16>, vector<64x8xf32> -> vector<64x8xf32>
    %175 = vector.broadcast %173 : vector<64x1xf32> to vector<64x8xf32>
    %176 = arith.mulf %174, %175 : vector<64x8xf32>
    %177 = vector.extract_strided_slice %158 {offsets = [64, 0], sizes = [64, 8], strides = [1, 1]} : vector<128x8xbf16> to vector<64x8xbf16>
    %178 = vector.extract_strided_slice %159 {offsets = [64, 0], sizes = [64, 8], strides = [1, 1]} : vector<128x8xbf16> to vector<64x8xbf16>
    %179 = vector.extract_strided_slice %160 {offsets = [64, 0], sizes = [64, 8], strides = [1, 1]} : vector<128x8xbf16> to vector<64x8xbf16>
    %cst_43 = arith.constant dense<0.000000e+00> : vector<64x64xf32>
    %180 = tpu.matmul %177, %178, %cst_43 {dimension_numbers = #tpu.dot_dimension_numbers<[1], [1], [0], [0], [0, 0, 1, 0], [], []>} : vector<64x8xbf16>, vector<64x8xbf16>, vector<64x64xf32> -> vector<64x64xf32>
    %cst_44 = arith.constant dense<0xFF800000> : vector<64xf32>
    %181 = vector.multi_reduction <maximumf>, %180, %cst_44 [1] : vector<64x64xf32> to vector<64xf32>
    %182 = vector.shape_cast %181 : vector<64xf32> to vector<64x1xf32>
    %183 = vector.broadcast %182 : vector<64x1xf32> to vector<64x64xf32>
    %184 = arith.subf %180, %183 : vector<64x64xf32>
    %185 = math.exp %184 : vector<64x64xf32>
    %cst_45 = arith.constant dense<0.000000e+00> : vector<64xf32>
    %186 = vector.multi_reduction <add>, %185, %cst_45 [1] : vector<64x64xf32> to vector<64xf32>
    %187 = vector.shape_cast %186 : vector<64xf32> to vector<64x1xf32>
    %188 = arith.truncf %185 : vector<64x64xf32> to vector<64x64xbf16>
    %189 = tpu.reciprocal %187 {approx = true} : vector<64x1xf32> -> vector<64x1xf32>
    %cst_46 = arith.constant dense<0.000000e+00> : vector<64x8xf32>
    %190 = tpu.matmul %188, %179, %cst_46 {dimension_numbers = #tpu.dot_dimension_numbers<[1], [0], [0], [1], [0, 0, 1, 1], [], []>} : vector<64x64xbf16>, vector<64x8xbf16>, vector<64x8xf32> -> vector<64x8xf32>
    %191 = vector.broadcast %189 : vector<64x1xf32> to vector<64x8xf32>
    %192 = arith.mulf %190, %191 : vector<64x8xf32>
    %193 = tpu.concatenate %176, %192 in 0 : vector<64x8xf32>, vector<64x8xf32> -> vector<128x8xf32>
    %194 = arith.truncf %193 : vector<128x8xf32> to vector<128x8xbf16>
    %195 = vector.extract_strided_slice %9 {offsets = [0, 40], sizes = [128, 8], strides = [1, 1]} : vector<128x192xbf16> to vector<128x8xbf16>
    %196 = vector.extract_strided_slice %9 {offsets = [0, 104], sizes = [128, 8], strides = [1, 1]} : vector<128x192xbf16> to vector<128x8xbf16>
    %197 = vector.extract_strided_slice %9 {offsets = [0, 168], sizes = [128, 8], strides = [1, 1]} : vector<128x192xbf16> to vector<128x8xbf16>
    %198 = vector.extract_strided_slice %195 {offsets = [0, 0], sizes = [64, 8], strides = [1, 1]} : vector<128x8xbf16> to vector<64x8xbf16>
    %199 = vector.extract_strided_slice %196 {offsets = [0, 0], sizes = [64, 8], strides = [1, 1]} : vector<128x8xbf16> to vector<64x8xbf16>
    %200 = vector.extract_strided_slice %197 {offsets = [0, 0], sizes = [64, 8], strides = [1, 1]} : vector<128x8xbf16> to vector<64x8xbf16>
    %cst_47 = arith.constant dense<0.000000e+00> : vector<64x64xf32>
    %201 = tpu.matmul %198, %199, %cst_47 {dimension_numbers = #tpu.dot_dimension_numbers<[1], [1], [0], [0], [0, 0, 1, 0], [], []>} : vector<64x8xbf16>, vector<64x8xbf16>, vector<64x64xf32> -> vector<64x64xf32>
    %cst_48 = arith.constant dense<0xFF800000> : vector<64xf32>
    %202 = vector.multi_reduction <maximumf>, %201, %cst_48 [1] : vector<64x64xf32> to vector<64xf32>
    %203 = vector.shape_cast %202 : vector<64xf32> to vector<64x1xf32>
    %204 = vector.broadcast %203 : vector<64x1xf32> to vector<64x64xf32>
    %205 = arith.subf %201, %204 : vector<64x64xf32>
    %206 = math.exp %205 : vector<64x64xf32>
    %cst_49 = arith.constant dense<0.000000e+00> : vector<64xf32>
    %207 = vector.multi_reduction <add>, %206, %cst_49 [1] : vector<64x64xf32> to vector<64xf32>
    %208 = vector.shape_cast %207 : vector<64xf32> to vector<64x1xf32>
    %209 = arith.truncf %206 : vector<64x64xf32> to vector<64x64xbf16>
    %210 = tpu.reciprocal %208 {approx = true} : vector<64x1xf32> -> vector<64x1xf32>
    %cst_50 = arith.constant dense<0.000000e+00> : vector<64x8xf32>
    %211 = tpu.matmul %209, %200, %cst_50 {dimension_numbers = #tpu.dot_dimension_numbers<[1], [0], [0], [1], [0, 0, 1, 1], [], []>} : vector<64x64xbf16>, vector<64x8xbf16>, vector<64x8xf32> -> vector<64x8xf32>
    %212 = vector.broadcast %210 : vector<64x1xf32> to vector<64x8xf32>
    %213 = arith.mulf %211, %212 : vector<64x8xf32>
    %214 = vector.extract_strided_slice %195 {offsets = [64, 0], sizes = [64, 8], strides = [1, 1]} : vector<128x8xbf16> to vector<64x8xbf16>
    %215 = vector.extract_strided_slice %196 {offsets = [64, 0], sizes = [64, 8], strides = [1, 1]} : vector<128x8xbf16> to vector<64x8xbf16>
    %216 = vector.extract_strided_slice %197 {offsets = [64, 0], sizes = [64, 8], strides = [1, 1]} : vector<128x8xbf16> to vector<64x8xbf16>
    %cst_51 = arith.constant dense<0.000000e+00> : vector<64x64xf32>
    %217 = tpu.matmul %214, %215, %cst_51 {dimension_numbers = #tpu.dot_dimension_numbers<[1], [1], [0], [0], [0, 0, 1, 0], [], []>} : vector<64x8xbf16>, vector<64x8xbf16>, vector<64x64xf32> -> vector<64x64xf32>
    %cst_52 = arith.constant dense<0xFF800000> : vector<64xf32>
    %218 = vector.multi_reduction <maximumf>, %217, %cst_52 [1] : vector<64x64xf32> to vector<64xf32>
    %219 = vector.shape_cast %218 : vector<64xf32> to vector<64x1xf32>
    %220 = vector.broadcast %219 : vector<64x1xf32> to vector<64x64xf32>
    %221 = arith.subf %217, %220 : vector<64x64xf32>
    %222 = math.exp %221 : vector<64x64xf32>
    %cst_53 = arith.constant dense<0.000000e+00> : vector<64xf32>
    %223 = vector.multi_reduction <add>, %222, %cst_53 [1] : vector<64x64xf32> to vector<64xf32>
    %224 = vector.shape_cast %223 : vector<64xf32> to vector<64x1xf32>
    %225 = arith.truncf %222 : vector<64x64xf32> to vector<64x64xbf16>
    %226 = tpu.reciprocal %224 {approx = true} : vector<64x1xf32> -> vector<64x1xf32>
    %cst_54 = arith.constant dense<0.000000e+00> : vector<64x8xf32>
    %227 = tpu.matmul %225, %216, %cst_54 {dimension_numbers = #tpu.dot_dimension_numbers<[1], [0], [0], [1], [0, 0, 1, 1], [], []>} : vector<64x64xbf16>, vector<64x8xbf16>, vector<64x8xf32> -> vector<64x8xf32>
    %228 = vector.broadcast %226 : vector<64x1xf32> to vector<64x8xf32>
    %229 = arith.mulf %227, %228 : vector<64x8xf32>
    %230 = tpu.concatenate %213, %229 in 0 : vector<64x8xf32>, vector<64x8xf32> -> vector<128x8xf32>
    %231 = arith.truncf %230 : vector<128x8xf32> to vector<128x8xbf16>
    %232 = vector.extract_strided_slice %9 {offsets = [0, 48], sizes = [128, 8], strides = [1, 1]} : vector<128x192xbf16> to vector<128x8xbf16>
    %233 = vector.extract_strided_slice %9 {offsets = [0, 112], sizes = [128, 8], strides = [1, 1]} : vector<128x192xbf16> to vector<128x8xbf16>
    %234 = vector.extract_strided_slice %9 {offsets = [0, 176], sizes = [128, 8], strides = [1, 1]} : vector<128x192xbf16> to vector<128x8xbf16>
    %235 = vector.extract_strided_slice %232 {offsets = [0, 0], sizes = [64, 8], strides = [1, 1]} : vector<128x8xbf16> to vector<64x8xbf16>
    %236 = vector.extract_strided_slice %233 {offsets = [0, 0], sizes = [64, 8], strides = [1, 1]} : vector<128x8xbf16> to vector<64x8xbf16>
    %237 = vector.extract_strided_slice %234 {offsets = [0, 0], sizes = [64, 8], strides = [1, 1]} : vector<128x8xbf16> to vector<64x8xbf16>
    %cst_55 = arith.constant dense<0.000000e+00> : vector<64x64xf32>
    %238 = tpu.matmul %235, %236, %cst_55 {dimension_numbers = #tpu.dot_dimension_numbers<[1], [1], [0], [0], [0, 0, 1, 0], [], []>} : vector<64x8xbf16>, vector<64x8xbf16>, vector<64x64xf32> -> vector<64x64xf32>
    %cst_56 = arith.constant dense<0xFF800000> : vector<64xf32>
    %239 = vector.multi_reduction <maximumf>, %238, %cst_56 [1] : vector<64x64xf32> to vector<64xf32>
    %240 = vector.shape_cast %239 : vector<64xf32> to vector<64x1xf32>
    %241 = vector.broadcast %240 : vector<64x1xf32> to vector<64x64xf32>
    %242 = arith.subf %238, %241 : vector<64x64xf32>
    %243 = math.exp %242 : vector<64x64xf32>
    %cst_57 = arith.constant dense<0.000000e+00> : vector<64xf32>
    %244 = vector.multi_reduction <add>, %243, %cst_57 [1] : vector<64x64xf32> to vector<64xf32>
    %245 = vector.shape_cast %244 : vector<64xf32> to vector<64x1xf32>
    %246 = arith.truncf %243 : vector<64x64xf32> to vector<64x64xbf16>
    %247 = tpu.reciprocal %245 {approx = true} : vector<64x1xf32> -> vector<64x1xf32>
    %cst_58 = arith.constant dense<0.000000e+00> : vector<64x8xf32>
    %248 = tpu.matmul %246, %237, %cst_58 {dimension_numbers = #tpu.dot_dimension_numbers<[1], [0], [0], [1], [0, 0, 1, 1], [], []>} : vector<64x64xbf16>, vector<64x8xbf16>, vector<64x8xf32> -> vector<64x8xf32>
    %249 = vector.broadcast %247 : vector<64x1xf32> to vector<64x8xf32>
    %250 = arith.mulf %248, %249 : vector<64x8xf32>
    %251 = vector.extract_strided_slice %232 {offsets = [64, 0], sizes = [64, 8], strides = [1, 1]} : vector<128x8xbf16> to vector<64x8xbf16>
    %252 = vector.extract_strided_slice %233 {offsets = [64, 0], sizes = [64, 8], strides = [1, 1]} : vector<128x8xbf16> to vector<64x8xbf16>
    %253 = vector.extract_strided_slice %234 {offsets = [64, 0], sizes = [64, 8], strides = [1, 1]} : vector<128x8xbf16> to vector<64x8xbf16>
    %cst_59 = arith.constant dense<0.000000e+00> : vector<64x64xf32>
    %254 = tpu.matmul %251, %252, %cst_59 {dimension_numbers = #tpu.dot_dimension_numbers<[1], [1], [0], [0], [0, 0, 1, 0], [], []>} : vector<64x8xbf16>, vector<64x8xbf16>, vector<64x64xf32> -> vector<64x64xf32>
    %cst_60 = arith.constant dense<0xFF800000> : vector<64xf32>
    %255 = vector.multi_reduction <maximumf>, %254, %cst_60 [1] : vector<64x64xf32> to vector<64xf32>
    %256 = vector.shape_cast %255 : vector<64xf32> to vector<64x1xf32>
    %257 = vector.broadcast %256 : vector<64x1xf32> to vector<64x64xf32>
    %258 = arith.subf %254, %257 : vector<64x64xf32>
    %259 = math.exp %258 : vector<64x64xf32>
    %cst_61 = arith.constant dense<0.000000e+00> : vector<64xf32>
    %260 = vector.multi_reduction <add>, %259, %cst_61 [1] : vector<64x64xf32> to vector<64xf32>
    %261 = vector.shape_cast %260 : vector<64xf32> to vector<64x1xf32>
    %262 = arith.truncf %259 : vector<64x64xf32> to vector<64x64xbf16>
    %263 = tpu.reciprocal %261 {approx = true} : vector<64x1xf32> -> vector<64x1xf32>
    %cst_62 = arith.constant dense<0.000000e+00> : vector<64x8xf32>
    %264 = tpu.matmul %262, %253, %cst_62 {dimension_numbers = #tpu.dot_dimension_numbers<[1], [0], [0], [1], [0, 0, 1, 1], [], []>} : vector<64x64xbf16>, vector<64x8xbf16>, vector<64x8xf32> -> vector<64x8xf32>
    %265 = vector.broadcast %263 : vector<64x1xf32> to vector<64x8xf32>
    %266 = arith.mulf %264, %265 : vector<64x8xf32>
    %267 = tpu.concatenate %250, %266 in 0 : vector<64x8xf32>, vector<64x8xf32> -> vector<128x8xf32>
    %268 = arith.truncf %267 : vector<128x8xf32> to vector<128x8xbf16>
    %269 = vector.extract_strided_slice %9 {offsets = [0, 56], sizes = [128, 8], strides = [1, 1]} : vector<128x192xbf16> to vector<128x8xbf16>
    %270 = vector.extract_strided_slice %9 {offsets = [0, 120], sizes = [128, 8], strides = [1, 1]} : vector<128x192xbf16> to vector<128x8xbf16>
    %271 = vector.extract_strided_slice %9 {offsets = [0, 184], sizes = [128, 8], strides = [1, 1]} : vector<128x192xbf16> to vector<128x8xbf16>
    %272 = vector.extract_strided_slice %269 {offsets = [0, 0], sizes = [64, 8], strides = [1, 1]} : vector<128x8xbf16> to vector<64x8xbf16>
    %273 = vector.extract_strided_slice %270 {offsets = [0, 0], sizes = [64, 8], strides = [1, 1]} : vector<128x8xbf16> to vector<64x8xbf16>
    %274 = vector.extract_strided_slice %271 {offsets = [0, 0], sizes = [64, 8], strides = [1, 1]} : vector<128x8xbf16> to vector<64x8xbf16>
    %cst_63 = arith.constant dense<0.000000e+00> : vector<64x64xf32>
    %275 = tpu.matmul %272, %273, %cst_63 {dimension_numbers = #tpu.dot_dimension_numbers<[1], [1], [0], [0], [0, 0, 1, 0], [], []>} : vector<64x8xbf16>, vector<64x8xbf16>, vector<64x64xf32> -> vector<64x64xf32>
    %cst_64 = arith.constant dense<0xFF800000> : vector<64xf32>
    %276 = vector.multi_reduction <maximumf>, %275, %cst_64 [1] : vector<64x64xf32> to vector<64xf32>
    %277 = vector.shape_cast %276 : vector<64xf32> to vector<64x1xf32>
    %278 = vector.broadcast %277 : vector<64x1xf32> to vector<64x64xf32>
    %279 = arith.subf %275, %278 : vector<64x64xf32>
    %280 = math.exp %279 : vector<64x64xf32>
    %cst_65 = arith.constant dense<0.000000e+00> : vector<64xf32>
    %281 = vector.multi_reduction <add>, %280, %cst_65 [1] : vector<64x64xf32> to vector<64xf32>
    %282 = vector.shape_cast %281 : vector<64xf32> to vector<64x1xf32>
    %283 = arith.truncf %280 : vector<64x64xf32> to vector<64x64xbf16>
    %284 = tpu.reciprocal %282 {approx = true} : vector<64x1xf32> -> vector<64x1xf32>
    %cst_66 = arith.constant dense<0.000000e+00> : vector<64x8xf32>
    %285 = tpu.matmul %283, %274, %cst_66 {dimension_numbers = #tpu.dot_dimension_numbers<[1], [0], [0], [1], [0, 0, 1, 1], [], []>} : vector<64x64xbf16>, vector<64x8xbf16>, vector<64x8xf32> -> vector<64x8xf32>
    %286 = vector.broadcast %284 : vector<64x1xf32> to vector<64x8xf32>
    %287 = arith.mulf %285, %286 : vector<64x8xf32>
    %288 = vector.extract_strided_slice %269 {offsets = [64, 0], sizes = [64, 8], strides = [1, 1]} : vector<128x8xbf16> to vector<64x8xbf16>
    %289 = vector.extract_strided_slice %270 {offsets = [64, 0], sizes = [64, 8], strides = [1, 1]} : vector<128x8xbf16> to vector<64x8xbf16>
    %290 = vector.extract_strided_slice %271 {offsets = [64, 0], sizes = [64, 8], strides = [1, 1]} : vector<128x8xbf16> to vector<64x8xbf16>
    %cst_67 = arith.constant dense<0.000000e+00> : vector<64x64xf32>
    %291 = tpu.matmul %288, %289, %cst_67 {dimension_numbers = #tpu.dot_dimension_numbers<[1], [1], [0], [0], [0, 0, 1, 0], [], []>} : vector<64x8xbf16>, vector<64x8xbf16>, vector<64x64xf32> -> vector<64x64xf32>
    %cst_68 = arith.constant dense<0xFF800000> : vector<64xf32>
    %292 = vector.multi_reduction <maximumf>, %291, %cst_68 [1] : vector<64x64xf32> to vector<64xf32>
    %293 = vector.shape_cast %292 : vector<64xf32> to vector<64x1xf32>
    %294 = vector.broadcast %293 : vector<64x1xf32> to vector<64x64xf32>
    %295 = arith.subf %291, %294 : vector<64x64xf32>
    %296 = math.exp %295 : vector<64x64xf32>
    %cst_69 = arith.constant dense<0.000000e+00> : vector<64xf32>
    %297 = vector.multi_reduction <add>, %296, %cst_69 [1] : vector<64x64xf32> to vector<64xf32>
    %298 = vector.shape_cast %297 : vector<64xf32> to vector<64x1xf32>
    %299 = arith.truncf %296 : vector<64x64xf32> to vector<64x64xbf16>
    %300 = tpu.reciprocal %298 {approx = true} : vector<64x1xf32> -> vector<64x1xf32>
    %cst_70 = arith.constant dense<0.000000e+00> : vector<64x8xf32>
    %301 = tpu.matmul %299, %290, %cst_70 {dimension_numbers = #tpu.dot_dimension_numbers<[1], [0], [0], [1], [0, 0, 1, 1], [], []>} : vector<64x64xbf16>, vector<64x8xbf16>, vector<64x8xf32> -> vector<64x8xf32>
    %302 = vector.broadcast %300 : vector<64x1xf32> to vector<64x8xf32>
    %303 = arith.mulf %301, %302 : vector<64x8xf32>
    %304 = tpu.concatenate %287, %303 in 0 : vector<64x8xf32>, vector<64x8xf32> -> vector<128x8xf32>
    %305 = arith.truncf %304 : vector<128x8xf32> to vector<128x8xbf16>
    %306 = tpu.concatenate %46, %83, %120, %157, %194, %231, %268, %305 in 1 : vector<128x8xbf16>, vector<128x8xbf16>, vector<128x8xbf16>, vector<128x8xbf16>, vector<128x8xbf16>, vector<128x8xbf16>, vector<128x8xbf16>, vector<128x8xbf16> -> vector<128x64xbf16>
    %c0_71 = arith.constant 0 : index
    %c0_72 = arith.constant 0 : index
    %307 = vector.load %arg5[%c0_71, %c0_72] : memref<64x64xbf16, #tpu.memory_space<vmem>>, vector<64x64xbf16>
    %cst_73 = arith.constant dense<0.000000e+00> : vector<128x64xf32>
    %308 = tpu.matmul %306, %307, %cst_73 {dimension_numbers = #tpu.dot_dimension_numbers<[1], [0], [0], [1], [0, 0, 1, 1], [], []>} : vector<128x64xbf16>, vector<64x64xbf16>, vector<128x64xf32> -> vector<128x64xf32>
    %c0_74 = arith.constant 0 : index
    %c0_75 = arith.constant 0 : index
    %309 = vector.load %arg6[%c0_74, %c0_75] : memref<1x64xf32, #tpu.memory_space<vmem>>, vector<1x64xf32>
    %310 = vector.broadcast %309 : vector<1x64xf32> to vector<128x64xf32>
    %311 = arith.addf %308, %310 : vector<128x64xf32>
    %312 = arith.addf %2, %311 : vector<128x64xf32>
    %cst_76 = arith.constant dense<0.000000e+00> : vector<128xf32>
    %313 = vector.multi_reduction <add>, %312, %cst_76 [1] : vector<128x64xf32> to vector<128xf32>
    %314 = vector.shape_cast %313 : vector<128xf32> to vector<128x1xf32>
    %cst_77 = arith.constant 6.400000e+01 : f32
    %315 = vector.broadcast %cst_77 : f32 to vector<128x1xf32>
    %316 = arith.divf %314, %315 : vector<128x1xf32>
    %317 = vector.broadcast %316 : vector<128x1xf32> to vector<128x64xf32>
    %318 = arith.subf %312, %317 : vector<128x64xf32>
    %319 = arith.mulf %318, %318 : vector<128x64xf32>
    %cst_78 = arith.constant dense<0.000000e+00> : vector<128xf32>
    %320 = vector.multi_reduction <add>, %319, %cst_78 [1] : vector<128x64xf32> to vector<128xf32>
    %321 = vector.shape_cast %320 : vector<128xf32> to vector<128x1xf32>
    %cst_79 = arith.constant 6.400000e+01 : f32
    %322 = vector.broadcast %cst_79 : f32 to vector<128x1xf32>
    %323 = arith.divf %321, %322 : vector<128x1xf32>
    %324 = vector.broadcast %316 : vector<128x1xf32> to vector<128x64xf32>
    %325 = arith.subf %312, %324 : vector<128x64xf32>
    %cst_80 = arith.constant 9.99999974E-6 : f32
    %326 = vector.broadcast %cst_80 : f32 to vector<128x1xf32>
    %327 = arith.addf %323, %326 : vector<128x1xf32>
    %328 = math.rsqrt %327 : vector<128x1xf32>
    %329 = vector.broadcast %328 : vector<128x1xf32> to vector<128x64xf32>
    %330 = arith.mulf %325, %329 : vector<128x64xf32>
    %c0_81 = arith.constant 0 : index
    %c0_82 = arith.constant 0 : index
    %331 = vector.load %arg7[%c0_81, %c0_82] : memref<1x64xf32, #tpu.memory_space<vmem>>, vector<1x64xf32>
    %332 = vector.broadcast %331 : vector<1x64xf32> to vector<128x64xf32>
    %333 = arith.mulf %330, %332 : vector<128x64xf32>
    %c0_83 = arith.constant 0 : index
    %c0_84 = arith.constant 0 : index
    %334 = vector.load %arg8[%c0_83, %c0_84] : memref<1x64xf32, #tpu.memory_space<vmem>>, vector<1x64xf32>
    %335 = vector.broadcast %334 : vector<1x64xf32> to vector<128x64xf32>
    %336 = arith.addf %333, %335 : vector<128x64xf32>
    %337 = arith.truncf %336 : vector<128x64xf32> to vector<128x64xbf16>
    %c0_85 = arith.constant 0 : index
    %c0_86 = arith.constant 0 : index
    %338 = vector.load %arg9[%c0_85, %c0_86] : memref<64x128xbf16, #tpu.memory_space<vmem>>, vector<64x128xbf16>
    %cst_87 = arith.constant dense<0.000000e+00> : vector<128x128xf32>
    %339 = tpu.matmul %337, %338, %cst_87 {dimension_numbers = #tpu.dot_dimension_numbers<[1], [0], [0], [1], [0, 0, 1, 1], [], []>} : vector<128x64xbf16>, vector<64x128xbf16>, vector<128x128xf32> -> vector<128x128xf32>
    %c0_88 = arith.constant 0 : index
    %c0_89 = arith.constant 0 : index
    %340 = vector.load %arg10[%c0_88, %c0_89] : memref<1x128xf32, #tpu.memory_space<vmem>>, vector<1x128xf32>
    %341 = vector.broadcast %340 : vector<1x128xf32> to vector<128x128xf32>
    %342 = arith.addf %339, %341 : vector<128x128xf32>
    %cst_90 = arith.constant 0.000000e+00 : f32
    %343 = vector.broadcast %cst_90 : f32 to vector<128x128xf32>
    %344 = arith.maximumf %342, %343 : vector<128x128xf32>
    %345 = arith.truncf %344 : vector<128x128xf32> to vector<128x128xbf16>
    %c0_91 = arith.constant 0 : index
    %c0_92 = arith.constant 0 : index
    %346 = vector.load %arg11[%c0_91, %c0_92] : memref<128x64xbf16, #tpu.memory_space<vmem>>, vector<128x64xbf16>
    %cst_93 = arith.constant dense<0.000000e+00> : vector<128x64xf32>
    %347 = tpu.matmul %345, %346, %cst_93 {dimension_numbers = #tpu.dot_dimension_numbers<[1], [0], [0], [1], [0, 0, 1, 1], [], []>} : vector<128x128xbf16>, vector<128x64xbf16>, vector<128x64xf32> -> vector<128x64xf32>
    %c0_94 = arith.constant 0 : index
    %c0_95 = arith.constant 0 : index
    %348 = vector.load %arg12[%c0_94, %c0_95] : memref<1x64xf32, #tpu.memory_space<vmem>>, vector<1x64xf32>
    %349 = vector.broadcast %348 : vector<1x64xf32> to vector<128x64xf32>
    %350 = arith.addf %347, %349 : vector<128x64xf32>
    %351 = arith.addf %336, %350 : vector<128x64xf32>
    %cst_96 = arith.constant dense<0.000000e+00> : vector<128xf32>
    %352 = vector.multi_reduction <add>, %351, %cst_96 [1] : vector<128x64xf32> to vector<128xf32>
    %353 = vector.shape_cast %352 : vector<128xf32> to vector<128x1xf32>
    %cst_97 = arith.constant 6.400000e+01 : f32
    %354 = vector.broadcast %cst_97 : f32 to vector<128x1xf32>
    %355 = arith.divf %353, %354 : vector<128x1xf32>
    %356 = vector.broadcast %355 : vector<128x1xf32> to vector<128x64xf32>
    %357 = arith.subf %351, %356 : vector<128x64xf32>
    %358 = arith.mulf %357, %357 : vector<128x64xf32>
    %cst_98 = arith.constant dense<0.000000e+00> : vector<128xf32>
    %359 = vector.multi_reduction <add>, %358, %cst_98 [1] : vector<128x64xf32> to vector<128xf32>
    %360 = vector.shape_cast %359 : vector<128xf32> to vector<128x1xf32>
    %cst_99 = arith.constant 6.400000e+01 : f32
    %361 = vector.broadcast %cst_99 : f32 to vector<128x1xf32>
    %362 = arith.divf %360, %361 : vector<128x1xf32>
    %363 = vector.broadcast %355 : vector<128x1xf32> to vector<128x64xf32>
    %364 = arith.subf %351, %363 : vector<128x64xf32>
    %cst_100 = arith.constant 9.99999974E-6 : f32
    %365 = vector.broadcast %cst_100 : f32 to vector<128x1xf32>
    %366 = arith.addf %362, %365 : vector<128x1xf32>
    %367 = math.rsqrt %366 : vector<128x1xf32>
    %368 = vector.broadcast %367 : vector<128x1xf32> to vector<128x64xf32>
    %369 = arith.mulf %364, %368 : vector<128x64xf32>
    %c0_101 = arith.constant 0 : index
    %c0_102 = arith.constant 0 : index
    %370 = vector.load %arg13[%c0_101, %c0_102] : memref<1x64xf32, #tpu.memory_space<vmem>>, vector<1x64xf32>
    %371 = vector.broadcast %370 : vector<1x64xf32> to vector<128x64xf32>
    %372 = arith.mulf %369, %371 : vector<128x64xf32>
    %c0_103 = arith.constant 0 : index
    %c0_104 = arith.constant 0 : index
    %373 = vector.load %arg14[%c0_103, %c0_104] : memref<1x64xf32, #tpu.memory_space<vmem>>, vector<1x64xf32>
    %374 = vector.broadcast %373 : vector<1x64xf32> to vector<128x64xf32>
    %375 = arith.addf %372, %374 : vector<128x64xf32>
    %c0_105 = arith.constant 0 : index
    %c0_106 = arith.constant 0 : index
    %376 = vector.load %arg15[%c0_105, %c0_106] : memref<128x64xf32, #tpu.memory_space<vmem>>, vector<128x64xf32>
    tpu.vector_store %arg15[%c0_105, %c0_106], %375 {strides = array<i32>} : memref<128x64xf32, #tpu.memory_space<vmem>>, vector<128x64xf32>,
    return
  }
  func.func @transform_0(%arg0: i32) -> (i32, i32) {
    %c0_i32 = arith.constant 0 : i32
    %c0_i32_0 = arith.constant 0 : i32
    %c0_i32_1 = arith.constant 0 : i32
    return %c0_i32, %c0_i32_0 : i32, i32
  }
  func.func @transform_1(%arg0: i32) -> (i32, i32) {
    %c0_i32 = arith.constant 0 : i32
    %c0_i32_0 = arith.constant 0 : i32
    return %arg0, %c0_i32 : i32, i32
  }
  func.func @transform_2(%arg0: i32) -> (i32, i32) {
    %c0_i32 = arith.constant 0 : i32
    %c0_i32_0 = arith.constant 0 : i32
    %c0_i32_1 = arith.constant 0 : i32
    return %c0_i32, %c0_i32_0 : i32, i32
  }
  func.func @transform_3(%arg0: i32) -> (i32, i32) {
    %c0_i32 = arith.constant 0 : i32
    %c0_i32_0 = arith.constant 0 : i32
    %c0_i32_1 = arith.constant 0 : i32
    return %c0_i32, %c0_i32_0 : i32, i32
  }
  func.func @transform_4(%arg0: i32) -> (i32, i32) {
    %c0_i32 = arith.constant 0 : i32
    %c0_i32_0 = arith.constant 0 : i32
    %c0_i32_1 = arith.constant 0 : i32
    return %c0_i32, %c0_i32_0 : i32, i32
  }
  func.func @transform_5(%arg0: i32) -> (i32, i32) {
    %c0_i32 = arith.constant 0 : i32
    %c0_i32_0 = arith.constant 0 : i32
    %c0_i32_1 = arith.constant 0 : i32
    return %c0_i32, %c0_i32_0 : i32, i32
  }
  func.func @transform_6(%arg0: i32) -> (i32, i32) {
    %c0_i32 = arith.constant 0 : i32
    %c0_i32_0 = arith.constant 0 : i32
    %c0_i32_1 = arith.constant 0 : i32
    return %c0_i32, %c0_i32_0 : i32, i32
  }
  func.func @transform_7(%arg0: i32) -> (i32, i32) {
    %c0_i32 = arith.constant 0 : i32
    %c0_i32_0 = arith.constant 0 : i32
    %c0_i32_1 = arith.constant 0 : i32
    return %c0_i32, %c0_i32_0 : i32, i32
  }
  func.func @transform_8(%arg0: i32) -> (i32, i32) {
    %c0_i32 = arith.constant 0 : i32
    %c0_i32_0 = arith.constant 0 : i32
    %c0_i32_1 = arith.constant 0 : i32
    return %c0_i32, %c0_i32_0 : i32, i32
  }
  func.func @transform_9(%arg0: i32) -> (i32, i32) {
    %c0_i32 = arith.constant 0 : i32
    %c0_i32_0 = arith.constant 0 : i32
    %c0_i32_1 = arith.constant 0 : i32
    return %c0_i32, %c0_i32_0 : i32, i32
  }
  func.func @transform_10(%arg0: i32) -> (i32, i32) {
    %c0_i32 = arith.constant 0 : i32
    %c0_i32_0 = arith.constant 0 : i32
    %c0_i32_1 = arith.constant 0 : i32
    return %c0_i32, %c0_i32_0 : i32, i32
  }
  func.func @transform_11(%arg0: i32) -> (i32, i32) {
    %c0_i32 = arith.constant 0 : i32
    %c0_i32_0 = arith.constant 0 : i32
    %c0_i32_1 = arith.constant 0 : i32
    return %c0_i32, %c0_i32_0 : i32, i32
  }
  func.func @transform_12(%arg0: i32) -> (i32, i32) {
    %c0_i32 = arith.constant 0 : i32
    %c0_i32_0 = arith.constant 0 : i32
    %c0_i32_1 = arith.constant 0 : i32
    return %c0_i32, %c0_i32_0 : i32, i32
  }
  func.func @transform_13(%arg0: i32) -> (i32, i32) {
    %c0_i32 = arith.constant 0 : i32
    %c0_i32_0 = arith.constant 0 : i32
    %c0_i32_1 = arith.constant 0 : i32
    return %c0_i32, %c0_i32_0 : i32, i32
  }
  func.func @transform_14(%arg0: i32) -> (i32, i32) {
    %c0_i32 = arith.constant 0 : i32
    %c0_i32_0 = arith.constant 0 : i32
    return %arg0, %c0_i32 : i32, i32
  }
}

</mosaic_0001>

<bundles_post_ra>
// kernel: adjust_transformer_forward.1
= control target key start
LH: loop header
LB: loop body
LE: loop exit
PB: predicated region body
PF: predicated region fallthrough
CT: control target
= control target key end

     0   :  { %s10892_s0 = inlined_call_operand.vmem [shape: f32[128,64], index: 0, kind: input, shape index: {}]   ;;  %s10893_s1 = inlined_call_operand.vmem [shape: f32[128,64], index: 1, kind: input, shape index: {}]   ;;  %s10894_s2 = inlined_call_operand.vmem [shape: bf16[64,192], index: 2, kind: input, shape index: {}]   ;;  %s10895_s3 = inlined_call_operand.vmem [shape: f32[1,192], index: 3, kind: input, shape index: {}]   ;;  %s10896_s4 = inlined_call_operand.vmem [shape: bf16[64,64], index: 4, kind: input, shape index: {}]   ;;  %s10897_s5 = inlined_call_operand.vmem [shape: f32[1,64], index: 5, kind: input, shape index: {}]   ;;  %s10898_s6 = inlined_call_operand.vmem [shape: f32[1,64], index: 6, kind: input, shape index: {}]   ;;  %s10899_s7 = inlined_call_operand.vmem [shape: f32[1,64], index: 7, kind: input, shape index: {}]   ;;  %s10900_s8 = inlined_call_operand.vmem [shape: bf16[64,128], index: 8, kind: input, shape index: {}]   ;;  %s10901_s9 = inlined_call_operand.vmem [shape: f32[1,128], index: 9, kind: input, shape index: {}]   ;;  %s10902_s10 = inlined_call_operand.vmem [shape: bf16[128,64], index: 10, kind: input, shape index: {}]   ;;  %s10903_s11 = inlined_call_operand.vmem [shape: f32[1,64], index: 11, kind: input, shape index: {}]   ;;  %s10904_s12 = inlined_call_operand.vmem [shape: f32[1,64], index: 12, kind: input, shape index: {}]   ;;  %s10905_s13 = inlined_call_operand.vmem [shape: f32[1,64], index: 13, kind: input, shape index: {}]   ;;  %s10906_s14 = inlined_call_operand.hbm [shape: f32[128,64], index: 14, kind: output, shape index: {}]  }
   0x1   :  { %v5683_v0 = vld [vmem:[%s10894_s2 + $0x30] sm:$0xf]  ;;  %v5920_v1 = vld [vmem:[%s10894_s2 + $0x34] sm:$0xf0]  ;;  %v5919_v2 = vld [vmem:[%s10894_s2 + $0x34] sm:$0xf] }
   0x2   :  { %v5684_v3 = vor.u32 %v5920_v1, %v5683_v0  ;;  %v5685_v4 = vld [vmem:[%s10894_s2 + $0x38] sm:$0xf0]  ;;  %v5675_v5 = vld [vmem:[%s10894_s2 + $0x20] sm:$0xf]  ;;  %v5918_v6 = vld [vmem:[%s10894_s2 + $0x24] sm:$0xf0] }
   0x3   :  { %v5688_v7 = vor.u32 %v5919_v2, %v5685_v4  ;;  %v5917_v8 = vld [vmem:[%s10894_s2 + $0x24] sm:$0xf]  ;;  %v5677_v9 = vld [vmem:[%s10894_s2 + $0x28] sm:$0xf0]  ;;  %v5676_v10 = vor.u32 %v5918_v6, %v5675_v5  ;;  %v5667_v12 = vld [vmem:[%s10894_s2 + $0x10] sm:$0xf] }
   0x4   :  { %188 = vmatpush.bf16.msra.mxu0 %v5684_v3  ;;  %v5680_v11 = vor.u32 %v5917_v8, %v5677_v9  ;;  %v5916_v13 = vld [vmem:[%s10894_s2 + $0x14] sm:$0xf0]  ;;  %v5915_v14 = vld [vmem:[%s10894_s2 + $0x14] sm:$0xf]  ;;  %v5669_v15 = vld [vmem:[%s10894_s2 + $0x18] sm:$0xf0] }
   0x5   :  { %237 = vmatpush.bf16.msra.mxu1 %v5688_v7  ;;  %v49_v16 = vld [vmem:[%s10893_s1] sm:$0xff]  ;;  %v5668_v17 = vor.u32 %v5916_v13, %v5667_v12  ;;  %v50_v18 = vld [vmem:[%s10893_s1 + $0x8] sm:$0xff]  ;;  %v5672_v21 = vor.u32 %v5915_v14, %v5669_v15 }
   0x6   :  { %v65_v19 = vld [vmem:[%s10892_s0] sm:$0xff]  ;;  %v66_v20 = vld [vmem:[%s10892_s0 + $0x8] sm:$0xff] }
   0x7   :  { %v5659_v22 = vld [vmem:[%s10894_s2] sm:$0xf]  ;;  %v5914_v23 = vld [vmem:[%s10894_s2 + $0x4] sm:$0xf0]  ;;  %v5913_v24 = vld [vmem:[%s10894_s2 + $0x4] sm:$0xf]  ;;  %v6731_v26 = vadd.f32 %v65_v19, %v49_v16  ;;  %v6733_v27 = vadd.f32 %v66_v20, %v50_v18 }
   0x8   :  { %189 = vmatpush.bf16.msra.mxu0 %v5676_v10  ;;  %v5661_v25 = vld [vmem:[%s10894_s2 + $0x8] sm:$0xf0]  ;;  %v5660_v28 = vor.u32 %v5914_v23, %v5659_v22 }
   0x9   :  { %238 = vmatpush.bf16.msra.mxu1 %v5680_v11  ;;  %11030 = vst [vmem:[#allocation5_spill] sm:$0xff] %v6731_v26 }
   0xa   :  { %11031 = vst [vmem:[#allocation6_spill] sm:$0xff] %v6733_v27 }
   0xc   :  { %190 = vmatpush.bf16.msra.mxu0 %v5668_v17 }
   0xd   :  { %19 = vsyncpa [#allocation3], 0  ;;  %239 = vmatpush.bf16.msra.mxu1 %v5672_v21  ;;  %v5664_v29 = vor.u32 %v5913_v24, %v5661_v25  ;;  %v97_v30 = vpack.c.bf16 %v6733_v27, %v6731_v26  ;;  %vm159_vm0 = vcmask 523264   ;;  %v51_v31 = vld [vmem:[%s10893_s1 + $0x10] sm:$0xff]  ;;  %v52_v32 = vld [vmem:[%s10893_s1 + $0x18] sm:$0xff]  ;;  %s6580_s26 = smov 64  }
   0xe   :  { %v67_v33 = vld [vmem:[%s10892_s0 + $0x10] sm:$0xff]  ;;  %v68_v34 = vld [vmem:[%s10892_s0 + $0x18] sm:$0xff]  ;;  %v53_v38 = vld [vmem:[%s10893_s1 + $0x20] sm:$0xff]  ;;  %s6581_s27 = smov 48   ;;  %s6582_s28 = smov 112   ;;  %vm326_vm1 = vcmask 64512  }
   0xf   :  { %v6751_v35 = vadd.f32 %v67_v33, %v51_v31  ;;  %v6753_v36 = vadd.f32 %v68_v34, %v52_v32  ;;  %v54_v39 = vld [vmem:[%s10893_s1 + $0x28] sm:$0xff]  ;;  %v69_v40 = vld [vmem:[%s10892_s0 + $0x20] sm:$0xff]  ;;  %v55_v45 = vld [vmem:[%s10893_s1 + $0x30] sm:$0xff]  ;;  %s6583_s29 = smov 40   ;;  %s6584_s30 = smov 104   ;;  %vm4339_vm2 = vcmask 130048  }
  0x10   :  { %191 = vmatpush.bf16.msra.mxu0 %v5660_v28  ;;  %v70_v41 = vld [vmem:[%s10892_s0 + $0x28] sm:$0xff]  ;;  %v6771_v42 = vadd.f32 %v69_v40, %v53_v38  ;;  %v56_v46 = vld [vmem:[%s10893_s1 + $0x38] sm:$0xff]  ;;  %v71_v47 = vld [vmem:[%s10892_s0 + $0x30] sm:$0xff]  ;;  %s6585_s15 = smov 32   ;;  %s6586_s16 = smov 96   ;;  %vm4356_vm3 = vcmask 195584  }
  0x11   :  { %240 = vmatpush.bf16.msra.mxu1 %v5664_v29  ;;  %11032 = vst [vmem:[#allocation7_spill] sm:$0xff] %v6751_v35  ;;  %v98_v37 = vpack.c.bf16 %v6753_v36, %v6751_v35  ;;  %v6773_v43 = vadd.f32 %v70_v41, %v54_v39  ;;  %v72_v48 = vld [vmem:[%s10892_s0 + $0x38] sm:$0xff]  ;;  %v6791_v49 = vadd.f32 %v71_v47, %v55_v45  ;;  %v57_v52 = vld [vmem:[%s10893_s1 + $0x40] sm:$0xff]  ;;  %v58_v53 = vld [vmem:[%s10893_s1 + $0x48] sm:$0xff]  ;;  %s6587_s17 = smov 24   ;;  %s6588_s18 = smov 88  }
  0x12   :  { %11033 = vst [vmem:[#allocation8_spill] sm:$0xff] %v6753_v36  ;;  %v6793_v50 = vadd.f32 %v72_v48, %v56_v46  ;;  %v73_v54 = vld [vmem:[%s10892_s0 + $0x40] sm:$0xff]  ;;  %v74_v55 = vld [vmem:[%s10892_s0 + $0x48] sm:$0xff]  ;;  %v59_v59 = vld [vmem:[%s10893_s1 + $0x50] sm:$0xff]  ;;  %s6589_s19 = smov 16   ;;  %s6590_s20 = smov 80  }
  0x13   :  { %5689 = vmatmul.msk.bf16.vlgmr.msra.gmra.mxu0 %vm159_vm0, %v97_v30  ;;  %11034 = vst [vmem:[#allocation9_spill] sm:$0xff] %v6771_v42  ;;  %v99_v44 = vpack.c.bf16 %v6773_v43, %v6771_v42  ;;  %v6811_v56 = vadd.f32 %v73_v54, %v57_v52  ;;  %v6813_v57 = vadd.f32 %v74_v55, %v58_v53  ;;  %v60_v60 = vld [vmem:[%s10893_s1 + $0x58] sm:$0xff]  ;;  %v75_v61 = vld [vmem:[%s10892_s0 + $0x50] sm:$0xff]  ;;  %v61_v2 = vld [vmem:[%s10893_s1 + $0x60] sm:$0xff]  ;;  %s6591_s2 = smov 8   ;;  %s6592_s21 = smov 72  }
  0x14   :  { %5697 = vmatmul.msk.bf16.vlgmr.msra.gmra.mxu1 %vm159_vm0, %v97_v30  ;;  %11035 = vst [vmem:[#allocation10_spill] sm:$0xff] %v6773_v43  ;;  %v100_v51 = vpack.c.bf16 %v6793_v50, %v6791_v49  ;;  %v76_v62 = vld [vmem:[%s10892_s0 + $0x58] sm:$0xff]  ;;  %v6831_v63 = vadd.f32 %v75_v61, %v59_v59  ;;  %v62_v3 = vld [vmem:[%s10893_s1 + $0x68] sm:$0xff]  ;;  %v77_v4 = vld [vmem:[%s10892_s0 + $0x60] sm:$0xff]  ;;  %vm4373_vm4 = vcmask 261120   ;;  %vm4390_vm5 = vcmask 326656  }
  0x15   :  { %11036 = vst [vmem:[#allocation11_spill] sm:$0xff] %v6791_v49  ;;  %v101_v58 = vpack.c.bf16 %v6813_v57, %v6811_v56  ;;  %v6833_v0 = vadd.f32 %v76_v62, %v60_v60  ;;  %v78_v5 = vld [vmem:[%s10892_s0 + $0x68] sm:$0xff]  ;;  %v6851_v6 = vadd.f32 %v77_v4, %v61_v2  ;;  %v63_v9 = vld [vmem:[%s10893_s1 + $0x70] sm:$0xff]  ;;  %v64_v10 = vld [vmem:[%s10893_s1 + $0x78] sm:$0xff]  ;;  %vm4407_vm6 = vcmask 392192  }
  0x16   :  { %11037 = vst [vmem:[#allocation12_spill] sm:$0xff] %v6793_v50  ;;  %v6853_v7 = vadd.f32 %v78_v5, %v62_v3  ;;  %v79_v11 = vld [vmem:[%s10892_s0 + $0x70] sm:$0xff]  ;;  %v80_v12 = vld [vmem:[%s10892_s0 + $0x78] sm:$0xff]  ;;  %v113_v16 = vld [vmem:[%s10895_s3] sm:$0x3]  ;;  %s6578_s0 = smov 120  }
  0x17   :  { %11038 = vst [vmem:[#allocation13_spill] sm:$0xff] %v6811_v56  ;;  %v102_v1 = vpack.c.bf16 %v6833_v0, %v6831_v63  ;;  %v6871_v13 = vadd.f32 %v79_v11, %v63_v9  ;;  %v6873_v14 = vadd.f32 %v80_v12, %v64_v10  ;;  %v6882_v19 = vperm.slane %v113_v16, 0  ;;  %s6579_s3 = smov 56  }
  0x18   :  { %11039 = vst [vmem:[#allocation14_spill] sm:$0xff] %v6813_v57  ;;  %v103_v8 = vpack.c.bf16 %v6853_v7, %v6851_v6  ;;  %v6884_v20 = vperm.slane %v113_v16, 1  ;;  %vm4424_vm7 = vcmask 457728  }
  0x19   :  { %11040 = vst [vmem:[#allocation15_spill] sm:$0xff] %v6831_v63  ;;  %v104_v15 = vpack.c.bf16 %v6873_v14, %v6871_v13 }
  0x1a   :  { %11041 = vst [vmem:[#allocation16_spill] sm:$0xff] %v6833_v0 }
  0x1b   :  { %11042 = vst [vmem:[#allocation17_spill] sm:$0xff] %v6851_v6 }
  0x1c   :  { %11043 = vst [vmem:[#allocation18_spill] sm:$0xff] %v6853_v7 }
  0x1d   :  { %11044 = vst [vmem:[#allocation19_spill] sm:$0xff] %v6871_v13 }
  0x1e   :  { %11045 = vst [vmem:[#allocation20_spill] sm:$0xff] %v6873_v14 }
  0x23   :  { %5690 = vmatmul.msk.bf16.gmra.mxu0 %vm159_vm0, %v98_v37 }
  0x24   :  { %5698 = vmatmul.msk.bf16.gmra.mxu1 %vm159_vm0, %v98_v37 }
  0x33   :  { %5691 = vmatmul.msk.bf16.gmra.mxu0 %vm159_vm0, %v99_v44 }
  0x34   :  { %5699 = vmatmul.msk.bf16.gmra.mxu1 %vm159_vm0, %v99_v44 }
  0x43   :  { %5692 = vmatmul.msk.bf16.gmra.mxu0 %vm159_vm0, %v100_v51 }
  0x44   :  { %5700 = vmatmul.msk.bf16.gmra.mxu1 %vm159_vm0, %v100_v51 }
  0x53   :  { %5693 = vmatmul.msk.bf16.gmra.mxu0 %vm159_vm0, %v101_v58 }
  0x54   :  { %5701 = vmatmul.msk.bf16.gmra.mxu1 %vm159_vm0, %v101_v58 }
  0x63   :  { %5694 = vmatmul.msk.bf16.gmra.mxu0 %vm159_vm0, %v102_v1 }
  0x64   :  { %5702 = vmatmul.msk.bf16.gmra.mxu1 %vm159_vm0, %v102_v1 }
  0x73   :  { %5695 = vmatmul.msk.bf16.gmra.mxu0 %vm159_vm0, %v103_v8 }
  0x74   :  { %5703 = vmatmul.msk.bf16.gmra.mxu1 %vm159_vm0, %v103_v8 }
  0x83   :  { %5696 = vmatmul.msk.bf16.gmra.mxu0 %vm159_vm0, %v104_v15 }
  0x84   :  { %5704 = vmatmul.msk.bf16.gmra.mxu1 %vm159_vm0, %v104_v15 }
  0x90   :  { %v193_v17 = vpop.f32.mrf.mxu0 }
  0x91   :  { %v242_v18 = vpop.f32.mrf.mxu1  ;;  %v194_v21 = vadd.f32 %v193_v17, %v6882_v19 }
  0x92   :  { %v243_v22 = vadd.f32 %v242_v18, %v6884_v20 }
  0x94   :  { %v282_v28 = vpack.c.bf16 %v243_v22, %v194_v21 }
  0x96   :  { %v306_v31 = vunpack.c.l.b16 %v282_v28  ;;  %v464_v41 = vunpack.c.h.b16 %v282_v28 }
  0x98   :  { %v195_v23 = vpop.f32.mrf.mxu0 }
  0x99   :  { %v196_v24 = vadd.f32 %v195_v23, %v6882_v19  ;;  %v244_v25 = vpop.f32.mrf.mxu1 }
  0x9a   :  { %v245_v29 = vadd.f32 %v244_v25, %v6884_v20 }
  0x9c   :  { %v283_v30 = vpack.c.bf16 %v245_v29, %v196_v24 }
  0x9e   :  { %v307_v32 = vunpack.c.l.b16 %v283_v30  ;;  %v465_v38 = vunpack.c.h.b16 %v283_v30 }
  0xa0   :  { %v6890_v33 = vpack.c.b16 %v307_v32, %v306_v31  ;;  %v198_v34 = vpop.f32.mrf.mxu0  ;;  %v6900_v44 = vpack.c.b16 %v465_v38, %v464_v41 }
  0xa1   :  { %v247_v37 = vpop.f32.mrf.mxu1  ;;  %v199_v39 = vadd.f32 %v198_v34, %v6882_v19 }
  0xa2   :  { %775 = vrot.lane.b32.xlu2 %v6890_v33, %s6578_s0  ;;  %783 = vrot.lane.b32.xlu0 %v6890_v33, %s6579_s3  ;;  %v248_v40 = vadd.f32 %v247_v37, %v6884_v20  ;;  %11046 = vst [vmem:[#allocation21_spill] sm:$0xff] %v6900_v44 }
  0xa3   :  { %318 = vrot.lane.b32.xlu1 %v6890_v33, %s6580_s26 }
  0xa4   :  { %v284_v45 = vpack.c.bf16 %v248_v40, %v199_v39 }
  0xa6   :  { %v308_v52 = vunpack.c.l.b16 %v284_v45  ;;  %v466_v60 = vunpack.c.h.b16 %v284_v45 }
  0xa8   :  { %v200_v46 = vpop.f32.mrf.mxu0 }
  0xa9   :  { %v201_v47 = vadd.f32 %v200_v46, %v6882_v19  ;;  %v249_v48 = vpop.f32.mrf.mxu1 }
  0xaa   :  { %v250_v51 = vadd.f32 %v249_v48, %v6884_v20  ;;  %928 = vrot.lane.b32.xlu0 %v6900_v44, %s6578_s0 }
  0xac   :  { %v285_v53 = vpack.c.bf16 %v250_v51, %v201_v47 }
  0xae   :  { %v309_v54 = vunpack.c.l.b16 %v285_v53  ;;  %v467_v61 = vunpack.c.h.b16 %v285_v53 }
  0xb0   :  { %v6906_v55 = vpack.c.b16 %v309_v54, %v308_v52  ;;  %v203_v58 = vpop.f32.mrf.mxu0  ;;  %v6914_v62 = vpack.c.b16 %v467_v61, %v466_v60 }
  0xb1   :  { %v252_v59 = vpop.f32.mrf.mxu1  ;;  %v204_v2 = vadd.f32 %v203_v58, %v6882_v19 }
  0xb2   :  { %777 = vrot.lane.b32.xlu2 %v6906_v55, %s6578_s0  ;;  %1227 = vrot.lane.b32.xlu0 %v6890_v33, %s6581_s27  ;;  %11047 = vst [vmem:[#allocation22_spill] sm:$0xff] %v6914_v62  ;;  %v253_v4 = vadd.f32 %v252_v59, %v6884_v20 }
  0xb3   :  { %320 = vrot.lane.b32.xlu1 %v6906_v55, %s6580_s26 }
  0xb4   :  { %v286_v9 = vpack.c.bf16 %v253_v4, %v204_v2 }
  0xb6   :  { %v310_v15 = vunpack.c.l.b16 %v286_v9  ;;  %v468_v32 = vunpack.c.h.b16 %v286_v9 }
  0xb8   :  { %v205_v1 = vpop.f32.mrf.mxu0 }
  0xb9   :  { %v254_v3 = vpop.f32.mrf.mxu1  ;;  %v206_v5 = vadd.f32 %v205_v1, %v6882_v19 }
  0xba   :  { %v255_v8 = vadd.f32 %v254_v3, %v6884_v20  ;;  %930 = vrot.lane.b32.xlu2 %v6914_v62, %s6578_s0  ;;  %1219 = vrot.lane.b32.xlu0 %v6890_v33, %s6582_s28 }
  0xbb   :  { %785 = vrot.lane.b32.xlu1 %v6906_v55, %s6579_s3 }
  0xbc   :  { %v287_v10 = vpack.c.bf16 %v255_v8, %v206_v5 }
  0xbe   :  { %v311_v16 = vunpack.c.l.b16 %v287_v10  ;;  %v469_v34 = vunpack.c.h.b16 %v287_v10 }
  0xc0   :  { %v208_v11 = vpop.f32.mrf.mxu0  ;;  %v6934_v21 = vpack.c.b16 %v311_v16, %v310_v15  ;;  %v6952_v45 = vpack.c.b16 %v469_v34, %v468_v32 }
  0xc1   :  { %v257_v12 = vpop.f32.mrf.mxu1  ;;  %v209_v17 = vadd.f32 %v208_v11, %v6882_v19 }
  0xc2   :  { %1673 = vrot.lane.b32.xlu2 %v6906_v55, %s6583_s29  ;;  %1671 = vrot.lane.b32.xlu0 %v6890_v33, %s6583_s29  ;;  %v258_v18 = vadd.f32 %v257_v12, %v6884_v20  ;;  %11049 = vst [vmem:[#allocation24_spill] sm:$0xff] %v6952_v45 }
  0xc3   :  { %1229 = vrot.lane.b32.xlu1 %v6906_v55, %s6581_s27 }
  0xc4   :  { %v288_v22 = vpack.c.bf16 %v258_v18, %v209_v17 }
  0xc6   :  { %v470_v29 = vunpack.c.h.b16 %v288_v22  ;;  %v312_v40 = vunpack.c.l.b16 %v288_v22 }
  0xc8   :  { %v210_v23 = vpop.f32.mrf.mxu0 }
  0xc9   :  { %v211_v24 = vadd.f32 %v210_v23, %v6882_v19  ;;  %v259_v25 = vpop.f32.mrf.mxu1 }
  0xca   :  { %v260_v28 = vadd.f32 %v259_v25, %v6884_v20  ;;  %779 = vrot.lane.b32.xlu2 %v6934_v21, %s6578_s0  ;;  %1663 = vrot.lane.b32.xlu0 %v6890_v33, %s6584_s30 }
  0xcb   :  { %1221 = vrot.lane.b32.xlu1 %v6906_v55, %s6582_s28 }
  0xcc   :  { %v289_v30 = vpack.c.bf16 %v260_v28, %v211_v24 }
  0xce   :  { %v471_v31 = vunpack.c.h.b16 %v289_v30  ;;  %v313_v41 = vunpack.c.l.b16 %v289_v30 }
  0xd0   :  { %v6944_v37 = vpack.c.b16 %v471_v31, %v470_v29  ;;  %v213_v38 = vpop.f32.mrf.mxu0  ;;  %v6960_v48 = vpack.c.b16 %v313_v41, %v312_v40 }
  0xd1   :  { %v262_v39 = vpop.f32.mrf.mxu1  ;;  %v214_v46 = vadd.f32 %v213_v38, %v6882_v19 }
  0xd2   :  { %11048 = vst [vmem:[#allocation23_spill] sm:$0xff] %v6944_v37  ;;  %496 = vmatpush.bf16.msrb.mxu1 %v6944_v37  ;;  %5937 = vmatpush.bf16.msra.mxu3 %v6944_v37  ;;  %v263_v47 = vadd.f32 %v262_v39, %v6884_v20 }
  0xd3   :  { %1231 = vrot.lane.b32.xlu2 %v6934_v21, %s6581_s27  ;;  %1665 = vrot.lane.b32.xlu0 %v6906_v55, %s6584_s30  ;;  %11050 = vst [vmem:[#allocation25_spill] sm:$0xff] %v6960_v48 }
  0xd4   :  { %2117 = vrot.lane.b32.xlu1 %v6906_v55, %s6585_s15  ;;  %v290_v54 = vpack.c.bf16 %v263_v47, %v214_v46 }
  0xd6   :  { %497 = vmatpush.bf16.msrb.mxu1 %v6952_v45  ;;  %5938 = vmatpush.bf16.msra.mxu3 %v6952_v45  ;;  %v694_v59 = vunpack.c.h.b16 %v290_v54  ;;  %v537_v4 = vunpack.c.l.b16 %v290_v54 }
  0xd8   :  { %v215_v51 = vpop.f32.mrf.mxu0 }
  0xd9   :  { %v216_v52 = vadd.f32 %v215_v51, %v6882_v19  ;;  %v264_v53 = vpop.f32.mrf.mxu1 }
  0xda   :  { %498 = vmatpush.bf16.msrb.mxu1 %v6914_v62  ;;  %5939 = vmatpush.bf16.msra.mxu3 %v6914_v62  ;;  %v265_v58 = vadd.f32 %v264_v53, %v6884_v20 }
  0xdb   :  { %789 = vrot.lane.b32.xlu2 %v6960_v48, %s6579_s3  ;;  %322 = vrot.lane.b32.xlu0 %v6934_v21, %s6580_s26 }
  0xdc   :  { %932 = vrot.lane.b32.xlu1 %v6952_v45, %s6578_s0  ;;  %v291_v60 = vpack.c.bf16 %v265_v58, %v216_v52 }
  0xde   :  { %499 = vmatpush.bf16.msrb.mxu1 %v6900_v44  ;;  %5940 = vmatpush.bf16.msra.mxu3 %v6900_v44  ;;  %v695_v61 = vunpack.c.h.b16 %v291_v60  ;;  %v538_v5 = vunpack.c.l.b16 %v291_v60 }
  0xe0   :  { %v6974_v1 = vpack.c.b16 %v695_v61, %v694_v59  ;;  %v218_v2 = vpop.f32.mrf.mxu0  ;;  %v6984_v10 = vpack.c.b16 %v538_v5, %v537_v4 }
  0xe1   :  { %v267_v3 = vpop.f32.mrf.mxu1  ;;  %v219_v8 = vadd.f32 %v218_v2, %v6882_v19 }
  0xe2   :  { %v268_v9 = vadd.f32 %v267_v3, %v6884_v20 }
  0xe3   :  { %781 = vrot.lane.b32.xlu2 %v6960_v48, %s6578_s0  ;;  %787 = vrot.lane.b32.xlu0 %v6934_v21, %s6579_s3 }
  0xe4   :  { %1675 = vrot.lane.b32.xlu1 %v6934_v21, %s6583_s29  ;;  %v292_v16 = vpack.c.bf16 %v268_v9, %v219_v8 }
  0xe6   :  { %v696_v18 = vunpack.c.h.b16 %v292_v16  ;;  %v539_v29 = vunpack.c.l.b16 %v292_v16 }
  0xe8   :  { %v220_v11 = vpop.f32.mrf.mxu0 }
  0xe9   :  { %v221_v12 = vadd.f32 %v220_v11, %v6882_v19  ;;  %v269_v15 = vpop.f32.mrf.mxu1 }
  0xea   :  { %v270_v17 = vadd.f32 %v269_v15, %v6884_v20 }
  0xeb   :  { %989 = vrot.lane.b32.xlu2 %v6984_v10, %s6578_s0  ;;  %1223 = vrot.lane.b32.xlu0 %v6934_v21, %s6582_s28 }
  0xec   :  { %1677 = vrot.lane.b32.xlu1 %v6960_v48, %s6583_s29  ;;  %v293_v22 = vpack.c.bf16 %v270_v17, %v221_v12 }
  0xee   :  { %v697_v23 = vunpack.c.h.b16 %v293_v22  ;;  %v540_v30 = vunpack.c.l.b16 %v293_v22 }
  0xf0   :  { %v6994_v24 = vpack.c.b16 %v697_v23, %v696_v18  ;;  %v223_v25 = vpop.f32.mrf.mxu0  ;;  %v7004_v34 = vpack.c.b16 %v540_v30, %v539_v29 }
  0xf1   :  { %v272_v28 = vpop.f32.mrf.mxu1  ;;  %v224_v31 = vadd.f32 %v223_v25, %v6882_v19 }
  0xf2   :  { %v273_v32 = vadd.f32 %v272_v28, %v6884_v20 }
  0xf3   :  { %1877 = vrot.lane.b32.xlu2 %v6984_v10, %s6584_s30  ;;  %1667 = vrot.lane.b32.xlu0 %v6934_v21, %s6584_s30 }
  0xf4   :  { %1885 = vrot.lane.b32.xlu1 %v6984_v10, %s6583_s29  ;;  %v294_v41 = vpack.c.bf16 %v273_v32, %v224_v31 }
  0xf6   :  { %v698_v47 = vunpack.c.h.b16 %v294_v41  ;;  %v541_v59 = vunpack.c.l.b16 %v294_v41 }
  0xf8   :  { %v225_v38 = vpop.f32.mrf.mxu0 }
  0xf9   :  { %v226_v39 = vadd.f32 %v225_v38, %v6882_v19  ;;  %v274_v40 = vpop.f32.mrf.mxu1 }
  0xfa   :  { %v275_v46 = vadd.f32 %v274_v40, %v6884_v20 }
  0xfb   :  { %551 = vrot.lane.b32.xlu2 %v7004_v34, %s6580_s26  ;;  %2119 = vrot.lane.b32.xlu0 %v6934_v21, %s6585_s15 }
  0xfc   :  { %999 = vrot.lane.b32.xlu1 %v7004_v34, %s6579_s3  ;;  %v295_v51 = vpack.c.bf16 %v275_v46, %v226_v39  ;;  %v7070_v29 = vpop.permute.xlu2 %775 }
  0xfd   :  { %11054 = vst [vmem:[#allocation29_spill] sm:$0xff] %v7070_v29 }
  0xfe   :  { %v699_v52 = vunpack.c.h.b16 %v295_v51  ;;  %v542_v60 = vunpack.c.l.b16 %v295_v51 }
 0x100   :  { %v7014_v53 = vpack.c.b16 %v699_v52, %v698_v47  ;;  %v228_v54 = vpop.f32.mrf.mxu0  ;;  %v7024_v3 = vpack.c.b16 %v542_v60, %v541_v59 }
 0x101   :  { %v277_v58 = vpop.f32.mrf.mxu1  ;;  %v229_v61 = vadd.f32 %v228_v54, %v6882_v19 }
 0x102   :  { %v278_v2 = vadd.f32 %v277_v58, %v6884_v20 }
 0x103   :  { %1435 = vrot.lane.b32.xlu2 %v7004_v34, %s6582_s28  ;;  %324 = vrot.lane.b32.xlu0 %v6960_v48, %s6580_s26 }
 0x104   :  { %1887 = vrot.lane.b32.xlu1 %v7004_v34, %s6583_s29  ;;  %v296_v9 = vpack.c.bf16 %v278_v2, %v229_v61 }
 0x106   :  { %v700_v12 = vunpack.c.h.b16 %v296_v9  ;;  %v543_v18 = vunpack.c.l.b16 %v296_v9 }
 0x108   :  { %v230_v4 = vpop.f32.mrf.mxu0 }
 0x109   :  { %v231_v5 = vadd.f32 %v230_v4, %v6882_v19  ;;  %v279_v8 = vpop.f32.mrf.mxu1 }
 0x10a   :  { %v280_v11 = vadd.f32 %v279_v8, %v6884_v20 }
 0x10b   :  { %1001 = vrot.lane.b32.xlu2 %v7024_v3, %s6579_s3  ;;  %934 = vrot.lane.b32.xlu0 %v6944_v37, %s6578_s0 }
 0x10c   :  { %993 = vrot.lane.b32.xlu1 %v7024_v3, %s6578_s0  ;;  %v297_v15 = vpack.c.bf16 %v280_v11, %v231_v5  ;;  %v7080_v31 = vpop.permute.xlu2 %777 }
 0x10d   :  { %11056 = vst [vmem:[#allocation31_spill] sm:$0xff] %v7080_v31 }
 0x10e   :  { %v701_v16 = vunpack.c.h.b16 %v297_v15  ;;  %v544_v19 = vunpack.c.l.b16 %v297_v15 }
 0x110   :  { %v7034_v17 = vpack.c.b16 %v701_v16, %v700_v12  ;;  %v7044_v22 = vpack.c.b16 %v544_v19, %v543_v18 }
 0x112   :  { %11051 = vst [vmem:[#allocation26_spill] sm:$0xff] %v7034_v17 }
 0x113   :  { %1437 = vrot.lane.b32.xlu2 %v7024_v3, %s6582_s28  ;;  %1233 = vrot.lane.b32.xlu0 %v6960_v48, %s6581_s27 }
 0x114   :  { %1445 = vrot.lane.b32.xlu1 %v7024_v3, %s6581_s27  ;;  %v7042_v20 = vpop.permute.xlu0 %783  ;;  %v7094_v38 = vpop.permute.xlu2 %930 }
 0x115   :  { %11058 = vst [vmem:[#allocation33_spill] sm:$0xff] %v7094_v38  ;;  %v7098_v39 = vpop.permute.xlu1 %318 }
 0x11b   :  { %995 = vrot.lane.b32.xlu2 %v7044_v22, %s6578_s0  ;;  %1225 = vrot.lane.b32.xlu0 %v6960_v48, %s6582_s28 }
 0x11c   :  { %1889 = vrot.lane.b32.xlu1 %v7024_v3, %s6583_s29  ;;  %v7052_v23 = vpop.permute.xlu0 %928  ;;  %v7108_v47 = vpop.permute.xlu2 %1673 }
 0x11d   :  { %11052 = vst [vmem:[#allocation27_spill] sm:$0xff] %v7052_v23 }
 0x11e   :  { %11060 = vst [vmem:[#allocation35_spill] sm:$0xff] %v7108_v47 }
 0x123   :  { %2333 = vrot.lane.b32.xlu2 %v7024_v3, %s6585_s15  ;;  %2121 = vrot.lane.b32.xlu0 %v6960_v48, %s6585_s15 }
 0x124   :  { %2107 = vrot.lane.b32.xlu1 %v6890_v33, %s6586_s16  ;;  %v7060_v25 = vpop.permute.xlu0 %1227  ;;  %v7120_v54 = vpop.permute.xlu2 %779 }
 0x125   :  { %v321_v41 = vpop.permute.xlu1 %320  ;;  %11061 = vst [vmem:[#allocation36_spill] sm:$0xff] %v7120_v54 }
 0x12b   :  { %2563 = vrot.lane.b32.xlu2 %v6934_v21, %s6587_s17  ;;  %1669 = vrot.lane.b32.xlu0 %v6960_v48, %s6584_s30 }
 0x12c   :  { %2109 = vrot.lane.b32.xlu1 %v6906_v55, %s6586_s16  ;;  %v7068_v28 = vpop.permute.xlu0 %1219 }
 0x12d   :  { %11053 = vst [vmem:[#allocation28_spill] sm:$0xff] %v7068_v28  ;;  %v7118_v52 = vpop.permute.xlu1 %785  ;;  %v1232_v60 = vpop.permute.xlu2 %1231 }
 0x133   :  { %1378 = vrot.lane.b32.xlu2 %v6944_v37, %s6582_s28  ;;  %549 = vrot.lane.b32.xlu0 %v6984_v10, %s6580_s26 }
 0x134   :  { %2565 = vrot.lane.b32.xlu1 %v6960_v48, %s6587_s17  ;;  %v7078_v30 = vpop.permute.xlu0 %1671 }
 0x135   :  { %11055 = vst [vmem:[#allocation30_spill] sm:$0xff] %v7078_v30  ;;  %v7130_v59 = vpop.permute.xlu1 %1229  ;;  %v790_v4 = vpop.permute.xlu2 %789 }
 0x13b   :  { %1144 = vrot.lane.b32.xlu2 %v6994_v24, %s6578_s0  ;;  %997 = vrot.lane.b32.xlu0 %v6984_v10, %s6579_s3 }
 0x13c   :  { %2329 = vrot.lane.b32.xlu1 %v6984_v10, %s6585_s15  ;;  %v7088_v32 = vpop.permute.xlu0 %1663 }
 0x13d   :  { %11057 = vst [vmem:[#allocation32_spill] sm:$0xff] %v7088_v32  ;;  %v7140_v2 = vpop.permute.xlu1 %1221  ;;  %v7158_v11 = vpop.permute.xlu2 %781 }
 0x13e   :  { %11064 = vst [vmem:[#allocation39_spill] sm:$0xff] %v7140_v2 }
 0x13f   :  { %11067 = vst [vmem:[#allocation42_spill] sm:$0xff] %v7158_v11 }
 0x143   :  { %2113 = vrot.lane.b32.xlu2 %v6960_v48, %s6586_s16  ;;  %1441 = vrot.lane.b32.xlu0 %v6984_v10, %s6581_s27 }
 0x144   :  { %2335 = vrot.lane.b32.xlu1 %v7044_v22, %s6585_s15 }
 0x145   :  { %v7100_v40 = vpop.permute.xlu0 %1665  ;;  %v7174_v19 = vpop.permute.xlu2 %989 }
 0x146   :  { %11059 = vst [vmem:[#allocation34_spill] sm:$0xff] %v7100_v40  ;;  %v7156_v8 = vpop.permute.xlu1 %2117 }
 0x147   :  { %11066 = vst [vmem:[#allocation41_spill] sm:$0xff] %v7156_v8 }
 0x14b   :  { %2561 = vrot.lane.b32.xlu2 %v6906_v55, %s6587_s17  ;;  %1433 = vrot.lane.b32.xlu0 %v6984_v10, %s6582_s28 }
 0x14c   :  { %2559 = vrot.lane.b32.xlu1 %v6890_v33, %s6587_s17 }
 0x14d   :  { %v323_v46 = vpop.permute.xlu0 %322 }
 0x14e   :  { %v346_v16 = vsel %vm326_vm1, %v323_v46, 0  ;;  %v7172_v18 = vpop.permute.xlu1 %932  ;;  %v343_v46 = vsel %vm326_vm1, %v321_v41, 0 }
 0x14f   :  { %11069 = vst [vmem:[#allocation44_spill] sm:$0xff] %v7172_v18 }
 0x153   :  { %1883 = vrot.lane.b32.xlu2 %v7044_v22, %s6584_s30  ;;  %991 = vrot.lane.b32.xlu0 %v7004_v34, %s6578_s0 }
 0x154   :  { %2551 = vrot.lane.b32.xlu1 %v6890_v33, %s6588_s18 }
 0x155   :  { %v7116_v51 = vpop.permute.xlu0 %787 }
 0x15b   :  { %1376 = vrot.lane.b32.xlu2 %v6952_v45, %s6582_s28  ;;  %1443 = vrot.lane.b32.xlu0 %v7004_v34, %s6581_s27 }
 0x15c   :  { %2323 = vrot.lane.b32.xlu1 %v7004_v34, %s6586_s16 }
 0x15d   :  { %v7128_v58 = vpop.permute.xlu0 %1223 }
 0x15e   :  { %11062 = vst [vmem:[#allocation37_spill] sm:$0xff] %v7128_v58 }
 0x163   :  { %1142 = vrot.lane.b32.xlu2 %v6974_v1, %s6578_s0  ;;  %553 = vrot.lane.b32.xlu0 %v7024_v3, %s6580_s26 }
 0x164   :  { %1148 = vrot.lane.b32.xlu1 %v7034_v17, %s6578_s0 }
 0x165   :  { %v7138_v61 = vpop.permute.xlu0 %1667 }
 0x166   :  { %11063 = vst [vmem:[#allocation38_spill] sm:$0xff] %v7138_v61 }
 0x16b   :  { %1374 = vrot.lane.b32.xlu2 %v6914_v62, %s6582_s28  ;;  %555 = vrot.lane.b32.xlu0 %v7044_v22, %s6580_s26 }
 0x16c   :  { %2777 = vrot.lane.b32.xlu1 %v7024_v3, %s6587_s17 }
 0x16d   :  { %v7148_v5 = vpop.permute.xlu0 %2119 }
 0x16e   :  { %11065 = vst [vmem:[#allocation40_spill] sm:$0xff] %v7148_v5 }
 0x173   :  { %1372 = vrot.lane.b32.xlu2 %v6900_v44, %s6582_s28  ;;  %1003 = vrot.lane.b32.xlu0 %v7044_v22, %s6579_s3 }
 0x174   :  { %2555 = vrot.lane.b32.xlu1 %v6934_v21, %s6588_s18 }
 0x175   :  { %v325_v9 = vpop.permute.xlu0 %324 }
 0x176   :  { %v349_v12 = vsel %vm326_vm1, %v325_v9, 0 }
 0x177   :  { %355 = vmatpush.bf16.xpose.msra.mxu2 %v349_v12  ;;  %v7187_v12 = vpop.permute.xlu1 %1675 }
 0x178   :  { %11070 = vst [vmem:[#allocation45_spill] sm:$0xff] %v7187_v12 }
 0x17b   :  { %2325 = vrot.lane.b32.xlu2 %v7024_v3, %s6586_s16  ;;  %1447 = vrot.lane.b32.xlu0 %v7044_v22, %s6581_s27 }
 0x17c   :  { %3009 = vrot.lane.b32.xlu1 %v6960_v48, %s6589_s19 }
 0x17d   :  { %v7167_v15 = vpop.permute.xlu0 %934 }
 0x17e   :  { %11068 = vst [vmem:[#allocation43_spill] sm:$0xff] %v7167_v15  ;;  %956 = vmatpush.bf16.msrb.mxu0 %v7167_v15  ;;  %5941 = vmatpush.bf16.msra.mxu1 %v7167_v15 }
 0x17f   :  { %356 = vmatpush.bf16.xpose.msra.mxu2 %v346_v16  ;;  %v7189_v16 = vpop.permute.xlu2 %1877  ;;  %v7205_v13 = vpop.permute.xlu1 %1677 }
 0x180   :  { %11072 = vst [vmem:[#allocation47_spill] sm:$0xff] %v7205_v13 }
 0x182   :  { %957 = vmatpush.bf16.msrb.mxu0 %v7172_v18  ;;  %5943 = vmatpush.bf16.msra.mxu1 %v7172_v18 }
 0x183   :  { %2775 = vrot.lane.b32.xlu2 %v7004_v34, %s6587_s17  ;;  %1891 = vrot.lane.b32.xlu0 %v7044_v22, %s6583_s29 }
 0x184   :  { %2327 = vrot.lane.b32.xlu1 %v7044_v22, %s6586_s16 }
 0x185   :  { %v1234_v9 = vpop.permute.xlu0 %1233 }
 0x186   :  { %958 = vmatpush.bf16.msrb.mxu0 %v7094_v38  ;;  %5945 = vmatpush.bf16.msra.mxu1 %v7094_v38  ;;  %v1257_v14 = vsel %vm326_vm1, %v1234_v9, 0  ;;  %v1254_v9 = vsel %vm326_vm1, %v1232_v60, 0  ;;  %v813_v60 = vsel %vm326_vm1, %v790_v4, 0 }
 0x187   :  { %357 = vmatpush.bf16.xpose.msra.mxu2 %v343_v46  ;;  %v340_v46 = vsel %vm326_vm1, %v7098_v39, 0  ;;  %v7212_v7 = vpop.permute.xlu2 %551  ;;  %v1251_v39 = vsel %vm326_vm1, %v7130_v59, 0  ;;  %v1248_v59 = vsel %vm326_vm1, %v7060_v25, 0 }
 0x18a   :  { %959 = vmatpush.bf16.msrb.mxu0 %v7052_v23  ;;  %5947 = vmatpush.bf16.msra.mxu1 %v7052_v23 }
 0x18b   :  { %3007 = vrot.lane.b32.xlu2 %v6934_v21, %s6589_s19  ;;  %1439 = vrot.lane.b32.xlu0 %v7044_v22, %s6582_s28 }
 0x18c   :  { %1822 = vrot.lane.b32.xlu1 %v6944_v37, %s6584_s30 }
 0x18d   :  { %v7200_v41 = vpop.permute.xlu0 %1225 }
 0x18e   :  { %1263 = vmatpush.bf16.xpose.msra.mxu0 %v1257_v14  ;;  %11071 = vst [vmem:[#allocation46_spill] sm:$0xff] %v7200_v41 }
 0x18f   :  { %358 = vmatpush.bf16.xpose.msra.mxu2 %v340_v46  ;;  %v7231_v46 = vpop.permute.xlu1 %1885  ;;  %v7236_v6 = vpop.permute.xlu2 %1435 }
 0x193   :  { %1590 = vrot.lane.b32.xlu2 %v7014_v53, %s6582_s28  ;;  %2115 = vrot.lane.b32.xlu0 %v6890_v33, %s6585_s15 }
 0x194   :  { %1588 = vrot.lane.b32.xlu1 %v6994_v24, %s6582_s28 }
 0x195   :  { %v7217_v14 = vpop.permute.xlu0 %2121 }
 0x196   :  { %1264 = vmatpush.bf16.xpose.msra.mxu0 %v1254_v9  ;;  %11073 = vst [vmem:[#allocation48_spill] sm:$0xff] %v7217_v14  ;;  %5705 = vmatmul.msk.bf16.vlgmr.msra.gmra.mxu2 %vm326_vm1, %v6890_v33 }
 0x197   :  { %726 = vmatpush.bf16.msrb.mxu2 %v7034_v17  ;;  %v7248_v0 = vpop.permute.xlu1 %999 }
 0x19b   :  { %727 = vmatpush.bf16.msrb.mxu2 %v7014_v53  ;;  %2773 = vrot.lane.b32.xlu2 %v6984_v10, %s6587_s17 }
 0x19c   :  { %1879 = vrot.lane.b32.xlu0 %v7004_v34, %s6584_s30  ;;  %3005 = vrot.lane.b32.xlu1 %v6906_v55, %s6589_s19 }
 0x19d   :  { %v7234_v9 = vpop.permute.xlu0 %1669 }
 0x19e   :  { %1265 = vmatpush.bf16.xpose.msra.mxu0 %v1251_v39  ;;  %11074 = vst [vmem:[#allocation49_spill] sm:$0xff] %v7234_v9  ;;  %v810_v39 = vsel %vm326_vm1, %v7116_v51, 0  ;;  %v807_v51 = vsel %vm326_vm1, %v7118_v52, 0  ;;  %v804_v52 = vsel %vm326_vm1, %v7042_v20, 0 }
 0x19f   :  { %728 = vmatpush.bf16.msrb.mxu2 %v6994_v24 }
 0x1a3   :  { %729 = vmatpush.bf16.msrb.mxu2 %v6974_v1  ;;  %1586 = vrot.lane.b32.xlu2 %v6974_v1, %s6582_s28 }
 0x1a4   :  { %1881 = vrot.lane.b32.xlu0 %v7024_v3, %s6584_s30  ;;  %1820 = vrot.lane.b32.xlu1 %v6952_v45, %s6584_s30 }
 0x1a5   :  { %v550_v4 = vpop.permute.xlu0 %549 }
 0x1a6   :  { %1266 = vmatpush.bf16.xpose.msra.mxu0 %v1248_v59  ;;  %5706 = vmatmul.msk.bf16.gmra.mxu2 %vm326_vm1, %v6906_v55  ;;  %v7264_v59 = vpop.permute.xlu1 %1887 }
 0x1a7   :  { %819 = vmatpush.bf16.xpose.msra.mxu2 %v813_v60  ;;  %v7252_v60 = vpop.permute.xlu2 %1001 }
 0x1ab   :  { %3003 = vrot.lane.b32.xlu2 %v6890_v33, %s6589_s19 }
 0x1ac   :  { %2111 = vrot.lane.b32.xlu0 %v6934_v21, %s6586_s16  ;;  %1818 = vrot.lane.b32.xlu1 %v6914_v62, %s6584_s30 }
 0x1ad   :  { %v7260_v25 = vpop.permute.xlu0 %997 }
 0x1af   :  { %820 = vmatpush.bf16.xpose.msra.mxu2 %v810_v39  ;;  %v7266_v39 = vpop.permute.xlu2 %1437 }
 0x1b3   :  { %1816 = vrot.lane.b32.xlu2 %v6900_v44, %s6584_s30 }
 0x1b4   :  { %2331 = vrot.lane.b32.xlu0 %v7004_v34, %s6585_s15  ;;  %2995 = vrot.lane.b32.xlu1 %v6890_v33, %s6590_s20 }
 0x1b5   :  { %v7274_v63 = vpop.permute.xlu0 %1441 }
 0x1b6   :  { %5707 = vmatmul.msk.bf16.gmra.mxu2 %vm326_vm1, %v6934_v21 }
 0x1b7   :  { %821 = vmatpush.bf16.xpose.msra.mxu2 %v807_v51  ;;  %v7280_v51 = vpop.permute.xlu1 %993  ;;  %v7286_v57 = vpop.permute.xlu2 %995 }
 0x1bb   :  { %2997 = vrot.lane.b32.xlu2 %v6906_v55, %s6590_s20 }
 0x1bc   :  { %1146 = vrot.lane.b32.xlu0 %v7014_v53, %s6578_s0  ;;  %3221 = vrot.lane.b32.xlu1 %v7024_v3, %s6589_s19 }
 0x1bd   :  { %v7290_v56 = vpop.permute.xlu0 %1433 }
 0x1bf   :  { %822 = vmatpush.bf16.xpose.msra.mxu2 %v804_v52  ;;  %v7296_v20 = vpop.permute.xlu1 %1445  ;;  %v7300_v50 = vpop.permute.xlu2 %2333 }
 0x1c3   :  { %2769 = vrot.lane.b32.xlu2 %v7024_v3, %s6588_s18 }
 0x1c4   :  { %2321 = vrot.lane.b32.xlu0 %v6984_v10, %s6586_s16 }
 0x1c5   :  { %v7298_v52 = vpop.permute.xlu0 %991 }
 0x1c6   :  { %5708 = vmatmul.msk.bf16.gmra.mxu2 %vm326_vm1, %v6960_v48 }
 0x1c7   :  { %v7308_v43 = vpop.permute.xlu1 %1889  ;;  %v7310_v36 = vpop.permute.xlu2 %2563 }
 0x1c8   :  { %11075 = vst [vmem:[#allocation50_spill] sm:$0xff] %v7310_v36 }
 0x1cc   :  { %2553 = vrot.lane.b32.xlu0 %v6906_v55, %s6588_s18 }
 0x1cd   :  { %v7306_v49 = vpop.permute.xlu0 %1443 }
 0x1cf   :  { %v7314_v26 = vpop.permute.xlu1 %2107  ;;  %v7316_v42 = vpop.permute.xlu2 %1378 }
 0x1d0   :  { %11076 = vst [vmem:[#allocation51_spill] sm:$0xff] %v7314_v26 }
 0x1d4   :  { %2779 = vrot.lane.b32.xlu0 %v7044_v22, %s6587_s17 }
 0x1d5   :  { %v554_v35 = vpop.permute.xlu0 %553 }
 0x1d6   :  { %v576_v36 = vsel %vm326_vm1, %v554_v35, 0  ;;  %v570_v35 = vsel %vm326_vm1, %v550_v4, 0 }
 0x1d7   :  { %v7321_v61 = vpop.permute.xlu1 %2109  ;;  %v7325_v40 = vpop.permute.xlu2 %1144 }
 0x1d8   :  { %11077 = vst [vmem:[#allocation52_spill] sm:$0xff] %v7321_v61 }
 0x1d9   :  { %11078 = vst [vmem:[#allocation53_spill] sm:$0xff] %v7325_v40 }
 0x1dc   :  { %1592 = vrot.lane.b32.xlu0 %v7034_v17, %s6582_s28 }
 0x1dd   :  { %v556_v27 = vpop.permute.xlu0 %555 }
 0x1de   :  { %v579_v9 = vsel %vm326_vm1, %v556_v27, 0  ;;  %v573_v27 = vsel %vm326_vm1, %v7212_v7, 0 }
 0x1df   :  { %585 = vmatpush.bf16.xpose.msrb.mxu3 %v579_v9  ;;  %v7332_v32 = vpop.permute.xlu1 %2565  ;;  %v7334_v41 = vpop.permute.xlu2 %2113 }
 0x1e0   :  { %11079 = vst [vmem:[#allocation54_spill] sm:$0xff] %v7332_v32 }
 0x1e1   :  { %11080 = vst [vmem:[#allocation55_spill] sm:$0xff] %v7334_v41 }
 0x1e4   :  { %2557 = vrot.lane.b32.xlu0 %v6960_v48, %s6588_s18 }
 0x1e5   :  { %v7328_v26 = vpop.permute.xlu0 %1003 }
 0x1e7   :  { %586 = vmatpush.bf16.xpose.msrb.mxu3 %v576_v36  ;;  %v7343_v36 = vpop.permute.xlu1 %2329  ;;  %v7345_v61 = vpop.permute.xlu2 %2561 }
 0x1e8   :  { %11081 = vst [vmem:[#allocation56_spill] sm:$0xff] %v7345_v61 }
 0x1ec   :  { %2765 = vrot.lane.b32.xlu0 %v6984_v10, %s6588_s18 }
 0x1ed   :  { %v7338_v9 = vpop.permute.xlu0 %1447 }
 0x1ef   :  { %587 = vmatpush.bf16.xpose.msrb.mxu3 %v573_v27  ;;  %v7349_v32 = vpop.permute.xlu1 %2335  ;;  %v7351_v41 = vpop.permute.xlu2 %1883 }
 0x1f0   :  { %11082 = vst [vmem:[#allocation57_spill] sm:$0xff] %v7351_v41 }
 0x1f4   :  { %2767 = vrot.lane.b32.xlu0 %v7004_v34, %s6588_s18 }
 0x1f5   :  { %v7347_v58 = vpop.permute.xlu0 %1891 }
 0x1f7   :  { %588 = vmatpush.bf16.xpose.msrb.mxu3 %v570_v35  ;;  %v7355_v27 = vpop.permute.xlu1 %2559  ;;  %v7357_v8 = vpop.permute.xlu2 %1376 }
 0x1f8   :  { %11083 = vst [vmem:[#allocation58_spill] sm:$0xff] %v7355_v27 }
 0x1fd   :  { %v7353_v7 = vpop.permute.xlu0 %1439 }
 0x1ff   :  { %v7361_v4 = vpop.permute.xlu1 %2551  ;;  %v7363_v5 = vpop.permute.xlu2 %1142 }
 0x200   :  { %11085 = vst [vmem:[#allocation60_spill] sm:$0xff] %v7361_v4 }
 0x201   :  { %11086 = vst [vmem:[#allocation61_spill] sm:$0xff] %v7363_v5 }
 0x205   :  { %v7359_v2 = vpop.permute.xlu0 %2115 }
 0x206   :  { %11084 = vst [vmem:[#allocation59_spill] sm:$0xff] %v7359_v2 }
 0x207   :  { %v7371_v28 = vpop.permute.xlu1 %2323  ;;  %v7373_v30 = vpop.permute.xlu2 %1374 }
 0x208   :  { %11087 = vst [vmem:[#allocation62_spill] sm:$0xff] %v7371_v28 }
 0x20e   :  { %v7367_v61 = vpop.permute.xlu0 %1879 }
 0x20f   :  { %v7381_v47 = vpop.permute.xlu1 %1148  ;;  %v7383_v12 = vpop.permute.xlu2 %1372 }
 0x210   :  { %11088 = vst [vmem:[#allocation63_spill] sm:$0xff] %v7381_v47 }
 0x216   :  { %v7379_v4 = vpop.permute.xlu0 %1881 }
 0x217   :  { %v7399_v5 = vpop.permute.xlu2 %2325 }
 0x218   :  { %11090 = vst [vmem:[#allocation65_spill] sm:$0xff] %v7399_v5 }
 0x219   :  { %v7365_v35 = vpop.f32.mrf.mxu2 }
 0x21a   :  { %v380_v14 = vsel %vm159_vm0, %v7365_v35, -inf }
 0x21e   :  { %381 = vmax.xlane.f32.xlu0 %v380_v14  ;;  %v7389_v11 = vpop.permute.xlu0 %2111 }
 0x21f   :  { %11089 = vst [vmem:[#allocation64_spill] sm:$0xff] %v7389_v11  ;;  %v7409_v11 = vpop.permute.xlu2 %2775 }
 0x221   :  { %v7375_v27 = vpop.f32.mrf.mxu2 }
 0x222   :  { %v383_v2 = vsel %vm159_vm0, %v7375_v27, -inf }
 0x223   :  { %384 = vmax.xlane.f32.xlu2 %v383_v2  ;;  %v7395_v2 = vpop.permute.xlu1 %2777 }
 0x226   :  { %v7401_v40 = vpop.permute.xlu0 %2331 }
 0x229   :  { %v7385_v13 = vpop.f32.mrf.mxu2 }
 0x22a   :  { %v386_v14 = vsel %vm159_vm0, %v7385_v13, -inf }
 0x22b   :  { %387 = vmax.xlane.f32.xlu1 %v386_v14  ;;  %v7407_v14 = vpop.permute.xlu1 %2555 }
 0x22c   :  { %11091 = vst [vmem:[#allocation66_spill] sm:$0xff] %v7407_v14 }
 0x22e   :  { %v7413_v47 = vpop.permute.xlu0 %1146 }
 0x22f   :  { %11092 = vst [vmem:[#allocation67_spill] sm:$0xff] %v7413_v47 }
 0x231   :  { %v7393_v54 = vpop.f32.mrf.mxu2 }
 0x232   :  { %3223 = vrot.lane.b32.xlu0 %v7044_v22, %s6589_s19  ;;  %v389_v31 = vsel %vm159_vm0, %v7393_v54, -inf }
 0x233   :  { %390 = vmax.xlane.f32.xlu1 %v389_v31  ;;  %v7415_v29 = vpop.permute.xlu1 %3009  ;;  %v7417_v31 = vpop.permute.xlu2 %3007 }
 0x234   :  { %11093 = vst [vmem:[#allocation68_spill] sm:$0xff] %v7415_v29 }
 0x235   :  { %11094 = vst [vmem:[#allocation69_spill] sm:$0xff] %v7417_v31 }
 0x236   :  { %v7421_v5 = vpop.permute.xlu0 %2321 }
 0x237   :  { %11095 = vst [vmem:[#allocation70_spill] sm:$0xff] %v7421_v5 }
 0x23a   :  { %3453 = vrot.lane.b32.xlu0 %v6960_v48, %s6591_s2 }
 0x23b   :  { %2999 = vrot.lane.b32.xlu2 %v6934_v21, %s6590_s20  ;;  %v7425_v14 = vpop.permute.xlu1 %2327 }
 0x23c   :  { %11096 = vst [vmem:[#allocation71_spill] sm:$0xff] %v7425_v14 }
 0x23e   :  { %v7431_v47 = vpop.permute.xlu0 %2553 }
 0x23f   :  { %11098 = vst [vmem:[#allocation73_spill] sm:$0xff] %v7431_v47 }
 0x242   :  { %2266 = vrot.lane.b32.xlu0 %v6944_v37, %s6586_s16  ;;  %v7429_v37 = vpop.permute.xlu2 %1590 }
 0x243   :  { %11097 = vst [vmem:[#allocation72_spill] sm:$0xff] %v7429_v37  ;;  %v7435_v31 = vpop.permute.xlu1 %1822 }
 0x244   :  { %11099 = vst [vmem:[#allocation74_spill] sm:$0xff] %v7435_v31 }
 0x246   :  { %v7441_v23 = vpop.permute.xlu0 %2779 }
 0x24a   :  { %3001 = vrot.lane.b32.xlu0 %v6960_v48, %s6590_s20  ;;  %v7437_v29 = vpop.permute.xlu2 %2773  ;;  %v7439_v48 = vpop.f32.mrf.mxu2 }
 0x24b   :  { %v392_v14 = vsel %vm159_vm0, %v7439_v48, -inf  ;;  %v7447_v37 = vpop.permute.xlu1 %1588 }
 0x24c   :  { %3219 = vrot.lane.b32.xlu1 %v7004_v34, %s6589_s19  ;;  %11100 = vst [vmem:[#allocation75_spill] sm:$0xff] %v7447_v37 }
 0x24e   :  { %v7455_v31 = vpop.permute.xlu0 %1592 }
 0x24f   :  { %11102 = vst [vmem:[#allocation77_spill] sm:$0xff] %v7455_v31 }
 0x252   :  { %3449 = vrot.lane.b32.xlu0 %v6906_v55, %s6591_s2  ;;  %v7449_v47 = vpop.permute.xlu2 %1586 }
 0x253   :  { %11101 = vst [vmem:[#allocation76_spill] sm:$0xff] %v7449_v47 }
 0x256   :  { %v7467_v47 = vpop.permute.xlu0 %2557 }
 0x257   :  { %11105 = vst [vmem:[#allocation80_spill] sm:$0xff] %v7467_v47 }
 0x25a   :  { %2264 = vrot.lane.b32.xlu0 %v6952_v45, %s6586_s16  ;;  %v7451_v45 = vpop.f32.mrf.mxu2  ;;  %v7461_v18 = vpop.permute.xlu2 %3003 }
 0x25b   :  { %v395_v38 = vsel %vm159_vm0, %v7451_v45, -inf  ;;  %11104 = vst [vmem:[#allocation79_spill] sm:$0xff] %v7461_v18 }
 0x262   :  { %2262 = vrot.lane.b32.xlu0 %v6914_v62, %s6586_s16  ;;  %v7459_v62 = vpop.permute.xlu1 %3005  ;;  %v7473_v28 = vpop.permute.xlu2 %1816 }
 0x263   :  { %11103 = vst [vmem:[#allocation78_spill] sm:$0xff] %v7459_v62 }
 0x264   :  { %393 = vmax.xlane.f32.xlu2 %v392_v14  ;;  %v7465_v14 = vpop.f32.mrf.mxu2  ;;  %11107 = vst [vmem:[#allocation82_spill] sm:$0xff] %v7473_v28 }
 0x265   :  { %v398_v37 = vsel %vm159_vm0, %v7465_v14, -inf }
 0x26a   :  { %3439 = vrot.lane.b32.xlu0 %v6890_v33, %s6592_s21  ;;  %v7471_v31 = vpop.permute.xlu1 %1820  ;;  %v7479_v18 = vpop.permute.xlu2 %2997 }
 0x26b   :  { %11106 = vst [vmem:[#allocation81_spill] sm:$0xff] %v7471_v31 }
 0x26c   :  { %396 = vmax.xlane.f32.xlu2 %v395_v38  ;;  %v7475_v38 = vpop.permute.xlu0 %2765  ;;  %11110 = vst [vmem:[#allocation85_spill] sm:$0xff] %v7479_v18 }
 0x26d   :  { %11108 = vst [vmem:[#allocation83_spill] sm:$0xff] %v7475_v38 }
 0x272   :  { %3213 = vrot.lane.b32.xlu0 %v7024_v3, %s6590_s20  ;;  %v7477_v62 = vpop.permute.xlu1 %1818  ;;  %v7487_v5 = vpop.permute.xlu2 %2769 }
 0x273   :  { %11109 = vst [vmem:[#allocation84_spill] sm:$0xff] %v7477_v62 }
 0x274   :  { %v7483_v15 = vpop.permute.xlu0 %2767  ;;  %11113 = vst [vmem:[#allocation88_spill] sm:$0xff] %v7487_v5 }
 0x275   :  { %11111 = vst [vmem:[#allocation86_spill] sm:$0xff] %v7483_v15 }
 0x276   :  { %399 = vmax.xlane.f32.xlu1 %v398_v37 }
 0x27a   :  { %v7485_v47 = vpop.permute.xlu1 %2995 }
 0x27b   :  { %11112 = vst [vmem:[#allocation87_spill] sm:$0xff] %v7485_v47 }
 0x282   :  { %v7492_v62 = vpop.permute.xlu1 %3221 }
 0x284   :  { %2771 = vrot.lane.b32.xlu2 %v7044_v22, %s6588_s18 }
 0x28f   :  { %3451 = vrot.lane.b32.xlu1 %v6934_v21, %s6591_s2 }
 0x291   :  { %v382_v37 = vpop.xlane.xlu0 %381 }
 0x292   :  { %v404_v28 = vsub.f32 %v7365_v35, %v382_v37 }
 0x294   :  { %v412_v31 = vmul.f32 1.442695, %v404_v28 }
 0x296   :  { %v385_v38 = vpop.xlane.xlu2 %384  ;;  %5974 = vpow2.f32 %v412_v31  ;;  %v377_v31 = vpop.f32.mrf.mxu2 }
 0x297   :  { %v405_v18 = vsub.f32 %v7375_v27, %v385_v38  ;;  %2034 = vrot.lane.b32.xlu1 %v7014_v53, %s6584_s30 }
 0x299   :  { %v414_v15 = vmul.f32 1.442695, %v405_v18 }
 0x29b   :  { %5976 = vpow2.f32 %v414_v15 }
 0x29c   :  { %v5975_v5 = vpop.eup %5974 }
 0x29e   :  { %v388_v47 = vpop.xlane.xlu1 %387 }
 0x29f   :  { %3217 = vrot.lane.b32.xlu1 %v6984_v10, %s6589_s19  ;;  %v406_v37 = vsub.f32 %v7385_v13, %v388_v47  ;;  %v401_v13 = vsel %vm159_vm0, %v377_v31, -inf }
 0x2a1   :  { %v5977_v41 = vpop.eup %5976  ;;  %v416_v27 = vmul.f32 1.442695, %v406_v37 }
 0x2a2   :  { %v431_v35 = vsel %vm159_vm0, %v5977_v41, 0.0  ;;  %v452_v28 = vpack.c.bf16 %v5977_v41, %v5975_v5 }
 0x2a3   :  { %432 = vadd.xlane.f32.xlu0 %v431_v35  ;;  %5978 = vpow2.f32 %v416_v27  ;;  %v428_v27 = vsel %vm159_vm0, %v5975_v5, 0.0  ;;  %v1018_v5 = vsel %vm326_vm1, %v7260_v25, 0 }
 0x2a4   :  { %5709 = vmatmul.msk.bf16.vlgmr.msrb.gmra.mxu1 %vm159_vm0, %v452_v28 }
 0x2a5   :  { %1400 = vmatpush.bf16.msrb.mxu1 %v7316_v42 }
 0x2a6   :  { %v391_v18 = vpop.xlane.xlu1 %390 }
 0x2a7   :  { %v407_v15 = vsub.f32 %v7393_v54, %v391_v18  ;;  %3209 = vrot.lane.b32.xlu1 %v6984_v10, %s6590_s20 }
 0x2a9   :  { %1401 = vmatpush.bf16.msrb.mxu1 %v7357_v8  ;;  %v418_v38 = vmul.f32 1.442695, %v407_v15  ;;  %v5979_v42 = vpop.eup %5978  ;;  %v1027_v15 = vsel %vm326_vm1, %v7328_v26, 0 }
 0x2ab   :  { %5980 = vpow2.f32 %v418_v38  ;;  %v1024_v38 = vsel %vm326_vm1, %v7252_v60, 0 }
 0x2ad   :  { %1402 = vmatpush.bf16.msrb.mxu1 %v7373_v30  ;;  %402 = vmax.xlane.f32.xlu2 %v401_v13  ;;  %v1021_v13 = vsel %vm326_vm1, %v7248_v0, 0 }
 0x2af   :  { %3447 = vrot.lane.b32.xlu1 %v6890_v33, %s6591_s2  ;;  %v7521_v33 = vpop.permute.xlu2 %2999 }
 0x2b0   :  { %11114 = vst [vmem:[#allocation89_spill] sm:$0xff] %v7521_v33 }
 0x2b1   :  { %1403 = vmatpush.bf16.msrb.mxu1 %v7383_v12  ;;  %v5981_v47 = vpop.eup %5980 }
 0x2b2   :  { %v453_v54 = vpack.c.bf16 %v5981_v47, %v5979_v42  ;;  %v437_v26 = vsel %vm159_vm0, %v5981_v47, 0.0 }
 0x2b4   :  { %5710 = vmatmul.msk.bf16.gmra.mxu1 %vm159_vm0, %v453_v54 }
 0x2b7   :  { %2260 = vrot.lane.b32.xlu1 %v6900_v44, %s6586_s16 }
 0x2bf   :  { %3441 = vrot.lane.b32.xlu1 %v6906_v55, %s6592_s21 }
 0x2c5   :  { %2036 = vrot.lane.b32.xlu2 %v7034_v17, %s6584_s30 }
 0x2cd   :  { %2032 = vrot.lane.b32.xlu2 %v6994_v24, %s6584_s30 }
 0x2d5   :  { %2030 = vrot.lane.b32.xlu2 %v6974_v1, %s6584_s30 }
 0x2d7   :  { %v394_v30 = vpop.xlane.xlu2 %393 }
 0x2d8   :  { %v408_v8 = vsub.f32 %v7439_v48, %v394_v30 }
 0x2da   :  { %v420_v12 = vmul.f32 1.442695, %v408_v8 }
 0x2dc   :  { %5982 = vpow2.f32 %v420_v12 }
 0x2dd   :  { %3211 = vrot.lane.b32.xlu2 %v7004_v34, %s6590_s20 }
 0x2df   :  { %v397_v55 = vpop.xlane.xlu2 %396 }
 0x2e0   :  { %v409_v41 = vsub.f32 %v7451_v45, %v397_v55  ;;  %v434_v45 = vsel %vm159_vm0, %v5979_v42, 0.0  ;;  %v7546_v42 = vpop.permute.xlu1 %3219 }
 0x2e2   :  { %v5983_v35 = vpop.eup %5982  ;;  %v422_v28 = vmul.f32 1.442695, %v409_v41 }
 0x2e3   :  { %v440_v37 = vsel %vm159_vm0, %v5983_v35, 0.0 }
 0x2e4   :  { %5984 = vpow2.f32 %v422_v28  ;;  %441 = vadd.xlane.f32.xlu0 %v440_v37  ;;  %v1468_v28 = vsel %vm326_vm1, %v7296_v20, 0  ;;  %v1462_v20 = vsel %vm326_vm1, %v7274_v63, 0 }
 0x2e5   :  { %3667 = vrot.lane.b32.xlu2 %v7044_v22, %s6591_s2 }
 0x2e7   :  { %v7548_v54 = vpop.permute.xlu2 %2771 }
 0x2e9   :  { %429 = vadd.xlane.f32.xlu1 %v428_v27  ;;  %v400_v60 = vpop.xlane.xlu1 %399 }
 0x2ea   :  { %v5985_v48 = vpop.eup %5984  ;;  %v410_v30 = vsub.f32 %v7465_v14, %v400_v60  ;;  %v1471_v14 = vsel %vm326_vm1, %v7338_v9, 0  ;;  %v1465_v9 = vsel %vm326_vm1, %v7306_v49, 0  ;;  %v1915_v60 = vsel %vm326_vm1, %v7347_v58, 0 }
 0x2eb   :  { %v454_v18 = vpack.c.bf16 %v5985_v48, %v5983_v35  ;;  %v443_v41 = vsel %vm159_vm0, %v5985_v48, 0.0  ;;  %v1909_v58 = vsel %vm326_vm1, %v7264_v59, 0 }
 0x2ec   :  { %v424_v8 = vmul.f32 1.442695, %v410_v30 }
 0x2ed   :  { %5711 = vmatmul.msk.bf16.vlgmr.msra.gmra.mxu3 %vm159_vm0, %v454_v18 }
 0x2ee   :  { %1033 = vmatpush.bf16.xpose.msra.mxu3 %v1027_v15  ;;  %5986 = vpow2.f32 %v424_v8 }
 0x2f1   :  { %435 = vadd.xlane.f32.xlu1 %v434_v45 }
 0x2f6   :  { %1034 = vmatpush.bf16.xpose.msra.mxu3 %v1024_v38 }
 0x2fe   :  { %1035 = vmatpush.bf16.xpose.msra.mxu3 %v1021_v13 }
 0x301   :  { %v7564_v37 = vpop.permute.xlu1 %3451 }
 0x302   :  { %11115 = vst [vmem:[#allocation90_spill] sm:$0xff] %v7564_v37 }
 0x306   :  { %1036 = vmatpush.bf16.xpose.msra.mxu3 %v1018_v5 }
 0x309   :  { %v7573_v18 = vpop.permute.xlu1 %2034 }
 0x30a   :  { %3443 = vrot.lane.b32.xlu1 %v6934_v21, %s6592_s21  ;;  %v5987_v21 = vpop.eup %5986 }
 0x30b   :  { %v446_v35 = vsel %vm159_vm0, %v5987_v21, 0.0 }
 0x30e   :  { %438 = vadd.xlane.f32.xlu2 %v437_v26 }
 0x311   :  { %v7579_v45 = vpop.permute.xlu1 %3217 }
 0x319   :  { %v7585_v49 = vpop.permute.xlu1 %3209 }
 0x320   :  { %v403_v0 = vpop.xlane.xlu2 %402 }
 0x321   :  { %v411_v12 = vsub.f32 %v377_v31, %v403_v0  ;;  %v7560_v31 = vpop.permute.xlu0 %3223  ;;  %v7591_v5 = vpop.permute.xlu1 %3447 }
 0x322   :  { %11120 = vst [vmem:[#allocation95_spill] sm:$0xff] %v7591_v5 }
 0x323   :  { %v426_v55 = vmul.f32 1.442695, %v411_v12  ;;  %v1912_v12 = vsel %vm326_vm1, %v7308_v43, 0  ;;  %v1906_v43 = vsel %vm326_vm1, %v7231_v46, 0 }
 0x325   :  { %5988 = vpow2.f32 %v426_v55 }
 0x326   :  { %3665 = vrot.lane.b32.xlu2 %v7024_v3, %s6591_s2 }
 0x328   :  { %v7603_v8 = vpop.permute.xlu2 %2036 }
 0x329   :  { %v7566_v27 = vpop.permute.xlu0 %3453  ;;  %v7595_v63 = vpop.permute.xlu1 %2260 }
 0x32a   :  { %11116 = vst [vmem:[#allocation91_spill] sm:$0xff] %v7566_v27 }
 0x32b   :  { %v5989_v25 = vpop.eup %5988  ;;  %11122 = vst [vmem:[#allocation97_spill] sm:$0xff] %v7595_v63 }
 0x32c   :  { %v455_v47 = vpack.c.bf16 %v5989_v25, %v5987_v21  ;;  %v449_v48 = vsel %vm159_vm0, %v5989_v25, 0.0 }
 0x32e   :  { %5712 = vmatmul.msk.bf16.gmra.mxu3 %vm159_vm0, %v455_v47 }
 0x330   :  { %v7611_v21 = vpop.permute.xlu2 %2032 }
 0x331   :  { %v7575_v15 = vpop.permute.xlu0 %2266  ;;  %v7605_v0 = vpop.permute.xlu1 %3441 }
 0x332   :  { %11117 = vst [vmem:[#allocation92_spill] sm:$0xff] %v7575_v15 }
 0x333   :  { %11124 = vst [vmem:[#allocation99_spill] sm:$0xff] %v7605_v0 }
 0x334   :  { %444 = vadd.xlane.f32.xlu1 %v443_v41 }
 0x338   :  { %v7621_v47 = vpop.permute.xlu2 %2030 }
 0x339   :  { %v7583_v38 = vpop.permute.xlu0 %3001 }
 0x33a   :  { %11118 = vst [vmem:[#allocation93_spill] sm:$0xff] %v7583_v38 }
 0x33c   :  { %447 = vadd.xlane.f32.xlu1 %v446_v35 }
 0x33e   :  { %5713 = vmatmul.msk.bf16.vlgmr.msrb.gmra.mxu3 %vm326_vm1, %v6984_v10 }
 0x33f   :  { %1477 = vmatpush.bf16.xpose.msrb.mxu3 %v1471_v14 }
 0x340   :  { %v7629_v14 = vpop.permute.xlu2 %3211 }
 0x341   :  { %v7587_v13 = vpop.permute.xlu0 %3449 }
 0x342   :  { %11119 = vst [vmem:[#allocation94_spill] sm:$0xff] %v7587_v13 }
 0x347   :  { %1478 = vmatpush.bf16.xpose.msrb.mxu3 %v1468_v28 }
 0x349   :  { %v7593_v26 = vpop.permute.xlu0 %2264 }
 0x34a   :  { %11121 = vst [vmem:[#allocation96_spill] sm:$0xff] %v7593_v26 }
 0x34e   :  { %5714 = vmatmul.msk.bf16.gmra.mxu3 %vm326_vm1, %v7004_v34 }
 0x34f   :  { %1479 = vmatpush.bf16.xpose.msrb.mxu3 %v1465_v9  ;;  %450 = vadd.xlane.f32.xlu2 %v449_v48  ;;  %v7635_v9 = vpop.permute.xlu2 %3667 }
 0x351   :  { %v7599_v30 = vpop.permute.xlu0 %2262 }
 0x352   :  { %11123 = vst [vmem:[#allocation98_spill] sm:$0xff] %v7599_v30 }
 0x357   :  { %1480 = vmatpush.bf16.xpose.msrb.mxu3 %v1462_v20 }
 0x359   :  { %v7609_v55 = vpop.permute.xlu0 %3439 }
 0x35a   :  { %11125 = vst [vmem:[#allocation100_spill] sm:$0xff] %v7609_v55 }
 0x35c   :  { %v7613_v25 = vpop.xlane.xlu1 %429 }
 0x35d   :  { %11126 = vst [vmem:[#allocation101_spill] sm:$0xff] %v7613_v25 }
 0x35e   :  { %5715 = vmatmul.msk.bf16.gmra.mxu3 %vm326_vm1, %v7024_v3 }
 0x364   :  { %v7625_v41 = vpop.xlane.xlu1 %435 }
 0x365   :  { %11127 = vst [vmem:[#allocation102_spill] sm:$0xff] %v7625_v41 }
 0x36e   :  { %5716 = vmatmul.msk.bf16.gmra.mxu3 %vm326_vm1, %v7044_v22 }
 0x37c   :  { %v7633_v59 = vpop.permute.xlu1 %3443 }
 0x37d   :  { %11129 = vst [vmem:[#allocation104_spill] sm:$0xff] %v7633_v59 }
 0x37e   :  { %5729 = vmatmul.msk.bf16.vlgmr.msra.gmra.mxu3 %vm326_vm1, %v7174_v19  ;;  %v7619_v19 = vpop.permute.xlu0 %3213 }
 0x37f   :  { %1921 = vmatpush.bf16.xpose.msra.mxu3 %v1915_v60 }
 0x386   :  { %v7627_v35 = vpop.xlane.xlu0 %432 }
 0x387   :  { %1922 = vmatpush.bf16.xpose.msra.mxu3 %v1912_v12  ;;  %11128 = vst [vmem:[#allocation103_spill] sm:$0xff] %v7627_v35 }
 0x38e   :  { %5730 = vmatmul.msk.bf16.gmra.mxu3 %vm326_vm1, %v7298_v52  ;;  %v511_v52 = vpop.f32.mrf.mxu3  ;;  %v442_v28 = vpop.xlane.xlu0 %441 }
 0x38f   :  { %1923 = vmatpush.bf16.xpose.msra.mxu3 %v1909_v58  ;;  %5990 = vrcp.f32 %v442_v28 }
 0x395   :  { %v5991_v46 = vpop.eup %5990 }
 0x396   :  { %v513_v20 = vpop.f32.mrf.mxu3  ;;  %v525_v60 = vmul.f32 %v5991_v46, %v511_v52 }
 0x397   :  { %1924 = vmatpush.bf16.xpose.msra.mxu3 %v1906_v43  ;;  %v7639_v43 = vpop.xlane.xlu2 %438 }
 0x398   :  { %v763_v58 = vpack.c.bf16 %v525_v60, %v525_v60  ;;  %11130 = vst [vmem:[#allocation105_spill] sm:$0xff] %v7639_v43 }
 0x39a   :  { %v7641_v25 = vunpack.c.l.b16 %v763_v58  ;;  %v2356_v58 = vsel %vm326_vm1, %v7300_v50, 0 }
 0x39c   :  { %11131 = vst [vmem:[#allocation106_spill] sm:$0xff] %v7641_v25 }
 0x39e   :  { %5731 = vmatmul.msk.bf16.gmra.mxu3 %vm326_vm1, %v7280_v51 }
 0x39f   :  { %v7647_v0 = vpop.permute.xlu2 %3665 }
 0x3a7   :  { %v445_v48 = vpop.xlane.xlu1 %444 }
 0x3a8   :  { %5992 = vrcp.f32 %v445_v48 }
 0x3ae   :  { %5732 = vmatmul.msk.bf16.gmra.mxu3 %vm326_vm1, %v7286_v57  ;;  %v5993_v12 = vpop.eup %5992  ;;  %v2359_v57 = vsel %vm326_vm1, %v7349_v32, 0 }
 0x3af   :  { %v526_v51 = vmul.f32 %v5993_v12, %v513_v20  ;;  %v448_v52 = vpop.xlane.xlu1 %447 }
 0x3b0   :  { %5994 = vrcp.f32 %v448_v52 }
 0x3b1   :  { %v516_v41 = vpop.f32.mrf.mxu3  ;;  %v764_v35 = vpack.c.bf16 %v526_v51, %v526_v51 }
 0x3b3   :  { %v7643_v28 = vunpack.c.l.b16 %v764_v35 }
 0x3b5   :  { %11132 = vst [vmem:[#allocation107_spill] sm:$0xff] %v7643_v28 }
 0x3b6   :  { %v5995_v60 = vpop.eup %5994 }
 0x3b7   :  { %v527_v12 = vmul.f32 %v5995_v60, %v516_v41  ;;  %v2353_v41 = vsel %vm326_vm1, %v7401_v40, 0  ;;  %v2350_v60 = vsel %vm326_vm1, %v7343_v36, 0 }
 0x3b9   :  { %v518_v48 = vpop.f32.mrf.mxu3  ;;  %v765_v52 = vpack.c.bf16 %v527_v12, %v527_v12 }
 0x3bb   :  { %v7663_v25 = vunpack.c.l.b16 %v765_v52 }
 0x3bd   :  { %11133 = vst [vmem:[#allocation108_spill] sm:$0xff] %v7663_v25 }
 0x3be   :  { %5745 = vmatmul.msk.bf16.vlgmr.msrb.gmra.mxu3 %vm326_vm1, %v7290_v56 }
 0x3bf   :  { %2365 = vmatpush.bf16.xpose.msrb.mxu3 %v2359_v57 }
 0x3c1   :  { %v7653_v20 = vpop.f32.mrf.mxu3 }
 0x3c2   :  { %v451_v46 = vpop.xlane.xlu2 %450  ;;  %v610_v35 = vsel %vm159_vm0, %v7653_v20, -inf }
 0x3c3   :  { %5996 = vrcp.f32 %v451_v46  ;;  %611 = vmax.xlane.f32.xlu2 %v610_v35 }
 0x3c7   :  { %2366 = vmatpush.bf16.xpose.msrb.mxu3 %v2356_v58 }
 0x3c9   :  { %v5997_v51 = vpop.eup %5996  ;;  %v7659_v32 = vpop.f32.mrf.mxu3 }
 0x3ca   :  { %v528_v56 = vmul.f32 %v5997_v51, %v518_v48  ;;  %v613_v57 = vsel %vm159_vm0, %v7659_v32, -inf }
 0x3cb   :  { %614 = vmax.xlane.f32.xlu0 %v613_v57  ;;  %v2803_v57 = vsel %vm326_vm1, %v7441_v23, 0  ;;  %v2797_v23 = vsel %vm326_vm1, %v7409_v11, 0 }
 0x3cc   :  { %v766_v59 = vpack.c.bf16 %v528_v56, %v528_v56 }
 0x3ce   :  { %5746 = vmatmul.msk.bf16.gmra.mxu3 %vm326_vm1, %v7236_v6  ;;  %v7669_v50 = vunpack.c.l.b16 %v766_v59 }
 0x3cf   :  { %2367 = vmatpush.bf16.xpose.msrb.mxu3 %v2353_v41 }
 0x3d0   :  { %11134 = vst [vmem:[#allocation109_spill] sm:$0xff] %v7669_v50 }
 0x3d1   :  { %v7673_v48 = vpop.f32.mrf.mxu3 }
 0x3d2   :  { %v616_v35 = vsel %vm159_vm0, %v7673_v48, -inf }
 0x3d3   :  { %617 = vmax.xlane.f32.xlu0 %v616_v35  ;;  %v2800_v35 = vsel %vm326_vm1, %v7395_v2, 0  ;;  %v2794_v2 = vsel %vm326_vm1, %v7437_v29, 0 }
 0x3d7   :  { %2368 = vmatpush.bf16.xpose.msrb.mxu3 %v2350_v60 }
 0x3d9   :  { %v7679_v6 = vpop.f32.mrf.mxu3 }
 0x3da   :  { %v619_v40 = vsel %vm159_vm0, %v7679_v6, -inf }
 0x3db   :  { %620 = vmax.xlane.f32.xlu1 %v619_v40 }
 0x3de   :  { %5747 = vmatmul.msk.bf16.gmra.mxu3 %vm326_vm1, %v7266_v39 }
 0x3e1   :  { %v7685_v59 = vpop.f32.mrf.mxu3 }
 0x3e2   :  { %v622_v12 = vsel %vm159_vm0, %v7685_v59, -inf }
 0x3e3   :  { %623 = vmax.xlane.f32.xlu2 %v622_v12 }
 0x3e9   :  { %v7689_v58 = vpop.f32.mrf.mxu3 }
 0x3ea   :  { %v625_v36 = vsel %vm159_vm0, %v7689_v58, -inf }
 0x3eb   :  { %626 = vmax.xlane.f32.xlu0 %v625_v36 }
 0x3ee   :  { %5748 = vmatmul.msk.bf16.gmra.mxu3 %vm326_vm1, %v7353_v7 }
 0x3f1   :  { %v7695_v51 = vpop.f32.mrf.mxu3 }
 0x3f2   :  { %v628_v39 = vsel %vm159_vm0, %v7695_v51, -inf }
 0x3f3   :  { %629 = vmax.xlane.f32.xlu1 %v628_v39 }
 0x3f9   :  { %v7699_v52 = vpop.f32.mrf.mxu3 }
 0x3fa   :  { %v631_v56 = vsel %vm159_vm0, %v7699_v52, -inf }
 0x3fb   :  { %632 = vmax.xlane.f32.xlu2 %v631_v56 }
 0x3fe   :  { %5761 = vmatmul.msk.bf16.vlgmr.msra.gmra.mxu3 %vm326_vm1, %v7189_v16 }
 0x3ff   :  { %2809 = vmatpush.bf16.xpose.msra.mxu3 %v2803_v57  ;;  %v11135_v57 = vld [vmem:[#allocation57_spill] sm:$0xff] }
 0x401   :  { %v7707_v7 = vpop.f32.mrf.mxu3 }
 0x402   :  { %v1058_v41 = vsel %vm159_vm0, %v7707_v7, -inf }
 0x403   :  { %1059 = vmax.xlane.f32.xlu1 %v1058_v41 }
 0x407   :  { %2810 = vmatpush.bf16.xpose.msra.mxu3 %v2800_v35 }
 0x409   :  { %v7713_v60 = vpop.f32.mrf.mxu3 }
 0x40a   :  { %v1061_v40 = vsel %vm159_vm0, %v7713_v60, -inf }
 0x40b   :  { %1062 = vmax.xlane.f32.xlu2 %v1061_v40 }
 0x40e   :  { %5762 = vmatmul.msk.bf16.gmra.mxu3 %vm326_vm1, %v7367_v61 }
 0x40f   :  { %2811 = vmatpush.bf16.xpose.msra.mxu3 %v2797_v23 }
 0x411   :  { %v7721_v16 = vpop.f32.mrf.mxu3 }
 0x412   :  { %v1064_v12 = vsel %vm159_vm0, %v7721_v16, -inf }
 0x413   :  { %1065 = vmax.xlane.f32.xlu0 %v1064_v12 }
 0x417   :  { %2812 = vmatpush.bf16.xpose.msra.mxu3 %v2794_v2 }
 0x419   :  { %v7727_v36 = vpop.f32.mrf.mxu3 }
 0x41a   :  { %v1067_v39 = vsel %vm159_vm0, %v7727_v36, -inf }
 0x41b   :  { %1068 = vmax.xlane.f32.xlu1 %v1067_v39  ;;  %v3247_v39 = vsel %vm326_vm1, %v7560_v31, 0 }
 0x41e   :  { %5763 = vmatmul.msk.bf16.gmra.mxu3 %vm326_vm1, %v7379_v4 }
 0x421   :  { %v7733_v61 = vpop.f32.mrf.mxu3 }
 0x422   :  { %v1070_v11 = vsel %vm159_vm0, %v7733_v61, -inf }
 0x423   :  { %1071 = vmax.xlane.f32.xlu2 %v1070_v11 }
 0x429   :  { %v7737_v56 = vpop.f32.mrf.mxu3 }
 0x42a   :  { %v1073_v29 = vsel %vm159_vm0, %v7737_v56, -inf }
 0x42b   :  { %1074 = vmax.xlane.f32.xlu0 %v1073_v29  ;;  %v11136_v29 = vld [vmem:[#allocation70_spill] sm:$0xff] }
 0x42e   :  { %5764 = vmatmul.msk.bf16.gmra.mxu3 %vm326_vm1, %v11135_v57 }
 0x431   :  { %v7743_v41 = vpop.f32.mrf.mxu3 }
 0x432   :  { %v1076_v4 = vsel %vm159_vm0, %v7743_v41, -inf }
 0x433   :  { %1077 = vmax.xlane.f32.xlu1 %v1076_v4 }
 0x436   :  { %v612_v35 = vpop.xlane.xlu2 %611 }
 0x437   :  { %v634_v40 = vsub.f32 %v7653_v20, %v612_v35 }
 0x439   :  { %v642_v23 = vmul.f32 1.442695, %v634_v40  ;;  %v7748_v12 = vpop.f32.mrf.mxu3 }
 0x43a   :  { %v1079_v2 = vsel %vm159_vm0, %v7748_v12, -inf }
 0x43b   :  { %5998 = vpow2.f32 %v642_v23  ;;  %1080 = vmax.xlane.f32.xlu2 %v1079_v2  ;;  %v3244_v2 = vsel %vm326_vm1, %v7492_v62, 0  ;;  %v11138_v62 = vld [vmem:[#allocation62_spill] sm:$0xff] }
 0x43e   :  { %v615_v11 = vpop.xlane.xlu0 %614  ;;  %5777 = vmatmul.msk.bf16.vlgmr.msrb.gmra.mxu3 %vm326_vm1, %v11136_v29 }
 0x43f   :  { %v635_v57 = vsub.f32 %v7659_v32, %v615_v11  ;;  %3253 = vmatpush.bf16.xpose.msrb.mxu3 %v3247_v39 }
 0x441   :  { %v5999_v4 = vpop.eup %5998  ;;  %v644_v20 = vmul.f32 1.442695, %v635_v57  ;;  %v7757_v35 = vpop.f32.mrf.mxu3 }
 0x442   :  { %v658_v40 = vsel %vm159_vm0, %v5999_v4, 0.0  ;;  %v1502_v23 = vsel %vm159_vm0, %v7757_v35, -inf }
 0x443   :  { %6000 = vpow2.f32 %v644_v20  ;;  %659 = vadd.xlane.f32.xlu0 %v658_v40  ;;  %1503 = vmax.xlane.f32.xlu1 %v1502_v23  ;;  %v11137_v20 = vld [vmem:[#allocation43_spill] sm:$0xff] }
 0x446   :  { %v618_v31 = vpop.xlane.xlu0 %617 }
 0x447   :  { %v636_v29 = vsub.f32 %v7673_v48, %v618_v31  ;;  %3254 = vmatpush.bf16.xpose.msrb.mxu3 %v3244_v2  ;;  %v3241_v48 = vsel %vm326_vm1, %v7546_v42, 0 }
 0x449   :  { %v6001_v32 = vpop.eup %6000  ;;  %v646_v39 = vmul.f32 1.442695, %v636_v29  ;;  %v7765_v11 = vpop.f32.mrf.mxu3 }
 0x44a   :  { %v1505_v57 = vsel %vm159_vm0, %v7765_v11, -inf  ;;  %v661_v46 = vsel %vm159_vm0, %v6001_v32, 0.0  ;;  %v682_v25 = vpack.c.bf16 %v6001_v32, %v5999_v4  ;;  %v11139_v4 = vld [vmem:[#allocation44_spill] sm:$0xff]  ;;  %v11140_v32 = vld [vmem:[#allocation33_spill] sm:$0xff] }
 0x44b   :  { %6002 = vpow2.f32 %v646_v39  ;;  %1506 = vmax.xlane.f32.xlu0 %v1505_v57  ;;  %662 = vadd.xlane.f32.xlu1 %v661_v46 }
 0x44c   :  { %5717 = vmatmul.msk.bf16.vlgmr.msrb.gmra.mxu2 %vm159_vm0, %v682_v25 }
 0x44d   :  { %5942 = vmatpush.bf16.msrb.mxu2 %v11137_v20 }
 0x44e   :  { %5778 = vmatmul.msk.bf16.gmra.mxu3 %vm326_vm1, %v11138_v62  ;;  %v621_v40 = vpop.xlane.xlu1 %620  ;;  %v11141_v62 = vld [vmem:[#allocation27_spill] sm:$0xff] }
 0x44f   :  { %3255 = vmatpush.bf16.xpose.msrb.mxu3 %v3241_v48  ;;  %v637_v23 = vsub.f32 %v7679_v6, %v621_v40  ;;  %v3238_v6 = vsel %vm326_vm1, %v7579_v45, 0 }
 0x451   :  { %v6003_v31 = vpop.eup %6002  ;;  %v648_v2 = vmul.f32 1.442695, %v637_v23  ;;  %5944 = vmatpush.bf16.msrb.mxu2 %v11139_v4  ;;  %v7778_v29 = vpop.f32.mrf.mxu3 }
 0x452   :  { %v1508_v25 = vsel %vm159_vm0, %v7778_v29, -inf  ;;  %v664_v46 = vsel %vm159_vm0, %v6003_v31, 0.0 }
 0x453   :  { %6004 = vpow2.f32 %v648_v2  ;;  %1509 = vmax.xlane.f32.xlu0 %v1508_v25  ;;  %665 = vadd.xlane.f32.xlu2 %v664_v46 }
 0x455   :  { %5946 = vmatpush.bf16.msrb.mxu2 %v11140_v32 }
 0x456   :  { %v624_v42 = vpop.xlane.xlu2 %623 }
 0x457   :  { %v638_v39 = vsub.f32 %v7685_v59, %v624_v42  ;;  %3256 = vmatpush.bf16.xpose.msrb.mxu3 %v3238_v6  ;;  %v11142_v59 = vld [vmem:[#allocation65_spill] sm:$0xff] }
 0x459   :  { %v6005_v57 = vpop.eup %6004  ;;  %v650_v20 = vmul.f32 1.442695, %v638_v39  ;;  %5948 = vmatpush.bf16.msrb.mxu2 %v11141_v62  ;;  %v7788_v48 = vpop.f32.mrf.mxu3 }
 0x45a   :  { %v1511_v40 = vsel %vm159_vm0, %v7788_v48, -inf  ;;  %v667_v23 = vsel %vm159_vm0, %v6005_v57, 0.0  ;;  %v683_v2 = vpack.c.bf16 %v6005_v57, %v6003_v31 }
 0x45b   :  { %6006 = vpow2.f32 %v650_v20  ;;  %1512 = vmax.xlane.f32.xlu1 %v1511_v40  ;;  %668 = vadd.xlane.f32.xlu0 %v667_v23  ;;  %v11143_v23 = vld [vmem:[#allocation71_spill] sm:$0xff] }
 0x45c   :  { %5718 = vmatmul.msk.bf16.gmra.mxu2 %vm159_vm0, %v683_v2 }
 0x45e   :  { %v627_v45 = vpop.xlane.xlu0 %626  ;;  %5779 = vmatmul.msk.bf16.gmra.mxu3 %vm326_vm1, %v11142_v59 }
 0x45f   :  { %v639_v4 = vsub.f32 %v7689_v58, %v627_v45 }
 0x461   :  { %v6007_v25 = vpop.eup %6006  ;;  %v652_v46 = vmul.f32 1.442695, %v639_v4  ;;  %v7797_v32 = vpop.f32.mrf.mxu3 }
 0x462   :  { %v670_v42 = vsel %vm159_vm0, %v6007_v25, 0.0  ;;  %v1514_v31 = vsel %vm159_vm0, %v7797_v32, -inf }
 0x463   :  { %6008 = vpow2.f32 %v652_v46  ;;  %671 = vadd.xlane.f32.xlu1 %v670_v42  ;;  %1515 = vmax.xlane.f32.xlu0 %v1514_v31 }
 0x466   :  { %v630_v6 = vpop.xlane.xlu1 %629 }
 0x467   :  { %v640_v39 = vsub.f32 %v7695_v51, %v630_v6 }
 0x469   :  { %v6009_v57 = vpop.eup %6008  ;;  %v654_v20 = vmul.f32 1.442695, %v640_v39  ;;  %v7803_v62 = vpop.f32.mrf.mxu3 }
 0x46a   :  { %v673_v58 = vsel %vm159_vm0, %v6009_v57, 0.0  ;;  %v684_v40 = vpack.c.bf16 %v6009_v57, %v6007_v25  ;;  %v1517_v46 = vsel %vm159_vm0, %v7803_v62, -inf }
 0x46b   :  { %6010 = vpow2.f32 %v654_v20  ;;  %674 = vadd.xlane.f32.xlu1 %v673_v58 }
 0x46c   :  { %5719 = vmatmul.msk.bf16.gmra.mxu2 %vm159_vm0, %v684_v40  ;;  %v3691_v40 = vsel %vm326_vm1, %v7635_v9, 0 }
 0x46e   :  { %5780 = vmatmul.msk.bf16.gmra.mxu3 %vm326_vm1, %v11143_v23  ;;  %v633_v2 = vpop.xlane.xlu2 %632 }
 0x46f   :  { %v641_v45 = vsub.f32 %v7699_v52, %v633_v2 }
 0x471   :  { %v6011_v59 = vpop.eup %6010  ;;  %v656_v4 = vmul.f32 1.442695, %v641_v45  ;;  %v7810_v51 = vpop.f32.mrf.mxu3 }
 0x472   :  { %v676_v42 = vsel %vm159_vm0, %v6011_v59, 0.0  ;;  %v1520_v20 = vsel %vm159_vm0, %v7810_v51, -inf }
 0x473   :  { %6012 = vpow2.f32 %v656_v4  ;;  %1518 = vmax.xlane.f32.xlu1 %v1517_v46  ;;  %677 = vadd.xlane.f32.xlu0 %v676_v42 }
 0x476   :  { %v1060_v25 = vpop.xlane.xlu1 %1059 }
 0x477   :  { %v1082_v31 = vsub.f32 %v7707_v7, %v1060_v25  ;;  %v11144_v7 = vld [vmem:[#allocation83_spill] sm:$0xff]  ;;  %v3688_v25 = vsel %vm326_vm1, %v7647_v0, 0 }
 0x479   :  { %v6013_v6 = vpop.eup %6012  ;;  %v1090_v39 = vmul.f32 1.442695, %v1082_v31  ;;  %v7816_v57 = vpop.f32.mrf.mxu3 }
 0x47a   :  { %v1523_v52 = vsel %vm159_vm0, %v7816_v57, -inf  ;;  %v685_v58 = vpack.c.bf16 %v6013_v6, %v6011_v59  ;;  %v679_v59 = vsel %vm159_vm0, %v6013_v6, 0.0 }
 0x47b   :  { %6014 = vpow2.f32 %v1090_v39  ;;  %1524 = vmax.xlane.f32.xlu2 %v1523_v52  ;;  %1521 = vmax.xlane.f32.xlu1 %v1520_v20 }
 0x47c   :  { %5720 = vmatmul.msk.bf16.gmra.mxu2 %vm159_vm0, %v685_v58 }
 0x47e   :  { %5793 = vmatmul.msk.bf16.vlgmr.msra.gmra.mxu3 %vm326_vm1, %v11144_v7  ;;  %v1063_v23 = vpop.xlane.xlu2 %1062  ;;  %v11148_v7 = vld [vmem:[#allocation86_spill] sm:$0xff] }
 0x47f   :  { %v1083_v2 = vsub.f32 %v7713_v60, %v1063_v23  ;;  %3697 = vmatpush.bf16.xpose.msra.mxu3 %v3691_v40  ;;  %v11147_v40 = vld [vmem:[#allocation63_spill] sm:$0xff] }
 0x481   :  { %v7828_v45 = vpop.eup %6014  ;;  %v1092_v4 = vmul.f32 1.442695, %v1083_v2  ;;  %v7830_v46 = vpop.f32.mrf.mxu3 }
 0x482   :  { %11145 = vst [vmem:[#allocation57_spill] sm:$0xff] %v7830_v46  ;;  %v1106_v42 = vsel %vm159_vm0, %v7828_v45, 0.0  ;;  %v1946_v0 = vsel %vm159_vm0, %v7830_v46, -inf }
 0x483   :  { %6016 = vpow2.f32 %v1092_v4  ;;  %680 = vadd.xlane.f32.xlu1 %v679_v59  ;;  %1107 = vadd.xlane.f32.xlu0 %v1106_v42  ;;  %v11149_v42 = vld [vmem:[#allocation67_spill] sm:$0xff] }
 0x486   :  { %v1066_v9 = vpop.xlane.xlu0 %1065 }
 0x487   :  { %v1084_v60 = vsub.f32 %v7721_v16, %v1066_v9  ;;  %3698 = vmatpush.bf16.xpose.msra.mxu3 %v3688_v25  ;;  %v11146_v16 = vld [vmem:[#allocation29_spill] sm:$0xff] }
 0x489   :  { %v7838_v31 = vpop.eup %6016  ;;  %v1094_v39 = vmul.f32 1.442695, %v1084_v60  ;;  %v7840_v52 = vpop.f32.mrf.mxu3  ;;  %v11151_v60 = vld [vmem:[#allocation53_spill] sm:$0xff] }
 0x48a   :  { %v1949_v20 = vsel %vm159_vm0, %v7840_v52, -inf  ;;  %v1109_v58 = vsel %vm159_vm0, %v7838_v31, 0.0 }
 0x48b   :  { %6018 = vpow2.f32 %v1094_v39  ;;  %1950 = vmax.xlane.f32.xlu2 %v1949_v20  ;;  %1110 = vadd.xlane.f32.xlu1 %v1109_v58 }
 0x48c   :  { %1947 = vmax.xlane.f32.xlu0 %v1946_v0  ;;  %5721 = vmatmul.msk.bf16.vlgmr.msra.gmra.mxu2 %vm326_vm1, %v11146_v16  ;;  %v11152_v0 = vld [vmem:[#allocation61_spill] sm:$0xff] }
 0x48d   :  { %1170 = vmatpush.bf16.msra.mxu2 %v11147_v40 }
 0x48e   :  { %5794 = vmatmul.msk.bf16.gmra.mxu3 %vm326_vm1, %v11148_v7  ;;  %v1069_v23 = vpop.xlane.xlu1 %1068 }
 0x48f   :  { %v1085_v2 = vsub.f32 %v7727_v36, %v1069_v23 }
 0x491   :  { %v7856_v4 = vpop.eup %6018  ;;  %v1096_v59 = vmul.f32 1.442695, %v1085_v2  ;;  %1171 = vmatpush.bf16.msra.mxu2 %v11149_v42  ;;  %v7859_v9 = vpop.f32.mrf.mxu3  ;;  %v11155_v42 = vld [vmem:[#allocation88_spill] sm:$0xff] }
 0x492   :  { %11150 = vst [vmem:[#allocation70_spill] sm:$0xff] %v7859_v9  ;;  %v1112_v25 = vsel %vm159_vm0, %v7856_v4, 0.0  ;;  %v1952_v40 = vsel %vm159_vm0, %v7859_v9, -inf }
 0x493   :  { %6020 = vpow2.f32 %v1096_v59  ;;  %1113 = vadd.xlane.f32.xlu2 %v1112_v25 }
 0x495   :  { %1172 = vmatpush.bf16.msra.mxu2 %v11151_v60 }
 0x496   :  { %v1072_v39 = vpop.xlane.xlu2 %1071 }
 0x497   :  { %v1086_v20 = vsub.f32 %v7733_v61, %v1072_v39  ;;  %v11154_v61 = vld [vmem:[#allocation31_spill] sm:$0xff] }
 0x499   :  { %v7865_v58 = vpop.eup %6020  ;;  %v1098_v36 = vmul.f32 1.442695, %v1086_v20  ;;  %1173 = vmatpush.bf16.msra.mxu2 %v11152_v0  ;;  %v7868_v16 = vpop.f32.mrf.mxu3 }
 0x49a   :  { %11153 = vst [vmem:[#allocation43_spill] sm:$0xff] %v7868_v16  ;;  %v1955_v7 = vsel %vm159_vm0, %v7868_v16, -inf  ;;  %v1115_v23 = vsel %vm159_vm0, %v7865_v58, 0.0 }
 0x49b   :  { %6022 = vpow2.f32 %v1098_v36  ;;  %1953 = vmax.xlane.f32.xlu2 %v1952_v40  ;;  %1956 = vmax.xlane.f32.xlu0 %v1955_v7 }
 0x49c   :  { %1116 = vadd.xlane.f32.xlu1 %v1115_v23  ;;  %5722 = vmatmul.msk.bf16.gmra.mxu2 %vm326_vm1, %v11154_v61 }
 0x49e   :  { %v1075_v59 = vpop.xlane.xlu0 %1074  ;;  %5795 = vmatmul.msk.bf16.gmra.mxu3 %vm326_vm1, %v11155_v42 }
 0x49f   :  { %v1087_v25 = vsub.f32 %v7737_v56, %v1075_v59 }
 0x4a1   :  { %v7883_v60 = vpop.eup %6022  ;;  %v1100_v39 = vmul.f32 1.442695, %v1087_v25  ;;  %v7885_v20 = vpop.f32.mrf.mxu3 }
 0x4a2   :  { %11156 = vst [vmem:[#allocation62_spill] sm:$0xff] %v7885_v20  ;;  %v1118_v36 = vsel %vm159_vm0, %v7883_v60, 0.0  ;;  %v1958_v0 = vsel %vm159_vm0, %v7885_v20, -inf }
 0x4a3   :  { %6024 = vpow2.f32 %v1100_v39  ;;  %1119 = vadd.xlane.f32.xlu2 %v1118_v36  ;;  %1959 = vmax.xlane.f32.xlu0 %v1958_v0  ;;  %v11158_v39 = vld [vmem:[#allocation36_spill] sm:$0xff] }
 0x4a6   :  { %v1078_v40 = vpop.xlane.xlu1 %1077 }
 0x4a7   :  { %v1088_v7 = vsub.f32 %v7743_v41, %v1078_v40 }
 0x4a9   :  { %v7892_v23 = vpop.eup %6024  ;;  %v1102_v56 = vmul.f32 1.442695, %v1088_v7  ;;  %v7894_v61 = vpop.f32.mrf.mxu3 }
 0x4aa   :  { %11157 = vst [vmem:[#allocation44_spill] sm:$0xff] %v7894_v61  ;;  %v1961_v59 = vsel %vm159_vm0, %v7894_v61, -inf  ;;  %v1121_v42 = vsel %vm159_vm0, %v7892_v23, 0.0 }
 0x4ab   :  { %6026 = vpow2.f32 %v1102_v56  ;;  %1962 = vmax.xlane.f32.xlu2 %v1961_v59  ;;  %1122 = vadd.xlane.f32.xlu1 %v1121_v42  ;;  %v11161_v59 = vld [vmem:[#allocation42_spill] sm:$0xff] }
 0x4ac   :  { %5723 = vmatmul.msk.bf16.gmra.mxu2 %vm326_vm1, %v11158_v39 }
 0x4ae   :  { %5796 = vmatmul.msk.bf16.gmra.mxu3 %vm326_vm1, %v7548_v54  ;;  %v7958_v25 = vpop.xlane.xlu2 %1080 }
 0x4b1   :  { %v7906_v41 = vpop.eup %6026  ;;  %v7908_v36 = vpop.f32.mrf.mxu3 }
 0x4b2   :  { %11159 = vst [vmem:[#allocation33_spill] sm:$0xff] %v7908_v36  ;;  %v1964_v0 = vsel %vm159_vm0, %v7908_v36, -inf  ;;  %v1124_v40 = vsel %vm159_vm0, %v7906_v41, 0.0 }
 0x4b3   :  { %1965 = vmax.xlane.f32.xlu1 %v1964_v0  ;;  %1125 = vadd.xlane.f32.xlu2 %v1124_v40 }
 0x4b6   :  { %v7946_v40 = vpop.xlane.xlu0 %659 }
 0x4b7   :  { %11166 = vst [vmem:[#allocation29_spill] sm:$0xff] %v7946_v40 }
 0x4b9   :  { %v7914_v7 = vpop.f32.mrf.mxu3 }
 0x4ba   :  { %11160 = vst [vmem:[#allocation27_spill] sm:$0xff] %v7914_v7  ;;  %v1967_v56 = vsel %vm159_vm0, %v7914_v7, -inf }
 0x4bb   :  { %1968 = vmax.xlane.f32.xlu0 %v1967_v56 }
 0x4bc   :  { %5724 = vmatmul.msk.bf16.gmra.mxu2 %vm326_vm1, %v11161_v59 }
 0x4be   :  { %5809 = vmatmul.msk.bf16.vlgmr.msrb.gmra.mxu3 %vm326_vm1, %v7585_v49  ;;  %v7936_v49 = vpop.xlane.xlu1 %1503  ;;  %v7960_v2 = vpop.xlane.xlu0 %1506 }
 0x4c1   :  { %v7922_v54 = vpop.f32.mrf.mxu3 }
 0x4c2   :  { %11162 = vst [vmem:[#allocation65_spill] sm:$0xff] %v7922_v54  ;;  %v2390_v42 = vsel %vm159_vm0, %v7922_v54, -inf  ;;  %v11191_v54 = vld [vmem:[#allocation22_spill] sm:$0xff] }
 0x4c3   :  { %2391 = vmax.xlane.f32.xlu1 %v2390_v42  ;;  %v11169_v42 = vld [vmem:[#allocation23_spill] sm:$0xff] }
 0x4c6   :  { %v7952_v59 = vpop.xlane.xlu1 %662 }
 0x4c7   :  { %11168 = vst [vmem:[#allocation86_spill] sm:$0xff] %v7952_v59 }
 0x4c9   :  { %v7982_v28 = vpop.f32.mrf.mxu3 }
 0x4cb   :  { %3663 = vrot.lane.b32.xlu2 %v7004_v34, %s6591_s2 }
 0x4ce   :  { %5810 = vmatmul.msk.bf16.gmra.mxu3 %vm326_vm1, %v7629_v14  ;;  %v11165_v14 = vld [vmem:[#allocation25_spill] sm:$0xff]  ;;  %v7964_v6 = vpop.xlane.xlu1 %1512 }
 0x4cf   :  { %v7930_v39 = vpop.f32.mrf.mxu2  ;;  %3215 = vrot.lane.b32.xlu0 %v7044_v22, %s6590_s20  ;;  %11177 = vst [vmem:[#allocation25_spill] sm:$0xff] %v7982_v28 }
 0x4d0   :  { %11163 = vst [vmem:[#allocation71_spill] sm:$0xff] %v7930_v39  ;;  %v7966_v39 = vpop.xlane.xlu2 %665 }
 0x4d1   :  { %11171 = vst [vmem:[#allocation53_spill] sm:$0xff] %v7966_v39 }
 0x4d3   :  { %2478 = vrot.lane.b32.xlu2 %v7014_v53, %s6586_s16 }
 0x4d7   :  { %v7938_v0 = vpop.f32.mrf.mxu2  ;;  %2480 = vrot.lane.b32.xlu0 %v7034_v17, %s6586_s16 }
 0x4d8   :  { %11164 = vst [vmem:[#allocation83_spill] sm:$0xff] %v7938_v0  ;;  %v7972_v0 = vpop.xlane.xlu1 %671 }
 0x4d9   :  { %11173 = vst [vmem:[#allocation31_spill] sm:$0xff] %v7972_v0 }
 0x4db   :  { %3661 = vrot.lane.b32.xlu2 %v6984_v10, %s6591_s2 }
 0x4dc   :  { %3445 = vrot.lane.b32.xlu1 %v11165_v14, %s6592_s21 }
 0x4de   :  { %5811 = vmatmul.msk.bf16.gmra.mxu3 %vm326_vm1, %v7619_v19 }
 0x4df   :  { %v7950_v56 = vpop.f32.mrf.mxu2 }
 0x4e0   :  { %11167 = vst [vmem:[#allocation63_spill] sm:$0xff] %v7950_v56  ;;  %v7970_v56 = vpop.xlane.xlu0 %1509  ;;  %v7980_v50 = vpop.xlane.xlu1 %674 }
 0x4e1   :  { %11176 = vst [vmem:[#allocation42_spill] sm:$0xff] %v7980_v50 }
 0x4e3   :  { %2710 = vrot.lane.b32.xlu2 %v11169_v42, %s6588_s18 }
 0x4e4   :  { %3653 = vrot.lane.b32.xlu1 %v6984_v10, %s6592_s21 }
 0x4e7   :  { %v7962_v14 = vpop.f32.mrf.mxu2 }
 0x4e8   :  { %11170 = vst [vmem:[#allocation67_spill] sm:$0xff] %v7962_v14  ;;  %v7978_v10 = vpop.xlane.xlu0 %668  ;;  %v7992_v0 = vpop.xlane.xlu1 %1518 }
 0x4e9   :  { %11175 = vst [vmem:[#allocation36_spill] sm:$0xff] %v7978_v10 }
 0x4ee   :  { %v7974_v40 = vpop.xlane.xlu2 %1524 }
 0x4ef   :  { %v7968_v19 = vpop.f32.mrf.mxu2 }
 0x4f0   :  { %11172 = vst [vmem:[#allocation61_spill] sm:$0xff] %v7968_v19  ;;  %v2393_v19 = vsel %vm159_vm0, %v7982_v28, -inf  ;;  %v7990_v39 = vpop.xlane.xlu0 %1515  ;;  %v8002_v33 = vpop.xlane.xlu1 %1521 }
 0x4f7   :  { %v7976_v59 = vpop.f32.mrf.mxu2 }
 0x4f8   :  { %11174 = vst [vmem:[#allocation88_spill] sm:$0xff] %v7976_v59  ;;  %v7998_v10 = vpop.xlane.xlu0 %677 }
 0x4f9   :  { %11181 = vst [vmem:[#allocation112_spill] sm:$0xff] %v7998_v10  ;;  %v11186_v10 = vld [vmem:[#allocation24_spill] sm:$0xff] }
 0x4fe   :  { %v7984_v14 = vpop.xlane.xlu2 %1950 }
 0x4ff   :  { %v7986_v43 = vpop.f32.mrf.mxu2 }
 0x500   :  { %11178 = vst [vmem:[#allocation23_spill] sm:$0xff] %v7986_v43  ;;  %v8005_v63 = vpop.xlane.xlu0 %1107 }
 0x501   :  { %2394 = vmax.xlane.f32.xlu0 %v2393_v19  ;;  %11183 = vst [vmem:[#allocation114_spill] sm:$0xff] %v8005_v63 }
 0x506   :  { %v7994_v55 = vpop.xlane.xlu2 %1113 }
 0x507   :  { %11179 = vst [vmem:[#allocation110_spill] sm:$0xff] %v7994_v55  ;;  %v7996_v59 = vpop.f32.mrf.mxu2 }
 0x508   :  { %11180 = vst [vmem:[#allocation111_spill] sm:$0xff] %v7996_v59  ;;  %v8013_v59 = vpop.xlane.xlu1 %680  ;;  %v8019_v15 = vpop.xlane.xlu0 %1947 }
 0x509   :  { %11185 = vst [vmem:[#allocation116_spill] sm:$0xff] %v8013_v59 }
 0x50e   :  { %v8000_v50 = vpop.xlane.xlu2 %1953 }
 0x50f   :  { %11182 = vst [vmem:[#allocation113_spill] sm:$0xff] %v8000_v50  ;;  %v824_v38 = vpop.f32.mrf.mxu2  ;;  %v11207_v50 = vld [vmem:[#allocation47_spill] sm:$0xff] }
 0x510   :  { %v844_v43 = vsel %vm159_vm0, %v824_v38, -inf  ;;  %v8025_v13 = vpop.xlane.xlu1 %1110  ;;  %v8029_v27 = vpop.xlane.xlu0 %1956  ;;  %v1701_v46 = vsel %vm326_vm1, %v11207_v50, 0 }
 0x511   :  { %845 = vmax.xlane.f32.xlu2 %v844_v43  ;;  %11188 = vst [vmem:[#allocation118_spill] sm:$0xff] %v8025_v13 }
 0x512   :  { %11190 = vst [vmem:[#allocation120_spill] sm:$0xff] %v8029_v27 }
 0x515   :  { %2476 = vrot.lane.b32.xlu0 %v6994_v24, %s6586_s16 }
 0x516   :  { %v8009_v19 = vpop.xlane.xlu2 %1119 }
 0x517   :  { %11184 = vst [vmem:[#allocation115_spill] sm:$0xff] %v8009_v19  ;;  %v8011_v30 = vpop.f32.mrf.mxu2 }
 0x518   :  { %v8035_v28 = vpop.xlane.xlu1 %1116  ;;  %v8042_v55 = vpop.xlane.xlu0 %1959 }
 0x519   :  { %11192 = vst [vmem:[#allocation121_spill] sm:$0xff] %v8035_v28 }
 0x51a   :  { %11193 = vst [vmem:[#allocation122_spill] sm:$0xff] %v8042_v55 }
 0x51d   :  { %2708 = vrot.lane.b32.xlu0 %v11186_v10, %s6588_s18 }
 0x51e   :  { %v8017_v26 = vpop.xlane.xlu2 %1962 }
 0x51f   :  { %11187 = vst [vmem:[#allocation117_spill] sm:$0xff] %v8017_v26  ;;  %v8021_v5 = vpop.f32.mrf.mxu2 }
 0x520   :  { %v850_v43 = vsel %vm159_vm0, %v8021_v5, -inf }
 0x521   :  { %851 = vmax.xlane.f32.xlu1 %v850_v43 }
 0x526   :  { %v8027_v37 = vpop.xlane.xlu2 %1125 }
 0x527   :  { %11189 = vst [vmem:[#allocation119_spill] sm:$0xff] %v8027_v37  ;;  %v8031_v59 = vpop.f32.mrf.mxu2  ;;  %v8046_v37 = vpop.xlane.xlu1 %1122 }
 0x528   :  { %11194 = vst [vmem:[#allocation123_spill] sm:$0xff] %v8046_v37 }
 0x529   :  { %2706 = vrot.lane.b32.xlu2 %v11191_v54, %s6588_s18 }
 0x52e   :  { %v3664_v19 = vpop.permute.xlu2 %3663  ;;  %v8052_v20 = vpop.xlane.xlu0 %1968 }
 0x52f   :  { %v8037_v36 = vpop.f32.mrf.mxu2  ;;  %v3685_v7 = vsel %vm326_vm1, %v3664_v19, 0  ;;  %11195 = vst [vmem:[#allocation124_spill] sm:$0xff] %v8052_v20  ;;  %v8058_v19 = vpop.xlane.xlu1 %1965 }
 0x530   :  { %3699 = vmatpush.bf16.xpose.msra.mxu3 %v3685_v7  ;;  %v856_v43 = vsel %vm159_vm0, %v8037_v36, -inf  ;;  %v8056_v7 = vpop.f32.mrf.mxu3  ;;  %11197 = vst [vmem:[#allocation126_spill] sm:$0xff] %v8058_v19  ;;  %v847_v19 = vsel %vm159_vm0, %v8011_v30, -inf }
 0x531   :  { %857 = vmax.xlane.f32.xlu1 %v856_v43  ;;  %2704 = vrot.lane.b32.xlu2 %v6900_v44, %s6588_s18  ;;  %11196 = vst [vmem:[#allocation125_spill] sm:$0xff] %v8056_v7 }
 0x536   :  { %v8048_v54 = vpop.permute.xlu2 %2478 }
 0x537   :  { %v8050_v28 = vpop.f32.mrf.mxu2 }
 0x538   :  { %v8066_v20 = vpop.f32.mrf.mxu3 }
 0x539   :  { %3657 = vrot.lane.b32.xlu2 %v7024_v3, %s6592_s21  ;;  %11198 = vst [vmem:[#allocation127_spill] sm:$0xff] %v8066_v20  ;;  %v8068_v3 = vpop.xlane.xlu1 %2391  ;;  %v2399_v26 = vsel %vm159_vm0, %v8066_v20, -inf }
 0x53a   :  { %11199 = vst [vmem:[#allocation128_spill] sm:$0xff] %v8068_v3 }
 0x53e   :  { %v3662_v55 = vpop.permute.xlu2 %3661 }
 0x53f   :  { %v8060_v43 = vpop.f32.mrf.mxu2  ;;  %v3682_v44 = vsel %vm326_vm1, %v3662_v55, 0 }
 0x540   :  { %3700 = vmatpush.bf16.xpose.msra.mxu3 %v3682_v44  ;;  %v862_v37 = vsel %vm159_vm0, %v8060_v43, -inf }
 0x541   :  { %v3216_v61 = vpop.permute.xlu0 %3215  ;;  %863 = vmax.xlane.f32.xlu1 %v862_v37 }
 0x542   :  { %5812 = vmatmul.msk.bf16.gmra.mxu3 %vm326_vm1, %v3216_v61 }
 0x546   :  { %v8083_v37 = vpop.permute.xlu2 %2710 }
 0x547   :  { %848 = vmax.xlane.f32.xlu0 %v847_v19  ;;  %11201 = vst [vmem:[#allocation130_spill] sm:$0xff] %v8083_v37  ;;  %v8090_v3 = vpop.f32.mrf.mxu2 }
 0x548   :  { %v865_v37 = vsel %vm159_vm0, %v8090_v3, -inf }
 0x549   :  { %2400 = vmax.xlane.f32.xlu1 %v2399_v26  ;;  %v853_v26 = vsel %vm159_vm0, %v8031_v59, -inf }
 0x54e   :  { %v8074_v44 = vpop.permute.xlu1 %3445 }
 0x54f   :  { %11200 = vst [vmem:[#allocation129_spill] sm:$0xff] %v8074_v44 }
 0x556   :  { %v3654_v55 = vpop.permute.xlu1 %3653 }
 0x557   :  { %5825 = vmatmul.msk.bf16.vlgmr.msra.gmra.mxu3 %vm326_vm1, %v3654_v55  ;;  %v859_v55 = vsel %vm159_vm0, %v8050_v28, -inf }
 0x55b   :  { %2474 = vrot.lane.b32.xlu0 %v6974_v1, %s6586_s16 }
 0x562   :  { %3655 = vrot.lane.b32.xlu1 %v7004_v34, %s6592_s21 }
 0x56a   :  { %2924 = vrot.lane.b32.xlu1 %v7034_v17, %s6588_s18  ;;  %v8094_v17 = vpop.permute.xlu0 %2480 }
 0x584   :  { %v846_v61 = vpop.xlane.xlu2 %845 }
 0x585   :  { %v868_v19 = vsub.f32 %v824_v38, %v846_v61  ;;  %854 = vmax.xlane.f32.xlu0 %v853_v26  ;;  %v8096_v38 = vpop.f32.mrf.mxu3  ;;  %v8100_v61 = vpop.xlane.xlu0 %2394 }
 0x586   :  { %11202 = vst [vmem:[#allocation131_spill] sm:$0xff] %v8096_v38  ;;  %v2402_v26 = vsel %vm159_vm0, %v8096_v38, -inf }
 0x587   :  { %v876_v44 = vmul.f32 1.442695, %v868_v19  ;;  %11203 = vst [vmem:[#allocation132_spill] sm:$0xff] %v8100_v61 }
 0x589   :  { %6028 = vpow2.f32 %v876_v44  ;;  %v2396_v44 = vsel %vm159_vm0, %v8056_v7, -inf }
 0x58d   :  { %860 = vmax.xlane.f32.xlu0 %v859_v55  ;;  %v8104_v19 = vpop.f32.mrf.mxu3  ;;  %v8106_v55 = vpop.permute.xlu0 %2476 }
 0x58e   :  { %11204 = vst [vmem:[#allocation133_spill] sm:$0xff] %v8104_v19 }
 0x58f   :  { %v6029_v20 = vpop.eup %6028 }
 0x590   :  { %v892_v34 = vsel %vm159_vm0, %v6029_v20, 0.0 }
 0x591   :  { %893 = vadd.xlane.f32.xlu2 %v892_v34 }
 0x594   :  { %v852_v7 = vpop.xlane.xlu1 %851 }
 0x595   :  { %866 = vmax.xlane.f32.xlu0 %v865_v37  ;;  %v2405_v37 = vsel %vm159_vm0, %v8104_v19, -inf  ;;  %v8110_v34 = vpop.f32.mrf.mxu3  ;;  %v8112_v13 = vpop.permute.xlu0 %2708 }
 0x596   :  { %11205 = vst [vmem:[#allocation134_spill] sm:$0xff] %v8110_v34 }
 0x597   :  { %11206 = vst [vmem:[#allocation135_spill] sm:$0xff] %v8112_v13 }
 0x59d   :  { %2397 = vmax.xlane.f32.xlu0 %v2396_v44  ;;  %v2408_v44 = vsel %vm159_vm0, %v8110_v34, -inf  ;;  %v8116_v61 = vpop.f32.mrf.mxu3 }
 0x59e   :  { %v2411_v16 = vsel %vm159_vm0, %v8116_v61, -inf }
 0x5a4   :  { %v858_v38 = vpop.xlane.xlu1 %857 }
 0x5a5   :  { %2403 = vmax.xlane.f32.xlu0 %v2402_v26 }
 0x5ad   :  { %2406 = vmax.xlane.f32.xlu0 %v2405_v37  ;;  %v872_v37 = vsub.f32 %v8037_v36, %v858_v38  ;;  %v8131_v38 = vpop.permute.xlu2 %2706 }
 0x5af   :  { %v884_v13 = vmul.f32 1.442695, %v872_v37  ;;  %v11211_v37 = vld [vmem:[#allocation30_spill] sm:$0xff] }
 0x5b4   :  { %v864_v27 = vpop.xlane.xlu1 %863 }
 0x5b5   :  { %2409 = vmax.xlane.f32.xlu0 %v2408_v44 }
 0x5ba   :  { %v849_v63 = vpop.xlane.xlu0 %848 }
 0x5bb   :  { %v869_v26 = vsub.f32 %v8011_v30, %v849_v63  ;;  %v8126_v63 = vpop.f32.mrf.mxu3 }
 0x5bc   :  { %v8128_v36 = vpop.xlane.xlu1 %2400 }
 0x5bd   :  { %v878_v19 = vmul.f32 1.442695, %v869_v26  ;;  %2412 = vmax.xlane.f32.xlu0 %v2411_v16  ;;  %v8144_v26 = vpop.permute.xlu2 %2704 }
 0x5be   :  { %11210 = vst [vmem:[#allocation47_spill] sm:$0xff] %v8144_v26 }
 0x5bf   :  { %6030 = vpow2.f32 %v878_v19  ;;  %v11209_v19 = vld [vmem:[#allocation35_spill] sm:$0xff] }
 0x5c0   :  { %6032 = vpow2.f32 %v884_v13  ;;  %v11208_v13 = vld [vmem:[#allocation45_spill] sm:$0xff] }
 0x5c3   :  { %v8137_v50 = vpop.f32.mrf.mxu3 }
 0x5c5   :  { %v6031_v9 = vpop.eup %6030 }
 0x5c6   :  { %v895_v44 = vsel %vm159_vm0, %v6031_v9, 0.0  ;;  %v916_v34 = vpack.c.bf16 %v6031_v9, %v6029_v20  ;;  %v6033_v30 = vpop.eup %6032  ;;  %v1698_v9 = vsel %vm326_vm1, %v11208_v13, 0 }
 0x5c7   :  { %896 = vadd.xlane.f32.xlu1 %v895_v44  ;;  %v904_v16 = vsel %vm159_vm0, %v6033_v30, 0.0  ;;  %v1692_v44 = vsel %vm326_vm1, %v11211_v37, 0 }
 0x5c8   :  { %5725 = vmatmul.msk.bf16.vlgmr.msrb.gmra.mxu0 %vm159_vm0, %v916_v34  ;;  %v1695_v34 = vsel %vm326_vm1, %v11209_v19, 0 }
 0x5c9   :  { %1707 = vmatpush.bf16.xpose.msrb.mxu0 %v1701_v46  ;;  %v2837_v46 = vsel %vm159_vm0, %v8137_v50, -inf }
 0x5cf   :  { %905 = vadd.xlane.f32.xlu1 %v904_v16  ;;  %v870_v16 = vsub.f32 %v8021_v5, %v852_v7 }
 0x5d1   :  { %1708 = vmatpush.bf16.xpose.msrb.mxu0 %v1698_v9  ;;  %3659 = vrot.lane.b32.xlu0 %v7044_v22, %s6592_s21  ;;  %v3658_v22 = vpop.permute.xlu2 %3657  ;;  %v880_v13 = vmul.f32 1.442695, %v870_v16  ;;  %v8150_v9 = vpop.permute.xlu0 %2474  ;;  %v874_v16 = vsub.f32 %v8060_v43, %v864_v27  ;;  %v11212_v27 = vld [vmem:[#allocation74_spill] sm:$0xff] }
 0x5d3   :  { %6034 = vpow2.f32 %v880_v13 }
 0x5d4   :  { %v3656_v20 = vpop.permute.xlu1 %3655 }
 0x5d5   :  { %5826 = vmatmul.msk.bf16.gmra.mxu3 %vm326_vm1, %v3656_v20 }
 0x5d7   :  { %2838 = vmax.xlane.f32.xlu1 %v2837_v46 }
 0x5d9   :  { %1709 = vmatpush.bf16.xpose.msrb.mxu0 %v1695_v34  ;;  %v6035_v20 = vpop.eup %6034 }
 0x5da   :  { %v898_v34 = vsel %vm159_vm0, %v6035_v20, 0.0 }
 0x5e1   :  { %1710 = vmatpush.bf16.xpose.msrb.mxu0 %v1692_v44 }
 0x5e5   :  { %5827 = vmatmul.msk.bf16.gmra.mxu3 %vm326_vm1, %v3658_v22 }
 0x5f0   :  { %3152 = vrot.lane.b32.xlu1 %v11186_v10, %s6590_s20 }
 0x5f8   :  { %v855_v46 = vpop.xlane.xlu0 %854 }
 0x5f9   :  { %v871_v19 = vsub.f32 %v8031_v59, %v855_v46  ;;  %v888_v59 = vmul.f32 1.442695, %v874_v16  ;;  %v11217_v16 = vld [vmem:[#allocation84_spill] sm:$0xff] }
 0x5fb   :  { %v882_v37 = vmul.f32 1.442695, %v871_v19  ;;  %899 = vadd.xlane.f32.xlu0 %v898_v34 }
 0x5fd   :  { %6036 = vpow2.f32 %v882_v37 }
 0x600   :  { %v861_v44 = vpop.xlane.xlu0 %860 }
 0x601   :  { %v873_v22 = vsub.f32 %v8050_v28, %v861_v44 }
 0x603   :  { %v6037_v5 = vpop.eup %6036  ;;  %v886_v7 = vmul.f32 1.442695, %v873_v22  ;;  %v11215_v22 = vld [vmem:[#allocation48_spill] sm:$0xff] }
 0x604   :  { %v901_v26 = vsel %vm159_vm0, %v6037_v5, 0.0  ;;  %v917_v10 = vpack.c.bf16 %v6037_v5, %v6035_v20  ;;  %v2145_v5 = vsel %vm326_vm1, %v11215_v22, 0 }
 0x605   :  { %6038 = vpow2.f32 %v886_v7  ;;  %902 = vadd.xlane.f32.xlu2 %v901_v26  ;;  %v11216_v7 = vld [vmem:[#allocation77_spill] sm:$0xff] }
 0x606   :  { %5726 = vmatmul.msk.bf16.gmra.mxu0 %vm159_vm0, %v917_v10  ;;  %6040 = vpow2.f32 %v888_v59  ;;  %v11213_v10 = vld [vmem:[#allocation81_spill] sm:$0xff] }
 0x608   :  { %v867_v13 = vpop.xlane.xlu0 %866 }
 0x609   :  { %v875_v46 = vsub.f32 %v8090_v3, %v867_v13  ;;  %v2834_v3 = vsel %vm159_vm0, %v8126_v63, -inf  ;;  %v11218_v13 = vld [vmem:[#allocation82_spill] sm:$0xff] }
 0x60b   :  { %v6039_v19 = vpop.eup %6038  ;;  %v890_v34 = vmul.f32 1.442695, %v875_v46  ;;  %v11219_v46 = vld [vmem:[#allocation72_spill] sm:$0xff] }
 0x60c   :  { %v918_v37 = vpack.c.bf16 %v6039_v19, %v6033_v30  ;;  %v907_v28 = vsel %vm159_vm0, %v6039_v19, 0.0  ;;  %v6041_v43 = vpop.eup %6040  ;;  %v11214_v30 = vld [vmem:[#allocation28_spill] sm:$0xff] }
 0x60d   :  { %6042 = vpow2.f32 %v890_v34  ;;  %908 = vadd.xlane.f32.xlu0 %v907_v28  ;;  %v11220_v34 = vld [vmem:[#allocation75_spill] sm:$0xff] }
 0x60e   :  { %5727 = vmatmul.msk.bf16.vlgmr.msra.gmra.mxu1 %vm159_vm0, %v918_v37  ;;  %v11221_v37 = vld [vmem:[#allocation40_spill] sm:$0xff] }
 0x60f   :  { %1844 = vmatpush.bf16.msra.mxu1 %v11212_v27  ;;  %v2142_v28 = vsel %vm326_vm1, %v11221_v37, 0  ;;  %v11222_v27 = vld [vmem:[#allocation76_spill] sm:$0xff] }
 0x610   :  { %v8164_v20 = vpop.xlane.xlu0 %2397 }
 0x613   :  { %v6043_v26 = vpop.eup %6042  ;;  %1845 = vmatpush.bf16.msra.mxu1 %v11213_v10  ;;  %v11224_v10 = vld [vmem:[#allocation39_spill] sm:$0xff] }
 0x614   :  { %v919_v44 = vpack.c.bf16 %v6043_v26, %v6041_v43  ;;  %v913_v59 = vsel %vm159_vm0, %v6043_v26, 0.0  ;;  %v11223_v26 = vpack.c.bf16 %v7838_v31, %v7828_v45  ;;  %v11226_v45 = vld [vmem:[#allocation59_spill] sm:$0xff] }
 0x615   :  { %2835 = vmax.xlane.f32.xlu0 %v2834_v3  ;;  %v11225_v3 = vld [vmem:[#allocation41_spill] sm:$0xff]  ;;  %v2136_v31 = vsel %vm326_vm1, %v11226_v45, 0 }
 0x616   :  { %5728 = vmatmul.msk.bf16.vlgmr.msrb.gmra.mxu2 %vm159_vm0, %v919_v44  ;;  %5737 = vmatmul.msk.bf16.vlgmr.msra.gmra.mxu0 %vm326_vm1, %v11214_v30  ;;  %v2139_v30 = vsel %vm326_vm1, %v11225_v3, 0 }
 0x617   :  { %1614 = vmatpush.bf16.msrb.mxu2 %v11216_v7  ;;  %1846 = vmatpush.bf16.msra.mxu1 %v11217_v16  ;;  %v11229_v16 = vpack.c.bf16 %v7892_v23, %v7883_v60  ;;  %v1526_v60 = vsub.f32 %v7757_v35, %v7936_v49  ;;  %v11232_v23 = vld [vmem:[#allocation54_spill] sm:$0xff]  ;;  %v1529_v49 = vsub.f32 %v7788_v48, %v7964_v6 }
 0x618   :  { %2151 = vmatpush.bf16.xpose.msra.mxu0 %v2145_v5  ;;  %v8179_v19 = vpop.xlane.xlu0 %2403  ;;  %v11228_v5 = vld [vmem:[#allocation37_spill] sm:$0xff]  ;;  %v11239_v48 = vld [vmem:[#allocation58_spill] sm:$0xff] }
 0x619   :  { %v1540_v3 = vmul.f32 1.442695, %v1529_v49  ;;  %v1971_v49 = vsub.f32 %v7840_v52, %v7984_v14  ;;  %v8319_v52 = vpop.f32.mrf.mxu3 }
 0x61a   :  { %914 = vadd.xlane.f32.xlu1 %v913_v59 }
 0x61b   :  { %1847 = vmatpush.bf16.msra.mxu1 %v11218_v13  ;;  %1615 = vmatpush.bf16.msrb.mxu2 %v11219_v46  ;;  %v2589_v13 = vsel %vm326_vm1, %v11232_v23, 0  ;;  %v11233_v46 = vld [vmem:[#allocation32_spill] sm:$0xff] }
 0x61d   :  { %2922 = vrot.lane.b32.xlu2 %v7014_v53, %s6588_s18 }
 0x61f   :  { %1616 = vmatpush.bf16.msrb.mxu2 %v11220_v34  ;;  %v1534_v34 = vmul.f32 1.442695, %v1526_v60 }
 0x620   :  { %2152 = vmatpush.bf16.xpose.msra.mxu0 %v2142_v28  ;;  %v8195_v44 = vpop.xlane.xlu0 %2406  ;;  %v1528_v28 = vsub.f32 %v7778_v29, %v7970_v56  ;;  %v2580_v29 = vsel %vm326_vm1, %v11239_v48, 0 }
 0x623   :  { %1617 = vmatpush.bf16.msrb.mxu2 %v11222_v27  ;;  %v11237_v27 = vld [vmem:[#allocation34_spill] sm:$0xff] }
 0x625   :  { %3154 = vrot.lane.b32.xlu2 %v11169_v42, %s6590_s20 }
 0x626   :  { %5733 = vmatmul.msk.bf16.vlgmr.msra.gmra.mxu2 %vm159_vm0, %v11223_v26  ;;  %5738 = vmatmul.msk.bf16.gmra.mxu0 %vm326_vm1, %v11224_v10  ;;  %v11238_v26 = vld [vmem:[#allocation56_spill] sm:$0xff] }
 0x627   :  { %2058 = vmatpush.bf16.msra.mxu2 %v7603_v8  ;;  %v11227_v8 = vpack.c.bf16 %v7865_v58, %v7856_v4  ;;  %v910_v58 = vsel %vm159_vm0, %v6041_v43, 0.0  ;;  %v2583_v10 = vsel %vm326_vm1, %v11238_v26, 0 }
 0x628   :  { %2153 = vmatpush.bf16.xpose.msra.mxu0 %v2139_v30  ;;  %v8206_v22 = vpop.xlane.xlu0 %2409  ;;  %v1538_v30 = vmul.f32 1.442695, %v1528_v28  ;;  %v11253_v28 = vld [vmem:[#allocation57_spill] sm:$0xff] }
 0x629   :  { %2920 = vrot.lane.b32.xlu0 %v6994_v24, %s6588_s18 }
 0x62b   :  { %2059 = vmatpush.bf16.msra.mxu2 %v7573_v18 }
 0x62f   :  { %2060 = vmatpush.bf16.msra.mxu2 %v7611_v21  ;;  %v1089_v21 = vsub.f32 %v7748_v12, %v7958_v25  ;;  %v1527_v12 = vsub.f32 %v7765_v11, %v7960_v2  ;;  %v11234_v11 = vld [vmem:[#allocation50_spill] sm:$0xff] }
 0x630   :  { %2154 = vmatpush.bf16.xpose.msra.mxu0 %v2136_v31  ;;  %v8217_v18 = vpop.xlane.xlu0 %2412  ;;  %v2586_v2 = vsel %vm326_vm1, %v11234_v11, 0  ;;  %v1530_v31 = vsub.f32 %v7797_v32, %v7990_v39  ;;  %v1533_v32 = vsub.f32 %v7816_v57, %v7974_v40 }
 0x631   :  { %2918 = vrot.lane.b32.xlu0 %v6974_v1, %s6588_s18  ;;  %v1104_v4 = vmul.f32 1.442695, %v1089_v21  ;;  %v1536_v43 = vmul.f32 1.442695, %v1527_v12  ;;  %v8280_v21 = vpop.xlane.xlu2 %893  ;;  %v11248_v12 = vld [vmem:[#allocation49_spill] sm:$0xff] }
 0x632   :  { %11244 = vst [vmem:[#allocation48_spill] sm:$0xff] %v8280_v21 }
 0x633   :  { %2061 = vmatpush.bf16.msra.mxu2 %v7621_v47  ;;  %v11230_v47 = vld [vmem:[#allocation46_spill] sm:$0xff]  ;;  %6044 = vpow2.f32 %v1104_v4 }
 0x634   :  { %6046 = vpow2.f32 %v1536_v43 }
 0x635   :  { %6048 = vpow2.f32 %v1534_v34 }
 0x636   :  { %5734 = vmatmul.msk.bf16.gmra.mxu2 %vm159_vm0, %v11227_v8  ;;  %5739 = vmatmul.msk.bf16.gmra.mxu0 %vm326_vm1, %v11228_v5  ;;  %6050 = vpow2.f32 %v1540_v3  ;;  %v1542_v5 = vmul.f32 1.442695, %v1530_v31 }
 0x637   :  { %6052 = vpow2.f32 %v1538_v30  ;;  %v11254_v30 = vld [vmem:[#allocation68_spill] sm:$0xff] }
 0x638   :  { %v3033_v48 = vsel %vm326_vm1, %v11254_v30, 0 }
 0x639   :  { %v8229_v59 = vpop.eup %6044 }
 0x63a   :  { %11231 = vst [vmem:[#allocation45_spill] sm:$0xff] %v8229_v59  ;;  %v1133_v25 = vpack.c.bf16 %v8229_v59, %v7906_v41  ;;  %v8244_v41 = vpop.eup %6046 }
 0x63b   :  { %11235 = vst [vmem:[#allocation35_spill] sm:$0xff] %v8244_v41  ;;  %v8246_v35 = vpop.eup %6048 }
 0x63c   :  { %11236 = vst [vmem:[#allocation30_spill] sm:$0xff] %v8246_v35  ;;  %v1574_v37 = vpack.c.bf16 %v8244_v41, %v8246_v35  ;;  %v8264_v6 = vpop.eup %6050 }
 0x63d   :  { %11240 = vst [vmem:[#allocation74_spill] sm:$0xff] %v8264_v6  ;;  %v8268_v45 = vpop.eup %6052 }
 0x63e   :  { %11242 = vst [vmem:[#allocation28_spill] sm:$0xff] %v8268_v45 }
 0x643   :  { %v3660_v7 = vpop.permute.xlu0 %3659 }
 0x644   :  { %5828 = vmatmul.msk.bf16.gmra.mxu3 %vm326_vm1, %v3660_v7 }
 0x645   :  { %v8266_v56 = vpop.f32.mrf.mxu0 }
 0x646   :  { %5735 = vmatmul.msk.bf16.gmra.mxu2 %vm159_vm0, %v11229_v16  ;;  %5740 = vmatmul.msk.bf16.gmra.mxu0 %vm326_vm1, %v11230_v47  ;;  %11241 = vst [vmem:[#allocation81_spill] sm:$0xff] %v8266_v56  ;;  %v1532_v16 = vsub.f32 %v7810_v51, %v8002_v33 }
 0x648   :  { %v1546_v60 = vmul.f32 1.442695, %v1532_v16 }
 0x64d   :  { %v8282_v7 = vpop.f32.mrf.mxu0 }
 0x64e   :  { %911 = vadd.xlane.f32.xlu2 %v910_v58  ;;  %11245 = vst [vmem:[#allocation77_spill] sm:$0xff] %v8282_v7  ;;  %v1548_v58 = vmul.f32 1.442695, %v1533_v32 }
 0x656   :  { %5736 = vmatmul.msk.bf16.gmra.mxu2 %vm159_vm0, %v1133_v25  ;;  %5753 = vmatmul.msk.bf16.vlgmr.msrb.gmra.mxu0 %vm326_vm1, %v11233_v46  ;;  %v2925_v46 = vpop.permute.xlu1 %2924 }
 0x657   :  { %2595 = vmatpush.bf16.xpose.msrb.mxu0 %v2589_v13 }
 0x65f   :  { %2596 = vmatpush.bf16.xpose.msrb.mxu0 %v2586_v2 }
 0x666   :  { %5749 = vmatmul.msk.bf16.vlgmr.msrb.gmra.mxu2 %vm159_vm0, %v1574_v37  ;;  %5754 = vmatmul.msk.bf16.gmra.mxu0 %vm326_vm1, %v11237_v27  ;;  %v1970_v27 = vsub.f32 %v11253_v28, %v8019_v15  ;;  %v11256_v15 = vld [vmem:[#allocation51_spill] sm:$0xff]  ;;  %v11266_v28 = vld [vmem:[#allocation52_spill] sm:$0xff] }
 0x667   :  { %2502 = vmatpush.bf16.msrb.mxu2 %v8094_v17  ;;  %2597 = vmatpush.bf16.xpose.msrb.mxu0 %v2583_v10  ;;  %v1531_v17 = vsub.f32 %v7803_v62, %v7992_v0 }
 0x669   :  { %v1544_v8 = vmul.f32 1.442695, %v1531_v17  ;;  %v1978_v17 = vmul.f32 1.442695, %v1970_v27  ;;  %v11267_v27 = vld [vmem:[#allocation78_spill] sm:$0xff] }
 0x66b   :  { %2503 = vmatpush.bf16.msrb.mxu2 %v8048_v54  ;;  %v1575_v54 = vpack.c.bf16 %v8264_v6, %v8268_v45  ;;  %6054 = vpow2.f32 %v1544_v8 }
 0x66c   :  { %6056 = vpow2.f32 %v1542_v5  ;;  %v11258_v5 = vld [vmem:[#allocation69_spill] sm:$0xff] }
 0x66e   :  { %v900_v62 = vpop.xlane.xlu0 %899 }
 0x66f   :  { %2598 = vmatpush.bf16.xpose.msrb.mxu0 %v2580_v29  ;;  %2504 = vmatpush.bf16.msrb.mxu2 %v8106_v55  ;;  %v11243_v55 = vld [vmem:[#allocation38_spill] sm:$0xff]  ;;  %6058 = vrcp.f32 %v900_v62  ;;  %v1980_v29 = vmul.f32 1.442695, %v1971_v49  ;;  %v3030_v62 = vsel %vm326_vm1, %v11258_v5, 0 }
 0x671   :  { %v8284_v0 = vpop.eup %6054 }
 0x672   :  { %11246 = vst [vmem:[#allocation84_spill] sm:$0xff] %v8284_v0 }
 0x673   :  { %2505 = vmatpush.bf16.msrb.mxu2 %v8150_v9  ;;  %v8288_v9 = vpop.eup %6056 }
 0x674   :  { %11247 = vst [vmem:[#allocation82_spill] sm:$0xff] %v8288_v9  ;;  %v1576_v4 = vpack.c.bf16 %v8284_v0, %v8288_v9  ;;  %v11285_v9 = vld [vmem:[#allocation27_spill] sm:$0xff] }
 0x675   :  { %v6059_v25 = vpop.eup %6058 }
 0x676   :  { %5750 = vmatmul.msk.bf16.gmra.mxu2 %vm159_vm0, %v1575_v54  ;;  %5755 = vmatmul.msk.bf16.gmra.mxu0 %vm326_vm1, %v11243_v55  ;;  %v8326_v54 = vpop.xlane.xlu1 %896 }
 0x677   :  { %11257 = vst [vmem:[#allocation41_spill] sm:$0xff] %v8326_v54 }
 0x678   :  { %v903_v39 = vpop.xlane.xlu2 %902 }
 0x679   :  { %6060 = vrcp.f32 %v903_v39  ;;  %v8338_v39 = vpop.f32.mrf.mxu3 }
 0x67a   :  { %6062 = vpow2.f32 %v1548_v58 }
 0x67b   :  { %6064 = vpow2.f32 %v1546_v60 }
 0x67c   :  { %6066 = vpow2.f32 %v1980_v29  ;;  %v11269_v29 = vld [vmem:[#allocation118_spill] sm:$0xff] }
 0x67d   :  { %6068 = vpow2.f32 %v1978_v17 }
 0x67f   :  { %v6061_v40 = vpop.eup %6060 }
 0x680   :  { %v8297_v43 = vpop.eup %6062  ;;  %v8321_v14 = vpop.xlane.xlu0 %908 }
 0x681   :  { %11249 = vst [vmem:[#allocation72_spill] sm:$0xff] %v8297_v43  ;;  %v8303_v2 = vpop.eup %6064  ;;  %v8365_v17 = vpop.f32.mrf.mxu3 }
 0x682   :  { %11252 = vst [vmem:[#allocation76_spill] sm:$0xff] %v8303_v2  ;;  %v1577_v3 = vpack.c.bf16 %v8297_v43, %v8303_v2  ;;  %v8336_v32 = vpop.eup %6066  ;;  %v11284_v2 = vld [vmem:[#allocation124_spill] sm:$0xff] }
 0x683   :  { %v966_v47 = vpop.f32.mrf.mxu0  ;;  %11255 = vst [vmem:[#allocation39_spill] sm:$0xff] %v8321_v14  ;;  %v1977_v0 = vsub.f32 %v11285_v9, %v11284_v2 }
 0x684   :  { %v983_v57 = vmul.f32 %v6059_v25, %v966_v47  ;;  %11259 = vst [vmem:[#allocation59_spill] sm:$0xff] %v8336_v32  ;;  %v8342_v47 = vpop.eup %6068  ;;  %v11263_v25 = vld [vmem:[#allocation70_spill] sm:$0xff] }
 0x685   :  { %11260 = vst [vmem:[#allocation37_spill] sm:$0xff] %v8342_v47  ;;  %v1992_v14 = vmul.f32 1.442695, %v1977_v0 }
 0x686   :  { %5751 = vmatmul.msk.bf16.gmra.mxu2 %vm159_vm0, %v1576_v4  ;;  %5756 = vmatmul.msk.bf16.gmra.mxu0 %vm326_vm1, %v11248_v12  ;;  %v1205_v13 = vpack.c.bf16 %v983_v57, %v983_v57  ;;  %v8344_v4 = vpop.xlane.xlu1 %905  ;;  %v11262_v12 = vld [vmem:[#allocation113_spill] sm:$0xff]  ;;  %v11264_v57 = vld [vmem:[#allocation120_spill] sm:$0xff] }
 0x687   :  { %11261 = vst [vmem:[#allocation46_spill] sm:$0xff] %v8344_v4  ;;  %v1972_v60 = vsub.f32 %v11263_v25, %v11262_v12  ;;  %v11291_v4 = vld [vmem:[#allocation115_spill] sm:$0xff] }
 0x688   :  { %v8299_v34 = vunpack.c.l.b16 %v1205_v13  ;;  %v8340_v16 = vpop.xlane.xlu0 %2835 }
 0x689   :  { %v1982_v49 = vmul.f32 1.442695, %v1972_v60  ;;  %v11270_v60 = vld [vmem:[#allocation79_spill] sm:$0xff] }
 0x68a   :  { %11250 = vst [vmem:[#allocation75_spill] sm:$0xff] %v8299_v34 }
 0x68b   :  { %v968_v23 = vpop.f32.mrf.mxu0 }
 0x68c   :  { %v984_v33 = vmul.f32 %v6061_v40, %v968_v23  ;;  %v11265_v40 = vld [vmem:[#allocation43_spill] sm:$0xff] }
 0x68d   :  { %v1973_v23 = vsub.f32 %v11265_v40, %v11264_v57  ;;  %v3024_v57 = vsel %vm326_vm1, %v11270_v60, 0  ;;  %v11276_v60 = vld [vmem:[#allocation62_spill] sm:$0xff] }
 0x68e   :  { %v1206_v51 = vpack.c.bf16 %v984_v33, %v984_v33  ;;  %v2018_v33 = vpack.c.bf16 %v8336_v32, %v8342_v47  ;;  %v8367_v5 = vpop.xlane.xlu1 %2838  ;;  %v11357_v32 = vld [vmem:[#allocation129_spill] sm:$0xff] }
 0x68f   :  { %v1984_v30 = vmul.f32 1.442695, %v1973_v23 }
 0x690   :  { %v8301_v11 = vunpack.c.l.b16 %v1206_v51 }
 0x692   :  { %11251 = vst [vmem:[#allocation40_spill] sm:$0xff] %v8301_v11 }
 0x693   :  { %v8311_v26 = vpop.f32.mrf.mxu0 }
 0x694   :  { %v1288_v10 = vsel %vm159_vm0, %v8311_v26, -inf }
 0x695   :  { %1289 = vmax.xlane.f32.xlu0 %v1288_v10  ;;  %v3027_v10 = vsel %vm326_vm1, %v11267_v27, 0 }
 0x696   :  { %5752 = vmatmul.msk.bf16.gmra.mxu2 %vm159_vm0, %v1577_v3  ;;  %5769 = vmatmul.msk.bf16.vlgmr.msra.gmra.mxu0 %vm326_vm1, %v11256_v15  ;;  %v11268_v3 = vld [vmem:[#allocation114_spill] sm:$0xff] }
 0x697   :  { %3039 = vmatpush.bf16.xpose.msra.mxu0 %v3033_v48  ;;  %6070 = vrcp.f32 %v11268_v3  ;;  %v11274_v3 = vld [vmem:[#allocation44_spill] sm:$0xff] }
 0x698   :  { %6072 = vrcp.f32 %v11269_v29  ;;  %v8381_v29 = vpop.permute.xlu1 %3152 }
 0x699   :  { %v8328_v31 = vpop.f32.mrf.mxu2  ;;  %6074 = vpow2.f32 %v1982_v49 }
 0x69a   :  { %6076 = vpow2.f32 %v1984_v30 }
 0x69b   :  { %v8330_v55 = vpop.f32.mrf.mxu0  ;;  %v2921_v48 = vpop.permute.xlu0 %2920 }
 0x69c   :  { %v1291_v8 = vsel %vm159_vm0, %v8330_v55, -inf }
 0x69d   :  { %1292 = vmax.xlane.f32.xlu1 %v1291_v8  ;;  %v2923_v8 = vpop.permute.xlu2 %2922  ;;  %v6071_v25 = vpop.eup %6070 }
 0x69e   :  { %v6073_v40 = vpop.eup %6072 }
 0x69f   :  { %3040 = vmatpush.bf16.xpose.msra.mxu0 %v3030_v62  ;;  %v8375_v23 = vpop.eup %6074 }
 0x6a0   :  { %11271 = vst [vmem:[#allocation54_spill] sm:$0xff] %v8375_v23 }
 0x6a1   :  { %v8346_v58 = vpop.f32.mrf.mxu2 }
 0x6a3   :  { %v8352_v13 = vpop.f32.mrf.mxu0  ;;  %v2919_v49 = vpop.permute.xlu0 %2918 }
 0x6a4   :  { %v1294_v51 = vsel %vm159_vm0, %v8352_v13, -inf }
 0x6a5   :  { %1295 = vmax.xlane.f32.xlu2 %v1294_v51 }
 0x6a6   :  { %5765 = vmatmul.msk.bf16.vlgmr.msra.gmra.mxu2 %vm159_vm0, %v2018_v33  ;;  %5770 = vmatmul.msk.bf16.gmra.mxu0 %vm326_vm1, %v11266_v28  ;;  %v8377_v33 = vpop.eup %6076 }
 0x6a7   :  { %2946 = vmatpush.bf16.msra.mxu2 %v2925_v46  ;;  %3041 = vmatpush.bf16.xpose.msra.mxu0 %v3027_v10  ;;  %11272 = vst [vmem:[#allocation32_spill] sm:$0xff] %v8377_v33  ;;  %v11273_v10 = vld [vmem:[#allocation117_spill] sm:$0xff] }
 0x6a8   :  { %v1975_v30 = vsub.f32 %v11274_v3, %v11273_v10 }
 0x6a9   :  { %v1175_v15 = vpop.f32.mrf.mxu2 }
 0x6aa   :  { %v1195_v46 = vmul.f32 %v6071_v25, %v1175_v15  ;;  %v11275_v25 = vld [vmem:[#allocation122_spill] sm:$0xff]  ;;  %v1988_v10 = vmul.f32 1.442695, %v1975_v30 }
 0x6ab   :  { %2947 = vmatpush.bf16.msra.mxu2 %v2923_v8  ;;  %v8369_v62 = vpop.f32.mrf.mxu0 }
 0x6ac   :  { %v1297_v12 = vsel %vm159_vm0, %v8369_v62, -inf  ;;  %v1211_v28 = vpack.c.bf16 %v1195_v46, %v1195_v46  ;;  %v8391_v46 = vpop.f32.mrf.mxu3 }
 0x6ad   :  { %1298 = vmax.xlane.f32.xlu0 %v1297_v12  ;;  %v2019_v12 = vpack.c.bf16 %v8377_v33, %v8375_v23  ;;  %v11343_v23 = vld [vmem:[#allocation93_spill] sm:$0xff] }
 0x6af   :  { %2948 = vmatpush.bf16.msra.mxu2 %v2921_v48  ;;  %3042 = vmatpush.bf16.xpose.msra.mxu0 %v3024_v57  ;;  %v1974_v57 = vsub.f32 %v11276_v60, %v11275_v25  ;;  %v8403_v25 = vpop.permute.xlu2 %3154 }
 0x6b1   :  { %v1177_v51 = vpop.f32.mrf.mxu2  ;;  %v1986_v37 = vmul.f32 1.442695, %v1974_v57 }
 0x6b2   :  { %v1196_v27 = vmul.f32 %v6073_v40, %v1177_v51  ;;  %v8393_v40 = vunpack.c.l.b16 %v1211_v28  ;;  %v915_v28 = vpop.xlane.xlu1 %914 }
 0x6b3   :  { %2949 = vmatpush.bf16.msra.mxu2 %v2919_v49  ;;  %v8383_v15 = vpop.f32.mrf.mxu0  ;;  %v11279_v49 = vld [vmem:[#allocation64_spill] sm:$0xff] }
 0x6b4   :  { %v1212_v8 = vpack.c.bf16 %v1196_v27, %v1196_v27  ;;  %v1300_v48 = vsel %vm159_vm0, %v8383_v15, -inf  ;;  %11277 = vst [vmem:[#allocation50_spill] sm:$0xff] %v8393_v40  ;;  %v11280_v27 = vld [vmem:[#allocation110_spill] sm:$0xff] }
 0x6b5   :  { %1301 = vmax.xlane.f32.xlu1 %v1300_v48  ;;  %6078 = vrcp.f32 %v11280_v27  ;;  %v11281_v48 = vld [vmem:[#allocation121_spill] sm:$0xff]  ;;  %v8412_v27 = vpop.f32.mrf.mxu3 }
 0x6b6   :  { %v8395_v51 = vunpack.c.l.b16 %v1212_v8  ;;  %5766 = vmatmul.msk.bf16.gmra.mxu2 %vm159_vm0, %v2019_v12  ;;  %5771 = vmatmul.msk.bf16.gmra.mxu0 %vm326_vm1, %v11279_v49  ;;  %6080 = vrcp.f32 %v11281_v48  ;;  %v2840_v12 = vsel %vm159_vm0, %v8319_v52, -inf  ;;  %v2852_v45 = vsel %vm159_vm0, %v8412_v27, -inf }
 0x6b7   :  { %6082 = vpow2.f32 %v1988_v10 }
 0x6b8   :  { %11278 = vst [vmem:[#allocation34_spill] sm:$0xff] %v8395_v51  ;;  %6084 = vpow2.f32 %v1986_v37 }
 0x6b9   :  { %v1180_v60 = vpop.f32.mrf.mxu2  ;;  %6086 = vrcp.f32 %v915_v28 }
 0x6bb   :  { %v8406_v8 = vpop.f32.mrf.mxu0  ;;  %v6079_v30 = vpop.eup %6078 }
 0x6bc   :  { %v1303_v49 = vsel %vm159_vm0, %v8406_v8, -inf  ;;  %v1197_v57 = vmul.f32 %v6079_v30, %v1180_v60  ;;  %v6081_v3 = vpop.eup %6080 }
 0x6bd   :  { %2841 = vmax.xlane.f32.xlu1 %v2840_v12  ;;  %1304 = vmax.xlane.f32.xlu2 %v1303_v49  ;;  %v8414_v48 = vpop.eup %6082  ;;  %v2849_v49 = vsel %vm159_vm0, %v8391_v46, -inf }
 0x6be   :  { %11282 = vst [vmem:[#allocation56_spill] sm:$0xff] %v8414_v48  ;;  %v1213_v51 = vpack.c.bf16 %v1197_v57, %v1197_v57  ;;  %v8416_v43 = vpop.eup %6084 }
 0x6bf   :  { %11283 = vst [vmem:[#allocation58_spill] sm:$0xff] %v8416_v43  ;;  %v6087_v12 = vpop.eup %6086  ;;  %v2020_v30 = vpack.c.bf16 %v8414_v48, %v8416_v43  ;;  %v11297_v43 = vld [vmem:[#allocation132_spill] sm:$0xff] }
 0x6c0   :  { %v8431_v9 = vunpack.c.l.b16 %v1213_v51 }
 0x6c1   :  { %v1182_v10 = vpop.f32.mrf.mxu2  ;;  %v912_v40 = vpop.xlane.xlu2 %911 }
 0x6c2   :  { %v1198_v59 = vmul.f32 %v6081_v3, %v1182_v10  ;;  %6088 = vrcp.f32 %v912_v40  ;;  %v11286_v3 = vld [vmem:[#allocation126_spill] sm:$0xff]  ;;  %v11287_v40 = vld [vmem:[#allocation33_spill] sm:$0xff]  ;;  %v988_v10 = vmul.f32 %v6087_v12, %v8346_v58  ;;  %11288 = vst [vmem:[#allocation38_spill] sm:$0xff] %v8431_v9  ;;  %v8441_v58 = vpop.f32.mrf.mxu3 }
 0x6c3   :  { %v8420_v37 = vpop.f32.mrf.mxu0  ;;  %v1976_v57 = vsub.f32 %v11287_v40, %v11286_v3  ;;  %6090 = vrcp.f32 %v11291_v4  ;;  %v2855_v0 = vsel %vm159_vm0, %v8441_v58, -inf }
 0x6c4   :  { %v1214_v28 = vpack.c.bf16 %v1198_v59, %v1198_v59  ;;  %v1306_v60 = vsel %vm159_vm0, %v8420_v37, -inf  ;;  %v11290_v59 = vld [vmem:[#allocation55_spill] sm:$0xff]  ;;  %v1210_v12 = vpack.c.bf16 %v988_v10, %v988_v10 }
 0x6c5   :  { %1307 = vmax.xlane.f32.xlu0 %v1306_v60  ;;  %2850 = vmax.xlane.f32.xlu1 %v2849_v49  ;;  %v1990_v40 = vmul.f32 1.442695, %v1976_v57  ;;  %v11292_v60 = vld [vmem:[#allocation123_spill] sm:$0xff] }
 0x6c6   :  { %v8433_v2 = vunpack.c.l.b16 %v1214_v28  ;;  %5767 = vmatmul.msk.bf16.gmra.mxu2 %vm159_vm0, %v2020_v30  ;;  %5772 = vmatmul.msk.bf16.gmra.mxu0 %vm326_vm1, %v11290_v59  ;;  %6092 = vrcp.f32 %v11292_v60  ;;  %v8451_v57 = vunpack.c.l.b16 %v1210_v12 }
 0x6c7   :  { %6094 = vpow2.f32 %v1992_v14 }
 0x6c8   :  { %11289 = vst [vmem:[#allocation49_spill] sm:$0xff] %v8433_v2  ;;  %v6089_v48 = vpop.eup %6088  ;;  %6096 = vpow2.f32 %v1990_v40  ;;  %v11298_v40 = vld [vmem:[#allocation25_spill] sm:$0xff] }
 0x6c9   :  { %v987_v51 = vmul.f32 %v6089_v48, %v8328_v31  ;;  %v1185_v28 = vpop.f32.mrf.mxu2  ;;  %v6091_v59 = vpop.eup %6090  ;;  %11293 = vst [vmem:[#allocation57_spill] sm:$0xff] %v8451_v57  ;;  %v2415_v12 = vsub.f32 %v11298_v40, %v11297_v43  ;;  %v11304_v43 = vld [vmem:[#allocation60_spill] sm:$0xff] }
 0x6ca   :  { %v1199_v48 = vmul.f32 %v6091_v59, %v1185_v28  ;;  %v11300_v59 = vld [vmem:[#allocation65_spill] sm:$0xff] }
 0x6cb   :  { %v1209_v49 = vpack.c.bf16 %v987_v51, %v987_v51  ;;  %v8445_v30 = vpop.f32.mrf.mxu0 }
 0x6cc   :  { %v1309_v4 = vsel %vm159_vm0, %v8445_v30, -inf  ;;  %v6093_v10 = vpop.eup %6092  ;;  %v1215_v3 = vpack.c.bf16 %v1199_v48, %v1199_v48  ;;  %v11301_v48 = vld [vmem:[#allocation91_spill] sm:$0xff] }
 0x6cd   :  { %2856 = vmax.xlane.f32.xlu1 %v2855_v0  ;;  %1310 = vmax.xlane.f32.xlu2 %v1309_v4  ;;  %v8453_v31 = vunpack.c.l.b16 %v1209_v49  ;;  %v8457_v51 = vpop.eup %6094  ;;  %v11299_v4 = vld [vmem:[#allocation128_spill] sm:$0xff] }
 0x6ce   :  { %11295 = vst [vmem:[#allocation51_spill] sm:$0xff] %v8457_v51  ;;  %v8459_v2 = vpop.eup %6096  ;;  %v2414_v14 = vsub.f32 %v11300_v59, %v11299_v4  ;;  %v11308_v59 = vld [vmem:[#allocation125_spill] sm:$0xff] }
 0x6cf   :  { %11294 = vst [vmem:[#allocation68_spill] sm:$0xff] %v8453_v31  ;;  %v2021_v49 = vpack.c.bf16 %v8457_v51, %v8459_v2 }
 0x6d0   :  { %11296 = vst [vmem:[#allocation69_spill] sm:$0xff] %v8459_v2  ;;  %v2422_v2 = vmul.f32 1.442695, %v2414_v14 }
 0x6d1   :  { %v1187_v60 = vpop.f32.mrf.mxu2 }
 0x6d2   :  { %v1200_v9 = vmul.f32 %v6093_v10, %v1187_v60  ;;  %v3477_v10 = vsel %vm326_vm1, %v11301_v48, 0  ;;  %v8473_v60 = vunpack.c.l.b16 %v1215_v3  ;;  %v2416_v48 = vsub.f32 %v11308_v59, %v8164_v20 }
 0x6d3   :  { %v8463_v6 = vpop.f32.mrf.mxu0 }
 0x6d4   :  { %v1216_v0 = vpack.c.bf16 %v1200_v9, %v1200_v9  ;;  %v1732_v28 = vsel %vm159_vm0, %v8463_v6, -inf  ;;  %11302 = vst [vmem:[#allocation113_spill] sm:$0xff] %v8473_v60  ;;  %v2424_v9 = vmul.f32 1.442695, %v2415_v12 }
 0x6d5   :  { %1733 = vmax.xlane.f32.xlu2 %v1732_v28 }
 0x6d6   :  { %v8475_v31 = vunpack.c.l.b16 %v1216_v0  ;;  %5768 = vmatmul.msk.bf16.gmra.mxu2 %vm159_vm0, %v2021_v49  ;;  %5785 = vmatmul.msk.bf16.vlgmr.msrb.gmra.mxu0 %vm326_vm1, %v11304_v43  ;;  %6098 = vpow2.f32 %v2424_v9  ;;  %v11305_v0 = vld [vmem:[#allocation90_spill] sm:$0xff]  ;;  %v11309_v43 = vld [vmem:[#allocation127_spill] sm:$0xff] }
 0x6d7   :  { %3483 = vmatpush.bf16.xpose.msrb.mxu0 %v3477_v10  ;;  %6100 = vpow2.f32 %v2422_v2  ;;  %v3474_v49 = vsel %vm326_vm1, %v11305_v0, 0  ;;  %v2417_v9 = vsub.f32 %v11309_v43, %v8128_v36  ;;  %v11311_v0 = vld [vmem:[#allocation94_spill] sm:$0xff]  ;;  %v11312_v36 = vld [vmem:[#allocation95_spill] sm:$0xff] }
 0x6d8   :  { %11303 = vst [vmem:[#allocation70_spill] sm:$0xff] %v8475_v31  ;;  %v3471_v20 = vsel %vm326_vm1, %v11311_v0, 0 }
 0x6d9   :  { %v2428_v59 = vmul.f32 1.442695, %v2417_v9 }
 0x6db   :  { %v8482_v28 = vpop.f32.mrf.mxu0 }
 0x6dc   :  { %v1735_v3 = vsel %vm159_vm0, %v8482_v28, -inf  ;;  %v8488_v4 = vpop.eup %6098 }
 0x6dd   :  { %1736 = vmax.xlane.f32.xlu0 %v1735_v3  ;;  %11306 = vst [vmem:[#allocation120_spill] sm:$0xff] %v8488_v4  ;;  %v8490_v12 = vpop.eup %6100  ;;  %v11310_v3 = vld [vmem:[#allocation73_spill] sm:$0xff] }
 0x6de   :  { %11307 = vst [vmem:[#allocation43_spill] sm:$0xff] %v8490_v12  ;;  %v2462_v10 = vpack.c.bf16 %v8488_v4, %v8490_v12 }
 0x6df   :  { %3484 = vmatpush.bf16.xpose.msrb.mxu0 %v3474_v49  ;;  %v2426_v49 = vmul.f32 1.442695, %v2416_v48  ;;  %v11315_v48 = vld [vmem:[#allocation133_spill] sm:$0xff] }
 0x6e1   :  { %6102 = vpow2.f32 %v2426_v49 }
 0x6e2   :  { %6104 = vpow2.f32 %v2428_v59  ;;  %v11317_v59 = vld [vmem:[#allocation66_spill] sm:$0xff] }
 0x6e3   :  { %v8494_v14 = vpop.f32.mrf.mxu0 }
 0x6e4   :  { %v1738_v2 = vsel %vm159_vm0, %v8494_v14, -inf }
 0x6e5   :  { %1739 = vmax.xlane.f32.xlu2 %v1738_v2 }
 0x6e6   :  { %5781 = vmatmul.msk.bf16.vlgmr.msrb.gmra.mxu2 %vm159_vm0, %v2462_v10  ;;  %5786 = vmatmul.msk.bf16.gmra.mxu0 %vm326_vm1, %v11310_v3  ;;  %v3468_v10 = vsel %vm326_vm1, %v11312_v36, 0  ;;  %v2419_v3 = vsub.f32 %v11315_v48, %v8195_v44 }
 0x6e7   :  { %3485 = vmatpush.bf16.xpose.msrb.mxu0 %v3471_v20  ;;  %v8513_v2 = vpop.eup %6102 }
 0x6e8   :  { %11313 = vst [vmem:[#allocation52_spill] sm:$0xff] %v8513_v2  ;;  %v8515_v43 = vpop.eup %6104  ;;  %v2432_v36 = vmul.f32 1.442695, %v2419_v3 }
 0x6e9   :  { %11314 = vst [vmem:[#allocation78_spill] sm:$0xff] %v8515_v43  ;;  %v2463_v20 = vpack.c.bf16 %v8515_v43, %v8513_v2 }
 0x6ea   :  { %6106 = vpow2.f32 %v2432_v36 }
 0x6eb   :  { %v8507_v40 = vpop.f32.mrf.mxu0 }
 0x6ec   :  { %v1741_v60 = vsel %vm159_vm0, %v8507_v40, -inf }
 0x6ed   :  { %1742 = vmax.xlane.f32.xlu0 %v1741_v60  ;;  %v11316_v60 = vld [vmem:[#allocation131_spill] sm:$0xff] }
 0x6ee   :  { %v2418_v49 = vsub.f32 %v11316_v60, %v8179_v19  ;;  %v2421_v19 = vsub.f32 %v8116_v61, %v8217_v18  ;;  %v11320_v60 = vld [vmem:[#allocation134_spill] sm:$0xff] }
 0x6ef   :  { %3486 = vmatpush.bf16.xpose.msrb.mxu0 %v3468_v10 }
 0x6f0   :  { %v2430_v10 = vmul.f32 1.442695, %v2418_v49  ;;  %v8534_v31 = vpop.eup %6106  ;;  %v2420_v49 = vsub.f32 %v11320_v60, %v8206_v22  ;;  %v2436_v36 = vmul.f32 1.442695, %v2421_v19 }
 0x6f1   :  { %11318 = vst [vmem:[#allocation114_spill] sm:$0xff] %v8534_v31 }
 0x6f2   :  { %6108 = vpow2.f32 %v2430_v10  ;;  %v8551_v10 = vpop.f32.mrf.mxu2  ;;  %v2434_v61 = vmul.f32 1.442695, %v2420_v49 }
 0x6f3   :  { %v8519_v9 = vpop.f32.mrf.mxu0  ;;  %11322 = vst [vmem:[#allocation79_spill] sm:$0xff] %v8551_v10  ;;  %6110 = vpow2.f32 %v2436_v36 }
 0x6f4   :  { %v1744_v0 = vsel %vm159_vm0, %v8519_v9, -inf  ;;  %6112 = vpow2.f32 %v2434_v61  ;;  %v11326_v61 = vld [vmem:[#allocation21_spill] sm:$0xff] }
 0x6f5   :  { %1745 = vmax.xlane.f32.xlu2 %v1744_v0 }
 0x6f6   :  { %5782 = vmatmul.msk.bf16.gmra.mxu2 %vm159_vm0, %v2463_v20  ;;  %5787 = vmatmul.msk.bf16.gmra.mxu0 %vm326_vm1, %v11317_v59  ;;  %v11321_v59 = vld [vmem:[#allocation80_spill] sm:$0xff] }
 0x6f8   :  { %v8536_v51 = vpop.eup %6108 }
 0x6f9   :  { %11319 = vst [vmem:[#allocation118_spill] sm:$0xff] %v8536_v51  ;;  %v2464_v20 = vpack.c.bf16 %v8534_v31, %v8536_v51  ;;  %v11340_v51 = vld [vmem:[#allocation89_spill] sm:$0xff] }
 0x6fa   :  { %v8561_v60 = vpop.f32.mrf.mxu2 }
 0x6fb   :  { %v8530_v44 = vpop.f32.mrf.mxu0  ;;  %11324 = vst [vmem:[#allocation44_spill] sm:$0xff] %v8561_v60 }
 0x6fc   :  { %v1747_v48 = vsel %vm159_vm0, %v8530_v44, -inf }
 0x6fd   :  { %1748 = vmax.xlane.f32.xlu2 %v1747_v48 }
 0x703   :  { %v8540_v0 = vpop.f32.mrf.mxu0 }
 0x704   :  { %v1750_v3 = vsel %vm159_vm0, %v8540_v0, -inf }
 0x705   :  { %1751 = vmax.xlane.f32.xlu0 %v1750_v3 }
 0x706   :  { %5783 = vmatmul.msk.bf16.gmra.mxu2 %vm159_vm0, %v2464_v20  ;;  %5788 = vmatmul.msk.bf16.gmra.mxu0 %vm326_vm1, %v11321_v59  ;;  %v8558_v20 = vpop.eup %6110  ;;  %v2858_v59 = vsub.f32 %v8126_v63, %v8340_v16  ;;  %v11327_v63 = vld [vmem:[#allocation87_spill] sm:$0xff] }
 0x707   :  { %11323 = vst [vmem:[#allocation117_spill] sm:$0xff] %v8558_v20  ;;  %v8563_v49 = vpop.eup %6112 }
 0x708   :  { %v1290_v18 = vpop.xlane.xlu0 %1289  ;;  %11325 = vst [vmem:[#allocation122_spill] sm:$0xff] %v8563_v49  ;;  %v2866_v16 = vmul.f32 1.442695, %v2858_v59  ;;  %v11331_v59 = vld [vmem:[#allocation92_spill] sm:$0xff] }
 0x709   :  { %v1312_v57 = vsub.f32 %v8311_v26, %v1290_v18 }
 0x70b   :  { %v8553_v48 = vpop.f32.mrf.mxu0  ;;  %v1320_v22 = vmul.f32 1.442695, %v1312_v57  ;;  %v2465_v57 = vpack.c.bf16 %v8558_v20, %v8563_v49 }
 0x70c   :  { %v1753_v31 = vsel %vm159_vm0, %v8553_v48, -inf }
 0x70d   :  { %1754 = vmax.xlane.f32.xlu1 %v1753_v31  ;;  %6114 = vpow2.f32 %v1320_v22 }
 0x710   :  { %v1293_v3 = vpop.xlane.xlu1 %1292 }
 0x711   :  { %v1313_v19 = vsub.f32 %v8330_v55, %v1293_v3  ;;  %v2859_v55 = vsub.f32 %v8137_v50, %v8367_v5  ;;  %v11328_v3 = vld [vmem:[#allocation22_spill] sm:$0xff]  ;;  %v8588_v5 = vpop.f32.mrf.mxu2 }
 0x712   :  { %11330 = vst [vmem:[#allocation64_spill] sm:$0xff] %v8588_v5  ;;  %v11334_v5 = vld [vmem:[#allocation96_spill] sm:$0xff] }
 0x713   :  { %v1322_v36 = vmul.f32 1.442695, %v1313_v19  ;;  %v8567_v26 = vpop.f32.mrf.mxu0  ;;  %v2868_v18 = vmul.f32 1.442695, %v2859_v55  ;;  %v8582_v19 = vpop.eup %6114 }
 0x714   :  { %v2176_v31 = vsel %vm159_vm0, %v8567_v26, -inf  ;;  %11329 = vst [vmem:[#allocation62_spill] sm:$0xff] %v8582_v19 }
 0x715   :  { %6116 = vpow2.f32 %v1322_v36  ;;  %2177 = vmax.xlane.f32.xlu1 %v2176_v31  ;;  %3148 = vrot.lane.b32.xlu2 %v11326_v61, %s6590_s20 }
 0x716   :  { %5784 = vmatmul.msk.bf16.gmra.mxu2 %vm159_vm0, %v2465_v57  ;;  %5801 = vmatmul.msk.bf16.vlgmr.msra.gmra.mxu0 %vm326_vm1, %v11327_v63  ;;  %6118 = vpow2.f32 %v2866_v16 }
 0x717   :  { %6120 = vpow2.f32 %v2868_v18 }
 0x718   :  { %v1296_v22 = vpop.xlane.xlu2 %1295 }
 0x719   :  { %3150 = vrot.lane.b32.xlu0 %v11328_v3, %s6590_s20  ;;  %v1314_v31 = vsub.f32 %v8352_v13, %v1296_v22  ;;  %v8607_v22 = vpop.f32.mrf.mxu2 }
 0x71a   :  { %11335 = vst [vmem:[#allocation124_spill] sm:$0xff] %v8607_v22 }
 0x71b   :  { %v8584_v60 = vpop.eup %6116  ;;  %v8586_v50 = vpop.f32.mrf.mxu0  ;;  %v1324_v57 = vmul.f32 1.442695, %v1314_v31 }
 0x71c   :  { %v1360_v36 = vpack.c.bf16 %v8584_v60, %v8582_v19  ;;  %v8595_v63 = vpop.eup %6118 }
 0x71d   :  { %11332 = vst [vmem:[#allocation110_spill] sm:$0xff] %v8595_v63  ;;  %v8598_v10 = vpop.eup %6120  ;;  %6122 = vpow2.f32 %v1324_v57  ;;  %v11339_v57 = vld [vmem:[#allocation97_spill] sm:$0xff] }
 0x71e   :  { %5741 = vmatmul.msk.bf16.vlgmr.msrb.gmra.mxu1 %vm159_vm0, %v1360_v36  ;;  %11333 = vst [vmem:[#allocation121_spill] sm:$0xff] %v8598_v10  ;;  %v2906_v13 = vpack.c.bf16 %v8598_v10, %v8595_v63  ;;  %v11337_v36 = vld [vmem:[#allocation98_spill] sm:$0xff]  ;;  %v11349_v10 = vld [vmem:[#allocation135_spill] sm:$0xff] }
 0x71f   :  { %2288 = vmatpush.bf16.msrb.mxu1 %v11331_v59 }
 0x720   :  { %v1299_v55 = vpop.xlane.xlu0 %1298 }
 0x721   :  { %v1315_v16 = vsub.f32 %v8369_v62, %v1299_v55  ;;  %v11336_v62 = vld [vmem:[#allocation85_spill] sm:$0xff]  ;;  %v8790_v54 = vpop.f32.mrf.mxu2 }
 0x722   :  { %11360 = vst [vmem:[#allocation91_spill] sm:$0xff] %v8790_v54  ;;  %v8803_v54 = vpop.f32.mrf.mxu1 }
 0x723   :  { %v1326_v49 = vmul.f32 1.442695, %v1315_v16  ;;  %2289 = vmatpush.bf16.msrb.mxu1 %v11334_v5  ;;  %v8601_v20 = vpop.f32.mrf.mxu0  ;;  %v8613_v31 = vpop.eup %6122  ;;  %11361 = vst [vmem:[#allocation60_spill] sm:$0xff] %v8803_v54 }
 0x724   :  { %v2182_v18 = vsel %vm159_vm0, %v8601_v20, -inf  ;;  %11338 = vst [vmem:[#allocation27_spill] sm:$0xff] %v8613_v31 }
 0x725   :  { %6124 = vpow2.f32 %v1326_v49  ;;  %2183 = vmax.xlane.f32.xlu1 %v2182_v18 }
 0x726   :  { %5797 = vmatmul.msk.bf16.vlgmr.msra.gmra.mxu2 %vm159_vm0, %v2906_v13  ;;  %5802 = vmatmul.msk.bf16.gmra.mxu0 %vm326_vm1, %v11336_v62 }
 0x727   :  { %2290 = vmatpush.bf16.msrb.mxu1 %v11337_v36 }
 0x728   :  { %v1302_v5 = vpop.xlane.xlu1 %1301 }
 0x729   :  { %v1316_v49 = vsub.f32 %v8383_v15, %v1302_v5 }
 0x72b   :  { %v8615_v59 = vpop.eup %6124  ;;  %2291 = vmatpush.bf16.msrb.mxu1 %v11339_v57  ;;  %v8618_v55 = vpop.f32.mrf.mxu0  ;;  %v1328_v13 = vmul.f32 1.442695, %v1316_v49 }
 0x72c   :  { %v1361_v16 = vpack.c.bf16 %v8615_v59, %v8613_v31  ;;  %v8629_v57 = vpop.f32.mrf.mxu3 }
 0x72d   :  { %6126 = vpow2.f32 %v1328_v13  ;;  %v2179_v13 = vsel %vm159_vm0, %v8586_v50, -inf }
 0x72e   :  { %5742 = vmatmul.msk.bf16.gmra.mxu1 %vm159_vm0, %v1361_v16 }
 0x730   :  { %v1305_v18 = vpop.xlane.xlu2 %1304 }
 0x731   :  { %v1317_v62 = vsub.f32 %v8406_v8, %v1305_v18  ;;  %v11342_v18 = vld [vmem:[#allocation26_spill] sm:$0xff] }
 0x733   :  { %v1330_v36 = vmul.f32 1.442695, %v1317_v62  ;;  %v8625_v22 = vpop.f32.mrf.mxu0  ;;  %v8631_v5 = vpop.eup %6126 }
 0x734   :  { %11341 = vst [vmem:[#allocation126_spill] sm:$0xff] %v8631_v5  ;;  %v8646_v43 = vpop.f32.mrf.mxu3 }
 0x735   :  { %6128 = vpow2.f32 %v1330_v36 }
 0x736   :  { %5803 = vmatmul.msk.bf16.gmra.mxu0 %vm326_vm1, %v11340_v51 }
 0x738   :  { %v1308_v15 = vpop.xlane.xlu0 %1307 }
 0x739   :  { %v1318_v49 = vsub.f32 %v8420_v37, %v1308_v15  ;;  %v2843_v37 = vsel %vm159_vm0, %v8338_v39, -inf }
 0x73b   :  { %v8633_v2 = vpop.eup %6128  ;;  %v8635_v16 = vpop.f32.mrf.mxu0  ;;  %v1332_v51 = vmul.f32 1.442695, %v1318_v49 }
 0x73c   :  { %v1362_v8 = vpack.c.bf16 %v8633_v2, %v8631_v5 }
 0x73d   :  { %6130 = vpow2.f32 %v1332_v51 }
 0x73e   :  { %3368 = vrot.lane.b32.xlu1 %v11342_v18, %s6590_s20  ;;  %2180 = vmax.xlane.f32.xlu2 %v2179_v13  ;;  %v3281_v13 = vsel %vm159_vm0, %v8646_v43, -inf }
 0x73f   :  { %5743 = vmatmul.msk.bf16.gmra.mxu1 %vm159_vm0, %v1362_v8  ;;  %v2846_v8 = vsel %vm159_vm0, %v8365_v17, -inf }
 0x740   :  { %v1311_v62 = vpop.xlane.xlu2 %1310 }
 0x741   :  { %v1319_v36 = vsub.f32 %v8445_v30, %v1311_v62 }
 0x743   :  { %v1334_v15 = vmul.f32 1.442695, %v1319_v36  ;;  %v8650_v33 = vpop.f32.mrf.mxu0  ;;  %2844 = vmax.xlane.f32.xlu0 %v2843_v37  ;;  %v8656_v30 = vpop.eup %6130 }
 0x744   :  { %11344 = vst [vmem:[#allocation33_spill] sm:$0xff] %v8656_v30 }
 0x745   :  { %6132 = vpow2.f32 %v1334_v15 }
 0x746   :  { %5804 = vmatmul.msk.bf16.gmra.mxu0 %vm326_vm1, %v11343_v23  ;;  %3282 = vmax.xlane.f32.xlu2 %v3281_v13 }
 0x748   :  { %v1734_v49 = vpop.xlane.xlu2 %1733 }
 0x749   :  { %v1756_v51 = vsub.f32 %v8463_v6, %v1734_v49 }
 0x74b   :  { %v8660_v62 = vpop.eup %6132  ;;  %v8662_v36 = vpop.f32.mrf.mxu0  ;;  %2847 = vmax.xlane.f32.xlu0 %v2846_v8  ;;  %v1764_v23 = vmul.f32 1.442695, %v1756_v51  ;;  %v11346_v8 = vld [vmem:[#allocation100_spill] sm:$0xff]  ;;  %v3278_v51 = vsel %vm159_vm0, %v8629_v57, -inf }
 0x74c   :  { %11345 = vst [vmem:[#allocation55_spill] sm:$0xff] %v8660_v62  ;;  %v1363_v37 = vpack.c.bf16 %v8660_v62, %v8656_v30 }
 0x74d   :  { %6134 = vpow2.f32 %v1764_v23  ;;  %v11348_v23 = vld [vmem:[#allocation130_spill] sm:$0xff] }
 0x74f   :  { %5744 = vmatmul.msk.bf16.gmra.mxu1 %vm159_vm0, %v1363_v37 }
 0x750   :  { %v1737_v15 = vpop.xlane.xlu0 %1736 }
 0x751   :  { %v1757_v13 = vsub.f32 %v8482_v28, %v1737_v15 }
 0x753   :  { %v1766_v34 = vmul.f32 1.442695, %v1757_v13  ;;  %v8671_v11 = vpop.f32.mrf.mxu0  ;;  %2853 = vmax.xlane.f32.xlu0 %v2852_v45  ;;  %v8675_v49 = vpop.eup %6134 }
 0x755   :  { %6136 = vpow2.f32 %v1766_v34 }
 0x756   :  { %5817 = vmatmul.msk.bf16.vlgmr.msrb.gmra.mxu0 %vm326_vm1, %v11346_v8 }
 0x758   :  { %v1740_v6 = vpop.xlane.xlu2 %1739 }
 0x759   :  { %v1758_v45 = vsub.f32 %v8494_v14, %v1740_v6  ;;  %v11350_v14 = vld [vmem:[#allocation99_spill] sm:$0xff] }
 0x75b   :  { %v8679_v37 = vpop.eup %6136  ;;  %v8681_v28 = vpop.f32.mrf.mxu0  ;;  %3279 = vmax.xlane.f32.xlu0 %v3278_v51  ;;  %v1768_v34 = vmul.f32 1.442695, %v1758_v45 }
 0x75c   :  { %11347 = vst [vmem:[#allocation115_spill] sm:$0xff] %v8679_v37  ;;  %v1804_v15 = vpack.c.bf16 %v8679_v37, %v8675_v49  ;;  %v8693_v51 = vpop.xlane.xlu1 %2841 }
 0x75d   :  { %6138 = vpow2.f32 %v1768_v34 }
 0x75e   :  { %3598 = vrot.lane.b32.xlu2 %v11169_v42, %s6592_s21  ;;  %v2188_v42 = vsel %vm159_vm0, %v8625_v22, -inf }
 0x75f   :  { %5757 = vmatmul.msk.bf16.vlgmr.msra.gmra.mxu1 %vm159_vm0, %v1804_v15 }
 0x760   :  { %2732 = vmatpush.bf16.msra.mxu1 %v11348_v23  ;;  %v1743_v13 = vpop.xlane.xlu0 %1742 }
 0x761   :  { %v1759_v8 = vsub.f32 %v8507_v40, %v1743_v13  ;;  %v11353_v13 = vld [vmem:[#allocation24_spill] sm:$0xff] }
 0x763   :  { %v1770_v4 = vmul.f32 1.442695, %v1759_v8  ;;  %v8691_v47 = vpop.f32.mrf.mxu0  ;;  %v8703_v6 = vpop.eup %6138 }
 0x764   :  { %2733 = vmatpush.bf16.msra.mxu1 %v11349_v10  ;;  %v11352_v10 = vld [vmem:[#allocation47_spill] sm:$0xff]  ;;  %v8713_v23 = vpop.xlane.xlu1 %2850 }
 0x765   :  { %6140 = vpow2.f32 %v1770_v4 }
 0x766   :  { %5818 = vmatmul.msk.bf16.gmra.mxu0 %vm326_vm1, %v11350_v14  ;;  %3364 = vrot.lane.b32.xlu2 %v6994_v24, %s6590_s20 }
 0x768   :  { %2734 = vmatpush.bf16.msra.mxu1 %v8131_v38  ;;  %2189 = vmax.xlane.f32.xlu1 %v2188_v42  ;;  %v1746_v40 = vpop.xlane.xlu2 %1745  ;;  %v2191_v38 = vsel %vm159_vm0, %v8635_v16, -inf }
 0x769   :  { %v1760_v4 = vsub.f32 %v8519_v9, %v1746_v40 }
 0x76b   :  { %v8705_v15 = vpop.eup %6140  ;;  %v8707_v45 = vpop.f32.mrf.mxu0  ;;  %v1772_v8 = vmul.f32 1.442695, %v1760_v4 }
 0x76c   :  { %11351 = vst [vmem:[#allocation123_spill] sm:$0xff] %v8705_v15  ;;  %2735 = vmatpush.bf16.msra.mxu1 %v11352_v10  ;;  %v1805_v34 = vpack.c.bf16 %v8705_v15, %v8703_v6  ;;  %v11354_v10 = vld [vmem:[#allocation104_spill] sm:$0xff]  ;;  %v2860_v15 = vsub.f32 %v8319_v52, %v8693_v51  ;;  %v8808_v52 = vpop.f32.mrf.mxu2 }
 0x76d   :  { %6142 = vpow2.f32 %v1772_v8  ;;  %11362 = vst [vmem:[#allocation90_spill] sm:$0xff] %v8808_v52 }
 0x76e   :  { %3596 = vrot.lane.b32.xlu2 %v11353_v13, %s6592_s21  ;;  %v8731_v13 = vpop.xlane.xlu1 %2856  ;;  %v2870_v31 = vmul.f32 1.442695, %v2860_v15 }
 0x76f   :  { %5758 = vmatmul.msk.bf16.gmra.mxu1 %vm159_vm0, %v1805_v34  ;;  %3366 = vrot.lane.b32.xlu0 %v7014_v53, %s6590_s20  ;;  %v2197_v34 = vsel %vm159_vm0, %v8662_v36, -inf }
 0x770   :  { %2192 = vmax.xlane.f32.xlu1 %v2191_v38  ;;  %v1749_v9 = vpop.xlane.xlu2 %1748 }
 0x771   :  { %v1761_v14 = vsub.f32 %v8530_v44, %v1749_v9 }
 0x773   :  { %v1774_v42 = vmul.f32 1.442695, %v1761_v14  ;;  %v8723_v40 = vpop.f32.mrf.mxu0  ;;  %v8733_v38 = vpop.eup %6142 }
 0x774   :  { %11355 = vst [vmem:[#allocation132_spill] sm:$0xff] %v8733_v38 }
 0x775   :  { %6144 = vpow2.f32 %v1774_v42  ;;  %v2623_v42 = vsel %vm159_vm0, %v8681_v28, -inf }
 0x776   :  { %5819 = vmatmul.msk.bf16.gmra.mxu0 %vm326_vm1, %v11354_v10  ;;  %3362 = vrot.lane.b32.xlu2 %v6974_v1, %s6590_s20 }
 0x778   :  { %2198 = vmax.xlane.f32.xlu1 %v2197_v34  ;;  %v1752_v4 = vpop.xlane.xlu0 %1751  ;;  %v8783_v7 = vpop.permute.xlu2 %3148 }
 0x779   :  { %v1762_v8 = vsub.f32 %v8540_v0, %v1752_v4 }
 0x77b   :  { %v8735_v44 = vpop.eup %6144  ;;  %v8737_v9 = vpop.f32.mrf.mxu0  ;;  %v1776_v10 = vmul.f32 1.442695, %v1762_v8 }
 0x77c   :  { %11356 = vst [vmem:[#allocation25_spill] sm:$0xff] %v8735_v44  ;;  %v1806_v14 = vpack.c.bf16 %v8735_v44, %v8733_v38  ;;  %v2635_v0 = vsel %vm159_vm0, %v8737_v9, -inf }
 0x77d   :  { %6146 = vpow2.f32 %v1776_v10 }
 0x77f   :  { %5759 = vmatmul.msk.bf16.gmra.mxu1 %vm159_vm0, %v1806_v14 }
 0x780   :  { %2624 = vmax.xlane.f32.xlu1 %v2623_v42  ;;  %v1755_v34 = vpop.xlane.xlu1 %1754  ;;  %v8758_v42 = vpop.f32.mrf.mxu3 }
 0x781   :  { %v1763_v12 = vsub.f32 %v8553_v48, %v1755_v34  ;;  %v2185_v34 = vsel %vm159_vm0, %v8618_v55, -inf }
 0x783   :  { %v1778_v63 = vmul.f32 1.442695, %v1763_v12  ;;  %v8746_v41 = vpop.f32.mrf.mxu0  ;;  %v8752_v4 = vpop.eup %6146 }
 0x784   :  { %11358 = vst [vmem:[#allocation128_spill] sm:$0xff] %v8752_v4 }
 0x785   :  { %6148 = vpow2.f32 %v1778_v63  ;;  %v2629_v63 = vsel %vm159_vm0, %v8707_v45, -inf }
 0x786   :  { %5820 = vmatmul.msk.bf16.gmra.mxu0 %vm326_vm1, %v11357_v32  ;;  %v3284_v32 = vsel %vm159_vm0, %v8758_v42, -inf }
 0x788   :  { %2636 = vmax.xlane.f32.xlu1 %v2635_v0  ;;  %v2178_v0 = vpop.xlane.xlu1 %2177 }
 0x78b   :  { %v8754_v14 = vpop.eup %6148  ;;  %v8756_v8 = vpop.f32.mrf.mxu0 }
 0x78c   :  { %11359 = vst [vmem:[#allocation65_spill] sm:$0xff] %v8754_v14  ;;  %v1807_v12 = vpack.c.bf16 %v8754_v14, %v8752_v4  ;;  %v3151_v14 = vpop.permute.xlu0 %3150 }
 0x78f   :  { %5760 = vmatmul.msk.bf16.gmra.mxu1 %vm159_vm0, %v1807_v12  ;;  %v2632_v12 = vsel %vm159_vm0, %v8723_v40, -inf }
 0x790   :  { %3285 = vmax.xlane.f32.xlu1 %v3284_v32  ;;  %v2194_v32 = vsel %vm159_vm0, %v8650_v33, -inf }
 0x793   :  { %v8765_v48 = vpop.f32.mrf.mxu0 }
 0x794   :  { %v3064_v44 = vsel %vm159_vm0, %v8765_v48, -inf }
 0x798   :  { %v8779_v56 = vpop.xlane.xlu1 %2183 }
 0x799   :  { %2630 = vmax.xlane.f32.xlu0 %v2629_v63  ;;  %v2638_v63 = vsel %vm159_vm0, %v8746_v41, -inf }
 0x79b   :  { %v8769_v10 = vpop.f32.mrf.mxu0 }
 0x79f   :  { %2186 = vmax.xlane.f32.xlu2 %v2185_v34 }
 0x7a1   :  { %2633 = vmax.xlane.f32.xlu0 %v2632_v12  ;;  %v2200_v12 = vsub.f32 %v8567_v26, %v2178_v0  ;;  %v8799_v26 = vpop.f32.mrf.mxu3 }
 0x7a3   :  { %v8775_v35 = vpop.f32.mrf.mxu0 }
 0x7a7   :  { %2195 = vmax.xlane.f32.xlu2 %v2194_v32  ;;  %v2620_v32 = vsel %vm159_vm0, %v8671_v11, -inf }
 0x7a9   :  { %2639 = vmax.xlane.f32.xlu0 %v2638_v63  ;;  %v2208_v63 = vmul.f32 1.442695, %v2200_v12 }
 0x7ab   :  { %v8785_v34 = vpop.f32.mrf.mxu0  ;;  %6150 = vpow2.f32 %v2208_v63 }
 0x7ac   :  { %v3073_v21 = vsel %vm159_vm0, %v8785_v34, -inf }
 0x7ad   :  { %3074 = vmax.xlane.f32.xlu1 %v3073_v21 }
 0x7af   :  { %2621 = vmax.xlane.f32.xlu2 %v2620_v32 }
 0x7b0   :  { %v3369_v30 = vpop.permute.xlu1 %3368 }
 0x7b1   :  { %3065 = vmax.xlane.f32.xlu0 %v3064_v44  ;;  %v2181_v5 = vpop.xlane.xlu2 %2180  ;;  %3390 = vmatpush.bf16.msrb.mxu2 %v3369_v30  ;;  %v2626_v44 = vsel %vm159_vm0, %v8691_v47, -inf  ;;  %v8812_v51 = vpop.eup %6150 }
 0x7b2   :  { %v2201_v21 = vsub.f32 %v8586_v50, %v2181_v5 }
 0x7b3   :  { %v8801_v0 = vpop.f32.mrf.mxu0 }
 0x7b4   :  { %v2210_v32 = vmul.f32 1.442695, %v2201_v21  ;;  %v3076_v50 = vsel %vm159_vm0, %v8801_v0, -inf  ;;  %v8824_v21 = vpop.f32.mrf.mxu1 }
 0x7b5   :  { %11363 = vst [vmem:[#allocation125_spill] sm:$0xff] %v8824_v21 }
 0x7b6   :  { %6152 = vpow2.f32 %v2210_v32  ;;  %v2845_v4 = vpop.xlane.xlu0 %2844 }
 0x7b7   :  { %v2861_v30 = vsub.f32 %v8338_v39, %v2845_v4  ;;  %2627 = vmax.xlane.f32.xlu2 %v2626_v44  ;;  %6154 = vpow2.f32 %v2870_v31  ;;  %v8820_v39 = vpop.f32.mrf.mxu3  ;;  %v2641_v31 = vsel %vm159_vm0, %v8756_v8, -inf }
 0x7b9   :  { %v2872_v5 = vmul.f32 1.442695, %v2861_v30  ;;  %3077 = vmax.xlane.f32.xlu0 %v3076_v50  ;;  %v8834_v50 = vpop.xlane.xlu2 %3282 }
 0x7bb   :  { %6156 = vpow2.f32 %v2872_v5  ;;  %v8814_v15 = vpop.f32.mrf.mxu0 }
 0x7bc   :  { %v8816_v12 = vpop.eup %6152  ;;  %v3079_v63 = vsel %vm159_vm0, %v8814_v15, -inf }
 0x7bd   :  { %v2248_v4 = vpack.c.bf16 %v8816_v12, %v8812_v51  ;;  %3080 = vmax.xlane.f32.xlu1 %v3079_v63  ;;  %v8829_v44 = vpop.eup %6154  ;;  %v8837_v63 = vpop.f32.mrf.mxu2 }
 0x7be   :  { %v2848_v32 = vpop.xlane.xlu0 %2847  ;;  %11364 = vst [vmem:[#allocation127_spill] sm:$0xff] %v8829_v44 }
 0x7bf   :  { %2642 = vmax.xlane.f32.xlu2 %v2641_v31  ;;  %5773 = vmatmul.msk.bf16.vlgmr.msrb.gmra.mxu1 %vm159_vm0, %v2248_v4  ;;  %v2862_v5 = vsub.f32 %v8365_v17, %v2848_v32  ;;  %11366 = vst [vmem:[#allocation94_spill] sm:$0xff] %v8837_v63  ;;  %v2863_v31 = vsub.f32 %v8391_v46, %v8713_v23  ;;  %v3290_v17 = vsel %vm159_vm0, %v8820_v39, -inf  ;;  %v3067_v32 = vsel %vm159_vm0, %v8769_v10, -inf  ;;  %v8853_v63 = vpop.f32.mrf.mxu3  ;;  %v8855_v23 = vpop.f32.mrf.mxu1 }
 0x7c0   :  { %3176 = vmatpush.bf16.msrb.mxu1 %v8403_v25  ;;  %11368 = vst [vmem:[#allocation133_spill] sm:$0xff] %v8855_v23 }
 0x7c1   :  { %v8832_v30 = vpop.eup %6156  ;;  %v2874_v4 = vmul.f32 1.442695, %v2862_v5  ;;  %v2876_v46 = vmul.f32 1.442695, %v2863_v31 }
 0x7c2   :  { %11365 = vst [vmem:[#allocation73_spill] sm:$0xff] %v8832_v30  ;;  %v2907_v52 = vpack.c.bf16 %v8832_v30, %v8829_v44 }
 0x7c3   :  { %v8843_v21 = vpop.f32.mrf.mxu0  ;;  %6158 = vpow2.f32 %v2874_v4 }
 0x7c4   :  { %11367 = vst [vmem:[#allocation95_spill] sm:$0xff] %v8843_v21  ;;  %3177 = vmatpush.bf16.msrb.mxu1 %v8381_v29  ;;  %5798 = vmatmul.msk.bf16.gmra.mxu2 %vm159_vm0, %v2907_v52  ;;  %v3082_v25 = vsel %vm159_vm0, %v8843_v21, -inf  ;;  %6160 = vpow2.f32 %v2876_v46  ;;  %v8857_v29 = vpop.permute.xlu2 %3598 }
 0x7c5   :  { %3083 = vmax.xlane.f32.xlu0 %v3082_v25  ;;  %3291 = vmax.xlane.f32.xlu1 %v3290_v17  ;;  %v8861_v30 = vpop.f32.mrf.mxu2  ;;  %v3070_v25 = vsel %vm159_vm0, %v8775_v35, -inf }
 0x7c6   :  { %11370 = vst [vmem:[#allocation66_spill] sm:$0xff] %v8861_v30  ;;  %v2854_v5 = vpop.xlane.xlu0 %2853 }
 0x7c7   :  { %3068 = vmax.xlane.f32.xlu2 %v3067_v32  ;;  %v8868_v31 = vpop.f32.mrf.mxu3  ;;  %v2864_v4 = vsub.f32 %v8412_v27, %v2854_v5  ;;  %v8873_v32 = vpop.f32.mrf.mxu1 }
 0x7c8   :  { %3178 = vmatpush.bf16.msrb.mxu1 %v3151_v14  ;;  %11373 = vst [vmem:[#allocation21_spill] sm:$0xff] %v8873_v32 }
 0x7c9   :  { %v8866_v17 = vpop.eup %6158 }
 0x7ca   :  { %11371 = vst [vmem:[#allocation134_spill] sm:$0xff] %v8866_v17  ;;  %v8870_v14 = vpop.eup %6160 }
 0x7cb   :  { %v8859_v52 = vpop.f32.mrf.mxu0  ;;  %11372 = vst [vmem:[#allocation80_spill] sm:$0xff] %v8870_v14  ;;  %v2908_v46 = vpack.c.bf16 %v8870_v14, %v8866_v17 }
 0x7cc   :  { %11369 = vst [vmem:[#allocation131_spill] sm:$0xff] %v8859_v52  ;;  %3179 = vmatpush.bf16.msrb.mxu1 %v8783_v7  ;;  %v2865_v7 = vsub.f32 %v8441_v58, %v8731_v13  ;;  %v3365_v44 = vpop.permute.xlu2 %3364 }
 0x7cd   :  { %v8884_v54 = vpop.f32.mrf.mxu2 }
 0x7ce   :  { %11374 = vst [vmem:[#allocation87_spill] sm:$0xff] %v8884_v54  ;;  %v2880_v27 = vmul.f32 1.442695, %v2865_v7  ;;  %v3280_v17 = vpop.xlane.xlu0 %3279 }
 0x7cf   :  { %3071 = vmax.xlane.f32.xlu2 %v3070_v25  ;;  %v2878_v25 = vmul.f32 1.442695, %v2864_v4  ;;  %v8886_v5 = vpop.f32.mrf.mxu3  ;;  %v8890_v58 = vpop.f32.mrf.mxu1 }
 0x7d0   :  { %11375 = vst [vmem:[#allocation22_spill] sm:$0xff] %v8890_v58  ;;  %v3299_v4 = vsel %vm159_vm0, %v8886_v5, -inf }
 0x7d1   :  { %6162 = vpow2.f32 %v2878_v25 }
 0x7d2   :  { %6164 = vpow2.f32 %v2880_v27 }
 0x7d3   :  { %v8879_v30 = vpop.f32.mrf.mxu0 }
 0x7d4   :  { %5799 = vmatmul.msk.bf16.gmra.mxu2 %vm159_vm0, %v2908_v46  ;;  %v3508_v23 = vsel %vm159_vm0, %v8879_v30, -inf  ;;  %v8898_v46 = vpop.permute.xlu2 %3596 }
 0x7d5   :  { %3509 = vmax.xlane.f32.xlu1 %v3508_v23  ;;  %v8900_v7 = vpop.f32.mrf.mxu2 }
 0x7d6   :  { %11377 = vst [vmem:[#allocation96_spill] sm:$0xff] %v8900_v7 }
 0x7d7   :  { %v8896_v23 = vpop.eup %6162  ;;  %v8904_v54 = vpop.f32.mrf.mxu3 }
 0x7d8   :  { %11376 = vst [vmem:[#allocation92_spill] sm:$0xff] %v8896_v23  ;;  %v8902_v25 = vpop.eup %6164  ;;  %v8913_v58 = vpop.f32.mrf.mxu1  ;;  %v3722_v7 = vsel %vm159_vm0, %v8904_v54, -inf }
 0x7d9   :  { %3592 = vrot.lane.b32.xlu0 %v11326_v61, %s6592_s21  ;;  %11378 = vst [vmem:[#allocation85_spill] sm:$0xff] %v8902_v25  ;;  %v3302_v61 = vsub.f32 %v8629_v57, %v3280_v17  ;;  %v2909_v27 = vpack.c.bf16 %v8902_v25, %v8896_v23 }
 0x7da   :  { %11379 = vst [vmem:[#allocation98_spill] sm:$0xff] %v8904_v54 }
 0x7db   :  { %v8892_v13 = vpop.f32.mrf.mxu0  ;;  %11380 = vst [vmem:[#allocation97_spill] sm:$0xff] %v8913_v58  ;;  %v3310_v62 = vmul.f32 1.442695, %v3302_v61 }
 0x7dc   :  { %v3363_v17 = vpop.permute.xlu2 %3362 }
 0x7dd   :  { %3300 = vmax.xlane.f32.xlu1 %v3299_v4  ;;  %v3303_v4 = vsub.f32 %v8646_v43, %v8834_v50  ;;  %6166 = vpow2.f32 %v3310_v62 }
 0x7df   :  { %v3312_v57 = vmul.f32 1.442695, %v3303_v4  ;;  %v2190_v4 = vpop.xlane.xlu1 %2189 }
 0x7e0   :  { %v8924_v50 = vpop.f32.mrf.mxu1 }
 0x7e1   :  { %v3367_v14 = vpop.permute.xlu0 %3366  ;;  %6168 = vpow2.f32 %v3312_v57  ;;  %11382 = vst [vmem:[#allocation26_spill] sm:$0xff] %v8924_v50  ;;  %v8965_v50 = vpop.f32.mrf.mxu3 }
 0x7e2   :  { %3391 = vmatpush.bf16.msrb.mxu2 %v3367_v14  ;;  %v8920_v14 = vpop.f32.mrf.mxu2  ;;  %11391 = vst [vmem:[#allocation129_spill] sm:$0xff] %v8965_v50 }
 0x7e3   :  { %v8911_v32 = vpop.f32.mrf.mxu0  ;;  %11381 = vst [vmem:[#allocation89_spill] sm:$0xff] %v8920_v14 }
 0x7e4   :  { %5800 = vmatmul.msk.bf16.gmra.mxu2 %vm159_vm0, %v2909_v27  ;;  %v3514_v27 = vsel %vm159_vm0, %v8911_v32, -inf }
 0x7e5   :  { %3723 = vmax.xlane.f32.xlu1 %v3722_v7  ;;  %v8928_v7 = vpop.eup %6166 }
 0x7e6   :  { %3392 = vmatpush.bf16.msrb.mxu2 %v3365_v44  ;;  %11383 = vst [vmem:[#allocation93_spill] sm:$0xff] %v8928_v7 }
 0x7e7   :  { %3594 = vrot.lane.b32.xlu2 %v11328_v3, %s6592_s21  ;;  %v8930_v44 = vpop.eup %6168  ;;  %v2193_v14 = vpop.xlane.xlu1 %2192 }
 0x7e8   :  { %11384 = vst [vmem:[#allocation100_spill] sm:$0xff] %v8930_v44  ;;  %v3350_v3 = vpack.c.bf16 %v8930_v44, %v8928_v7  ;;  %v3293_v44 = vsel %vm159_vm0, %v8853_v63, -inf }
 0x7ea   :  { %3393 = vmatpush.bf16.msrb.mxu2 %v3363_v17  ;;  %v8936_v61 = vpop.f32.mrf.mxu2  ;;  %v8941_v17 = vpop.f32.mrf.mxu1 }
 0x7eb   :  { %v8922_v43 = vpop.f32.mrf.mxu0  ;;  %11385 = vst [vmem:[#allocation130_spill] sm:$0xff] %v8936_v61  ;;  %v3511_v61 = vsel %vm159_vm0, %v8892_v13, -inf }
 0x7ec   :  { %v3517_v57 = vsel %vm159_vm0, %v8922_v43, -inf  ;;  %11386 = vst [vmem:[#allocation135_spill] sm:$0xff] %v8941_v17 }
 0x7ed   :  { %3515 = vmax.xlane.f32.xlu1 %v3514_v27 }
 0x7f2   :  { %v8947_v23 = vpop.f32.mrf.mxu1 }
 0x7f3   :  { %v8934_v62 = vpop.f32.mrf.mxu0  ;;  %11388 = vst [vmem:[#allocation47_spill] sm:$0xff] %v8947_v23 }
 0x7f4   :  { %5813 = vmatmul.msk.bf16.vlgmr.msrb.gmra.mxu2 %vm159_vm0, %v3350_v3  ;;  %v3520_v25 = vsel %vm159_vm0, %v8934_v62, -inf }
 0x7f5   :  { %3518 = vmax.xlane.f32.xlu1 %v3517_v57  ;;  %v2199_v57 = vpop.xlane.xlu1 %2198 }
 0x7fa   :  { %v8955_v7 = vpop.f32.mrf.mxu1 }
 0x7fb   :  { %v8943_v27 = vpop.f32.mrf.mxu0  ;;  %11389 = vst [vmem:[#allocation24_spill] sm:$0xff] %v8955_v7 }
 0x7fc   :  { %11387 = vst [vmem:[#allocation99_spill] sm:$0xff] %v8943_v27  ;;  %v3523_v3 = vsel %vm159_vm0, %v8943_v27, -inf }
 0x7fd   :  { %3521 = vmax.xlane.f32.xlu1 %v3520_v25  ;;  %v8969_v17 = vpop.xlane.xlu1 %2624 }
 0x803   :  { %v8951_v58 = vpop.f32.mrf.mxu0  ;;  %3512 = vmax.xlane.f32.xlu0 %v3511_v61  ;;  %v2202_v61 = vsub.f32 %v8601_v20, %v8779_v56  ;;  %v3287_v56 = vsel %vm159_vm0, %v8799_v26, -inf }
 0x805   :  { %3524 = vmax.xlane.f32.xlu1 %v3523_v3  ;;  %v3085_v3 = vsel %vm159_vm0, %v8859_v52, -inf  ;;  %v2212_v7 = vmul.f32 1.442695, %v2202_v61  ;;  %v8980_v61 = vpop.xlane.xlu1 %2636 }
 0x807   :  { %6170 = vpow2.f32 %v2212_v7  ;;  %v3296_v7 = vsel %vm159_vm0, %v8868_v31, -inf }
 0x80b   :  { %v8959_v25 = vpop.f32.mrf.mxu0  ;;  %3294 = vmax.xlane.f32.xlu0 %v3293_v44  ;;  %v3725_v44 = vsel %vm159_vm0, %v8965_v50, -inf  ;;  %v2205_v50 = vsub.f32 %v8635_v16, %v2193_v14 }
 0x80c   :  { %11390 = vst [vmem:[#allocation104_spill] sm:$0xff] %v8959_v25  ;;  %v3529_v23 = vsel %vm159_vm0, %v8959_v25, -inf }
 0x80d   :  { %3530 = vmax.xlane.f32.xlu1 %v3529_v23  ;;  %v8974_v23 = vpop.f32.mrf.mxu1  ;;  %v8978_v20 = vpop.eup %6170 }
 0x80e   :  { %11392 = vst [vmem:[#allocation136_spill] sm:$0xff] %v8974_v23  ;;  %v2631_v23 = vpop.xlane.xlu0 %2630  ;;  %v8995_v16 = vpop.xlane.xlu1 %3285 }
 0x810   :  { %3086 = vmax.xlane.f32.xlu2 %v3085_v3 }
 0x812   :  { %v2187_v54 = vpop.xlane.xlu2 %2186 }
 0x813   :  { %v2203_v37 = vsub.f32 %v8618_v55, %v2187_v54  ;;  %3726 = vmax.xlane.f32.xlu0 %v3725_v44  ;;  %v8993_v44 = vpop.f32.mrf.mxu3 }
 0x815   :  { %v2214_v25 = vmul.f32 1.442695, %v2203_v37  ;;  %v8985_v54 = vpop.f32.mrf.mxu1  ;;  %v2204_v37 = vsub.f32 %v8625_v22, %v2190_v4 }
 0x816   :  { %11393 = vst [vmem:[#allocation137_spill] sm:$0xff] %v8985_v54 }
 0x817   :  { %6172 = vpow2.f32 %v2214_v25  ;;  %v2218_v25 = vmul.f32 1.442695, %v2205_v50 }
 0x818   :  { %3288 = vmax.xlane.f32.xlu2 %v3287_v56  ;;  %v2216_v56 = vmul.f32 1.442695, %v2204_v37 }
 0x819   :  { %6174 = vpow2.f32 %v2218_v25 }
 0x81a   :  { %v2196_v3 = vpop.xlane.xlu2 %2195  ;;  %6176 = vpow2.f32 %v2216_v56  ;;  %v2207_v56 = vsub.f32 %v8662_v36, %v2199_v57 }
 0x81b   :  { %v2206_v37 = vsub.f32 %v8650_v33, %v2196_v3 }
 0x81c   :  { %v2222_v27 = vmul.f32 1.442695, %v2207_v56 }
 0x81d   :  { %v8982_v19 = vpop.eup %6172  ;;  %v9001_v22 = vpop.f32.mrf.mxu1 }
 0x81e   :  { %v2249_v55 = vpack.c.bf16 %v8982_v19, %v8978_v20  ;;  %11394 = vst [vmem:[#allocation138_spill] sm:$0xff] %v9001_v22  ;;  %v2220_v22 = vmul.f32 1.442695, %v2206_v37 }
 0x81f   :  { %v9003_v4 = vpop.eup %6174 }
 0x820   :  { %3297 = vmax.xlane.f32.xlu2 %v3296_v7  ;;  %5774 = vmatmul.msk.bf16.gmra.mxu1 %vm159_vm0, %v2249_v55  ;;  %11395 = vst [vmem:[#allocation139_spill] sm:$0xff] %v9003_v4  ;;  %v9005_v50 = vpop.eup %6176  ;;  %v9007_v55 = vpop.f32.mrf.mxu3  ;;  %6178 = vpow2.f32 %v2220_v22 }
 0x821   :  { %11396 = vst [vmem:[#allocation140_spill] sm:$0xff] %v9005_v50  ;;  %v9010_v7 = vpop.xlane.xlu0 %2633  ;;  %v9012_v25 = vpop.xlane.xlu1 %3074  ;;  %6180 = vpow2.f32 %v2222_v27 }
 0x822   :  { %v2622_v14 = vpop.xlane.xlu2 %2621 }
 0x823   :  { %v2644_v22 = vsub.f32 %v8671_v11, %v2622_v14 }
 0x825   :  { %v9018_v54 = vpop.f32.mrf.mxu1 }
 0x826   :  { %3810 = vrot.lane.b32.xlu1 %v7014_v53, %s6592_s21  ;;  %v2250_v53 = vpack.c.bf16 %v9003_v4, %v9005_v50  ;;  %11397 = vst [vmem:[#allocation141_spill] sm:$0xff] %v9018_v54  ;;  %v9030_v36 = vpop.eup %6178 }
 0x827   :  { %3808 = vrot.lane.b32.xlu0 %v6994_v24, %s6592_s21  ;;  %11398 = vst [vmem:[#allocation142_spill] sm:$0xff] %v9030_v36  ;;  %v9034_v37 = vpop.eup %6180 }
 0x828   :  { %v9022_v33 = vpop.f32.mrf.mxu3  ;;  %11400 = vst [vmem:[#allocation144_spill] sm:$0xff] %v9034_v37  ;;  %v2251_v27 = vpack.c.bf16 %v9034_v37, %v9030_v36 }
 0x829   :  { %v9024_v3 = vpop.xlane.xlu0 %2639 }
 0x82a   :  { %v2628_v24 = vpop.xlane.xlu2 %2627 }
 0x82d   :  { %v9032_v57 = vpop.f32.mrf.mxu1 }
 0x82e   :  { %11399 = vst [vmem:[#allocation143_spill] sm:$0xff] %v9032_v57 }
 0x830   :  { %5775 = vmatmul.msk.bf16.gmra.mxu1 %vm159_vm0, %v2250_v53  ;;  %v9020_v21 = vpop.xlane.xlu1 %3080  ;;  %v2645_v53 = vsub.f32 %v8681_v28, %v8969_v17  ;;  %v9044_v54 = vpop.f32.mrf.mxu3 }
 0x831   :  { %11401 = vst [vmem:[#allocation145_spill] sm:$0xff] %v9044_v54  ;;  %v3066_v52 = vpop.xlane.xlu0 %3065 }
 0x832   :  { %v9028_v4 = vpop.xlane.xlu2 %2642  ;;  %v2654_v38 = vmul.f32 1.442695, %v2645_v53 }
 0x835   :  { %v9048_v50 = vpop.f32.mrf.mxu1 }
 0x836   :  { %11402 = vst [vmem:[#allocation146_spill] sm:$0xff] %v9048_v50 }
 0x838   :  { %3812 = vrot.lane.b32.xlu2 %v11342_v18, %s6592_s21  ;;  %v9041_v56 = vpop.xlane.xlu1 %3291  ;;  %v2652_v18 = vmul.f32 1.442695, %v2644_v22  ;;  %v9052_v14 = vpop.f32.mrf.mxu3  ;;  %v2646_v22 = vsub.f32 %v8691_v47, %v2628_v24  ;;  %v3731_v47 = vsel %vm159_vm0, %v9007_v55, -inf }
 0x839   :  { %v9056_v17 = vpop.xlane.xlu0 %3077 }
 0x83a   :  { %v9046_v57 = vpop.xlane.xlu2 %3068  ;;  %6182 = vpow2.f32 %v2652_v18  ;;  %v2647_v18 = vsub.f32 %v8707_v45, %v2631_v23  ;;  %v2656_v24 = vmul.f32 1.442695, %v2646_v22 }
 0x83b   :  { %6184 = vpow2.f32 %v2654_v38  ;;  %v3734_v38 = vsel %vm159_vm0, %v9022_v33, -inf }
 0x83c   :  { %6186 = vpow2.f32 %v2656_v24 }
 0x83d   :  { %v9068_v50 = vpop.f32.mrf.mxu1 }
 0x83e   :  { %11404 = vst [vmem:[#allocation148_spill] sm:$0xff] %v9068_v50 }
 0x840   :  { %5776 = vmatmul.msk.bf16.gmra.mxu1 %vm159_vm0, %v2251_v27  ;;  %v9054_v28 = vpop.eup %6182  ;;  %v9076_v54 = vpop.f32.mrf.mxu3 }
 0x841   :  { %11403 = vst [vmem:[#allocation147_spill] sm:$0xff] %v9054_v28  ;;  %v9058_v27 = vpop.eup %6184  ;;  %v9078_v45 = vpop.xlane.xlu0 %3083  ;;  %v3743_v23 = vsel %vm159_vm0, %v9076_v54, -inf }
 0x842   :  { %v2692_v53 = vpack.c.bf16 %v9058_v27, %v9054_v28  ;;  %v9063_v37 = vpop.xlane.xlu2 %3071  ;;  %v2658_v28 = vmul.f32 1.442695, %v2647_v18  ;;  %v9089_v18 = vpop.eup %6186 }
 0x844   :  { %6188 = vpow2.f32 %v2658_v28  ;;  %v3088_v28 = vsub.f32 %v8765_v48, %v3066_v52 }
 0x845   :  { %v9087_v22 = vpop.f32.mrf.mxu1 }
 0x846   :  { %11405 = vst [vmem:[#allocation149_spill] sm:$0xff] %v9087_v22  ;;  %v3526_v22 = vsel %vm159_vm0, %v8951_v58, -inf  ;;  %v3096_v52 = vmul.f32 1.442695, %v3088_v28 }
 0x848   :  { %v9050_v11 = vpop.xlane.xlu1 %3509 }
 0x84a   :  { %v9091_v24 = vpop.eup %6188 }
 0x850   :  { %3735 = vmax.xlane.f32.xlu1 %v3734_v38  ;;  %5789 = vmatmul.msk.bf16.vlgmr.msra.gmra.mxu1 %vm159_vm0, %v2692_v53  ;;  %v9071_v36 = vpop.xlane.xlu1 %3300  ;;  %v3595_v53 = vpop.permute.xlu2 %3594 }
 0x851   :  { %3620 = vmatpush.bf16.msra.mxu1 %v8857_v29  ;;  %3732 = vmax.xlane.f32.xlu0 %v3731_v47  ;;  %v3740_v29 = vsel %vm159_vm0, %v9052_v14, -inf  ;;  %v3593_v47 = vpop.permute.xlu0 %3592 }
 0x855   :  { %3621 = vmatpush.bf16.msra.mxu1 %v8898_v46  ;;  %v2648_v46 = vsub.f32 %v8723_v40, %v9010_v7  ;;  %v1339_v40 = vsel %vm159_vm0, %v8584_v60, 0.0 }
 0x857   :  { %v2660_v48 = vmul.f32 1.442695, %v2648_v46 }
 0x858   :  { %3744 = vmax.xlane.f32.xlu1 %v3743_v23  ;;  %v9083_v38 = vpop.xlane.xlu1 %3723  ;;  %v2693_v23 = vpack.c.bf16 %v9091_v24, %v9089_v18 }
 0x859   :  { %3622 = vmatpush.bf16.msra.mxu1 %v3595_v53  ;;  %3741 = vmax.xlane.f32.xlu0 %v3740_v29  ;;  %v2649_v53 = vsub.f32 %v8737_v9, %v8980_v61  ;;  %v1780_v29 = vsel %vm159_vm0, %v8675_v49, 0.0  ;;  %6190 = vpow2.f32 %v2660_v48  ;;  %v3532_v49 = vsub.f32 %v8879_v30, %v9050_v11 }
 0x85a   :  { %6192 = vpow2.f32 %v3096_v52  ;;  %v2227_v61 = vsel %vm159_vm0, %v8816_v12, 0.0  ;;  %v2651_v12 = vsub.f32 %v8756_v8, %v9028_v4 }
 0x85b   :  { %v2662_v7 = vmul.f32 1.442695, %v2649_v53 }
 0x85c   :  { %v2666_v8 = vmul.f32 1.442695, %v2651_v12 }
 0x85d   :  { %3623 = vmatpush.bf16.msra.mxu1 %v3593_v47  ;;  %v9107_v47 = vpop.f32.mrf.mxu1  ;;  %6194 = vpow2.f32 %v2662_v7 }
 0x85f   :  { %v9117_v28 = vpop.eup %6190 }
 0x860   :  { %1781 = vadd.xlane.f32.xlu1 %v1780_v29  ;;  %5790 = vmatmul.msk.bf16.gmra.mxu1 %vm159_vm0, %v2693_v23  ;;  %v3516_v50 = vpop.xlane.xlu1 %3515  ;;  %v9119_v53 = vpop.eup %6192 }
 0x861   :  { %3527 = vmax.xlane.f32.xlu2 %v3526_v22  ;;  %1340 = vadd.xlane.f32.xlu0 %v1339_v40  ;;  %v3534_v9 = vsub.f32 %v8911_v32, %v3516_v50  ;;  %v2224_v22 = vsel %vm159_vm0, %v8812_v51, 0.0  ;;  %v3540_v32 = vmul.f32 1.442695, %v3532_v49  ;;  %v3112_v29 = vsel %vm159_vm0, %v9119_v53, 0.0 }
 0x862   :  { %v2671_v40 = vsel %vm159_vm0, %v9058_v27, 0.0 }
 0x863   :  { %v3544_v23 = vmul.f32 1.442695, %v3534_v9  ;;  %v9121_v30 = vpop.eup %6194 }
 0x864   :  { %v2694_v51 = vpack.c.bf16 %v9121_v30, %v9117_v28 }
 0x865   :  { %6196 = vpow2.f32 %v3544_v23  ;;  %v9125_v11 = vpop.f32.mrf.mxu1 }
 0x868   :  { %2228 = vadd.xlane.f32.xlu1 %v2227_v61  ;;  %v3519_v60 = vpop.xlane.xlu1 %3518 }
 0x869   :  { %v3535_v46 = vsub.f32 %v8922_v43, %v3519_v60  ;;  %2225 = vadd.xlane.f32.xlu0 %v2224_v22  ;;  %v2650_v43 = vsub.f32 %v8746_v41, %v9024_v3  ;;  %v3089_v22 = vsub.f32 %v8769_v10, %v9046_v57 }
 0x86b   :  { %v3546_v50 = vmul.f32 1.442695, %v3535_v46  ;;  %v9136_v4 = vpop.eup %6196  ;;  %v2664_v52 = vmul.f32 1.442695, %v2650_v43  ;;  %v1345_v46 = vsel %vm159_vm0, %v8615_v59, 0.0  ;;  %v9174_v43 = vpop.f32.mrf.mxu2  ;;  %v3304_v59 = vsub.f32 %v8758_v42, %v8995_v16 }
 0x86d   :  { %6198 = vpow2.f32 %v3546_v50  ;;  %v9145_v49 = vpop.f32.mrf.mxu1 }
 0x86e   :  { %6200 = vpow2.f32 %v3540_v32  ;;  %11406 = vst [vmem:[#allocation150_spill] sm:$0xff] %v9145_v49  ;;  %v11477_v49 = vld [vmem:[#allocation24_spill] sm:$0xff] }
 0x86f   :  { %6202 = vpow2.f32 %v2666_v8  ;;  %v1786_v8 = vsel %vm159_vm0, %v8703_v6, 0.0  ;;  %v3091_v6 = vsub.f32 %v8785_v34, %v9012_v25 }
 0x870   :  { %3113 = vadd.xlane.f32.xlu1 %v3112_v29  ;;  %5791 = vmatmul.msk.bf16.gmra.mxu1 %vm159_vm0, %v2694_v51  ;;  %6204 = vpow2.f32 %v2664_v52  ;;  %v9170_v57 = vpop.xlane.xlu1 %3521  ;;  %v2230_v29 = vsel %vm159_vm0, %v8978_v20, 0.0 }
 0x871   :  { %2672 = vadd.xlane.f32.xlu0 %v2671_v40  ;;  %v3090_v40 = vsub.f32 %v8775_v35, %v9063_v37 }
 0x873   :  { %v9138_v48 = vpop.eup %6198  ;;  %v3100_v42 = vmul.f32 1.442695, %v3090_v40  ;;  %v9195_v37 = vpop.f32.mrf.mxu2  ;;  %v3562_v40 = vsel %vm159_vm0, %v9136_v4, 0.0 }
 0x874   :  { %v3581_v41 = vpack.c.bf16 %v9138_v48, %v9136_v4  ;;  %v9142_v3 = vpop.eup %6200 }
 0x875   :  { %v3556_v27 = vsel %vm159_vm0, %v9142_v3, 0.0  ;;  %v9151_v23 = vpop.eup %6202  ;;  %v9164_v50 = vpop.f32.mrf.mxu1 }
 0x876   :  { %v3513_v7 = vpop.xlane.xlu0 %3512  ;;  %v9153_v60 = vpop.eup %6204  ;;  %11407 = vst [vmem:[#allocation151_spill] sm:$0xff] %v9164_v50 }
 0x877   :  { %v3533_v9 = vsub.f32 %v8892_v13, %v3513_v7  ;;  %v2695_v13 = vpack.c.bf16 %v9151_v23, %v9153_v60  ;;  %v3314_v7 = vmul.f32 1.442695, %v3304_v59 }
 0x878   :  { %v9189_v16 = vpop.xlane.xlu1 %3524 }
 0x879   :  { %v3542_v61 = vmul.f32 1.442695, %v3533_v9  ;;  %3806 = vrot.lane.b32.xlu2 %v6974_v1, %s6592_s21  ;;  %3557 = vadd.xlane.f32.xlu0 %v3556_v27  ;;  %v3098_v1 = vmul.f32 1.442695, %v3089_v22  ;;  %v2677_v22 = vsel %vm159_vm0, %v9091_v24, 0.0 }
 0x87b   :  { %6206 = vpow2.f32 %v3542_v61 }
 0x87c   :  { %6208 = vpow2.f32 %v3098_v1 }
 0x87d   :  { %v9186_v9 = vpop.f32.mrf.mxu1  ;;  %6210 = vpow2.f32 %v3314_v7 }
 0x880   :  { %5792 = vmatmul.msk.bf16.gmra.mxu1 %vm159_vm0, %v2695_v13  ;;  %v2233_v13 = vsel %vm159_vm0, %v8982_v19, 0.0  ;;  %v9209_v24 = vpop.xlane.xlu1 %3530  ;;  %v3306_v19 = vsub.f32 %v8820_v39, %v9041_v56  ;;  %v3093_v39 = vsub.f32 %v8814_v15, %v9020_v21  ;;  %v3728_v15 = vsel %vm159_vm0, %v8993_v44, -inf }
 0x881   :  { %v9162_v32 = vpop.eup %6206  ;;  %1346 = vadd.xlane.f32.xlu0 %v1345_v46  ;;  %v3565_v21 = vsel %vm159_vm0, %v9138_v48, 0.0 }
 0x882   :  { %v3580_v12 = vpack.c.bf16 %v9162_v32, %v9142_v3  ;;  %v3559_v10 = vsel %vm159_vm0, %v9162_v32, 0.0  ;;  %v9184_v52 = vpop.eup %6208 }
 0x883   :  { %v9172_v51 = vpop.xlane.xlu2 %3086  ;;  %3560 = vadd.xlane.f32.xlu1 %v3559_v10  ;;  %v3136_v20 = vpack.c.bf16 %v9184_v52, %v9119_v53  ;;  %v3102_v53 = vmul.f32 1.442695, %v3091_v6  ;;  %v9202_v1 = vpop.eup %6210  ;;  %v3092_v6 = vsub.f32 %v8801_v0, %v9056_v17 }
 0x885   :  { %v9204_v34 = vpop.f32.mrf.mxu1 }
 0x889   :  { %2231 = vadd.xlane.f32.xlu0 %v2230_v29 }
 0x88b   :  { %v3289_v27 = vpop.xlane.xlu2 %3288  ;;  %1787 = vadd.xlane.f32.xlu1 %v1786_v8  ;;  %v9218_v8 = vpop.f32.mrf.mxu2 }
 0x88c   :  { %v3305_v61 = vsub.f32 %v8799_v26, %v3289_v27  ;;  %v3295_v26 = vpop.xlane.xlu0 %3294  ;;  %11408 = vst [vmem:[#allocation152_spill] sm:$0xff] %v9218_v8 }
 0x88d   :  { %v3307_v10 = vsub.f32 %v8853_v63, %v3295_v26  ;;  %v1351_v26 = vsel %vm159_vm0, %v8633_v2, 0.0 }
 0x88e   :  { %v3316_v35 = vmul.f32 1.442695, %v3305_v61 }
 0x88f   :  { %v3320_v7 = vmul.f32 1.442695, %v3307_v10 }
 0x890   :  { %6212 = vpow2.f32 %v3316_v35  ;;  %5805 = vmatmul.msk.bf16.vlgmr.msrb.gmra.mxu1 %vm159_vm0, %v3136_v20 }
 0x891   :  { %6214 = vpow2.f32 %v3100_v42  ;;  %2678 = vadd.xlane.f32.xlu0 %v2677_v22  ;;  %v3318_v42 = vmul.f32 1.442695, %v3306_v19  ;;  %v3536_v19 = vsub.f32 %v8934_v62, %v9170_v57 }
 0x892   :  { %6216 = vpow2.f32 %v3102_v53  ;;  %v3104_v53 = vmul.f32 1.442695, %v3092_v6 }
 0x893   :  { %v3298_v46 = vpop.xlane.xlu2 %3297  ;;  %2234 = vadd.xlane.f32.xlu1 %v2233_v13  ;;  %6218 = vpow2.f32 %v3320_v7  ;;  %v3106_v13 = vmul.f32 1.442695, %v3093_v39  ;;  %v9241_v17 = vpop.f32.mrf.mxu2  ;;  %v3309_v7 = vsub.f32 %v8886_v5, %v9071_v36  ;;  %v11414_v36 = vld [vmem:[#allocation131_spill] sm:$0xff] }
 0x894   :  { %v9221_v27 = vpop.xlane.xlu0 %3726  ;;  %6220 = vpow2.f32 %v3318_v42  ;;  %11410 = vst [vmem:[#allocation154_spill] sm:$0xff] %v9241_v17  ;;  %v11412_v42 = vld [vmem:[#allocation145_spill] sm:$0xff] }
 0x895   :  { %6222 = vpow2.f32 %v3106_v13  ;;  %v3737_v39 = vsel %vm159_vm0, %v11412_v42, -inf  ;;  %v3324_v6 = vmul.f32 1.442695, %v3309_v7 }
 0x896   :  { %v9206_v25 = vpop.eup %6212  ;;  %6224 = vpow2.f32 %v3104_v53 }
 0x897   :  { %v6215_v59 = vpop.eup %6214  ;;  %v3351_v29 = vpack.c.bf16 %v9206_v25, %v9202_v1 }
 0x898   :  { %v3118_v63 = vsel %vm159_vm0, %v6215_v59, 0.0  ;;  %v9223_v20 = vpop.eup %6216  ;;  %v3811_v22 = vpop.permute.xlu1 %3810 }
 0x899   :  { %5814 = vmatmul.msk.bf16.gmra.mxu2 %vm159_vm0, %v3351_v29  ;;  %3563 = vadd.xlane.f32.xlu0 %v3562_v40  ;;  %v3137_v35 = vpack.c.bf16 %v9223_v20, %v6215_v59  ;;  %v9239_v0 = vpop.eup %6218  ;;  %v3308_v29 = vsub.f32 %v8868_v31, %v3298_v46  ;;  %v11413_v46 = vld [vmem:[#allocation132_spill] sm:$0xff] }
 0x89a   :  { %11409 = vst [vmem:[#allocation153_spill] sm:$0xff] %v9239_v0  ;;  %v9245_v2 = vpop.eup %6220  ;;  %v1792_v62 = vsel %vm159_vm0, %v11413_v46, 0.0 }
 0x89b   :  { %v3813_v61 = vpop.permute.xlu2 %3812  ;;  %3119 = vadd.xlane.f32.xlu1 %v3118_v63  ;;  %v3352_v40 = vpack.c.bf16 %v9239_v0, %v9245_v2  ;;  %v11411_v63 = vld [vmem:[#allocation140_spill] sm:$0xff]  ;;  %v3322_v31 = vmul.f32 1.442695, %v3308_v29  ;;  %v9261_v57 = vpop.eup %6222  ;;  %v11417_v29 = vld [vmem:[#allocation99_spill] sm:$0xff] }
 0x89c   :  { %3834 = vmatpush.bf16.msra.mxu2 %v3813_v61  ;;  %v3809_v10 = vpop.permute.xlu0 %3808  ;;  %v2236_v61 = vsel %vm159_vm0, %v11411_v63, 0.0  ;;  %v6225_v5 = vpop.eup %6224  ;;  %v11419_v63 = vld [vmem:[#allocation139_spill] sm:$0xff] }
 0x89d   :  { %v9227_v56 = vpop.f32.mrf.mxu1  ;;  %6226 = vpow2.f32 %v3322_v31  ;;  %v3138_v13 = vpack.c.bf16 %v9261_v57, %v6225_v5 }
 0x8a0   :  { %5806 = vmatmul.msk.bf16.gmra.mxu1 %vm159_vm0, %v3137_v35  ;;  %3835 = vmatpush.bf16.msra.mxu2 %v3811_v22  ;;  %v3548_v35 = vmul.f32 1.442695, %v3536_v19  ;;  %v3095_v22 = vsub.f32 %v11414_v36, %v9172_v51  ;;  %v3537_v51 = vsub.f32 %v11417_v29, %v9189_v16  ;;  %v11423_v36 = vld [vmem:[#allocation115_spill] sm:$0xff] }
 0x8a1   :  { %1352 = vadd.xlane.f32.xlu0 %v1351_v26 }
 0x8a2   :  { %3729 = vmax.xlane.f32.xlu2 %v3728_v15  ;;  %v9268_v15 = vpop.f32.mrf.mxu2  ;;  %6228 = vpow2.f32 %v3548_v35  ;;  %v3110_v19 = vmul.f32 1.442695, %v3095_v22  ;;  %v3550_v46 = vmul.f32 1.442695, %v3537_v51  ;;  %v1783_v22 = vsel %vm159_vm0, %v11423_v36, 0.0 }
 0x8a3   :  { %3566 = vadd.xlane.f32.xlu1 %v3565_v21  ;;  %11415 = vst [vmem:[#allocation140_spill] sm:$0xff] %v9268_v15  ;;  %v11416_v21 = vld [vmem:[#allocation95_spill] sm:$0xff]  ;;  %6230 = vpow2.f32 %v3324_v6 }
 0x8a4   :  { %3836 = vmatpush.bf16.msra.mxu2 %v3809_v10  ;;  %v3094_v53 = vsub.f32 %v11416_v21, %v9078_v45  ;;  %v2683_v10 = vsel %vm159_vm0, %v9121_v30, 0.0  ;;  %6232 = vpow2.f32 %v3110_v19  ;;  %v11425_v19 = vld [vmem:[#allocation55_spill] sm:$0xff] }
 0x8a5   :  { %v9243_v59 = vpop.f32.mrf.mxu1 }
 0x8a6   :  { %v3108_v45 = vmul.f32 1.442695, %v3094_v53 }
 0x8a8   :  { %6234 = vpow2.f32 %v3108_v45  ;;  %v11428_v45 = vld [vmem:[#allocation142_spill] sm:$0xff] }
 0x8a9   :  { %5815 = vmatmul.msk.bf16.gmra.mxu2 %vm159_vm0, %v3352_v40  ;;  %2237 = vadd.xlane.f32.xlu0 %v2236_v61  ;;  %v11418_v40 = vld [vmem:[#allocation62_spill] sm:$0xff]  ;;  %v2239_v61 = vsel %vm159_vm0, %v11419_v63, 0.0  ;;  %6236 = vpow2.f32 %v3550_v46  ;;  %v2242_v46 = vsel %vm159_vm0, %v11428_v45, 0.0  ;;  %v11433_v45 = vld [vmem:[#allocation27_spill] sm:$0xff] }
 0x8aa   :  { %3738 = vmax.xlane.f32.xlu2 %v3737_v39  ;;  %v1336_v7 = vsel %vm159_vm0, %v11418_v40, 0.0  ;;  %v9281_v39 = vpop.eup %6226  ;;  %v9293_v6 = vpop.f32.mrf.mxu2  ;;  %v1357_v40 = vsel %vm159_vm0, %v11425_v19, 0.0  ;;  %v11431_v19 = vld [vmem:[#allocation98_spill] sm:$0xff] }
 0x8ab   :  { %1793 = vadd.xlane.f32.xlu1 %v1792_v62  ;;  %11420 = vst [vmem:[#allocation145_spill] sm:$0xff] %v9281_v39  ;;  %v9283_v31 = vpop.eup %6228 }
 0x8ac   :  { %v9287_v16 = vpop.eup %6230  ;;  %v3568_v35 = vsel %vm159_vm0, %v9283_v31, 0.0  ;;  %11422 = vst [vmem:[#allocation131_spill] sm:$0xff] %v9293_v6  ;;  %v11448_v6 = vld [vmem:[#allocation41_spill] sm:$0xff] }
 0x8ad   :  { %v9265_v26 = vpop.f32.mrf.mxu1  ;;  %11421 = vst [vmem:[#allocation132_spill] sm:$0xff] %v9287_v16  ;;  %v3353_v62 = vpack.c.bf16 %v9287_v16, %v9281_v39  ;;  %v9299_v21 = vpop.eup %6232 }
 0x8ae   :  { %v6235_v53 = vpop.eup %6234 }
 0x8af   :  { %v3139_v29 = vpack.c.bf16 %v9299_v21, %v6235_v53  ;;  %v9304_v51 = vpop.eup %6236 }
 0x8b0   :  { %5807 = vmatmul.msk.bf16.gmra.mxu1 %vm159_vm0, %v3138_v13  ;;  %v3124_v13 = vsel %vm159_vm0, %v6225_v5, 0.0  ;;  %v3571_v5 = vsel %vm159_vm0, %v9304_v51, 0.0  ;;  %v3582_v48 = vpack.c.bf16 %v9304_v51, %v9283_v31  ;;  %v2680_v31 = vsel %vm159_vm0, %v9117_v28, 0.0  ;;  %v11443_v28 = vld [vmem:[#allocation33_spill] sm:$0xff] }
 0x8b1   :  { %2684 = vadd.xlane.f32.xlu0 %v2683_v10 }
 0x8b2   :  { %1337 = vadd.xlane.f32.xlu2 %v1336_v7  ;;  %v11426_v7 = vld [vmem:[#allocation147_spill] sm:$0xff] }
 0x8b3   :  { %2240 = vadd.xlane.f32.xlu1 %v2239_v61  ;;  %v2668_v63 = vsel %vm159_vm0, %v11426_v7, 0.0  ;;  %v11432_v7 = vld [vmem:[#allocation104_spill] sm:$0xff] }
 0x8b5   :  { %v9285_v30 = vpop.f32.mrf.mxu1 }
 0x8b9   :  { %5816 = vmatmul.msk.bf16.gmra.mxu2 %vm159_vm0, %v3353_v62  ;;  %3569 = vadd.xlane.f32.xlu0 %v3568_v35  ;;  %v3115_v62 = vsel %vm159_vm0, %v9184_v52, 0.0  ;;  %v11429_v35 = vld [vmem:[#allocation128_spill] sm:$0xff]  ;;  %v2689_v52 = vsel %vm159_vm0, %v9151_v23, 0.0 }
 0x8ba   :  { %1784 = vadd.xlane.f32.xlu2 %v1783_v22  ;;  %v1798_v36 = vsel %vm159_vm0, %v11429_v35, 0.0  ;;  %v11430_v22 = vld [vmem:[#allocation129_spill] sm:$0xff] }
 0x8bb   :  { %3125 = vadd.xlane.f32.xlu1 %v3124_v13  ;;  %v3747_v13 = vsub.f32 %v11430_v22, %v9221_v27  ;;  %v1342_v27 = vsel %vm159_vm0, %v11433_v45, 0.0 }
 0x8bd   :  { %v9301_v10 = vpop.f32.mrf.mxu1 }
 0x8be   :  { %11424 = vst [vmem:[#allocation95_spill] sm:$0xff] %v9301_v10 }
 0x8c0   :  { %5808 = vmatmul.msk.bf16.gmra.mxu1 %vm159_vm0, %v3139_v29 }
 0x8c1   :  { %1358 = vadd.xlane.f32.xlu0 %v1357_v40  ;;  %v3746_v40 = vsub.f32 %v11431_v19, %v9083_v38 }
 0x8c2   :  { %2669 = vadd.xlane.f32.xlu2 %v2668_v63  ;;  %v3539_v63 = vsub.f32 %v11432_v7, %v9209_v24 }
 0x8c3   :  { %3572 = vadd.xlane.f32.xlu1 %v3571_v5  ;;  %v3756_v5 = vmul.f32 1.442695, %v3747_v13  ;;  %v3130_v13 = vsel %vm159_vm0, %v6235_v53, 0.0 }
 0x8c4   :  { %v3554_v24 = vmul.f32 1.442695, %v3539_v63  ;;  %v3733_v51 = vpop.xlane.xlu0 %3732 }
 0x8c5   :  { %v9313_v61 = vpop.f32.mrf.mxu1  ;;  %6238 = vpow2.f32 %v3756_v5 }
 0x8c6   :  { %11427 = vst [vmem:[#allocation99_spill] sm:$0xff] %v9313_v61 }
 0x8c9   :  { %2243 = vadd.xlane.f32.xlu0 %v2242_v46  ;;  %v11434_v46 = vld [vmem:[#allocation144_spill] sm:$0xff] }
 0x8ca   :  { %3116 = vadd.xlane.f32.xlu2 %v3115_v62  ;;  %v2245_v38 = vsel %vm159_vm0, %v11434_v46, 0.0  ;;  %v3754_v62 = vmul.f32 1.442695, %v3746_v40 }
 0x8cb   :  { %1799 = vadd.xlane.f32.xlu1 %v1798_v36  ;;  %v11436_v36 = vld [vmem:[#allocation123_spill] sm:$0xff]  ;;  %v9347_v19 = vpop.eup %6238 }
 0x8cc   :  { %6240 = vpow2.f32 %v3754_v62  ;;  %v1789_v22 = vsel %vm159_vm0, %v11436_v36, 0.0  ;;  %v3121_v62 = vsel %vm159_vm0, %v9223_v20, 0.0 }
 0x8cd   :  { %v9323_v29 = vpop.f32.mrf.mxu1  ;;  %6242 = vpow2.f32 %v3554_v24 }
 0x8d0   :  { %5821 = vmatmul.msk.bf16.vlgmr.msra.gmra.mxu1 %vm159_vm0, %v3580_v12  ;;  %v9342_v12 = vpop.f32.mrf.mxu2 }
 0x8d1   :  { %2690 = vadd.xlane.f32.xlu0 %v2689_v52  ;;  %11435 = vst [vmem:[#allocation62_spill] sm:$0xff] %v9342_v12 }
 0x8d2   :  { %1343 = vadd.xlane.f32.xlu2 %v1342_v27  ;;  %v9349_v7 = vpop.eup %6240  ;;  %v2674_v27 = vsel %vm159_vm0, %v9089_v18, 0.0 }
 0x8d3   :  { %2246 = vadd.xlane.f32.xlu1 %v2245_v38  ;;  %v6243_v63 = vpop.eup %6242  ;;  %v3794_v52 = vpack.c.bf16 %v9347_v19, %v9349_v7 }
 0x8d4   :  { %v3528_v35 = vpop.xlane.xlu2 %3527  ;;  %v3577_v46 = vsel %vm159_vm0, %v6243_v63, 0.0 }
 0x8d5   :  { %v3538_v3 = vsub.f32 %v8951_v58, %v3528_v35  ;;  %v9340_v32 = vpop.f32.mrf.mxu1  ;;  %v11439_v35 = vld [vmem:[#allocation25_spill] sm:$0xff] }
 0x8d7   :  { %v3552_v23 = vmul.f32 1.442695, %v3538_v3  ;;  %v1795_v3 = vsel %vm159_vm0, %v11439_v35, 0.0  ;;  %v11444_v35 = vld [vmem:[#allocation65_spill] sm:$0xff] }
 0x8d8   :  { %v9355_v45 = vpop.f32.mrf.mxu2 }
 0x8d9   :  { %6244 = vpow2.f32 %v3552_v23  ;;  %11437 = vst [vmem:[#allocation139_spill] sm:$0xff] %v9355_v45 }
 0x8da   :  { %1790 = vadd.xlane.f32.xlu2 %v1789_v22  ;;  %v3736_v22 = vpop.xlane.xlu1 %3735 }
 0x8db   :  { %3131 = vadd.xlane.f32.xlu1 %v3130_v13  ;;  %v3127_v13 = vsel %vm159_vm0, %v9261_v57, 0.0 }
 0x8dc   :  { %v3807_v40 = vpop.permute.xlu2 %3806 }
 0x8dd   :  { %v9351_v58 = vpop.f32.mrf.mxu1  ;;  %3837 = vmatpush.bf16.msra.mxu2 %v3807_v40 }
 0x8df   :  { %v6245_v5 = vpop.eup %6244 }
 0x8e0   :  { %5822 = vmatmul.msk.bf16.gmra.mxu1 %vm159_vm0, %v3581_v41  ;;  %5829 = vmatmul.msk.bf16.vlgmr.msra.gmra.mxu2 %vm159_vm0, %v3794_v52  ;;  %v3574_v53 = vsel %vm159_vm0, %v6245_v5, 0.0  ;;  %v11438_v41 = vld [vmem:[#allocation126_spill] sm:$0xff]  ;;  %v3583_v20 = vpack.c.bf16 %v6243_v63, %v6245_v5  ;;  %v9392_v52 = vpop.xlane.xlu0 %3741  ;;  %v3749_v5 = vsub.f32 %v9007_v55, %v3733_v51 }
 0x8e1   :  { %3575 = vadd.xlane.f32.xlu0 %v3574_v53  ;;  %v1348_v18 = vsel %vm159_vm0, %v11438_v41, 0.0  ;;  %v9394_v53 = vpop.f32.mrf.mxu2 }
 0x8e2   :  { %2675 = vadd.xlane.f32.xlu2 %v2674_v27  ;;  %11442 = vst [vmem:[#allocation147_spill] sm:$0xff] %v9394_v53  ;;  %v9396_v63 = vpop.xlane.xlu1 %3744  ;;  %v1354_v27 = vsel %vm159_vm0, %v11443_v28, 0.0  ;;  %v2686_v28 = vsel %vm159_vm0, %v9153_v60, 0.0  ;;  %v11447_v60 = vld [vmem:[#allocation135_spill] sm:$0xff] }
 0x8e3   :  { %3578 = vadd.xlane.f32.xlu1 %v3577_v46  ;;  %v3760_v46 = vmul.f32 1.442695, %v3749_v5 }
 0x8e5   :  { %v9366_v38 = vpop.f32.mrf.mxu1  ;;  %6246 = vpow2.f32 %v3760_v46  ;;  %v3750_v46 = vsub.f32 %v9022_v33, %v3736_v22  ;;  %v3133_v33 = vsel %vm159_vm0, %v9299_v21, 0.0 }
 0x8e8   :  { %v1341_v41 = vpop.xlane.xlu0 %1340 }
 0x8ea   :  { %3122 = vadd.xlane.f32.xlu2 %v3121_v62 }
 0x8ed   :  { %v9370_v4 = vpop.f32.mrf.mxu1 }
 0x8f0   :  { %5823 = vmatmul.msk.bf16.gmra.mxu1 %vm159_vm0, %v3582_v48 }
 0x8f2   :  { %1349 = vadd.xlane.f32.xlu2 %v1348_v18 }
 0x8f5   :  { %v9377_v24 = vpop.f32.mrf.mxu1 }
 0x8fa   :  { %1796 = vadd.xlane.f32.xlu2 %v1795_v3  ;;  %v1801_v3 = vsel %vm159_vm0, %v11444_v35, 0.0 }
 0x8fd   :  { %v9381_v23 = vpop.f32.mrf.mxu1 }
 0x8fe   :  { %11440 = vst [vmem:[#allocation115_spill] sm:$0xff] %v9381_v23 }
 0x900   :  { %5824 = vmatmul.msk.bf16.gmra.mxu1 %vm159_vm0, %v3583_v20  ;;  %v9406_v20 = vpop.f32.mrf.mxu2 }
 0x901   :  { %11445 = vst [vmem:[#allocation142_spill] sm:$0xff] %v9406_v20 }
 0x902   :  { %2681 = vadd.xlane.f32.xlu2 %v2680_v31  ;;  %v1782_v31 = vpop.xlane.xlu1 %1781 }
 0x905   :  { %v9386_v36 = vpop.f32.mrf.mxu1 }
 0x906   :  { %11441 = vst [vmem:[#allocation55_spill] sm:$0xff] %v9386_v36  ;;  %v11466_v36 = vld [vmem:[#allocation43_spill] sm:$0xff] }
 0x907   :  { %v2438_v23 = vsel %vm159_vm0, %v11466_v36, 0.0  ;;  %v11470_v36 = vld [vmem:[#allocation120_spill] sm:$0xff] }
 0x90a   :  { %3128 = vadd.xlane.f32.xlu2 %v3127_v13  ;;  %v9410_v13 = vpop.eup %6246 }
 0x90d   :  { %v9390_v40 = vpop.f32.mrf.mxu1 }
 0x912   :  { %1355 = vadd.xlane.f32.xlu2 %v1354_v27 }
 0x915   :  { %v3730_v62 = vpop.xlane.xlu2 %3729  ;;  %v9401_v48 = vpop.f32.mrf.mxu1 }
 0x916   :  { %v3748_v57 = vsub.f32 %v8993_v44, %v3730_v62  ;;  %v2226_v62 = vpop.xlane.xlu0 %2225 }
 0x918   :  { %v3758_v18 = vmul.f32 1.442695, %v3748_v57  ;;  %v9421_v57 = vpop.f32.mrf.mxu2 }
 0x919   :  { %11446 = vst [vmem:[#allocation128_spill] sm:$0xff] %v9421_v57  ;;  %v11449_v57 = vld [vmem:[#allocation26_spill] sm:$0xff] }
 0x91a   :  { %6248 = vpow2.f32 %v3758_v18  ;;  %1802 = vadd.xlane.f32.xlu2 %v1801_v3  ;;  %v2229_v18 = vpop.xlane.xlu1 %2228 }
 0x91b   :  { %6250 = vrcp.f32 %v1341_v41 }
 0x91d   :  { %v3739_v55 = vpop.xlane.xlu2 %3738  ;;  %v9408_v51 = vpop.f32.mrf.mxu1 }
 0x91e   :  { %v3751_v44 = vsub.f32 %v11412_v42, %v3739_v55  ;;  %v3762_v55 = vmul.f32 1.442695, %v3750_v46 }
 0x920   :  { %v9412_v5 = vpop.eup %6248  ;;  %v3764_v35 = vmul.f32 1.442695, %v3751_v44  ;;  %v9435_v21 = vpop.f32.mrf.mxu2 }
 0x921   :  { %v3795_v27 = vpack.c.bf16 %v9410_v13, %v9412_v5  ;;  %v6251_v42 = vpop.eup %6250  ;;  %11451 = vst [vmem:[#allocation129_spill] sm:$0xff] %v9435_v21 }
 0x922   :  { %2687 = vadd.xlane.f32.xlu2 %v2686_v28  ;;  %v1426_v15 = vmul.f32 %v6251_v42, %v11447_v60  ;;  %v2673_v28 = vpop.xlane.xlu0 %2672  ;;  %v3753_v42 = vsub.f32 %v9076_v54, %v9396_v63  ;;  %v11453_v63 = vld [vmem:[#allocation77_spill] sm:$0xff] }
 0x923   :  { %5830 = vmatmul.msk.bf16.gmra.mxu2 %vm159_vm0, %v3795_v27 }
 0x924   :  { %v1648_v44 = vpack.c.bf16 %v1426_v15, %v1426_v15  ;;  %v3752_v15 = vsub.f32 %v9052_v14, %v9392_v52  ;;  %v3768_v21 = vmul.f32 1.442695, %v3753_v42 }
 0x925   :  { %v1338_v3 = vpop.xlane.xlu2 %1337  ;;  %v9423_v41 = vpop.f32.mrf.mxu1 }
 0x926   :  { %6252 = vrcp.f32 %v1338_v3  ;;  %v11450_v3 = vld [vmem:[#allocation48_spill] sm:$0xff]  ;;  %v3766_v45 = vmul.f32 1.442695, %v3752_v15 }
 0x927   :  { %6254 = vrcp.f32 %v1782_v31 }
 0x928   :  { %6256 = vpow2.f32 %v3764_v35  ;;  %v3114_v35 = vpop.xlane.xlu1 %3113 }
 0x929   :  { %6258 = vpow2.f32 %v3762_v55 }
 0x92a   :  { %3134 = vadd.xlane.f32.xlu2 %v3133_v33  ;;  %6260 = vrcp.f32 %v11448_v6  ;;  %v11452_v6 = vld [vmem:[#allocation143_spill] sm:$0xff] }
 0x92c   :  { %v6253_v22 = vpop.eup %6252 }
 0x92d   :  { %v6255_v27 = vpop.eup %6254  ;;  %v1425_v8 = vmul.f32 %v6253_v22, %v11449_v57  ;;  %v1785_v17 = vpop.xlane.xlu2 %1784  ;;  %v3996_v22 = vunpack.c.l.b16 %v1648_v44  ;;  %v11455_v44 = vld [vmem:[#allocation81_spill] sm:$0xff] }
 0x92e   :  { %v9430_v46 = vpop.f32.mrf.mxu1  ;;  %v9432_v31 = vpop.eup %6256  ;;  %6262 = vrcp.f32 %v1785_v17  ;;  %v1869_v57 = vmul.f32 %v6255_v27, %v11452_v6 }
 0x92f   :  { %6264 = vrcp.f32 %v11450_v3  ;;  %v1647_v55 = vpack.c.bf16 %v1425_v8, %v1425_v8  ;;  %v9439_v60 = vpop.eup %6258 }
 0x930   :  { %6266 = vrcp.f32 %v2673_v28  ;;  %v3796_v33 = vpack.c.bf16 %v9432_v31, %v9439_v60  ;;  %v6261_v3 = vpop.eup %6260  ;;  %v2091_v52 = vpack.c.bf16 %v1869_v57, %v1869_v57  ;;  %v11454_v28 = vld [vmem:[#allocation146_spill] sm:$0xff]  ;;  %v9453_v57 = vpop.f32.mrf.mxu2 }
 0x931   :  { %v3995_v17 = vunpack.c.l.b16 %v1647_v55  ;;  %6268 = vrcp.f32 %v2229_v18  ;;  %v982_v12 = vmul.f32 %v6261_v3, %v11453_v63  ;;  %v3561_v55 = vpop.xlane.xlu1 %3560  ;;  %11456 = vst [vmem:[#allocation98_spill] sm:$0xff] %v9453_v57 }
 0x932   :  { %6270 = vrcp.f32 %v2226_v62  ;;  %v3558_v62 = vpop.xlane.xlu0 %3557 }
 0x933   :  { %5831 = vmatmul.msk.bf16.gmra.mxu2 %vm159_vm0, %v3796_v33  ;;  %v4011_v54 = vpack.c.b16 %v3996_v22, %v3995_v17  ;;  %v1204_v22 = vpack.c.bf16 %v982_v12, %v982_v12 }
 0x934   :  { %v6263_v8 = vpop.eup %6262 }
 0x935   :  { %v6265_v14 = vpop.eup %6264  ;;  %v1870_v27 = vmul.f32 %v6263_v8, %v11454_v28  ;;  %v2670_v6 = vpop.xlane.xlu2 %2669  ;;  %4019 = vrot.lane.b32.xlu0 %v4011_v54, %s6589_s19  ;;  %v4051_v8 = vunpack.c.l.b16 %v2091_v52 }
 0x936   :  { %v9449_v16 = vpop.f32.mrf.mxu1  ;;  %v6267_v18 = vpop.eup %6266  ;;  %v981_v42 = vmul.f32 %v6265_v14, %v11455_v44  ;;  %6272 = vrcp.f32 %v2670_v6  ;;  %v3940_v14 = vunpack.c.l.b16 %v1204_v22 }
 0x937   :  { %6274 = vpow2.f32 %v3768_v21  ;;  %v2092_v33 = vpack.c.bf16 %v1870_v27, %v1870_v27  ;;  %v6269_v17 = vpop.eup %6268  ;;  %v2758_v3 = vmul.f32 %v6267_v18, %v9340_v32 }
 0x938   :  { %6276 = vpow2.f32 %v3766_v45  ;;  %v6271_v15 = vpop.eup %6270  ;;  %v1203_v28 = vpack.c.bf16 %v981_v42, %v981_v42  ;;  %v2314_v44 = vmul.f32 %v6269_v17, %v9204_v34 }
 0x939   :  { %v4052_v63 = vunpack.c.l.b16 %v2092_v33  ;;  %6278 = vrcp.f32 %v3114_v35  ;;  %v2313_v21 = vmul.f32 %v6271_v15, %v9186_v9  ;;  %v2980_v12 = vpack.c.bf16 %v2758_v3, %v2758_v3  ;;  %v9468_v17 = vpop.xlane.xlu1 %1787  ;;  %v9474_v3 = vpop.f32.mrf.mxu2 }
 0x93a   :  { %v3939_v35 = vunpack.c.l.b16 %v1203_v28  ;;  %v2536_v34 = vpack.c.bf16 %v2314_v44, %v2314_v44  ;;  %v9466_v9 = vpop.xlane.xlu0 %1346  ;;  %11460 = vst [vmem:[#allocation123_spill] sm:$0xff] %v9474_v3 }
 0x93b   :  { %v4067_v54 = vpack.c.b16 %v4052_v63, %v4051_v8  ;;  %v2535_v33 = vpack.c.bf16 %v2313_v21, %v2313_v21  ;;  %v4164_v15 = vunpack.c.l.b16 %v2980_v12 }
 0x93c   :  { %v6273_v39 = vpop.eup %6272  ;;  %v3955_v42 = vpack.c.b16 %v3940_v14, %v3939_v35 }
 0x93d   :  { %v9458_v27 = vpop.eup %6274  ;;  %v2757_v45 = vmul.f32 %v6273_v39, %v9323_v29  ;;  %v3117_v6 = vpop.xlane.xlu2 %3116  ;;  %4075 = vrot.lane.b32.xlu1 %v4067_v54, %s6587_s17  ;;  %v4107_v28 = vunpack.c.l.b16 %v2535_v33  ;;  %v4108_v54 = vunpack.c.l.b16 %v2536_v34 }
 0x93e   :  { %11457 = vst [vmem:[#allocation104_spill] sm:$0xff] %v9458_v27  ;;  %v9461_v57 = vpop.f32.mrf.mxu1  ;;  %v9464_v32 = vpop.eup %6276  ;;  %6280 = vrcp.f32 %v3117_v6 }
 0x93f   :  { %11458 = vst [vmem:[#allocation27_spill] sm:$0xff] %v9461_v57  ;;  %v2979_v52 = vpack.c.bf16 %v2757_v45, %v2757_v45  ;;  %v6279_v18 = vpop.eup %6278  ;;  %v3797_v29 = vpack.c.bf16 %v9458_v27, %v9464_v32  ;;  %v4123_v45 = vpack.c.b16 %v4108_v54, %v4107_v28  ;;  %6282 = vrcp.f32 %v3558_v62 }
 0x940   :  { %11459 = vst [vmem:[#allocation144_spill] sm:$0xff] %v9464_v32  ;;  %v3201_v39 = vmul.f32 %v6279_v18, %v9390_v40  ;;  %6284 = vrcp.f32 %v3561_v55 }
 0x941   :  { %v4163_v22 = vunpack.c.l.b16 %v2979_v52  ;;  %v2235_v18 = vpop.xlane.xlu1 %2234 }
 0x942   :  { %3963 = vrot.lane.b32.xlu2 %v3955_v42, %s6591_s2  ;;  %v3423_v14 = vpack.c.bf16 %v3201_v39, %v3201_v39  ;;  %v2232_v52 = vpop.xlane.xlu0 %2231  ;;  %6286 = vrcp.f32 %v2235_v18 }
 0x943   :  { %5832 = vmatmul.msk.bf16.gmra.mxu2 %vm159_vm0, %v3797_v29  ;;  %v4179_v8 = vpack.c.b16 %v4164_v15, %v4163_v22  ;;  %6288 = vrcp.f32 %v2232_v52 }
 0x944   :  { %v6281_v63 = vpop.eup %6280  ;;  %v4219_v6 = vunpack.c.l.b16 %v3423_v14 }
 0x945   :  { %v3202_v44 = vmul.f32 %v6281_v63, %v9401_v48  ;;  %v9478_v21 = vpop.xlane.xlu2 %1343  ;;  %4187 = vrot.lane.b32.xlu0 %v4179_v8, %s6583_s29  ;;  %v6283_v48 = vpop.eup %6282 }
 0x946   :  { %v9480_v40 = vpop.f32.mrf.mxu1  ;;  %v6285_v15 = vpop.eup %6284  ;;  %6290 = vrcp.f32 %v9478_v21 }
 0x947   :  { %11461 = vst [vmem:[#allocation126_spill] sm:$0xff] %v9480_v40  ;;  %v3424_v12 = vpack.c.bf16 %v3202_v44, %v3202_v44  ;;  %6292 = vrcp.f32 %v9466_v9  ;;  %v5922_v9 = vld [vmem:[%s10896_s4 + $0x8] sm:$0xff] }
 0x949   :  { %v4220_v35 = vunpack.c.l.b16 %v3424_v12  ;;  %v9487_v22 = vpop.xlane.xlu1 %3119 }
 0x94a   :  { %4131 = vrot.lane.b32.xlu2 %v4123_v45, %s6585_s15  ;;  %v2679_v29 = vpop.xlane.xlu0 %2678 }
 0x94b   :  { %v4235_v42 = vpack.c.b16 %v4220_v35, %v4219_v6 }
 0x94d   :  { %v9484_v34 = vpop.xlane.xlu2 %1790  ;;  %4243 = vrot.lane.b32.xlu1 %v4235_v42, %s6581_s27 }
 0x94e   :  { %v3625_v33 = vpop.f32.mrf.mxu1 }
 0x94f   :  { %v3645_v39 = vmul.f32 %v6283_v48, %v3625_v33 }
 0x951   :  { %v3867_v28 = vpack.c.bf16 %v3645_v39, %v3645_v39  ;;  %v9494_v55 = vpop.xlane.xlu1 %3566  ;;  %v11462_v39 = vld [vmem:[#allocation30_spill] sm:$0xff] }
 0x952   :  { %v9491_v6 = vpop.xlane.xlu0 %3563 }
 0x953   :  { %v4275_v44 = vunpack.c.l.b16 %v3867_v28 }
 0x955   :  { %v2676_v8 = vpop.xlane.xlu2 %2675 }
 0x956   :  { %v3627_v63 = vpop.f32.mrf.mxu1  ;;  %6294 = vrcp.f32 %v2676_v8 }
 0x957   :  { %v3646_v54 = vmul.f32 %v6285_v15, %v3627_v63  ;;  %v1550_v15 = vsel %vm159_vm0, %v11462_v39, 0.0  ;;  %6296 = vrcp.f32 %v2679_v29 }
 0x958   :  { %6298 = vrcp.f32 %v9494_v55  ;;  %v5921_v55 = vld [vmem:[%s10896_s4] sm:$0xff] }
 0x959   :  { %v3868_v14 = vpack.c.bf16 %v3646_v54, %v3646_v54  ;;  %v9500_v33 = vpop.xlane.xlu1 %1793  ;;  %6300 = vrcp.f32 %v9491_v6 }
 0x95a   :  { %v9498_v42 = vpop.xlane.xlu0 %1352 }
 0x95b   :  { %v4276_v62 = vunpack.c.l.b16 %v3868_v14  ;;  %v11463_v14 = vld [vmem:[#allocation59_spill] sm:$0xff] }
 0x95d   :  { %v4291_v12 = vpack.c.b16 %v4276_v62, %v4275_v44  ;;  %v9489_v45 = vpop.xlane.xlu2 %3122  ;;  %v1997_v44 = vsel %vm159_vm0, %v11463_v14, 0.0  ;;  %v11464_v62 = vld [vmem:[#allocation35_spill] sm:$0xff] }
 0x95e   :  { %v3630_v18 = vpop.f32.mrf.mxu1 }
 0x95f   :  { %4299 = vrot.lane.b32.xlu2 %v4291_v12, %s6579_s3  ;;  %v1553_v12 = vsel %vm159_vm0, %v11464_v62, 0.0 }
 0x961   :  { %v9508_v28 = vpop.xlane.xlu1 %2240 }
 0x962   :  { %v9506_v63 = vpop.xlane.xlu0 %2237 }
 0x965   :  { %v9496_v35 = vpop.xlane.xlu2 %1349 }
 0x966   :  { %v3632_v50 = vpop.f32.mrf.mxu1 }
 0x969   :  { %v9518_v32 = vpop.xlane.xlu1 %3125 }
 0x96a   :  { %v9516_v3 = vpop.xlane.xlu0 %2684 }
 0x96d   :  { %v9502_v48 = vpop.xlane.xlu2 %1796 }
 0x96f   :  { %1551 = vadd.xlane.f32.xlu0 %v1550_v15  ;;  %v11465_v15 = vld [vmem:[#allocation110_spill] sm:$0xff] }
 0x970   :  { %v2882_v27 = vsel %vm159_vm0, %v11465_v15, 0.0  ;;  %v11469_v15 = vld [vmem:[#allocation37_spill] sm:$0xff] }
 0x971   :  { %v9534_v20 = vpop.xlane.xlu1 %3572  ;;  %v1994_v40 = vsel %vm159_vm0, %v11469_v15, 0.0  ;;  %v5923_v15 = vld [vmem:[%s10896_s4 + $0x10] sm:$0xff] }
 0x972   :  { %v9526_v14 = vpop.xlane.xlu0 %3569 }
 0x975   :  { %v9510_v54 = vpop.xlane.xlu2 %2681 }
 0x977   :  { %1998 = vadd.xlane.f32.xlu0 %v1997_v44  ;;  %1554 = vadd.xlane.f32.xlu1 %v1553_v12  ;;  %v11467_v44 = vld [vmem:[#allocation100_spill] sm:$0xff]  ;;  %v11468_v12 = vld [vmem:[#allocation121_spill] sm:$0xff] }
 0x978   :  { %v3329_v62 = vsel %vm159_vm0, %v11467_v44, 0.0  ;;  %v2885_v57 = vsel %vm159_vm0, %v11468_v12, 0.0 }
 0x97a   :  { %v9542_v44 = vpop.xlane.xlu0 %1358 }
 0x97d   :  { %v9520_v39 = vpop.xlane.xlu2 %3128 }
 0x97f   :  { %2883 = vadd.xlane.f32.xlu0 %v2882_v27  ;;  %2439 = vadd.xlane.f32.xlu1 %v2438_v23  ;;  %v3770_v23 = vsel %vm159_vm0, %v9349_v7, 0.0  ;;  %v2441_v27 = vsel %vm159_vm0, %v11470_v36, 0.0 }
 0x982   :  { %v9563_v29 = vpop.xlane.xlu0 %2243 }
 0x985   :  { %v9528_v53 = vpop.xlane.xlu2 %1355 }
 0x987   :  { %3330 = vadd.xlane.f32.xlu0 %v3329_v62  ;;  %2886 = vadd.xlane.f32.xlu1 %v2885_v57  ;;  %v5924_v57 = vld [vmem:[%s10896_s4 + $0x18] sm:$0xff]  ;;  %v9549_v62 = vpop.xlane.xlu1 %1799 }
 0x988   :  { %1995 = vadd.xlane.f32.xlu2 %v1994_v40  ;;  %v6287_v40 = vpop.eup %6286  ;;  %4497 = vmatpush.bf16.msra.mxu0 %v5924_v57 }
 0x989   :  { %v6289_v7 = vpop.eup %6288  ;;  %v2316_v52 = vmul.f32 %v6287_v40, %v9243_v59  ;;  %v11472_v40 = vld [vmem:[#allocation47_spill] sm:$0xff] }
 0x98a   :  { %v2315_v36 = vmul.f32 %v6289_v7, %v9227_v56  ;;  %v11474_v7 = vld [vmem:[#allocation40_spill] sm:$0xff] }
 0x98b   :  { %v2538_v59 = vpack.c.bf16 %v2316_v52, %v2316_v52 }
 0x98c   :  { %4498 = vmatpush.bf16.msra.mxu0 %v5923_v15  ;;  %v2537_v61 = vpack.c.bf16 %v2315_v36, %v2315_v36  ;;  %v11475_v15 = vld [vmem:[#allocation75_spill] sm:$0xff] }
 0x98d   :  { %v9544_v12 = vpop.xlane.xlu2 %1802 }
 0x98f   :  { %3771 = vadd.xlane.f32.xlu1 %v3770_v23  ;;  %v6291_v23 = vpop.eup %6290  ;;  %v9569_v56 = vpop.xlane.xlu1 %2246 }
 0x990   :  { %2442 = vadd.xlane.f32.xlu2 %v2441_v27  ;;  %v11471_v27 = vld [vmem:[#allocation93_spill] sm:$0xff]  ;;  %v6293_v8 = vpop.eup %6292  ;;  %v1427_v10 = vmul.f32 %v6291_v23, %v11472_v40  ;;  %4499 = vmatpush.bf16.msra.mxu0 %v5922_v9  ;;  %v4110_v40 = vunpack.c.l.b16 %v2538_v59 }
 0x991   :  { %v3326_v21 = vsel %vm159_vm0, %v11471_v27, 0.0  ;;  %v6295_v57 = vpop.eup %6294  ;;  %v11476_v27 = vpack.c.b16 %v11474_v7, %v11475_v15  ;;  %v1428_v52 = vmul.f32 %v6293_v8, %v11477_v49  ;;  %v3773_v7 = vsel %vm159_vm0, %v9347_v19, 0.0  ;;  %v11479_v19 = vld [vmem:[#allocation103_spill] sm:$0xff] }
 0x992   :  { %v2759_v23 = vmul.f32 %v6295_v57, %v9351_v58  ;;  %v4109_v15 = vunpack.c.l.b16 %v2537_v61  ;;  %v9589_v61 = vpop.xlane.xlu0 %2690 }
 0x993   :  { %v1650_v49 = vpack.c.bf16 %v1428_v52, %v1428_v52 }
 0x994   :  { %4500 = vmatpush.bf16.msra.mxu0 %v5921_v55  ;;  %v4124_v58 = vpack.c.b16 %v4110_v40, %v4109_v15  ;;  %v11480_v15 = vld [vmem:[#allocation60_spill] sm:$0xff] }
 0x995   :  { %v9566_v0 = vpop.xlane.xlu2 %2687  ;;  %v3998_v52 = vunpack.c.l.b16 %v1650_v49 }
 0x996   :  { %11473 = vst [vmem:[#allocation25_spill] sm:$0xff] %v9566_v0  ;;  %v1649_v0 = vpack.c.bf16 %v1427_v10, %v1427_v10  ;;  %v2981_v10 = vpack.c.bf16 %v2759_v23, %v2759_v23 }
 0x997   :  { %v9593_v55 = vpop.xlane.xlu1 %3131 }
 0x998   :  { %3327 = vadd.xlane.f32.xlu2 %v3326_v21  ;;  %v6297_v21 = vpop.eup %6296  ;;  %v3997_v8 = vunpack.c.l.b16 %v1649_v0 }
 0x999   :  { %v2760_v36 = vmul.f32 %v6297_v21, %v9366_v38  ;;  %v6299_v6 = vpop.eup %6298 }
 0x99a   :  { %v3648_v9 = vmul.f32 %v6299_v6, %v3632_v50  ;;  %v6301_v59 = vpop.eup %6300  ;;  %v4012_v0 = vpack.c.b16 %v3998_v52, %v3997_v8 }
 0x99b   :  { %3965 = vrot.lane.b32.xlu0 %v11476_v27, %s6591_s2  ;;  %v11478_v27 = vld [vmem:[#allocation101_spill] sm:$0xff]  ;;  %v2982_v38 = vpack.c.bf16 %v2760_v36, %v2760_v36  ;;  %v3647_v57 = vmul.f32 %v6301_v59, %v3630_v18 }
 0x99c   :  { %6302 = vrcp.f32 %v11478_v27  ;;  %v3870_v50 = vpack.c.bf16 %v3648_v9, %v3648_v9  ;;  %v11483_v9 = vld [vmem:[#allocation148_spill] sm:$0xff] }
 0x99d   :  { %6304 = vrcp.f32 %v9484_v34  ;;  %v9591_v21 = vpop.xlane.xlu2 %3134  ;;  %v4165_v34 = vunpack.c.l.b16 %v2981_v10 }
 0x99e   :  { %6306 = vrcp.f32 %v9468_v17  ;;  %v3869_v17 = vpack.c.bf16 %v3647_v57, %v3647_v57  ;;  %v4278_v59 = vunpack.c.l.b16 %v3870_v50 }
 0x99f   :  { %6308 = vrcp.f32 %v11479_v19  ;;  %v11482_v19 = vld [vmem:[#allocation125_spill] sm:$0xff] }
 0x9a0   :  { %3774 = vadd.xlane.f32.xlu2 %v3773_v7  ;;  %v4166_v7 = vunpack.c.l.b16 %v2982_v38  ;;  %6310 = vrcp.f32 %v9489_v45  ;;  %v9602_v38 = vpop.xlane.xlu0 %3575  ;;  %v4277_v57 = vunpack.c.l.b16 %v3869_v17 }
 0x9a1   :  { %6312 = vrcp.f32 %v9487_v22 }
 0x9a2   :  { %v6303_v23 = vpop.eup %6302  ;;  %v4180_v18 = vpack.c.b16 %v4166_v7, %v4165_v34 }
 0x9a3   :  { %4133 = vrot.lane.b32.xlu0 %v4124_v58, %s6585_s15  ;;  %v6305_v40 = vpop.eup %6304  ;;  %v521_v27 = vmul.f32 %v6303_v23, %v11480_v15  ;;  %v11481_v58 = vld [vmem:[#allocation149_spill] sm:$0xff]  ;;  %v9605_v15 = vpop.xlane.xlu1 %3578 }
 0x9a4   :  { %v6307_v36 = vpop.eup %6306  ;;  %v1872_v49 = vmul.f32 %v6305_v40, %v11481_v58 }
 0x9a5   :  { %v6309_v6 = vpop.eup %6308  ;;  %v1871_v8 = vmul.f32 %v6307_v36, %v11483_v9  ;;  %v759_v52 = vpack.c.bf16 %v521_v27, %v521_v27  ;;  %v3964_v45 = vpop.permute.xlu2 %3963 }
 0x9a6   :  { %v522_v10 = vmul.f32 %v6309_v6, %v11482_v19  ;;  %v2094_v23 = vpack.c.bf16 %v1872_v49, %v1872_v49  ;;  %v6311_v34 = vpop.eup %6310 }
 0x9a7   :  { %v2093_v50 = vpack.c.bf16 %v1871_v8, %v1871_v8  ;;  %v3899_v40 = vunpack.c.l.b16 %v759_v52  ;;  %v6313_v6 = vpop.eup %6312 }
 0x9a8   :  { %4021 = vrot.lane.b32.xlu1 %v4012_v0, %s6589_s19  ;;  %v4292_v0 = vpack.c.b16 %v4278_v59, %v4277_v57  ;;  %v760_v7 = vpack.c.bf16 %v522_v10, %v522_v10  ;;  %v4054_v36 = vunpack.c.l.b16 %v2094_v23  ;;  %v3203_v17 = vmul.f32 %v6313_v6, %v9408_v51  ;;  %v4020_v22 = vpop.permute.xlu0 %4019 }
 0x9a9   :  { %v4053_v27 = vunpack.c.l.b16 %v2093_v50 }
 0x9aa   :  { %v3900_v58 = vunpack.c.l.b16 %v760_v7  ;;  %v3425_v8 = vpack.c.bf16 %v3203_v17, %v3203_v17 }
 0x9ab   :  { %4189 = vrot.lane.b32.xlu0 %v4180_v18, %s6583_s29  ;;  %v3204_v18 = vmul.f32 %v6311_v34, %v9423_v41  ;;  %v4068_v19 = vpack.c.b16 %v4054_v36, %v4053_v27 }
 0x9ac   :  { %v3915_v49 = vpack.c.b16 %v3900_v58, %v3899_v40  ;;  %v4221_v51 = vunpack.c.l.b16 %v3425_v8  ;;  %v9616_v40 = vpop.f32.mrf.mxu2  ;;  %v11487_v8 = vld [vmem:[#allocation78_spill] sm:$0xff] }
 0x9ad   :  { %v3426_v59 = vpack.c.bf16 %v3204_v18, %v3204_v18  ;;  %v4132_v57 = vpop.permute.xlu2 %4131 }
 0x9ae   :  { %v4317_v10 = vsel %vm326_vm1, %v3915_v49, %v3964_v45  ;;  %v11485_v49 = vld [vmem:[#allocation54_spill] sm:$0xff] }
 0x9af   :  { %v4076_v9 = vpop.permute.xlu1 %4075  ;;  %v4341_v41 = vsel %vm4339_vm2, %v4317_v10, %v4020_v22  ;;  %v4222_v52 = vunpack.c.l.b16 %v3426_v59  ;;  %v11484_v22 = vld [vmem:[#allocation28_spill] sm:$0xff]  ;;  %v2000_v59 = vsel %vm159_vm0, %v11485_v49, 0.0 }
 0x9b0   :  { %4301 = vrot.lane.b32.xlu1 %v4292_v0, %s6579_s3  ;;  %v4358_v23 = vsel %vm4356_vm3, %v4341_v41, %v4076_v9  ;;  %v1556_v27 = vsel %vm159_vm0, %v11484_v22, 0.0  ;;  %v11486_v10 = vld [vmem:[#allocation32_spill] sm:$0xff]  ;;  %v11488_v41 = vld [vmem:[#allocation127_spill] sm:$0xff] }
 0x9b1   :  { %v4375_v34 = vsel %vm4373_vm4, %v4358_v23, %v4132_v57  ;;  %v4236_v45 = vpack.c.b16 %v4222_v52, %v4221_v51  ;;  %v2003_v9 = vsel %vm159_vm0, %v11486_v10, 0.0  ;;  %v2447_v57 = vsel %vm159_vm0, %v11487_v8, 0.0  ;;  %v11494_v8 = vld [vmem:[#allocation22_spill] sm:$0xff] }
 0x9b2   :  { %v2888_v52 = vsel %vm159_vm0, %v11488_v41, 0.0 }
 0x9b4   :  { %v9622_v58 = vpop.f32.mrf.mxu2 }
 0x9b7   :  { %v4188_v0 = vpop.permute.xlu0 %4187 }
 0x9b8   :  { %4077 = vrot.lane.b32.xlu2 %v4068_v19, %s6587_s17  ;;  %v4392_v7 = vsel %vm4390_vm5, %v4375_v34, %v4188_v0  ;;  %v11489_v0 = vld [vmem:[#allocation74_spill] sm:$0xff] }
 0x9b9   :  { %v4300_v18 = vpop.permute.xlu2 %4299  ;;  %v1559_v34 = vsel %vm159_vm0, %v11489_v0, 0.0  ;;  %v11495_v0 = vld [vmem:[#allocation73_spill] sm:$0xff] }
 0x9bc   :  { %v9624_v17 = vpop.f32.mrf.mxu2 }
 0x9bf   :  { %v4244_v50 = vpop.permute.xlu1 %4243 }
 0x9c0   :  { %4245 = vrot.lane.b32.xlu2 %v4236_v45, %s6581_s27  ;;  %v4409_v36 = vsel %vm4407_vm6, %v4392_v7, %v4244_v50  ;;  %v3332_v45 = vsel %vm159_vm0, %v9202_v1, 0.0  ;;  %v11490_v7 = vld [vmem:[#allocation39_spill] sm:$0xff]  ;;  %v3335_v50 = vsel %vm159_vm0, %v9206_v25, 0.0  ;;  %v3779_v1 = vsel %vm159_vm0, %v9410_v13, 0.0  ;;  %v3635_v13 = vpop.f32.mrf.mxu1 }
 0x9c1   :  { %v4426_v6 = vsel %vm4424_vm7, %v4409_v36, %v4300_v18  ;;  %6314 = vrcp.f32 %v11490_v7  ;;  %v11491_v18 = vld [vmem:[#allocation46_spill] sm:$0xff] }
 0x9c2   :  { %5849 = vmatmul.msk.bf16.vlgmr.msra.gmra.mxu0 %vm159_vm0, %v4426_v6  ;;  %6316 = vrcp.f32 %v11491_v18  ;;  %v11492_v6 = vld [vmem:[#allocation52_spill] sm:$0xff] }
 0x9c3   :  { %v2444_v22 = vsel %vm159_vm0, %v11492_v6, 0.0  ;;  %6318 = vrcp.f32 %v9508_v28  ;;  %v2891_v28 = vsel %vm159_vm0, %v11495_v0, 0.0 }
 0x9c4   :  { %v9630_v19 = vpop.f32.mrf.mxu2  ;;  %6320 = vrcp.f32 %v9506_v63 }
 0x9c5   :  { %6322 = vrcp.f32 %v9502_v48 }
 0x9c6   :  { %6324 = vrcp.f32 %v9500_v33 }
 0x9c7   :  { %v6315_v49 = vpop.eup %6314  ;;  %6326 = vrcp.f32 %v9520_v39 }
 0x9c8   :  { %v6317_v10 = vpop.eup %6316  ;;  %6328 = vrcp.f32 %v9518_v32  ;;  %v11496_v32 = vld [vmem:[#allocation102_spill] sm:$0xff] }
 0x9c9   :  { %6330 = vrcp.f32 %v9534_v20  ;;  %v3637_v20 = vpop.f32.mrf.mxu1 }
 0x9ca   :  { %6332 = vrcp.f32 %v9526_v14 }
 0x9cb   :  { %6334 = vrcp.f32 %v11496_v32  ;;  %v11498_v32 = vld [vmem:[#allocation136_spill] sm:$0xff] }
 0x9cc   :  { %v9638_v23 = vpop.f32.mrf.mxu2  ;;  %6336 = vrcp.f32 %v9496_v35 }
 0x9d4   :  { %v9650_v36 = vpop.f32.mrf.mxu2 }
 0x9d5   :  { %1557 = vadd.xlane.f32.xlu0 %v1556_v27 }
 0x9da   :  { %2001 = vadd.xlane.f32.xlu1 %v2000_v59  ;;  %v11493_v59 = vld [vmem:[#allocation97_spill] sm:$0xff] }
 0x9db   :  { %v986_v25 = vmul.f32 %v6315_v49, %v11493_v59 }
 0x9dc   :  { %v9668_v63 = vpop.f32.mrf.mxu2 }
 0x9dd   :  { %2004 = vadd.xlane.f32.xlu0 %v2003_v9  ;;  %v1208_v41 = vpack.c.bf16 %v986_v25, %v986_v25 }
 0x9df   :  { %v3944_v48 = vunpack.c.l.b16 %v1208_v41  ;;  %v11497_v41 = vld [vmem:[#allocation105_spill] sm:$0xff] }
 0x9e0   :  { %6338 = vrcp.f32 %v11497_v41 }
 0x9e1   :  { %6340 = vrcp.f32 %v9498_v42 }
 0x9e2   :  { %2448 = vadd.xlane.f32.xlu1 %v2447_v57  ;;  %v9640_v51 = vpop.xlane.xlu0 %1551  ;;  %v985_v57 = vmul.f32 %v6317_v10, %v11494_v8  ;;  %v3776_v8 = vsel %vm159_vm0, %v9412_v5, 0.0  ;;  %6342 = vrcp.f32 %v9510_v54 }
 0x9e3   :  { %6344 = vrcp.f32 %v9516_v3 }
 0x9e5   :  { %2889 = vadd.xlane.f32.xlu0 %v2888_v52  ;;  %v6319_v52 = vpop.eup %6318 }
 0x9e9   :  { %1560 = vadd.xlane.f32.xlu2 %v1559_v34  ;;  %v6321_v34 = vpop.eup %6320 }
 0x9ea   :  { %3333 = vadd.xlane.f32.xlu1 %v3332_v45  ;;  %v9654_v27 = vpop.xlane.xlu0 %1998  ;;  %v9662_v9 = vpop.xlane.xlu1 %1554  ;;  %v1207_v45 = vpack.c.bf16 %v985_v57, %v985_v57 }
 0x9eb   :  { %v6323_v7 = vpop.eup %6322 }
 0x9ec   :  { %v6325_v6 = vpop.eup %6324  ;;  %v1874_v49 = vmul.f32 %v6323_v7, %v9125_v11 }
 0x9ed   :  { %3336 = vadd.xlane.f32.xlu0 %v3335_v50  ;;  %v2318_v50 = vmul.f32 %v6319_v52, %v9285_v30  ;;  %v1873_v25 = vmul.f32 %v6325_v6, %v9107_v47  ;;  %v6327_v10 = vpop.eup %6326 }
 0x9ee   :  { %v6329_v11 = vpop.eup %6328  ;;  %v3206_v52 = vmul.f32 %v6327_v10, %v9449_v16 }
 0x9ef   :  { %v2540_v30 = vpack.c.bf16 %v2318_v50, %v2318_v50  ;;  %v2095_v47 = vpack.c.bf16 %v1873_v25, %v1873_v25  ;;  %v6331_v5 = vpop.eup %6330 }
 0x9f0   :  { %v6333_v50 = vpop.eup %6332 }
 0x9f1   :  { %2445 = vadd.xlane.f32.xlu2 %v2444_v22  ;;  %v3943_v22 = vunpack.c.l.b16 %v1207_v45  ;;  %v4112_v0 = vunpack.c.l.b16 %v2540_v30  ;;  %v3650_v45 = vmul.f32 %v6331_v5, %v3637_v20  ;;  %v6335_v6 = vpop.eup %6334  ;;  %v11499_v20 = vld [vmem:[#allocation21_spill] sm:$0xff] }
 0x9f2   :  { %3780 = vadd.xlane.f32.xlu1 %v3779_v1  ;;  %v9672_v18 = vpop.xlane.xlu0 %2883  ;;  %v2317_v1 = vmul.f32 %v6321_v34, %v9265_v26  ;;  %v9680_v59 = vpop.xlane.xlu1 %2439  ;;  %v2096_v26 = vpack.c.bf16 %v1874_v49, %v1874_v49  ;;  %v3205_v34 = vmul.f32 %v6329_v11, %v9430_v46  ;;  %v4055_v49 = vunpack.c.l.b16 %v2095_v47  ;;  %v11500_v47 = vld [vmem:[#allocation137_spill] sm:$0xff] }
 0x9f3   :  { %v3957_v39 = vpack.c.b16 %v3944_v48, %v3943_v22  ;;  %v3649_v22 = vmul.f32 %v6333_v50, %v3635_v13  ;;  %v3872_v10 = vpack.c.bf16 %v3650_v45, %v3650_v45  ;;  %v11501_v45 = vld [vmem:[#allocation133_spill] sm:$0xff] }
 0x9f4   :  { %v2539_v57 = vpack.c.bf16 %v2317_v1, %v2317_v1  ;;  %v4056_v48 = vunpack.c.l.b16 %v2096_v26  ;;  %v3428_v1 = vpack.c.bf16 %v3206_v52, %v3206_v52  ;;  %v3427_v42 = vpack.c.bf16 %v3205_v34, %v3205_v34 }
 0x9f5   :  { %v3871_v26 = vpack.c.bf16 %v3649_v22, %v3649_v22 }
 0x9f6   :  { %v4111_v35 = vunpack.c.l.b16 %v2539_v57  ;;  %v4069_v46 = vpack.c.b16 %v4056_v48, %v4055_v49  ;;  %v4224_v13 = vunpack.c.l.b16 %v3428_v1  ;;  %v4223_v34 = vunpack.c.l.b16 %v3427_v42 }
 0x9f7   :  { %v4279_v50 = vunpack.c.l.b16 %v3871_v26 }
 0x9f8   :  { %v4125_v16 = vpack.c.b16 %v4112_v0, %v4111_v35  ;;  %v4280_v0 = vunpack.c.l.b16 %v3872_v10  ;;  %v523_v35 = vmul.f32 %v6335_v6, %v11501_v45  ;;  %v4237_v22 = vpack.c.b16 %v4224_v13, %v4223_v34 }
 0x9f9   :  { %2892 = vadd.xlane.f32.xlu2 %v2891_v28  ;;  %v9694_v28 = vpop.f32.mrf.mxu2 }
 0x9fa   :  { %v9697_v7 = vpop.xlane.xlu0 %3330  ;;  %v9699_v25 = vpop.xlane.xlu1 %2886  ;;  %v4293_v1 = vpack.c.b16 %v4280_v0, %v4279_v50 }
 0x9fb   :  { %v9674_v33 = vpop.xlane.xlu2 %1995 }
 0xa01   :  { %3777 = vadd.xlane.f32.xlu2 %v3776_v8  ;;  %3967 = vrot.lane.b32.xlu0 %v3957_v39, %s6591_s2  ;;  %v6337_v39 = vpop.eup %6336  ;;  %v9711_v54 = vpop.f32.mrf.mxu2 }
 0xa02   :  { %v6339_v30 = vpop.eup %6338  ;;  %v1429_v57 = vmul.f32 %v6337_v39, %v11498_v32  ;;  %v9714_v3 = vpop.xlane.xlu1 %3771 }
 0xa03   :  { %v9691_v14 = vpop.xlane.xlu2 %2442  ;;  %v6341_v8 = vpop.eup %6340  ;;  %v524_v41 = vmul.f32 %v6339_v30, %v11499_v20 }
 0xa04   :  { %v1430_v52 = vmul.f32 %v6341_v8, %v11500_v47  ;;  %v1651_v48 = vpack.c.bf16 %v1429_v57, %v1429_v57 }
 0xa05   :  { %v762_v49 = vpack.c.bf16 %v524_v41, %v524_v41 }
 0xa06   :  { %v1652_v39 = vpack.c.bf16 %v1430_v52, %v1430_v52  ;;  %v3999_v6 = vunpack.c.l.b16 %v1651_v48 }
 0xa07   :  { %v3902_v8 = vunpack.c.l.b16 %v762_v49 }
 0xa08   :  { %v4000_v57 = vunpack.c.l.b16 %v1652_v39 }
 0xa09   :  { %4135 = vrot.lane.b32.xlu0 %v4125_v16, %s6585_s15  ;;  %v6343_v16 = vpop.eup %6342  ;;  %v9721_v52 = vpop.f32.mrf.mxu2 }
 0xa0a   :  { %v6345_v30 = vpop.eup %6344  ;;  %v2761_v10 = vmul.f32 %v6343_v16, %v9370_v4  ;;  %v4013_v41 = vpack.c.b16 %v4000_v57, %v3999_v6 }
 0xa0b   :  { %v9704_v11 = vpop.xlane.xlu2 %3327  ;;  %4079 = vrot.lane.b32.xlu1 %v4069_v46, %s6587_s17  ;;  %v761_v46 = vpack.c.bf16 %v523_v35, %v523_v35  ;;  %v2762_v32 = vmul.f32 %v6345_v30, %v9377_v24 }
 0xa0c   :  { %v2983_v20 = vpack.c.bf16 %v2761_v10, %v2761_v10 }
 0xa0d   :  { %v3966_v5 = vpop.permute.xlu0 %3965  ;;  %v3901_v26 = vunpack.c.l.b16 %v761_v46  ;;  %v2984_v0 = vpack.c.bf16 %v2762_v32, %v2762_v32  ;;  %v11502_v32 = vld [vmem:[#allocation84_spill] sm:$0xff] }
 0xa0e   :  { %v4167_v48 = vunpack.c.l.b16 %v2983_v20  ;;  %v1565_v57 = vsel %vm159_vm0, %v11502_v32, 0.0 }
 0xa0f   :  { %v3916_v47 = vpack.c.b16 %v3902_v8, %v3901_v26  ;;  %v4168_v50 = vunpack.c.l.b16 %v2984_v0  ;;  %v11503_v26 = vld [vmem:[#allocation58_spill] sm:$0xff] }
 0xa10   :  { %v11505_v0 = vld [vmem:[#allocation114_spill] sm:$0xff] }
 0xa11   :  { %4247 = vrot.lane.b32.xlu0 %v4237_v22, %s6581_s27  ;;  %v4320_v4 = vsel %vm326_vm1, %v3916_v47, %v3966_v5  ;;  %v4181_v22 = vpack.c.b16 %v4168_v50, %v4167_v48  ;;  %v9728_v39 = vpop.f32.mrf.mxu2 }
 0xa13   :  { %v9717_v42 = vpop.xlane.xlu2 %3774  ;;  %4303 = vrot.lane.b32.xlu1 %v4293_v1, %s6579_s3 }
 0xa15   :  { %v4134_v13 = vpop.permute.xlu0 %4133 }
 0xa19   :  { %4023 = vrot.lane.b32.xlu2 %v4013_v41, %s6589_s19  ;;  %v9735_v6 = vpop.f32.mrf.mxu2  ;;  %v11504_v41 = vld [vmem:[#allocation118_spill] sm:$0xff] }
 0xa1a   :  { %v4022_v34 = vpop.permute.xlu1 %4021  ;;  %v2450_v47 = vsel %vm159_vm0, %v11504_v41, 0.0 }
 0xa1b   :  { %v4078_v45 = vpop.permute.xlu2 %4077  ;;  %v4343_v35 = vsel %vm4339_vm2, %v4320_v4, %v4022_v34  ;;  %v2453_v4 = vsel %vm159_vm0, %v11505_v0, 0.0 }
 0xa1c   :  { %v4360_v24 = vsel %vm4356_vm3, %v4343_v35, %v4078_v45  ;;  %v11506_v35 = vld [vmem:[#allocation82_spill] sm:$0xff] }
 0xa1d   :  { %v4190_v16 = vpop.permute.xlu0 %4189  ;;  %v4377_v49 = vsel %vm4373_vm4, %v4360_v24, %v4134_v13  ;;  %v2006_v13 = vsel %vm159_vm0, %v11503_v26, 0.0  ;;  %v1562_v48 = vsel %vm159_vm0, %v11506_v35, 0.0  ;;  %v11507_v24 = vld [vmem:[#allocation80_spill] sm:$0xff] }
 0xa1e   :  { %v4394_v30 = vsel %vm4390_vm5, %v4377_v49, %v4190_v16  ;;  %v2897_v50 = vsel %vm159_vm0, %v11507_v24, 0.0 }
 0xa21   :  { %4191 = vrot.lane.b32.xlu2 %v4181_v22, %s6583_s29  ;;  %v9737_v8 = vpop.f32.mrf.mxu2  ;;  %v3338_v22 = vsel %vm159_vm0, %v9245_v2, 0.0 }
 0xa22   :  { %v4302_v1 = vpop.permute.xlu1 %4301 }
 0xa23   :  { %v4246_v5 = vpop.permute.xlu2 %4245 }
 0xa24   :  { %v4411_v46 = vsel %vm4407_vm6, %v4394_v30, %v4246_v5  ;;  %v3782_v5 = vsel %vm159_vm0, %v9439_v60, 0.0 }
 0xa25   :  { %v4428_v10 = vsel %vm4424_vm7, %v4411_v46, %v4302_v1  ;;  %v11508_v1 = vld [vmem:[#allocation56_spill] sm:$0xff] }
 0xa26   :  { %5850 = vmatmul.msk.bf16.gmra.mxu0 %vm159_vm0, %v4428_v10  ;;  %v2009_v30 = vsel %vm159_vm0, %v11508_v1, 0.0  ;;  %v3785_v10 = vsel %vm159_vm0, %v9432_v31, 0.0  ;;  %v11509_v31 = vld [vmem:[#allocation138_spill] sm:$0xff] }
 0xa29   :  { %v9743_v20 = vpop.f32.mrf.mxu2 }
 0xa31   :  { %v9749_v45 = vpop.f32.mrf.mxu2 }
 0xa39   :  { %v9763_v46 = vpop.f32.mrf.mxu2 }
 0xa3b   :  { %1566 = vadd.xlane.f32.xlu0 %v1565_v57 }
 0xa3d   :  { %2007 = vadd.xlane.f32.xlu1 %v2006_v13 }
 0xa43   :  { %2451 = vadd.xlane.f32.xlu0 %v2450_v47  ;;  %v11510_v47 = vld [vmem:[#allocation134_spill] sm:$0xff] }
 0xa45   :  { %2454 = vadd.xlane.f32.xlu1 %v2453_v4 }
 0xa48   :  { %v1558_v34 = vpop.xlane.xlu0 %1557 }
 0xa4a   :  { %1563 = vadd.xlane.f32.xlu2 %v1562_v48 }
 0xa4b   :  { %2898 = vadd.xlane.f32.xlu0 %v2897_v50 }
 0xa4d   :  { %3339 = vadd.xlane.f32.xlu1 %v3338_v22  ;;  %v2002_v16 = vpop.xlane.xlu1 %2001 }
 0xa4e   :  { %6346 = vrcp.f32 %v2002_v16 }
 0xa4f   :  { %6348 = vrcp.f32 %v9528_v53 }
 0xa50   :  { %v2005_v49 = vpop.xlane.xlu0 %2004 }
 0xa51   :  { %6350 = vrcp.f32 %v2005_v49 }
 0xa52   :  { %6352 = vrcp.f32 %v9542_v44  ;;  %2010 = vadd.xlane.f32.xlu2 %v2009_v30 }
 0xa53   :  { %3783 = vadd.xlane.f32.xlu0 %v3782_v5  ;;  %6354 = vrcp.f32 %v9544_v12 }
 0xa54   :  { %v6347_v2 = vpop.eup %6346  ;;  %6356 = vrcp.f32 %v1558_v34  ;;  %v11511_v34 = vld [vmem:[#allocation141_spill] sm:$0xff] }
 0xa55   :  { %v2085_v53 = vmul.f32 %v6347_v2, %v9174_v43  ;;  %3786 = vadd.xlane.f32.xlu1 %v3785_v10  ;;  %v2449_v32 = vpop.xlane.xlu1 %2448  ;;  %v6349_v57 = vpop.eup %6348  ;;  %6358 = vrcp.f32 %v9549_v62  ;;  %v2894_v43 = vsel %vm159_vm0, %v11510_v47, 0.0  ;;  %v11512_v2 = vld [vmem:[#allocation151_spill] sm:$0xff] }
 0xa56   :  { %6360 = vrcp.f32 %v9569_v56  ;;  %v1431_v12 = vmul.f32 %v6349_v57, %v11509_v31  ;;  %v9777_v62 = vpop.f32.mrf.mxu2  ;;  %v9779_v56 = vpop.f32.mrf.mxu1  ;;  %v11514_v57 = vld [vmem:[#allocation150_spill] sm:$0xff]  ;;  %v11516_v31 = vld [vmem:[#allocation153_spill] sm:$0xff] }
 0xa57   :  { %v6351_v44 = vpop.eup %6350  ;;  %v2101_v60 = vpack.c.bf16 %v2085_v53, %v2085_v53  ;;  %6362 = vrcp.f32 %v9563_v29  ;;  %v11513_v53 = vld [vmem:[#allocation91_spill] sm:$0xff] }
 0xa58   :  { %v6353_v26 = vpop.eup %6352  ;;  %v2086_v13 = vmul.f32 %v6351_v44, %v9195_v37  ;;  %v2890_v41 = vpop.xlane.xlu0 %2889  ;;  %6364 = vrcp.f32 %v9591_v21  ;;  %v1653_v22 = vpack.c.bf16 %v1431_v12, %v1431_v12  ;;  %v3341_v12 = vsel %vm159_vm0, %v11516_v31, 0.0 }
 0xa59   :  { %v6355_v4 = vpop.eup %6354  ;;  %v1432_v35 = vmul.f32 %v6353_v26, %v11511_v34  ;;  %v9782_v37 = vunpack.c.l.b16 %v2101_v60  ;;  %v11515_v60 = vld [vmem:[#allocation99_spill] sm:$0xff] }
 0xa5a   :  { %v2102_v0 = vpack.c.bf16 %v2086_v13, %v2086_v13  ;;  %2895 = vadd.xlane.f32.xlu2 %v2894_v43  ;;  %v6357_v48 = vpop.eup %6356  ;;  %v1876_v10 = vmul.f32 %v6355_v4, %v11512_v2  ;;  %v4001_v47 = vunpack.c.l.b16 %v1653_v22 }
 0xa5b   :  { %v6359_v50 = vpop.eup %6358  ;;  %v1654_v5 = vpack.c.bf16 %v1432_v35, %v1432_v35  ;;  %v1641_v21 = vmul.f32 %v6357_v48, %v11513_v53 }
 0xa5c   :  { %v9784_v29 = vunpack.c.l.b16 %v2102_v0  ;;  %v1561_v24 = vpop.xlane.xlu2 %1560  ;;  %v6361_v49 = vpop.eup %6360  ;;  %v1875_v44 = vmul.f32 %v6359_v50, %v11514_v57  ;;  %v11517_v0 = vld [vmem:[#allocation95_spill] sm:$0xff]  ;;  %v11518_v50 = vld [vmem:[#allocation90_spill] sm:$0xff] }
 0xa5d   :  { %6366 = vrcp.f32 %v1561_v24  ;;  %v3334_v16 = vpop.xlane.xlu1 %3333  ;;  %v6363_v30 = vpop.eup %6362  ;;  %v2320_v13 = vmul.f32 %v6361_v49, %v11515_v60  ;;  %v1657_v35 = vpack.c.bf16 %v1641_v21, %v1641_v21  ;;  %v4002_v48 = vunpack.c.l.b16 %v1654_v5  ;;  %v11519_v60 = vld [vmem:[#allocation126_spill] sm:$0xff] }
 0xa5e   :  { %6368 = vrcp.f32 %v3334_v16  ;;  %v4072_v1 = vpack.c.b16 %v9784_v29, %v9782_v37  ;;  %v6365_v43 = vpop.eup %6364  ;;  %v2319_v34 = vmul.f32 %v6363_v30, %v11517_v0  ;;  %v9799_v22 = vpop.f32.mrf.mxu2 }
 0xa5f   :  { %6370 = vrcp.f32 %v2449_v32  ;;  %v2098_v32 = vpack.c.bf16 %v1876_v10, %v1876_v10  ;;  %v2542_v53 = vpack.c.bf16 %v2320_v13, %v2320_v13  ;;  %v3642_v10 = vpop.f32.mrf.mxu1  ;;  %v9803_v31 = vunpack.c.l.b16 %v1657_v35  ;;  %v11521_v35 = vld [vmem:[#allocation27_spill] sm:$0xff] }
 0xa60   :  { %6372 = vrcp.f32 %v9593_v55  ;;  %v3337_v26 = vpop.xlane.xlu0 %3336  ;;  %v2097_v55 = vpack.c.bf16 %v1875_v44, %v1875_v44  ;;  %v3208_v44 = vmul.f32 %v6365_v43, %v11519_v60 }
 0xa61   :  { %6374 = vrcp.f32 %v3337_v26  ;;  %v2541_v26 = vpack.c.bf16 %v2319_v34, %v2319_v34 }
 0xa62   :  { %6376 = vrcp.f32 %v9605_v15  ;;  %3342 = vadd.xlane.f32.xlu2 %v3341_v12  ;;  %v4014_v15 = vpack.c.b16 %v4002_v48, %v4001_v47  ;;  %v11520_v12 = vld [vmem:[#allocation142_spill] sm:$0xff]  ;;  %v4057_v48 = vunpack.c.l.b16 %v2097_v55 }
 0xa63   :  { %v6367_v4 = vpop.eup %6366  ;;  %6378 = vrcp.f32 %v9602_v38  ;;  %v4058_v38 = vunpack.c.l.b16 %v2098_v32 }
 0xa64   :  { %v6369_v24 = vpop.eup %6368  ;;  %v1642_v16 = vmul.f32 %v6367_v4, %v11518_v50  ;;  %v2446_v49 = vpop.xlane.xlu2 %2445 }
 0xa65   :  { %v6371_v2 = vpop.eup %6370  ;;  %v3417_v30 = vmul.f32 %v6369_v24, %v9728_v39  ;;  %6380 = vrcp.f32 %v2446_v49  ;;  %v4114_v24 = vunpack.c.l.b16 %v2542_v53  ;;  %v11523_v53 = vld [vmem:[#allocation147_spill] sm:$0xff] }
 0xa66   :  { %v6373_v57 = vpop.eup %6372  ;;  %v1658_v21 = vpack.c.bf16 %v1642_v16, %v1642_v16  ;;  %6382 = vrcp.f32 %v2890_v41  ;;  %v2530_v0 = vmul.f32 %v6371_v2, %v11520_v12  ;;  %v4113_v16 = vunpack.c.l.b16 %v2541_v26 }
 0xa67   :  { %v6375_v5 = vpop.eup %6374  ;;  %4025 = vrot.lane.b32.xlu0 %v4014_v15, %s6589_s19  ;;  %v3433_v39 = vpack.c.bf16 %v3417_v30, %v3417_v30  ;;  %6384 = vrcp.f32 %v9589_v61  ;;  %v3207_v50 = vmul.f32 %v6373_v57, %v11521_v35  ;;  %v11522_v15 = vld [vmem:[#allocation25_spill] sm:$0xff]  ;;  %v3430_v30 = vpack.c.bf16 %v3208_v44, %v3208_v44  ;;  %v3781_v57 = vpop.xlane.xlu1 %3780 }
 0xa68   :  { %v6377_v13 = vpop.eup %6376  ;;  %v9807_v4 = vunpack.c.l.b16 %v1658_v21  ;;  %v3418_v47 = vmul.f32 %v6375_v5, %v9735_v6  ;;  %6386 = vrcp.f32 %v11522_v15  ;;  %v4070_v6 = vpack.c.b16 %v4058_v38, %v4057_v48 }
 0xa69   :  { %v3652_v34 = vmul.f32 %v6377_v13, %v3642_v10  ;;  %v6379_v43 = vpop.eup %6378  ;;  %v2546_v21 = vpack.c.bf16 %v2530_v0, %v2530_v0  ;;  %v9816_v61 = vunpack.c.l.b16 %v3433_v39  ;;  %v3844_v13 = vpop.f32.mrf.mxu2  ;;  %v4126_v12 = vpack.c.b16 %v4114_v24, %v4113_v16 }
 0xa6a   :  { %v3434_v41 = vpack.c.bf16 %v3418_v47, %v3418_v47  ;;  %v4016_v32 = vpack.c.b16 %v9807_v4, %v9803_v31  ;;  %v3651_v2 = vmul.f32 %v6379_v43, %v9779_v56  ;;  %v3429_v47 = vpack.c.bf16 %v3207_v50, %v3207_v50 }
 0xa6b   :  { %v6381_v49 = vpop.eup %6380  ;;  %v3874_v60 = vpack.c.bf16 %v3652_v34, %v3652_v34  ;;  %v9825_v39 = vunpack.c.l.b16 %v2546_v21  ;;  %v4226_v43 = vunpack.c.l.b16 %v3430_v30  ;;  %v11525_v30 = vld [vmem:[#allocation55_spill] sm:$0xff] }
 0xa6c   :  { %v9818_v55 = vunpack.c.l.b16 %v3434_v41  ;;  %v2529_v10 = vmul.f32 %v6381_v49, %v11523_v53  ;;  %v2893_v5 = vpop.xlane.xlu2 %2892  ;;  %v6383_v26 = vpop.eup %6382  ;;  %v3873_v0 = vpack.c.bf16 %v3651_v2, %v3651_v2  ;;  %v4225_v50 = vunpack.c.l.b16 %v3429_v47  ;;  %v11524_v2 = vld [vmem:[#allocation115_spill] sm:$0xff] }
 0xa6d   :  { %6388 = vrcp.f32 %v2893_v5  ;;  %v6385_v38 = vpop.eup %6384  ;;  %v2973_v48 = vmul.f32 %v6383_v26, %v9624_v17  ;;  %v4282_v35 = vunpack.c.l.b16 %v3874_v60 }
 0xa6e   :  { %v2545_v56 = vpack.c.bf16 %v2529_v10, %v2529_v10  ;;  %4081 = vrot.lane.b32.xlu1 %v4070_v6, %s6587_s17  ;;  %v4240_v44 = vpack.c.b16 %v9818_v55, %v9816_v61  ;;  %6390 = vrcp.f32 %v3781_v57  ;;  %v6387_v24 = vpop.eup %6386  ;;  %v4281_v49 = vunpack.c.l.b16 %v3873_v0 }
 0xa6f   :  { %4137 = vrot.lane.b32.xlu0 %v4126_v12, %s6585_s15  ;;  %v2763_v6 = vmul.f32 %v6387_v24, %v11524_v2  ;;  %v2989_v53 = vpack.c.bf16 %v2973_v48, %v2973_v48  ;;  %v4238_v57 = vpack.c.b16 %v4226_v43, %v4225_v50  ;;  %v2764_v26 = vmul.f32 %v6385_v38, %v11525_v30  ;;  %v11526_v43 = vld [vmem:[#allocation57_spill] sm:$0xff]  ;;  %v11527_v24 = vld [vmem:[#allocation68_spill] sm:$0xff] }
 0xa70   :  { %v9828_v34 = vunpack.c.l.b16 %v2545_v56  ;;  %v4294_v5 = vpack.c.b16 %v4282_v35, %v4281_v49  ;;  %v11528_v35 = vpack.c.b16 %v11526_v43, %v11527_v24 }
 0xa71   :  { %v3846_v12 = vpop.f32.mrf.mxu2  ;;  %v2985_v47 = vpack.c.bf16 %v2763_v6, %v2763_v6  ;;  %v9837_v56 = vunpack.c.l.b16 %v2989_v53  ;;  %v11529_v53 = vld [vmem:[#allocation107_spill] sm:$0xff] }
 0xa72   :  { %v4128_v41 = vpack.c.b16 %v9825_v39, %v9828_v34 }
 0xa73   :  { %v6389_v16 = vpop.eup %6388  ;;  %v3968_v15 = vpop.permute.xlu0 %3967  ;;  %v4169_v6 = vunpack.c.l.b16 %v2985_v47 }
 0xa74   :  { %v2974_v21 = vmul.f32 %v6389_v16, %v9630_v19  ;;  %v3778_v10 = vpop.xlane.xlu2 %3777  ;;  %v6391_v17 = vpop.eup %6390  ;;  %v2986_v19 = vpack.c.bf16 %v2764_v26, %v2764_v26 }
 0xa75   :  { %6392 = vrcp.f32 %v3778_v10  ;;  %v3862_v0 = vmul.f32 %v6391_v17, %v3846_v12  ;;  %v11530_v10 = vld [vmem:[#allocation106_spill] sm:$0xff] }
 0xa76   :  { %v2990_v60 = vpack.c.bf16 %v2974_v21, %v2974_v21  ;;  %4249 = vrot.lane.b32.xlu1 %v4238_v57, %s6581_s27  ;;  %v11531_v57 = vpack.c.b16 %v11529_v53, %v11530_v10  ;;  %v11533_v53 = vld [vmem:[#allocation72_spill] sm:$0xff]  ;;  %6394 = vrcp.f32 %v9674_v33 }
 0xa77   :  { %4305 = vrot.lane.b32.xlu0 %v4294_v5, %s6579_s3  ;;  %v3878_v49 = vpack.c.bf16 %v3862_v0, %v3862_v0  ;;  %v1571_v10 = vsel %vm159_vm0, %v11533_v53, 0.0  ;;  %6396 = vrcp.f32 %v9654_v27  ;;  %v11542_v53 = vld [vmem:[#allocation122_spill] sm:$0xff]  ;;  %v11543_v27 = vld [vmem:[#allocation89_spill] sm:$0xff] }
 0xa78   :  { %v9839_v48 = vunpack.c.l.b16 %v2990_v60  ;;  %v4323_v17 = vsel %vm326_vm1, %v11531_v57, %v3968_v15  ;;  %v4170_v60 = vunpack.c.l.b16 %v2986_v19  ;;  %v11534_v57 = vld [vmem:[#allocation51_spill] sm:$0xff]  ;;  %6398 = vrcp.f32 %v9691_v14 }
 0xa79   :  { %v9852_v12 = vunpack.c.l.b16 %v3878_v49  ;;  %6400 = vrcp.f32 %v9680_v59  ;;  %v11546_v59 = vld [vmem:[#allocation139_spill] sm:$0xff]  ;;  %v3849_v4 = vpop.f32.mrf.mxu2 }
 0xa7a   :  { %3969 = vrot.lane.b32.xlu2 %v11528_v35, %s6591_s2  ;;  %v4184_v38 = vpack.c.b16 %v9839_v48, %v9837_v56  ;;  %v4182_v24 = vpack.c.b16 %v4170_v60, %v4169_v6  ;;  %v11537_v60 = vld [vmem:[#allocation92_spill] sm:$0xff]  ;;  %6402 = vrcp.f32 %v9699_v25  ;;  %v11566_v48 = vld [vmem:[#allocation70_spill] sm:$0xff] }
 0xa7b   :  { %v6393_v50 = vpop.eup %6392  ;;  %v4136_v16 = vpop.permute.xlu0 %4135  ;;  %6404 = vrcp.f32 %v9672_v18 }
 0xa7c   :  { %v3861_v2 = vmul.f32 %v6393_v50, %v3844_v13  ;;  %v4024_v21 = vpop.permute.xlu2 %4023  ;;  %6406 = vrcp.f32 %v9717_v42 }
 0xa7d   :  { %v4080_v5 = vpop.permute.xlu1 %4079  ;;  %v4345_v26 = vsel %vm4339_vm2, %v4323_v17, %v4024_v21  ;;  %v11532_v21 = vld [vmem:[#allocation76_spill] sm:$0xff]  ;;  %v11535_v17 = vld [vmem:[#allocation117_spill] sm:$0xff]  ;;  %6408 = vrcp.f32 %v9714_v3 }
 0xa7e   :  { %v3877_v30 = vpack.c.bf16 %v3861_v2, %v3861_v2  ;;  %v4362_v0 = vsel %vm4356_vm3, %v4345_v26, %v4080_v5  ;;  %v1568_v6 = vsel %vm159_vm0, %v11532_v21, 0.0  ;;  %v2459_v5 = vsel %vm159_vm0, %v11535_v17, 0.0 }
 0xa7f   :  { %v4379_v15 = vsel %vm4373_vm4, %v4362_v0, %v4136_v16  ;;  %v2015_v16 = vsel %vm159_vm0, %v11534_v57, 0.0  ;;  %v11538_v0 = vld [vmem:[#allocation145_spill] sm:$0xff]  ;;  %v6395_v57 = vpop.eup %6394  ;;  %6410 = vrcp.f32 %v9662_v9  ;;  %v11550_v9 = vld [vmem:[#allocation50_spill] sm:$0xff] }
 0xa80   :  { %v9854_v43 = vunpack.c.l.b16 %v3877_v30  ;;  %v11536_v30 = vld [vmem:[#allocation45_spill] sm:$0xff]  ;;  %v6397_v17 = vpop.eup %6396  ;;  %6412 = vrcp.f32 %v9640_v51 }
 0xa81   :  { %v1127_v26 = vsel %vm159_vm0, %v11536_v30, 0.0  ;;  %v11544_v30 = vld [vmem:[#allocation130_spill] sm:$0xff]  ;;  %6414 = vrcp.f32 %v9704_v11 }
 0xa82   :  { %4193 = vrot.lane.b32.xlu2 %v4182_v24, %s6583_s29  ;;  %v4296_v13 = vpack.c.b16 %v9852_v12, %v9854_v43  ;;  %v2900_v24 = vsel %vm159_vm0, %v11537_v60, 0.0  ;;  %v11545_v60 = vld [vmem:[#allocation85_spill] sm:$0xff]  ;;  %6416 = vrcp.f32 %v9697_v7 }
 0xa83   :  { %v4248_v47 = vpop.permute.xlu0 %4247 }
 0xa84   :  { %v4192_v35 = vpop.permute.xlu2 %4191 }
 0xa85   :  { %v4396_v50 = vsel %vm4390_vm5, %v4379_v15, %v4192_v35  ;;  %v4304_v2 = vpop.permute.xlu1 %4303  ;;  %v11539_v35 = vld [vmem:[#allocation69_spill] sm:$0xff] }
 0xa86   :  { %v4413_v19 = vsel %vm4407_vm6, %v4396_v50, %v4248_v47  ;;  %v3344_v47 = vsel %vm159_vm0, %v11538_v0, 0.0  ;;  %v2012_v15 = vsel %vm159_vm0, %v11539_v35, 0.0 }
 0xa87   :  { %v4430_v49 = vsel %vm4424_vm7, %v4413_v19, %v4304_v2  ;;  %v11540_v2 = vld [vmem:[#allocation132_spill] sm:$0xff] }
 0xa88   :  { %5851 = vmatmul.msk.bf16.gmra.mxu0 %vm159_vm0, %v4430_v49  ;;  %v3347_v19 = vsel %vm159_vm0, %v11540_v2, 0.0  ;;  %v11541_v49 = vld [vmem:[#allocation104_spill] sm:$0xff] }
 0xa89   :  { %v3791_v21 = vsel %vm159_vm0, %v11541_v49, 0.0 }
 0xaa0   :  { %1569 = vadd.xlane.f32.xlu1 %v1568_v6 }
 0xaa1   :  { %1572 = vadd.xlane.f32.xlu0 %v1571_v10  ;;  %v2456_v10 = vsel %vm159_vm0, %v11542_v53, 0.0  ;;  %v11547_v53 = vld [vmem:[#allocation62_spill] sm:$0xff] }
 0xaa8   :  { %2016 = vadd.xlane.f32.xlu1 %v2015_v16 }
 0xaa9   :  { %2460 = vadd.xlane.f32.xlu0 %v2459_v5  ;;  %v2083_v5 = vmul.f32 %v6395_v57, %v11543_v27 }
 0xaab   :  { %1128 = vadd.xlane.f32.xlu2 %v1127_v26  ;;  %v2084_v26 = vmul.f32 %v6397_v17, %v11544_v30  ;;  %v2099_v0 = vpack.c.bf16 %v2083_v5, %v2083_v5  ;;  %v11548_v17 = vld [vmem:[#allocation144_spill] sm:$0xff] }
 0xaac   :  { %v3788_v27 = vsel %vm159_vm0, %v11548_v17, 0.0 }
 0xaad   :  { %v4059_v25 = vunpack.c.l.b16 %v2099_v0 }
 0xaae   :  { %v9881_v50 = vpop.xlane.xlu0 %1566 }
 0xab0   :  { %2901 = vadd.xlane.f32.xlu1 %v2900_v24  ;;  %v9889_v6 = vpop.xlane.xlu1 %2007  ;;  %v2903_v24 = vsel %vm159_vm0, %v11545_v60, 0.0 }
 0xab1   :  { %3345 = vadd.xlane.f32.xlu0 %v3344_v47  ;;  %v6399_v47 = vpop.eup %6398 }
 0xab2   :  { %v6401_v2 = vpop.eup %6400 }
 0xab3   :  { %2013 = vadd.xlane.f32.xlu2 %v2012_v15  ;;  %v2100_v15 = vpack.c.bf16 %v2084_v26, %v2084_v26 }
 0xab5   :  { %v4060_v57 = vunpack.c.l.b16 %v2100_v15 }
 0xab6   :  { %v9893_v16 = vpop.xlane.xlu0 %2451 }
 0xab7   :  { %v4071_v42 = vpack.c.b16 %v4060_v57, %v4059_v25 }
 0xab8   :  { %3348 = vadd.xlane.f32.xlu1 %v3347_v19  ;;  %v9905_v35 = vpop.xlane.xlu1 %2454  ;;  %v2528_v19 = vmul.f32 %v6399_v47, %v11546_v59 }
 0xab9   :  { %3792 = vadd.xlane.f32.xlu0 %v3791_v21  ;;  %v6403_v21 = vpop.eup %6402 }
 0xaba   :  { %v6405_v18 = vpop.eup %6404  ;;  %v2972_v5 = vmul.f32 %v6403_v21, %v9622_v58  ;;  %v2544_v30 = vpack.c.bf16 %v2528_v19, %v2528_v19 }
 0xabb   :  { %2457 = vadd.xlane.f32.xlu2 %v2456_v10  ;;  %v2527_v10 = vmul.f32 %v6401_v2, %v11547_v53  ;;  %v6407_v26 = vpop.eup %6406  ;;  %v2971_v60 = vmul.f32 %v6405_v18, %v9616_v40  ;;  %v11549_v40 = vld [vmem:[#allocation34_spill] sm:$0xff] }
 0xabc   :  { %v6409_v3 = vpop.eup %6408  ;;  %v2988_v15 = vpack.c.bf16 %v2972_v5, %v2972_v5  ;;  %v3860_v58 = vmul.f32 %v6407_v26, %v9799_v22  ;;  %v4116_v2 = vunpack.c.l.b16 %v2544_v30  ;;  %v11551_v21 = vpack.c.b16 %v11549_v40, %v11550_v9  ;;  %v11552_v22 = vld [vmem:[#allocation124_spill] sm:$0xff] }
 0xabd   :  { %v9895_v33 = vpop.xlane.xlu2 %1563  ;;  %v2987_v59 = vpack.c.bf16 %v2971_v60, %v2971_v60  ;;  %v3859_v19 = vmul.f32 %v6409_v3, %v9777_v62 }
 0xabe   :  { %v9911_v49 = vpop.xlane.xlu0 %2898  ;;  %v3876_v57 = vpack.c.bf16 %v3860_v58, %v3860_v58  ;;  %v4172_v18 = vunpack.c.l.b16 %v2988_v15  ;;  %6418 = vrcp.f32 %v9895_v33 }
 0xabf   :  { %v3875_v5 = vpack.c.bf16 %v3859_v19, %v3859_v19  ;;  %v4171_v62 = vunpack.c.l.b16 %v2987_v59  ;;  %6420 = vrcp.f32 %v9881_v50 }
 0xac0   :  { %v9922_v47 = vpop.xlane.xlu1 %3339 }
 0xac1   :  { %v4183_v60 = vpack.c.b16 %v4172_v18, %v4171_v62  ;;  %v4283_v11 = vunpack.c.l.b16 %v3875_v5  ;;  %v11558_v62 = vld [vmem:[#allocation38_spill] sm:$0xff] }
 0xac3   :  { %2904 = vadd.xlane.f32.xlu2 %v2903_v24  ;;  %v2543_v24 = vpack.c.bf16 %v2527_v10, %v2527_v10  ;;  %v6411_v10 = vpop.eup %6410 }
 0xac4   :  { %v6413_v17 = vpop.eup %6412 }
 0xac5   :  { %v9907_v14 = vpop.xlane.xlu2 %2010  ;;  %v4115_v53 = vunpack.c.l.b16 %v2543_v24  ;;  %v4284_v24 = vunpack.c.l.b16 %v3876_v57  ;;  %v11554_v57 = vld [vmem:[#allocation109_spill] sm:$0xff] }
 0xac6   :  { %v9926_v25 = vpop.xlane.xlu0 %3783  ;;  %6422 = vrcp.f32 %v9907_v14  ;;  %v11560_v14 = vld [vmem:[#allocation94_spill] sm:$0xff] }
 0xac7   :  { %v4127_v51 = vpack.c.b16 %v4116_v2, %v4115_v53  ;;  %v6415_v2 = vpop.eup %6414  ;;  %v4295_v19 = vpack.c.b16 %v4284_v24, %v4283_v11  ;;  %6424 = vrcp.f32 %v9889_v6 }
 0xac8   :  { %v9937_v3 = vpop.xlane.xlu1 %3786  ;;  %v6417_v9 = vpop.eup %6416 }
 0xac9   :  { %v3416_v53 = vmul.f32 %v6417_v9, %v9721_v52  ;;  %v6419_v50 = vpop.eup %6418 }
 0xaca   :  { %v6421_v11 = vpop.eup %6420 }
 0xacb   :  { %3789 = vadd.xlane.f32.xlu2 %v3788_v27  ;;  %v1640_v27 = vmul.f32 %v6411_v10, %v11552_v22  ;;  %v3432_v52 = vpack.c.bf16 %v3416_v53, %v3416_v53 }
 0xacd   :  { %v2896_v0 = vpop.xlane.xlu2 %2895  ;;  %4083 = vrot.lane.b32.xlu0 %v4071_v42, %s6587_s17  ;;  %v11553_v42 = vld [vmem:[#allocation64_spill] sm:$0xff]  ;;  %v1656_v58 = vpack.c.bf16 %v1640_v27, %v1640_v27 }
 0xace   :  { %v1639_v26 = vmul.f32 %v6413_v17, %v11553_v42  ;;  %6426 = vrcp.f32 %v2896_v0 }
 0xacf   :  { %v4004_v7 = vunpack.c.l.b16 %v1656_v58  ;;  %6428 = vrcp.f32 %v9911_v49  ;;  %v11562_v49 = vld [vmem:[#allocation154_spill] sm:$0xff] }
 0xad0   :  { %v1655_v40 = vpack.c.bf16 %v1639_v26, %v1639_v26 }
 0xad1   :  { %3971 = vrot.lane.b32.xlu1 %v11551_v21, %s6591_s2  ;;  %v3415_v21 = vmul.f32 %v6415_v2, %v9711_v54  ;;  %v11557_v54 = vld [vmem:[#allocation49_spill] sm:$0xff]  ;;  %v1643_v2 = vmul.f32 %v6419_v50, %v11560_v14  ;;  %v11565_v50 = vld [vmem:[#allocation128_spill] sm:$0xff] }
 0xad2   :  { %v4003_v10 = vunpack.c.l.b16 %v1655_v40  ;;  %v11559_v42 = vpack.c.b16 %v11557_v54, %v11558_v62  ;;  %v4228_v40 = vunpack.c.l.b16 %v3432_v52 }
 0xad3   :  { %v3431_v27 = vpack.c.bf16 %v3415_v21, %v3415_v21  ;;  %v11561_v21 = vld [vmem:[#allocation66_spill] sm:$0xff]  ;;  %v1659_v53 = vpack.c.bf16 %v1643_v2, %v1643_v2  ;;  %v3851_v2 = vpop.f32.mrf.mxu2 }
 0xad4   :  { %v4015_v26 = vpack.c.b16 %v4004_v7, %v4003_v10 }
 0xad5   :  { %v3343_v30 = vpop.xlane.xlu2 %3342  ;;  %4139 = vrot.lane.b32.xlu0 %v4127_v51, %s6585_s15  ;;  %v11555_v51 = vld [vmem:[#allocation108_spill] sm:$0xff]  ;;  %v4227_v58 = vunpack.c.l.b16 %v3431_v27  ;;  %v4007_v34 = vunpack.c.l.b16 %v1659_v53 }
 0xad6   :  { %v11556_v18 = vpack.c.b16 %v11554_v57, %v11555_v51  ;;  %6430 = vrcp.f32 %v3343_v30 }
 0xad7   :  { %v4239_v29 = vpack.c.b16 %v4228_v40, %v4227_v58  ;;  %6432 = vrcp.f32 %v9922_v47 }
 0xad8   :  { %6434 = vrcp.f32 %v9905_v35 }
 0xad9   :  { %v4026_v15 = vpop.permute.xlu0 %4025  ;;  %4195 = vrot.lane.b32.xlu1 %v4183_v60, %s6583_s29  ;;  %6436 = vrcp.f32 %v9893_v16  ;;  %v11564_v16 = vld [vmem:[#allocation129_spill] sm:$0xff] }
 0xada   :  { %6438 = vrcp.f32 %v9937_v3 }
 0xadb   :  { %6440 = vrcp.f32 %v9926_v25 }
 0xadd   :  { %v3970_v59 = vpop.permute.xlu2 %3969  ;;  %4307 = vrot.lane.b32.xlu0 %v4295_v19, %s6579_s3  ;;  %v6423_v19 = vpop.eup %6422 }
 0xade   :  { %v4326_v17 = vsel %vm326_vm1, %v11556_v18, %v3970_v59  ;;  %v1644_v59 = vmul.f32 %v6421_v11, %v11561_v21  ;;  %v2088_v10 = vmul.f32 %v6423_v19, %v11562_v49  ;;  %v11563_v18 = vld [vmem:[#allocation152_spill] sm:$0xff]  ;;  %v11569_v49 = vld [vmem:[#allocation119_spill] sm:$0xff] }
 0xadf   :  { %v4347_v33 = vsel %vm4339_vm2, %v4326_v17, %v4026_v15 }
 0xae0   :  { %v4082_v22 = vpop.permute.xlu1 %4081  ;;  %v1660_v51 = vpack.c.bf16 %v1644_v59, %v1644_v59 }
 0xae1   :  { %v4138_v5 = vpop.permute.xlu0 %4137  ;;  %3973 = vrot.lane.b32.xlu1 %v11559_v42, %s6591_s2  ;;  %v4364_v60 = vsel %vm4356_vm3, %v4347_v33, %v4082_v22 }
 0xae2   :  { %v4381_v15 = vsel %vm4373_vm4, %v4364_v60, %v4138_v5  ;;  %v4008_v27 = vunpack.c.l.b16 %v1660_v51 }
 0xae3   :  { %4027 = vrot.lane.b32.xlu2 %v4015_v26, %s6589_s19 }
 0xae5   :  { %v4194_v24 = vpop.permute.xlu2 %4193  ;;  %4085 = vrot.lane.b32.xlu0 %v4072_v1, %s6587_s17  ;;  %v6425_v1 = vpop.eup %6424 }
 0xae6   :  { %v4398_v6 = vsel %vm4390_vm5, %v4381_v15, %v4194_v24  ;;  %v6427_v57 = vpop.eup %6426  ;;  %v2087_v17 = vmul.f32 %v6425_v1, %v11563_v18  ;;  %v11571_v18 = vld [vmem:[#allocation96_spill] sm:$0xff] }
 0xae7   :  { %v6429_v39 = vpop.eup %6428  ;;  %v2975_v30 = vmul.f32 %v6427_v57, %v9638_v23  ;;  %v4017_v23 = vpack.c.b16 %v4008_v27, %v4007_v34 }
 0xae8   :  { %v4250_v9 = vpop.permute.xlu1 %4249  ;;  %v6431_v22 = vpop.eup %6430  ;;  %v2103_v5 = vpack.c.bf16 %v2087_v17, %v2087_v17  ;;  %v2976_v54 = vmul.f32 %v6429_v39, %v9650_v36 }
 0xae9   :  { %v4415_v7 = vsel %vm4407_vm6, %v4398_v6, %v4250_v9  ;;  %v4306_v37 = vpop.permute.xlu0 %4305  ;;  %4141 = vrot.lane.b32.xlu1 %v4128_v41, %s6585_s15  ;;  %v2104_v41 = vpack.c.bf16 %v2088_v10, %v2088_v10  ;;  %v6433_v47 = vpop.eup %6432  ;;  %v2991_v42 = vpack.c.bf16 %v2975_v30, %v2975_v30  ;;  %v3420_v61 = vmul.f32 %v6431_v22, %v9743_v20  ;;  %v11570_v10 = vld [vmem:[#allocation87_spill] sm:$0xff] }
 0xaea   :  { %v4432_v0 = vsel %vm4424_vm7, %v4415_v7, %v4306_v37  ;;  %v4063_v55 = vunpack.c.l.b16 %v2103_v5  ;;  %v2992_v36 = vpack.c.bf16 %v2976_v54, %v2976_v54  ;;  %v6435_v31 = vpop.eup %6434  ;;  %v11572_v54 = vld [vmem:[#allocation79_spill] sm:$0xff] }
 0xaeb   :  { %4251 = vrot.lane.b32.xlu2 %v4239_v29, %s6581_s27  ;;  %5852 = vmatmul.msk.bf16.gmra.mxu0 %vm159_vm0, %v4432_v0  ;;  %v4064_v62 = vunpack.c.l.b16 %v2104_v41  ;;  %v4175_v12 = vunpack.c.l.b16 %v2991_v42  ;;  %v3436_v43 = vpack.c.bf16 %v3420_v61, %v3420_v61  ;;  %v6437_v35 = vpop.eup %6436  ;;  %v2532_v52 = vmul.f32 %v6435_v31, %v11564_v16 }
 0xaec   :  { %v4176_v20 = vunpack.c.l.b16 %v2992_v36  ;;  %v2531_v60 = vmul.f32 %v6437_v35, %v11565_v50  ;;  %v6439_v11 = vpop.eup %6438  ;;  %v11576_v50 = vld [vmem:[#allocation140_spill] sm:$0xff] }
 0xaed   :  { %4253 = vrot.lane.b32.xlu0 %v4240_v44, %s6581_s27  ;;  %v3419_v44 = vmul.f32 %v6433_v47, %v9737_v8  ;;  %v2548_v58 = vpack.c.bf16 %v2532_v52, %v2532_v52  ;;  %v6441_v3 = vpop.eup %6440  ;;  %v3864_v40 = vmul.f32 %v6439_v11, %v3851_v2  ;;  %v11575_v52 = vld [vmem:[#allocation86_spill] sm:$0xff]  ;;  %v11577_v11 = vld [vmem:[#allocation29_spill] sm:$0xff] }
 0xaee   :  { %v4185_v8 = vpack.c.b16 %v4176_v20, %v4175_v12  ;;  %v2547_v56 = vpack.c.bf16 %v2531_v60, %v2531_v60  ;;  %v3863_v6 = vmul.f32 %v6441_v3, %v3849_v4 }
 0xaef   :  { %v3435_v26 = vpack.c.bf16 %v3419_v44, %v3419_v44  ;;  %v4120_v15 = vunpack.c.l.b16 %v2548_v58  ;;  %v3880_v25 = vpack.c.bf16 %v3864_v40, %v3864_v40 }
 0xaf0   :  { %v4119_v19 = vunpack.c.l.b16 %v2547_v56  ;;  %v3879_v21 = vpack.c.bf16 %v3863_v6, %v3863_v6 }
 0xaf1   :  { %4309 = vrot.lane.b32.xlu1 %v4296_v13, %s6579_s3  ;;  %v4073_v13 = vpack.c.b16 %v4064_v62, %v4063_v55  ;;  %v4231_v33 = vunpack.c.l.b16 %v3435_v26  ;;  %v4288_v59 = vunpack.c.l.b16 %v3880_v25  ;;  %v11573_v55 = vld [vmem:[#allocation44_spill] sm:$0xff]  ;;  %v11574_v26 = vld [vmem:[#allocation131_spill] sm:$0xff] }
 0xaf2   :  { %v4129_v9 = vpack.c.b16 %v4120_v15, %v4119_v19  ;;  %v4287_v7 = vunpack.c.l.b16 %v3879_v21 }
 0xaf3   :  { %4029 = vrot.lane.b32.xlu2 %v4016_v32, %s6589_s19  ;;  %v4232_v32 = vunpack.c.l.b16 %v3436_v43 }
 0xaf4   :  { %v4297_v37 = vpack.c.b16 %v4288_v59, %v4287_v7 }
 0xaf5   :  { %4031 = vrot.lane.b32.xlu0 %v4017_v23, %s6589_s19  ;;  %v4241_v24 = vpack.c.b16 %v4232_v32, %v4231_v33 }
 0xaf9   :  { %4087 = vrot.lane.b32.xlu1 %v4073_v13, %s6587_s17 }
 0xafb   :  { %4197 = vrot.lane.b32.xlu2 %v4184_v38, %s6583_s29  ;;  %v11567_v38 = vld [vmem:[#allocation113_spill] sm:$0xff] }
 0xafc   :  { %v11568_v14 = vpack.c.b16 %v11566_v48, %v11567_v38 }
 0xafd   :  { %4199 = vrot.lane.b32.xlu0 %v4185_v8, %s6583_s29 }
 0xb01   :  { %4255 = vrot.lane.b32.xlu1 %v4241_v24, %s6581_s27 }
 0xb03   :  { %3975 = vrot.lane.b32.xlu2 %v11568_v14, %s6591_s2  ;;  %v11578_v14 = vld [vmem:[#allocation123_spill] sm:$0xff] }
 0xb0b   :  { %4143 = vrot.lane.b32.xlu2 %v4129_v9, %s6585_s15  ;;  %v11579_v9 = vld [vmem:[#allocation83_spill] sm:$0xff] }
 0xb13   :  { %4311 = vrot.lane.b32.xlu2 %v4297_v37, %s6579_s3  ;;  %v1570_v29 = vpop.xlane.xlu1 %1569 }
 0xb14   :  { %6442 = vrcp.f32 %v1570_v29  ;;  %v1573_v1 = vpop.xlane.xlu0 %1572 }
 0xb15   :  { %6444 = vrcp.f32 %v1573_v1 }
 0xb16   :  { %6446 = vrcp.f32 %v11569_v49 }
 0xb1a   :  { %v6443_v0 = vpop.eup %6442 }
 0xb1b   :  { %v6445_v53 = vpop.eup %6444  ;;  %v1645_v57 = vmul.f32 %v6443_v0, %v11570_v10  ;;  %v2017_v51 = vpop.xlane.xlu1 %2016  ;;  %v11580_v0 = vld [vmem:[#allocation98_spill] sm:$0xff] }
 0xb1c   :  { %v1646_v17 = vmul.f32 %v6445_v53, %v11571_v18  ;;  %v2461_v39 = vpop.xlane.xlu0 %2460  ;;  %v6447_v5 = vpop.eup %6446 }
 0xb1d   :  { %v1661_v34 = vpack.c.bf16 %v1645_v57, %v1645_v57  ;;  %v1201_v47 = vmul.f32 %v6447_v5, %v11572_v54  ;;  %v11581_v57 = vld [vmem:[#allocation71_spill] sm:$0xff] }
 0xb1e   :  { %v1662_v41 = vpack.c.bf16 %v1646_v17, %v1646_v17  ;;  %v1129_v30 = vpop.xlane.xlu2 %1128 }
 0xb1f   :  { %v4009_v22 = vunpack.c.l.b16 %v1661_v34  ;;  %6448 = vrcp.f32 %v1129_v30  ;;  %v1217_v23 = vpack.c.bf16 %v1201_v47, %v1201_v47 }
 0xb20   :  { %v4010_v27 = vunpack.c.l.b16 %v1662_v41  ;;  %6450 = vrcp.f32 %v2017_v51 }
 0xb21   :  { %v3953_v20 = vunpack.c.l.b16 %v1217_v23 }
 0xb22   :  { %v4018_v62 = vpack.c.b16 %v4010_v27, %v4009_v22 }
 0xb23   :  { %v2902_v42 = vpop.xlane.xlu1 %2901 }
 0xb24   :  { %4033 = vrot.lane.b32.xlu1 %v4018_v62, %s6589_s19  ;;  %v3346_v44 = vpop.xlane.xlu0 %3345  ;;  %s5645_s19 = sshll.u32 %s10906_s14, 4  ;;  %s5646_s19 = int_to_ptr.hbm [resolvable:$true] %s5645_s19 }
 0xb25   :  { %v6449_v61 = vpop.eup %6448 }
 0xb26   :  { %v1202_v36 = vmul.f32 %v6449_v61, %v11573_v55  ;;  %v2014_v12 = vpop.xlane.xlu2 %2013  ;;  %v6451_v43 = vpop.eup %6450 }
 0xb27   :  { %6452 = vrcp.f32 %v2014_v12  ;;  %v2090_v31 = vmul.f32 %v6451_v43, %v11574_v26  ;;  %v10036_v55 = vpop.f32.mrf.mxu0  ;;  %v11582_v12 = vld [vmem:[#allocation36_spill] sm:$0xff] }
 0xb28   :  { %6454 = vrcp.f32 %v2461_v39  ;;  %v1218_v13 = vpack.c.bf16 %v1202_v36, %v1202_v36 }
 0xb29   :  { %6456 = vrcp.f32 %v3346_v44  ;;  %v2106_v33 = vpack.c.bf16 %v2090_v31, %v2090_v31 }
 0xb2a   :  { %v3954_v4 = vunpack.c.l.b16 %v1218_v13 }
 0xb2b   :  { %v3349_v32 = vpop.xlane.xlu1 %3348  ;;  %v4066_v38 = vunpack.c.l.b16 %v2106_v33 }
 0xb2c   :  { %6458 = vrcp.f32 %v3349_v32  ;;  %v3962_v8 = vpack.c.b16 %v3954_v4, %v3953_v20  ;;  %v3793_v1 = vpop.xlane.xlu0 %3792 }
 0xb2d   :  { %v6453_v35 = vpop.eup %6452  ;;  %6460 = vrcp.f32 %v11575_v52 }
 0xb2e   :  { %v6455_v16 = vpop.eup %6454  ;;  %v2089_v60 = vmul.f32 %v6453_v35, %v11576_v50  ;;  %v2458_v24 = vpop.xlane.xlu2 %2457  ;;  %3977 = vrot.lane.b32.xlu0 %v3962_v8, %s6591_s2 }
 0xb2f   :  { %v6457_v58 = vpop.eup %6456  ;;  %6462 = vrcp.f32 %v2458_v24  ;;  %v2534_v3 = vmul.f32 %v6455_v16, %v11578_v14  ;;  %v4504_v14 = vpop.f32.mrf.mxu0 }
 0xb30   :  { %6464 = vrcp.f32 %v11577_v11  ;;  %v2105_v56 = vpack.c.bf16 %v2089_v60, %v2089_v60  ;;  %v3421_v2 = vmul.f32 %v6457_v58, %v9749_v45  ;;  %v3854_v45 = vpop.f32.mrf.mxu2  ;;  %v11584_v58 = vld [vmem:[#allocation67_spill] sm:$0xff] }
 0xb31   :  { %6466 = vrcp.f32 %v2902_v42  ;;  %v2550_v37 = vpack.c.bf16 %v2534_v3, %v2534_v3  ;;  %v11585_v3 = vld [vmem:[#allocation63_spill] sm:$0xff] }
 0xb32   :  { %v6459_v48 = vpop.eup %6458  ;;  %v4065_v15 = vunpack.c.l.b16 %v2105_v56  ;;  %v3437_v29 = vpack.c.bf16 %v3421_v2, %v3421_v2 }
 0xb33   :  { %v3422_v40 = vmul.f32 %v6459_v48, %v9763_v46  ;;  %v6461_v19 = vpop.eup %6460  ;;  %v4122_v39 = vunpack.c.l.b16 %v2550_v37 }
 0xb34   :  { %v4074_v6 = vpack.c.b16 %v4066_v38, %v4065_v15  ;;  %v752_v21 = vmul.f32 %v6461_v19, %v11579_v9  ;;  %v4233_v41 = vunpack.c.l.b16 %v3437_v29 }
 0xb35   :  { %v6463_v25 = vpop.eup %6462  ;;  %v3438_v59 = vpack.c.bf16 %v3422_v40, %v3422_v40 }
 0xb36   :  { %v6465_v7 = vpop.eup %6464  ;;  %v2533_v53 = vmul.f32 %v6463_v25, %v11580_v0  ;;  %v2905_v49 = vpop.xlane.xlu2 %2904  ;;  %4089 = vrot.lane.b32.xlu2 %v4074_v6, %s6587_s17  ;;  %v768_v17 = vpack.c.bf16 %v752_v21, %v752_v21 }
 0xb37   :  { %v6467_v10 = vpop.eup %6466  ;;  %6468 = vrcp.f32 %v2905_v49  ;;  %v751_v46 = vmul.f32 %v6465_v7, %v11581_v57  ;;  %v4234_v51 = vunpack.c.l.b16 %v3438_v59 }
 0xb38   :  { %v2549_v18 = vpack.c.bf16 %v2533_v53, %v2533_v53  ;;  %6470 = vrcp.f32 %v3793_v1  ;;  %v2977_v34 = vmul.f32 %v6467_v10, %v9668_v63  ;;  %v3908_v47 = vunpack.c.l.b16 %v768_v17  ;;  %v3856_v43 = vpop.f32.mrf.mxu2  ;;  %v4507_v53 = vpop.f32.mrf.mxu0 }
 0xb39   :  { %v767_v22 = vpack.c.bf16 %v751_v46, %v751_v46  ;;  %v4242_v5 = vpack.c.b16 %v4234_v51, %v4233_v41  ;;  %v11587_v46 = vld [vmem:[#allocation31_spill] sm:$0xff]  ;;  %v11588_v41 = vld [vmem:[#allocation88_spill] sm:$0xff] }
 0xb3a   :  { %v4121_v30 = vunpack.c.l.b16 %v2549_v18  ;;  %v2993_v62 = vpack.c.bf16 %v2977_v34, %v2977_v34 }
 0xb3b   :  { %v3907_v36 = vunpack.c.l.b16 %v767_v22 }
 0xb3c   :  { %v4130_v27 = vpack.c.b16 %v4122_v39, %v4121_v30  ;;  %v4177_v20 = vunpack.c.l.b16 %v2993_v62  ;;  %v11589_v62 = vld [vmem:[#allocation61_spill] sm:$0xff] }
 0xb3d   :  { %v6469_v54 = vpop.eup %6468  ;;  %v3919_v13 = vpack.c.b16 %v3908_v47, %v3907_v36 }
 0xb3e   :  { %v2978_v42 = vmul.f32 %v6469_v54, %v9694_v28  ;;  %v3790_v61 = vpop.xlane.xlu2 %3789  ;;  %4145 = vrot.lane.b32.xlu0 %v4130_v27, %s6585_s15  ;;  %4257 = vrot.lane.b32.xlu2 %v4242_v5, %s6581_s27  ;;  %v6471_v23 = vpop.eup %6470  ;;  %v11583_v28 = vld [vmem:[#allocation53_spill] sm:$0xff] }
 0xb3f   :  { %6472 = vrcp.f32 %v3790_v61  ;;  %v4084_v63 = vpop.permute.xlu0 %4083  ;;  %v3866_v26 = vmul.f32 %v6471_v23, %v3856_v43  ;;  %v10060_v54 = vld [vmem:[%s10897_s5] ss:$0 sm:$0xff] }
 0xb40   :  { %v2994_v44 = vpack.c.bf16 %v2978_v42, %v2978_v42  ;;  %6474 = vrcp.f32 %v11582_v12  ;;  %v4509_v22 = vpop.f32.mrf.mxu0  ;;  %v4505_v23 = vadd.f32 %v10060_v54, %v4504_v14 }
 0xb41   :  { %6476 = vrcp.f32 %v11583_v28  ;;  %v3882_v16 = vpack.c.bf16 %v3866_v26, %v3866_v26 }
 0xb42   :  { %v4178_v31 = vunpack.c.l.b16 %v2994_v44 }
 0xb43   :  { %v3972_v4 = vpop.permute.xlu1 %3971  ;;  %v4290_v15 = vunpack.c.l.b16 %v3882_v16 }
 0xb44   :  { %v4329_v32 = vsel %vm326_vm1, %v3919_v13, %v3972_v4  ;;  %v4186_v8 = vpack.c.b16 %v4178_v31, %v4177_v20  ;;  %v11590_v13 = vld [vmem:[#allocation6_spill] sm:$0xff] }
 0xb45   :  { %v6473_v35 = vpop.eup %6472  ;;  %v10068_v20 = vadd.f32 %v4505_v23, %v11590_v13 }
 0xb46   :  { %v3865_v52 = vmul.f32 %v6473_v35, %v3854_v45  ;;  %v4028_v33 = vpop.permute.xlu2 %4027  ;;  %4201 = vrot.lane.b32.xlu1 %v4186_v8, %s6583_s29  ;;  %v6475_v50 = vpop.eup %6474  ;;  %v11586_v45 = vld [vmem:[#allocation42_spill] sm:$0xff] }
 0xb47   :  { %v4349_v60 = vsel %vm4339_vm2, %v4329_v32, %v4028_v33  ;;  %v4140_v24 = vpop.permute.xlu0 %4139  ;;  %v754_v11 = vmul.f32 %v6475_v50, %v11584_v58  ;;  %v6477_v38 = vpop.eup %6476  ;;  %6478 = vrcp.f32 %v11586_v45  ;;  %v4503_v50 = vadd.f32 %v10060_v54, %v10036_v55  ;;  %v11591_v58 = vld [vmem:[#allocation9_spill] sm:$0xff] }
 0xb48   :  { %v3881_v56 = vpack.c.bf16 %v3865_v52, %v3865_v52  ;;  %v4366_v48 = vsel %vm4356_vm3, %v4349_v60, %v4084_v63  ;;  %v753_v2 = vmul.f32 %v6477_v38, %v11585_v3  ;;  %6480 = vrcp.f32 %v11587_v46  ;;  %v4512_v31 = vpop.f32.mrf.mxu0  ;;  %v11595_v46 = vld [vmem:[#allocation10_spill] sm:$0xff] }
 0xb49   :  { %v4383_v19 = vsel %vm4373_vm4, %v4366_v48, %v4140_v24  ;;  %v770_v25 = vpack.c.bf16 %v754_v11, %v754_v11  ;;  %v4513_v35 = vadd.f32 %v10060_v54, %v4512_v31  ;;  %v4561_v52 = vsel %vm159_vm0, %v10068_v20, 0.0 }
 0xb4a   :  { %v4289_v40 = vunpack.c.l.b16 %v3881_v56  ;;  %v769_v59 = vpack.c.bf16 %v753_v2, %v753_v2  ;;  %v11592_v56 = vld [vmem:[#allocation5_spill] sm:$0xff]  ;;  %v4508_v55 = vadd.f32 %v10060_v54, %v4507_v53 }
 0xb4b   :  { %v4196_v6 = vpop.permute.xlu1 %4195  ;;  %v3910_v1 = vunpack.c.l.b16 %v770_v25  ;;  %v10080_v11 = vadd.f32 %v4513_v35, %v11591_v58  ;;  %v10083_v48 = vadd.f32 %v4503_v50, %v11592_v56  ;;  %v6593_v50 = vmov 64.0  }
 0xb4c   :  { %v4400_v9 = vsel %vm4390_vm5, %v4383_v19, %v4196_v6  ;;  %v4298_v21 = vpack.c.b16 %v4290_v15, %v4289_v40  ;;  %v3909_v49 = vunpack.c.l.b16 %v769_v59  ;;  %v4510_v40 = vadd.f32 %v10060_v54, %v4509_v22  ;;  %v11594_v59 = vld [vmem:[#allocation8_spill] sm:$0xff] }
 0xb4d   :  { %v6479_v34 = vpop.eup %6478  ;;  %v4570_v15 = vsel %vm159_vm0, %v10080_v11, 0.0  ;;  %v4558_v19 = vsel %vm159_vm0, %v10083_v48, 0.0  ;;  %v11597_v22 = vld [vmem:[#allocation116_spill] sm:$0xff] }
 0xb4e   :  { %v4252_v7 = vpop.permute.xlu2 %4251  ;;  %4313 = vrot.lane.b32.xlu0 %v4298_v21, %s6579_s3  ;;  %v3920_v57 = vpack.c.b16 %v3910_v1, %v3909_v49  ;;  %v756_v30 = vmul.f32 %v6479_v34, %v11588_v41  ;;  %v6481_v5 = vpop.eup %6480  ;;  %v11596_v34 = vld [vmem:[#allocation11_spill] sm:$0xff]  ;;  %6482 = vrcp.f32 %v11597_v22 }
 0xb4f   :  { %v4417_v37 = vsel %vm4407_vm6, %v4400_v9, %v4252_v7  ;;  %v4308_v29 = vpop.permute.xlu0 %4307  ;;  %v755_v42 = vmul.f32 %v6481_v5, %v11589_v62  ;;  %v11593_v9 = vld [vmem:[#allocation7_spill] sm:$0xff]  ;;  %v10098_v7 = vadd.f32 %v4510_v40, %v11594_v59 }
 0xb50   :  { %v4434_v0 = vsel %vm4424_vm7, %v4417_v37, %v4308_v29  ;;  %v772_v36 = vpack.c.bf16 %v756_v30, %v756_v30  ;;  %v10095_v21 = vadd.f32 %v4508_v55, %v11593_v9  ;;  %v4514_v1 = vpop.f32.mrf.mxu0 }
 0xb51   :  { %5853 = vmatmul.msk.bf16.gmra.mxu0 %vm159_vm0, %v4434_v0  ;;  %v771_v43 = vpack.c.bf16 %v755_v42, %v755_v42  ;;  %v4515_v49 = vadd.f32 %v10060_v54, %v4514_v1 }
 0xb52   :  { %v3912_v26 = vunpack.c.l.b16 %v772_v36  ;;  %v4564_v45 = vsel %vm159_vm0, %v10095_v21, 0.0 }
 0xb53   :  { %v3974_v10 = vpop.permute.xlu1 %3973  ;;  %v3911_v8 = vunpack.c.l.b16 %v771_v43 }
 0xb54   :  { %v4332_v51 = vsel %vm326_vm1, %v3920_v57, %v3974_v10  ;;  %v4567_v57 = vsel %vm159_vm0, %v10098_v7, 0.0  ;;  %v6483_v5 = vpop.eup %6482 }
 0xb55   :  { %v3921_v33 = vpack.c.b16 %v3912_v26, %v3911_v8 }
 0xb56   :  { %v4030_v18 = vpop.permute.xlu2 %4029 }
 0xb57   :  { %v4086_v17 = vpop.permute.xlu0 %4085  ;;  %v4351_v39 = vsel %vm4339_vm2, %v4332_v51, %v4030_v18  ;;  %v10110_v51 = vadd.f32 %v4515_v49, %v11595_v46 }
 0xb58   :  { %v4368_v47 = vsel %vm4356_vm3, %v4351_v39, %v4086_v17 }
 0xb59   :  { %v4573_v39 = vsel %vm159_vm0, %v10110_v51, 0.0 }
 0xb5b   :  { %v4142_v27 = vpop.permute.xlu1 %4141 }
 0xb5c   :  { %v4385_v61 = vsel %vm4373_vm4, %v4368_v47, %v4142_v27  ;;  %v11598_v27 = vld [vmem:[#allocation112_spill] sm:$0xff]  ;;  %v11599_v47 = vld [vmem:[#allocation111_spill] sm:$0xff] }
 0xb5d   :  { %6484 = vrcp.f32 %v11598_v27  ;;  %v758_v62 = vmul.f32 %v6483_v5, %v11599_v47 }
 0xb5e   :  { %v4198_v63 = vpop.permute.xlu2 %4197  ;;  %6486 = vrcp.f32 %v6593_v50 }
 0xb5f   :  { %v4254_v44 = vpop.permute.xlu0 %4253  ;;  %v4402_v12 = vsel %vm4390_vm5, %v4385_v61, %v4198_v63  ;;  %v11600_v61 = vld [vmem:[#allocation23_spill] sm:$0xff]  ;;  %v774_v63 = vpack.c.bf16 %v758_v62, %v758_v62 }
 0xb60   :  { %v4419_v28 = vsel %vm4407_vm6, %v4402_v12, %v4254_v44 }
 0xb61   :  { %v3914_v44 = vunpack.c.l.b16 %v774_v63 }
 0xb63   :  { %v4310_v4 = vpop.permute.xlu1 %4309  ;;  %v6485_v42 = vpop.eup %6484 }
 0xb64   :  { %v4436_v32 = vsel %vm4424_vm7, %v4419_v28, %v4310_v4  ;;  %v757_v23 = vmul.f32 %v6485_v42, %v11600_v61  ;;  %v6487_v56 = vpop.eup %6486 }
 0xb65   :  { %5854 = vmatmul.msk.bf16.gmra.mxu0 %vm159_vm0, %v4436_v32  ;;  %vm4611_vm8 = vweird.f32 %v6487_v56 }
 0xb66   :  { %v3976_v16 = vpop.permute.xlu2 %3975  ;;  %v773_v36 = vpack.c.bf16 %v757_v23, %v757_v23 }
 0xb67   :  { %4562 = vadd.xlane.f32.xlu2 %v4561_v52  ;;  %v4032_v60 = vpop.permute.xlu0 %4031  ;;  %v4335_v24 = vsel %vm326_vm1, %v3921_v33, %v3976_v16 }
 0xb68   :  { %v4353_v14 = vsel %vm4339_vm2, %v4335_v24, %v4032_v60  ;;  %v4517_v18 = vpop.f32.mrf.mxu0  ;;  %v3913_v43 = vunpack.c.l.b16 %v773_v36  ;;  %v11602_v36 = vld [vmem:[#allocation13_spill] sm:$0xff] }
 0xb69   :  { %v4518_v17 = vadd.f32 %v10060_v54, %v4517_v18 }
 0xb6a   :  { %v3922_v26 = vpack.c.b16 %v3914_v44, %v3913_v43 }
 0xb6b   :  { %v4088_v38 = vpop.permute.xlu1 %4087  ;;  %v10116_v41 = vadd.f32 %v4518_v17, %v11596_v34 }
 0xb6c   :  { %v4370_v3 = vsel %vm4356_vm3, %v4353_v14, %v4088_v38  ;;  %v4607_v38 = vmul.f32 64.0, %v6487_v56 }
 0xb6d   :  { %v4576_v30 = vsel %vm159_vm0, %v10116_v41, 0.0 }
 0xb6e   :  { %v4144_v2 = vpop.permute.xlu2 %4143  ;;  %v4608_v14 = vsub.f32 1.0, %v4607_v38 }
 0xb6f   :  { %4571 = vadd.xlane.f32.xlu2 %v4570_v15  ;;  %v4387_v6 = vsel %vm4373_vm4, %v4370_v3, %v4144_v2  ;;  %v4200_v25 = vpop.permute.xlu0 %4199 }
 0xb70   :  { %4559 = vadd.xlane.f32.xlu1 %v4558_v19  ;;  %v4404_v37 = vsel %vm4390_vm5, %v4387_v6, %v4200_v25  ;;  %v4519_v3 = vpop.f32.mrf.mxu0  ;;  %v4609_v2 = vmul.f32 %v6487_v56, %v4608_v14 }
 0xb71   :  { %v4520_v49 = vadd.f32 %v10060_v54, %v4519_v3 }
 0xb72   :  { %v4610_v15 = vadd.f32 %v6487_v56, %v4609_v2 }
 0xb73   :  { %v4256_v29 = vpop.permute.xlu1 %4255 }
 0xb74   :  { %v4421_v0 = vsel %vm4407_vm6, %v4404_v37, %v4256_v29  ;;  %v10132_v40 = vsel %vm4611_vm8, %v6487_v56, %v4610_v15  ;;  %v11606_v15 = vld [vmem:[#allocation17_spill] sm:$0xff] }
 0xb76   :  { %v4312_v53 = vpop.permute.xlu2 %4311 }
 0xb77   :  { %v4438_v10 = vsel %vm4424_vm7, %v4421_v0, %v4312_v53 }
 0xb78   :  { %4565 = vadd.xlane.f32.xlu0 %v4564_v45  ;;  %4568 = vadd.xlane.f32.xlu1 %v4567_v57 }
 0xb79   :  { %5855 = vmatmul.msk.bf16.gmra.mxu0 %vm159_vm0, %v4438_v10 }
 0xb80   :  { %4574 = vadd.xlane.f32.xlu0 %v4573_v39  ;;  %v11601_v39 = vld [vmem:[#allocation12_spill] sm:$0xff] }
 0xb81   :  { %v10152_v34 = vadd.f32 %v4520_v49, %v11601_v39  ;;  %v11608_v49 = vld [vmem:[#allocation19_spill] sm:$0xff] }
 0xb83   :  { %v4579_v47 = vsel %vm159_vm0, %v10152_v34, 0.0 }
 0xb88   :  { %4577 = vadd.xlane.f32.xlu0 %v4576_v30 }
 0xb90   :  { %v4090_v31 = vpop.permute.xlu2 %4089 }
 0xb96   :  { %v4034_v13 = vpop.permute.xlu1 %4033 }
 0xb98   :  { %v4258_v33 = vpop.permute.xlu2 %4257 }
 0xba0   :  { %v3978_v12 = vpop.permute.xlu0 %3977 }
 0xba1   :  { %v4338_v28 = vsel %vm326_vm1, %v3922_v26, %v3978_v12  ;;  %v11603_v12 = vld [vmem:[#allocation14_spill] sm:$0xff] }
 0xba2   :  { %v4355_v4 = vsel %vm4339_vm2, %v4338_v28, %v4034_v13 }
 0xba3   :  { %v4372_v35 = vsel %vm4356_vm3, %v4355_v4, %v4090_v31 }
 0xbb0   :  { %v4146_v32 = vpop.permute.xlu0 %4145 }
 0xbb1   :  { %v4389_v16 = vsel %vm4373_vm4, %v4372_v35, %v4146_v32 }
 0xbb8   :  { %v4202_v8 = vpop.permute.xlu1 %4201 }
 0xbb9   :  { %v4406_v52 = vsel %vm4390_vm5, %v4389_v16, %v4202_v8 }
 0xbba   :  { %v4423_v24 = vsel %vm4407_vm6, %v4406_v52, %v4258_v33  ;;  %v11604_v52 = vld [vmem:[#allocation15_spill] sm:$0xff] }
 0xbc0   :  { %v4314_v60 = vpop.permute.xlu0 %4313 }
 0xbc1   :  { %v4440_v58 = vsel %vm4424_vm7, %v4423_v24, %v4314_v60  ;;  %v11605_v60 = vld [vmem:[#allocation16_spill] sm:$0xff] }
 0xbc2   :  { %5856 = vmatmul.msk.bf16.gmra.mxu0 %vm159_vm0, %v4440_v58 }
 0xbce   :  { %v4522_v55 = vpop.f32.mrf.mxu0 }
 0xbcf   :  { %v4523_v62 = vadd.f32 %v10060_v54, %v4522_v55 }
 0xbd1   :  { %v10175_v44 = vadd.f32 %v4523_v62, %v11602_v36 }
 0xbd3   :  { %v4582_v4 = vsel %vm159_vm0, %v10175_v44, 0.0 }
 0xbd6   :  { %v4524_v37 = vpop.f32.mrf.mxu0 }
 0xbd7   :  { %v4525_v42 = vadd.f32 %v10060_v54, %v4524_v37 }
 0xbd9   :  { %v10178_v43 = vadd.f32 %v4525_v42, %v11603_v12 }
 0xbda   :  { %v4563_v19 = vpop.xlane.xlu2 %4562 }
 0xbdb   :  { %v4614_v6 = vmul.f32 %v10132_v40, %v4563_v19  ;;  %v4585_v28 = vsel %vm159_vm0, %v10178_v43, 0.0 }
 0xbdd   :  { %v10136_v25 = vsub.f32 %v10068_v20, %v4614_v6 }
 0xbdf   :  { %v4646_v9 = vmul.f32 %v10136_v25, %v10136_v25 }
 0xbe1   :  { %v4664_v59 = vsel %vm159_vm0, %v4646_v9, 0.0 }
 0xbe2   :  { %4665 = vadd.xlane.f32.xlu2 %v4664_v59  ;;  %v4527_v20 = vpop.f32.mrf.mxu0  ;;  %v4572_v46 = vpop.xlane.xlu2 %4571  ;;  %v11607_v59 = vld [vmem:[#allocation18_spill] sm:$0xff] }
 0xbe3   :  { %v4560_v29 = vpop.xlane.xlu1 %4559  ;;  %v4617_v22 = vmul.f32 %v10132_v40, %v4572_v46  ;;  %v4528_v31 = vadd.f32 %v10060_v54, %v4527_v20 }
 0xbe4   :  { %v4613_v1 = vmul.f32 %v10132_v40, %v4560_v29 }
 0xbe5   :  { %v10172_v61 = vsub.f32 %v10080_v11, %v4617_v22  ;;  %v10194_v33 = vadd.f32 %v4528_v31, %v11604_v52  ;;  %v5925_v22 = vld [vmem:[%s10900_s8] sm:$0xff] }
 0xbe6   :  { %v10143_v0 = vsub.f32 %v10083_v48, %v4613_v1 }
 0xbe7   :  { %v4649_v26 = vmul.f32 %v10172_v61, %v10172_v61  ;;  %v4588_v56 = vsel %vm159_vm0, %v10194_v33, 0.0 }
 0xbe8   :  { %v4645_v53 = vmul.f32 %v10143_v0, %v10143_v0 }
 0xbe9   :  { %v4673_v35 = vsel %vm159_vm0, %v4649_v26, 0.0 }
 0xbea   :  { %v4661_v10 = vsel %vm159_vm0, %v4645_v53, 0.0  ;;  %v4529_v63 = vpop.f32.mrf.mxu0 }
 0xbeb   :  { %v4566_v45 = vpop.xlane.xlu0 %4565  ;;  %4662 = vadd.xlane.f32.xlu1 %v4661_v10  ;;  %v4569_v57 = vpop.xlane.xlu1 %4568  ;;  %v4530_v32 = vadd.f32 %v10060_v54, %v4529_v63 }
 0xbec   :  { %v4615_v18 = vmul.f32 %v10132_v40, %v4566_v45  ;;  %v4616_v17 = vmul.f32 %v10132_v40, %v4569_v57  ;;  %v5928_v45 = vld [vmem:[%s10900_s8 + $0x18] sm:$0xff]  ;;  %v5927_v57 = vld [vmem:[%s10900_s8 + $0x10] sm:$0xff] }
 0xbed   :  { %v10200_v24 = vadd.f32 %v4530_v32, %v11605_v60  ;;  %5029 = vmatpush.bf16.msrb.mxu1 %v5928_v45 }
 0xbee   :  { %v10155_v48 = vsub.f32 %v10095_v21, %v4615_v18  ;;  %v10158_v30 = vsub.f32 %v10098_v7, %v4616_v17  ;;  %v5926_v18 = vld [vmem:[%s10900_s8 + $0x8] sm:$0xff] }
 0xbef   :  { %v4591_v3 = vsel %vm159_vm0, %v10200_v24, 0.0 }
 0xbf0   :  { %v4647_v27 = vmul.f32 %v10155_v48, %v10155_v48  ;;  %v4648_v5 = vmul.f32 %v10158_v30, %v10158_v30 }
 0xbf1   :  { %5030 = vmatpush.bf16.msrb.mxu1 %v5927_v57 }
 0xbf2   :  { %v4667_v21 = vsel %vm159_vm0, %v4647_v27, 0.0  ;;  %v4670_v7 = vsel %vm159_vm0, %v4648_v5, 0.0 }
 0xbf3   :  { %v4575_v23 = vpop.xlane.xlu0 %4574  ;;  %4668 = vadd.xlane.f32.xlu2 %v4667_v21  ;;  %4580 = vadd.xlane.f32.xlu1 %v4579_v47 }
 0xbf4   :  { %4671 = vadd.xlane.f32.xlu0 %v4670_v7  ;;  %v4618_v13 = vmul.f32 %v10132_v40, %v4575_v23 }
 0xbf5   :  { %5031 = vmatpush.bf16.msrb.mxu1 %v5926_v18 }
 0xbf6   :  { %v10185_v11 = vsub.f32 %v10110_v51, %v4618_v13  ;;  %v4532_v16 = vpop.f32.mrf.mxu0 }
 0xbf7   :  { %v4533_v14 = vadd.f32 %v10060_v54, %v4532_v16 }
 0xbf8   :  { %v4650_v50 = vmul.f32 %v10185_v11, %v10185_v11 }
 0xbf9   :  { %v10214_v55 = vadd.f32 %v4533_v14, %v11606_v15  ;;  %5032 = vmatpush.bf16.msrb.mxu1 %v5925_v22 }
 0xbfa   :  { %v4676_v38 = vsel %vm159_vm0, %v4650_v50, 0.0 }
 0xbfb   :  { %v4578_v8 = vpop.xlane.xlu0 %4577  ;;  %4586 = vadd.xlane.f32.xlu2 %v4585_v28  ;;  %4583 = vadd.xlane.f32.xlu1 %v4582_v4  ;;  %v4594_v9 = vsel %vm159_vm0, %v10214_v55, 0.0 }
 0xbfc   :  { %4674 = vadd.xlane.f32.xlu0 %v4673_v35  ;;  %v4619_v51 = vmul.f32 %v10132_v40, %v4578_v8 }
 0xbfe   :  { %v10203_v58 = vsub.f32 %v10116_v41, %v4619_v51  ;;  %v4534_v41 = vpop.f32.mrf.mxu0 }
 0xbff   :  { %v4535_v19 = vadd.f32 %v10060_v54, %v4534_v41 }
 0xc00   :  { %v4651_v2 = vmul.f32 %v10203_v58, %v10203_v58 }
 0xc01   :  { %v10221_v37 = vadd.f32 %v4535_v19, %v11607_v59 }
 0xc02   :  { %v4679_v6 = vsel %vm159_vm0, %v4651_v2, 0.0 }
 0xc03   :  { %4589 = vadd.xlane.f32.xlu2 %v4588_v56  ;;  %4677 = vadd.xlane.f32.xlu1 %v4676_v38  ;;  %v4597_v29 = vsel %vm159_vm0, %v10221_v37, 0.0 }
 0xc04   :  { %4592 = vadd.xlane.f32.xlu0 %v4591_v3 }
 0xc0b   :  { %4680 = vadd.xlane.f32.xlu1 %v4679_v6 }
 0xc0c   :  { %4595 = vadd.xlane.f32.xlu0 %v4594_v9 }
 0xc13   :  { %4598 = vadd.xlane.f32.xlu1 %v4597_v29 }
 0xc3f   :  { %v4537_v1 = vpop.f32.mrf.mxu0 }
 0xc40   :  { %v4538_v53 = vadd.f32 %v10060_v54, %v4537_v1 }
 0xc42   :  { %v10227_v20 = vadd.f32 %v4538_v53, %v11608_v49  ;;  %v10281_v49 = vld [vmem:[%s10899_s7] ss:$0 sm:$0xff]  ;;  %s6595_s7 = smov 128  }
 0xc44   :  { %v4600_v10 = vsel %vm159_vm0, %v10227_v20, 0.0 }
 0xc45   :  { %4601 = vadd.xlane.f32.xlu1 %v4600_v10 }
 0xc47   :  { %v4539_v60 = vpop.f32.mrf.mxu0 }
 0xc48   :  { %v4540_v29 = vadd.f32 %v10060_v54, %v4539_v60 }
 0xc55   :  { %v4666_v46 = vpop.xlane.xlu2 %4665 }
 0xc56   :  { %v4710_v17 = vmul.f32 %v4666_v46, %v10132_v40 }
 0xc58   :  { %v4726_v39 = vadd.f32 1e-05, %v4710_v17 }
 0xc5a   :  { %6488 = vrsqrt.f32 %v4726_v39  ;;  %vm4757_vm10 = vweird.f32 %v4726_v39 }
 0xc5e   :  { %v4663_v27 = vpop.xlane.xlu1 %4662 }
 0xc5f   :  { %v4709_v5 = vmul.f32 %v4663_v27, %v10132_v40 }
 0xc60   :  { %v6489_v47 = vpop.eup %6488 }
 0xc61   :  { %v4752_v62 = vmul.f32 %v6489_v47, %v4726_v39  ;;  %v4725_v42 = vadd.f32 1e-05, %v4709_v5  ;;  %vm4758_vm9 = vweird.f32 %v6489_v47 }
 0xc62   :  { %vm4759_vm11 = vmor %vm4757_vm10, %vm4758_vm9 }
 0xc63   :  { %v4753_v21 = vmul.f32 %v6489_v47, %v4752_v62  ;;  %6490 = vrsqrt.f32 %v4725_v42  ;;  %vm4747_vm13 = vweird.f32 %v4725_v42 }
 0xc65   :  { %v4754_v7 = vmul.f32 0.5, %v4753_v21 }
 0xc66   :  { %v4669_v23 = vpop.xlane.xlu2 %4668  ;;  %v4581_v63 = vpop.xlane.xlu1 %4580 }
 0xc67   :  { %v4755_v36 = vsub.f32 1.5, %v4754_v7  ;;  %v4711_v12 = vmul.f32 %v4669_v23, %v10132_v40  ;;  %v4672_v13 = vpop.xlane.xlu0 %4671  ;;  %v4620_v26 = vmul.f32 %v10132_v40, %v4581_v63 }
 0xc68   :  { %v4712_v31 = vmul.f32 %v4672_v13, %v10132_v40 }
 0xc69   :  { %v6491_v28 = vpop.eup %6490  ;;  %v4756_v4 = vmul.f32 %v6489_v47, %v4755_v36  ;;  %v10248_v32 = vadd.f32 1e-05, %v4711_v12  ;;  %v10251_v8 = vsub.f32 %v10152_v34, %v4620_v26  ;;  %v10263_v34 = vld [vmem:[%s10898_s6] ss:$0 sm:$0xff]  ;;  %s6594_s6 = smov [#allocation2]  }
 0xc6a   :  { %v4742_v35 = vmul.f32 %v6491_v28, %v4725_v42  ;;  %v10253_v16 = vadd.f32 1e-05, %v4712_v31  ;;  %vm4748_vm12 = vweird.f32 %v6491_v28  ;;  %s5643_s20 = sshll.u32 %s6594_s6, 4  ;;  %s5644_s20 = int_to_ptr.vmem [resolvable:$true] %s5643_s20 }
 0xc6b   :  { %v4760_v52 = vsel %vm4759_vm11, %v6489_v47, %v4756_v4  ;;  %6492 = vrsqrt.f32 %v10248_v32  ;;  %v4652_v51 = vmul.f32 %v10251_v8, %v10251_v8  ;;  %vm4749_vm14 = vmor %vm4747_vm13, %vm4748_vm12  ;;  %v11609_v47 = vld [vmem:[#allocation20_spill] sm:$0xff]  ;;  %vm4767_vm2 = vweird.f32 %v10248_v32 }
 0xc6c   :  { %v4743_v50 = vmul.f32 %v6491_v28, %v4742_v35  ;;  %6494 = vrsqrt.f32 %v10253_v16  ;;  %v4902_v38 = vmul.f32 %v4760_v52, %v10136_v25  ;;  %v10299_v62 = vadd.f32 %v4540_v29, %v11609_v47 }
 0xc6d   :  { %v4682_v56 = vsel %vm159_vm0, %v4652_v51, 0.0  ;;  %vm4777_vm4 = vweird.f32 %v10253_v16 }
 0xc6e   :  { %v4744_v14 = vmul.f32 0.5, %v4743_v50  ;;  %v4587_v3 = vpop.xlane.xlu2 %4586  ;;  %4683 = vadd.xlane.f32.xlu2 %v4682_v56  ;;  %v4584_v2 = vpop.xlane.xlu1 %4583  ;;  %v4922_v10 = vmul.f32 %v10263_v34, %v4902_v38 }
 0xc6f   :  { %v4622_v15 = vmul.f32 %v10132_v40, %v4587_v3  ;;  %v4675_v41 = vpop.xlane.xlu0 %4674  ;;  %v4621_v19 = vmul.f32 %v10132_v40, %v4584_v2 }
 0xc70   :  { %v4745_v6 = vsub.f32 1.5, %v4744_v14  ;;  %v4713_v9 = vmul.f32 %v4675_v41, %v10132_v40  ;;  %v10302_v42 = vadd.f32 %v10281_v49, %v4922_v10 }
 0xc71   :  { %v10269_v59 = vpop.eup %6492  ;;  %v10273_v25 = vsub.f32 %v10178_v43, %v4622_v15  ;;  %v10276_v1 = vsub.f32 %v10175_v44, %v4621_v19 }
 0xc72   :  { %v6495_v53 = vpop.eup %6494  ;;  %v4746_v45 = vmul.f32 %v6491_v28, %v4745_v6  ;;  %v4762_v57 = vmul.f32 %v10269_v59, %v10248_v32  ;;  %v10286_v54 = vadd.f32 1e-05, %v4713_v9  ;;  %vm4768_vm15 = vweird.f32 %v10269_v59 }
 0xc73   :  { %v4772_v43 = vmul.f32 %v6495_v53, %v10253_v16  ;;  %v4654_v44 = vmul.f32 %v10273_v25, %v10273_v25  ;;  %v4653_v46 = vmul.f32 %v10276_v1, %v10276_v1  ;;  %vm4778_vm1 = vweird.f32 %v6495_v53  ;;  %vm10324_vm3 = vmor %vm4767_vm2, %vm4768_vm15 }
 0xc74   :  { %v4750_v18 = vsel %vm4749_vm14, %v6491_v28, %v4746_v45  ;;  %v4763_v17 = vmul.f32 %v10269_v59, %v4762_v57  ;;  %6496 = vrsqrt.f32 %v10286_v54  ;;  %vm4779_vm5 = vmor %vm4777_vm4, %vm4778_vm1  ;;  %v4603_v16 = vsel %vm159_vm0, %v10299_v62, 0.0 }
 0xc75   :  { %v4901_v39 = vmul.f32 %v4750_v18, %v10143_v0  ;;  %v4773_v22 = vmul.f32 %v6495_v53, %v4772_v43  ;;  %v4688_v27 = vsel %vm159_vm0, %v4654_v44, 0.0  ;;  %v4685_v5 = vsel %vm159_vm0, %v4653_v46, 0.0 }
 0xc76   :  { %v4764_v21 = vmul.f32 0.5, %v4763_v17  ;;  %v4590_v7 = vpop.xlane.xlu2 %4589  ;;  %4689 = vadd.xlane.f32.xlu0 %v4688_v27  ;;  %4686 = vadd.xlane.f32.xlu2 %v4685_v5  ;;  %v4678_v23 = vpop.xlane.xlu1 %4677  ;;  %vm4787_vm9 = vweird.f32 %v10286_v54 }
 0xc77   :  { %v4921_v63 = vmul.f32 %v10263_v34, %v4901_v39  ;;  %v4774_v36 = vmul.f32 0.5, %v4773_v22  ;;  %v4623_v0 = vmul.f32 %v10132_v40, %v4590_v7  ;;  %v4593_v12 = vpop.xlane.xlu0 %4592  ;;  %v4714_v13 = vmul.f32 %v4678_v23, %v10132_v40 }
 0xc78   :  { %v4765_v26 = vsub.f32 1.5, %v4764_v21  ;;  %v4624_v31 = vmul.f32 %v10132_v40, %v4593_v12 }
 0xc79   :  { %v10310_v28 = vadd.f32 %v10281_v49, %v4921_v63  ;;  %v4775_v4 = vsub.f32 1.5, %v4774_v36  ;;  %v10313_v35 = vsub.f32 %v10194_v33, %v4623_v0  ;;  %v4730_v52 = vadd.f32 1e-05, %v4714_v13 }
 0xc7a   :  { %v10315_v51 = vpop.eup %6496  ;;  %v4766_v50 = vmul.f32 %v10269_v59, %v4765_v26  ;;  %v10320_v60 = vsub.f32 %v10200_v24, %v4624_v31 }
 0xc7b   :  { %v4957_v56 = vpack.c.bf16 %v10302_v42, %v10310_v28  ;;  %v4776_v14 = vmul.f32 %v6495_v53, %v4775_v4  ;;  %v4782_v33 = vmul.f32 %v10315_v51, %v10286_v54  ;;  %6498 = vrsqrt.f32 %v4730_v52 }
 0xc7c   :  { %v4770_v32 = vsel %vm10324_vm3, %v10269_v59, %v4766_v50  ;;  %v4655_v24 = vmul.f32 %v10313_v35, %v10313_v35  ;;  %v4656_v2 = vmul.f32 %v10320_v60, %v10320_v60  ;;  %vm4788_vm7 = vweird.f32 %v10315_v51 }
 0xc7d   :  { %v4780_v3 = vsel %vm4779_vm5, %v6495_v53, %v4776_v14  ;;  %5873 = vmatmul.msk.bf16.vlgmr.msrb.gmra.mxu1 %vm159_vm0, %v4957_v56  ;;  %v4783_v15 = vmul.f32 %v10315_v51, %v4782_v33  ;;  %v4903_v6 = vmul.f32 %v4770_v32, %v10155_v48  ;;  %vm4797_vm8 = vweird.f32 %v4730_v52  ;;  %vm4789_vm11 = vmor %vm4787_vm9, %vm4788_vm7  ;;  %v5936_v14 = vld [vmem:[%s10902_s10 + $0x38] sm:$0xff]  ;;  %v5935_v32 = vld [vmem:[%s10902_s10 + $0x30] sm:$0xff] }
 0xc7e   :  { %v4691_v41 = vsel %vm159_vm0, %v4655_v24, 0.0  ;;  %4604 = vadd.xlane.f32.xlu2 %v4603_v16  ;;  %v4681_v19 = vpop.xlane.xlu1 %4680  ;;  %v4904_v9 = vmul.f32 %v4780_v3, %v10158_v30  ;;  %v4694_v59 = vsel %vm159_vm0, %v4656_v2, 0.0  ;;  %5166 = vmatpush.bf16.msrb.mxu3 %v5936_v14  ;;  %v5933_v3 = vld [vmem:[%s10902_s10 + $0x20] sm:$0xff]  ;;  %v5932_v16 = vld [vmem:[%s10902_s10 + $0x18] sm:$0xff] }
 0xc7f   :  { %4692 = vadd.xlane.f32.xlu0 %v4691_v41  ;;  %v4596_v29 = vpop.xlane.xlu0 %4595  ;;  %4695 = vadd.xlane.f32.xlu1 %v4694_v59  ;;  %v4784_v45 = vmul.f32 0.5, %v4783_v15  ;;  %v4923_v44 = vmul.f32 %v10263_v34, %v4903_v6  ;;  %v4715_v33 = vmul.f32 %v4681_v19, %v10132_v40  ;;  %v5931_v41 = vld [vmem:[%s10902_s10 + $0x10] sm:$0xff]  ;;  %v5930_v59 = vld [vmem:[%s10902_s10 + $0x8] sm:$0xff] }
 0xc80   :  { %v4625_v53 = vmul.f32 %v10132_v40, %v4596_v29  ;;  %v4924_v46 = vmul.f32 %v10263_v34, %v4904_v9 }
 0xc81   :  { %v6499_v10 = vpop.eup %6498  ;;  %v4785_v18 = vsub.f32 1.5, %v4784_v45  ;;  %v4731_v24 = vadd.f32 1e-05, %v4715_v33 }
 0xc82   :  { %v10349_v57 = vsub.f32 %v10214_v55, %v4625_v53  ;;  %v4792_v43 = vmul.f32 %v6499_v10, %v4730_v52  ;;  %v10358_v55 = vadd.f32 %v10281_v49, %v4923_v44  ;;  %v10361_v5 = vadd.f32 %v10281_v49, %v4924_v46  ;;  %5167 = vmatpush.bf16.msrb.mxu3 %v5935_v32 }
 0xc83   :  { %vm4798_vm6 = vweird.f32 %v6499_v10  ;;  %v4786_v7 = vmul.f32 %v10315_v51, %v4785_v18  ;;  %6500 = vrsqrt.f32 %v4731_v24  ;;  %vm4807_vm13 = vweird.f32 %v4731_v24 }
 0xc84   :  { %v4657_v48 = vmul.f32 %v10349_v57, %v10349_v57  ;;  %v4793_v30 = vmul.f32 %v6499_v10, %v4792_v43  ;;  %v4958_v63 = vpack.c.bf16 %v10361_v5, %v10358_v55  ;;  %vm4799_vm10 = vmor %vm4797_vm8, %vm4798_vm6 }
 0xc85   :  { %v4790_v12 = vsel %vm4789_vm11, %v10315_v51, %v4786_v7 }
 0xc86   :  { %v4697_v17 = vsel %vm159_vm0, %v4657_v48, 0.0  ;;  %v4599_v39 = vpop.xlane.xlu1 %4598  ;;  %v4794_v22 = vmul.f32 0.5, %v4793_v30  ;;  %v4905_v26 = vmul.f32 %v4790_v12, %v10172_v61 }
 0xc87   :  { %4698 = vadd.xlane.f32.xlu2 %v4697_v17  ;;  %v4626_v27 = vmul.f32 %v10132_v40, %v4599_v39 }
 0xc88   :  { %v4795_v47 = vsub.f32 1.5, %v4794_v22  ;;  %v4925_v4 = vmul.f32 %v10263_v34, %v4905_v26 }
 0xc89   :  { %v10364_v21 = vsub.f32 %v10221_v37, %v4626_v27  ;;  %v6501_v2 = vpop.eup %6500 }
 0xc8a   :  { %v4796_v23 = vmul.f32 %v6499_v10, %v4795_v47  ;;  %v10384_v52 = vadd.f32 %v10281_v49, %v4925_v4  ;;  %v4802_v15 = vmul.f32 %v6501_v2, %v4731_v24  ;;  %vm4808_vm12 = vweird.f32 %v6501_v2 }
 0xc8b   :  { %v4658_v36 = vmul.f32 %v10364_v21, %v10364_v21  ;;  %vm4809_vm14 = vmor %vm4807_vm13, %vm4808_vm12 }
 0xc8c   :  { %v4800_v0 = vsel %vm4799_vm10, %v6499_v10, %v4796_v23  ;;  %v4803_v19 = vmul.f32 %v6501_v2, %v4802_v15  ;;  %v5929_v10 = vld [vmem:[%s10902_s10] sm:$0xff] }
 0xc8d   :  { %5874 = vmatmul.msk.bf16.gmra.mxu1 %vm159_vm0, %v4958_v63  ;;  %v4700_v37 = vsel %vm159_vm0, %v4658_v36, 0.0  ;;  %v4906_v13 = vmul.f32 %v4800_v0, %v10185_v11 }
 0xc8e   :  { %4701 = vadd.xlane.f32.xlu0 %v4700_v37  ;;  %v4804_v29 = vmul.f32 0.5, %v4803_v19 }
 0xc8f   :  { %v4926_v31 = vmul.f32 %v10263_v34, %v4906_v13 }
 0xc90   :  { %v4805_v45 = vsub.f32 1.5, %v4804_v29 }
 0xc91   :  { %v10381_v54 = vadd.f32 %v10281_v49, %v4926_v31 }
 0xc92   :  { %v4806_v18 = vmul.f32 %v6501_v2, %v4805_v45  ;;  %v10453_v45 = vld [vmem:[%s10901_s9] ss:$0 sm:$0xff] }
 0xc93   :  { %v4959_v50 = vpack.c.bf16 %v10381_v54, %v10384_v52 }
 0xc94   :  { %v4810_v47 = vsel %vm4809_vm14, %v6501_v2, %v4806_v18 }
 0xc95   :  { %v4907_v0 = vmul.f32 %v4810_v47, %v10203_v58 }
 0xc9d   :  { %5875 = vmatmul.msk.bf16.gmra.mxu1 %vm159_vm0, %v4959_v50 }
 0xcb8   :  { %v4602_v51 = vpop.xlane.xlu1 %4601 }
 0xcb9   :  { %v4627_v11 = vmul.f32 %v10132_v40, %v4602_v51 }
 0xcbb   :  { %v10391_v61 = vsub.f32 %v10227_v20, %v4627_v11  ;;  %v5934_v20 = vld [vmem:[%s10902_s10 + $0x28] sm:$0xff] }
 0xcbc   :  { %5168 = vmatpush.bf16.msrb.mxu3 %v5934_v20 }
 0xcbd   :  { %v4659_v56 = vmul.f32 %v10391_v61, %v10391_v61 }
 0xcbf   :  { %v4703_v38 = vsel %vm159_vm0, %v4659_v56, 0.0 }
 0xcc0   :  { %4704 = vadd.xlane.f32.xlu1 %v4703_v38  ;;  %5169 = vmatpush.bf16.msrb.mxu3 %v5933_v3 }
 0xcc4   :  { %5170 = vmatpush.bf16.msrb.mxu3 %v5932_v16 }
 0xcc8   :  { %5171 = vmatpush.bf16.msrb.mxu3 %v5931_v41 }
 0xccc   :  { %5172 = vmatpush.bf16.msrb.mxu3 %v5930_v59 }
 0xcd0   :  { %5173 = vmatpush.bf16.msrb.mxu3 %v5929_v10 }
 0xce1   :  { %v4684_v6 = vpop.xlane.xlu2 %4683 }
 0xce2   :  { %v4716_v9 = vmul.f32 %v4684_v6, %v10132_v40 }
 0xce4   :  { %v4732_v53 = vadd.f32 1e-05, %v4716_v9 }
 0xce6   :  { %6502 = vrsqrt.f32 %v4732_v53  ;;  %vm4817_vm1 = vweird.f32 %v4732_v53 }
 0xce9   :  { %v4690_v43 = vpop.xlane.xlu0 %4689  ;;  %v4687_v44 = vpop.xlane.xlu2 %4686 }
 0xcea   :  { %v4718_v46 = vmul.f32 %v4690_v43, %v10132_v40  ;;  %v4717_v48 = vmul.f32 %v4687_v44, %v10132_v40 }
 0xcec   :  { %v6503_v30 = vpop.eup %6502  ;;  %v4734_v17 = vadd.f32 1e-05, %v4718_v46  ;;  %v4733_v39 = vadd.f32 1e-05, %v4717_v48 }
 0xced   :  { %v4812_v22 = vmul.f32 %v6503_v30, %v4732_v53  ;;  %vm4818_vm15 = vweird.f32 %v6503_v30 }
 0xcee   :  { %6504 = vrsqrt.f32 %v4734_v17  ;;  %vm4819_vm2 = vmor %vm4817_vm1, %vm4818_vm15  ;;  %vm4837_vm5 = vweird.f32 %v4734_v17  ;;  %vm4827_vm7 = vweird.f32 %v4733_v39 }
 0xcef   :  { %v4813_v27 = vmul.f32 %v6503_v30, %v4812_v22  ;;  %6506 = vrsqrt.f32 %v4733_v39 }
 0xcf1   :  { %v4814_v7 = vmul.f32 0.5, %v4813_v27  ;;  %v4605_v23 = vpop.xlane.xlu2 %4604 }
 0xcf2   :  { %v4693_v63 = vpop.xlane.xlu0 %4692  ;;  %v4628_v36 = vmul.f32 %v10132_v40, %v4605_v23  ;;  %v4696_v13 = vpop.xlane.xlu1 %4695 }
 0xcf3   :  { %v4815_v37 = vsub.f32 1.5, %v4814_v7  ;;  %v4719_v12 = vmul.f32 %v4693_v63, %v10132_v40  ;;  %v4720_v4 = vmul.f32 %v4696_v13, %v10132_v40 }
 0xcf4   :  { %v6505_v26 = vpop.eup %6504  ;;  %v10428_v31 = vsub.f32 %v10299_v62, %v4628_v36  ;;  %v4927_v62 = vmul.f32 %v10263_v34, %v4907_v0 }
 0xcf5   :  { %v6507_v50 = vpop.eup %6506  ;;  %v4816_v51 = vmul.f32 %v6503_v30, %v4815_v37  ;;  %v4832_v11 = vmul.f32 %v6505_v26, %v4734_v17  ;;  %v10431_v56 = vadd.f32 1e-05, %v4719_v12  ;;  %v10433_v58 = vadd.f32 1e-05, %v4720_v4 }
 0xcf6   :  { %v4822_v38 = vmul.f32 %v6507_v50, %v4733_v39  ;;  %v4660_v14 = vmul.f32 %v10428_v31, %v10428_v31  ;;  %vm4838_vm3 = vweird.f32 %v6505_v26  ;;  %v10444_v9 = vadd.f32 %v10281_v49, %v4927_v62 }
 0xcf7   :  { %v4820_v33 = vsel %vm4819_vm2, %v6503_v30, %v4816_v51  ;;  %v4833_v32 = vmul.f32 %v6505_v26, %v4832_v11  ;;  %6508 = vrsqrt.f32 %v10431_v56  ;;  %vm4828_vm4 = vweird.f32 %v6507_v50  ;;  %vm4839_vm6 = vmor %vm4837_vm5, %vm4838_vm3 }
 0xcf8   :  { %v4908_v24 = vmul.f32 %v4820_v33, %v10251_v8  ;;  %v4823_v20 = vmul.f32 %v6507_v50, %v4822_v38  ;;  %6510 = vrsqrt.f32 %v10433_v58  ;;  %v4706_v2 = vsel %vm159_vm0, %v4660_v14, 0.0  ;;  %vm4829_vm8 = vmor %vm4827_vm7, %vm4828_vm4 }
 0xcf9   :  { %v4834_v3 = vmul.f32 0.5, %v4833_v32  ;;  %4707 = vadd.xlane.f32.xlu2 %v4706_v2  ;;  %vm4847_vm11 = vweird.f32 %v10431_v56  ;;  %vm4857_vm13 = vweird.f32 %v10433_v58 }
 0xcfa   :  { %v4824_v16 = vmul.f32 0.5, %v4823_v20  ;;  %v4699_v15 = vpop.xlane.xlu2 %4698  ;;  %v5034_v41 = vpop.f32.mrf.mxu1  ;;  %v4928_v19 = vmul.f32 %v10263_v34, %v4908_v24 }
 0xcfb   :  { %v4835_v6 = vsub.f32 1.5, %v4834_v3  ;;  %v4721_v8 = vmul.f32 %v4699_v15, %v10132_v40  ;;  %v5035_v7 = vadd.f32 %v10453_v45, %v5034_v41 }
 0xcfc   :  { %v4825_v59 = vsub.f32 1.5, %v4824_v16  ;;  %v10448_v29 = vadd.f32 %v10281_v49, %v4928_v19 }
 0xcfd   :  { %v6509_v53 = vpop.eup %6508  ;;  %v4836_v10 = vmul.f32 %v6505_v26, %v4835_v6  ;;  %v10459_v27 = vadd.f32 1e-05, %v4721_v8  ;;  %v5074_v4 = vmax.f32 %v5035_v7, 0.0 }
 0xcfe   :  { %v6511_v43 = vpop.eup %6510  ;;  %v4826_v44 = vmul.f32 %v6507_v50, %v4825_v59  ;;  %v4842_v46 = vmul.f32 %v6509_v53, %v10431_v56  ;;  %v4960_v48 = vpack.c.bf16 %v10448_v29, %v10444_v9  ;;  %vm4848_vm9 = vweird.f32 %v6509_v53 }
 0xcff   :  { %v4840_v30 = vsel %vm4839_vm6, %v6505_v26, %v4836_v10  ;;  %v4852_v18 = vmul.f32 %v6511_v43, %v10433_v58  ;;  %6512 = vrsqrt.f32 %v10459_v27  ;;  %vm4858_vm10 = vweird.f32 %v6511_v43  ;;  %vm4849_vm12 = vmor %vm4847_vm11, %vm4848_vm9 }
 0xd00   :  { %v4830_v22 = vsel %vm4829_vm8, %v6507_v50, %v4826_v44  ;;  %v4843_v17 = vmul.f32 %v6509_v53, %v4842_v46  ;;  %5876 = vmatmul.msk.bf16.gmra.mxu1 %vm159_vm0, %v4960_v48  ;;  %v4910_v39 = vmul.f32 %v4840_v30, %v10273_v25  ;;  %vm4859_vm14 = vmor %vm4857_vm13, %vm4858_vm10  ;;  %vm4867_vm4 = vweird.f32 %v10459_v27 }
 0xd01   :  { %v4853_v47 = vmul.f32 %v6511_v43, %v4852_v18  ;;  %v4702_v23 = vpop.xlane.xlu0 %4701  ;;  %v4909_v63 = vmul.f32 %v4830_v22, %v10276_v1 }
 0xd02   :  { %v4722_v36 = vmul.f32 %v4702_v23, %v10132_v40  ;;  %v5036_v0 = vpop.f32.mrf.mxu1  ;;  %v4844_v37 = vmul.f32 0.5, %v4843_v17  ;;  %v4930_v11 = vmul.f32 %v10263_v34, %v4910_v39 }
 0xd03   :  { %v4854_v12 = vmul.f32 0.5, %v4853_v47  ;;  %v5037_v13 = vadd.f32 %v10453_v45, %v5036_v0  ;;  %v4929_v51 = vmul.f32 %v10263_v34, %v4909_v63 }
 0xd04   :  { %v4738_v26 = vadd.f32 1e-05, %v4722_v36  ;;  %v4845_v25 = vsub.f32 1.5, %v4844_v37  ;;  %v10474_v62 = vadd.f32 %v10281_v49, %v4930_v11 }
 0xd05   :  { %v5075_v50 = vmax.f32 %v5037_v13, 0.0  ;;  %v4855_v38 = vsub.f32 1.5, %v4854_v12  ;;  %v6513_v14 = vpop.eup %6512  ;;  %v10471_v32 = vadd.f32 %v10281_v49, %v4929_v51 }
 0xd06   :  { %6514 = vrsqrt.f32 %v4738_v26  ;;  %v4846_v24 = vmul.f32 %v6509_v53, %v4845_v25  ;;  %v4862_v2 = vmul.f32 %v6513_v14, %v10459_v27  ;;  %vm4868_vm1 = vweird.f32 %v6513_v14 }
 0xd07   :  { %v5090_v1 = vpack.c.bf16 %v5075_v50, %v5074_v4  ;;  %v4856_v20 = vmul.f32 %v6511_v43, %v4855_v38  ;;  %v4961_v15 = vpack.c.bf16 %v10474_v62, %v10471_v32  ;;  %vm4877_vm2 = vweird.f32 %v4738_v26  ;;  %vm4869_vm5 = vmor %vm4867_vm4, %vm4868_vm1 }
 0xd08   :  { %v4850_v41 = vsel %vm4849_vm12, %v6509_v53, %v4846_v24  ;;  %v4863_v59 = vmul.f32 %v6513_v14, %v4862_v2 }
 0xd09   :  { %5174 = vmatmul.bf16.vlgmr.msrb.gmra.mxu3 %v5090_v1  ;;  %v4860_v19 = vsel %vm4859_vm14, %v6511_v43, %v4856_v20  ;;  %v4911_v56 = vmul.f32 %v4850_v41, %v10313_v35 }
 0xd0a   :  { %v5039_v33 = vpop.f32.mrf.mxu1  ;;  %v4912_v10 = vmul.f32 %v4860_v19, %v10320_v60  ;;  %v4864_v48 = vmul.f32 0.5, %v4863_v59 }
 0xd0b   :  { %v5040_v8 = vadd.f32 %v10453_v45, %v5039_v33  ;;  %v4931_v53 = vmul.f32 %v10263_v34, %v4911_v56 }
 0xd0c   :  { %v6515_v3 = vpop.eup %6514  ;;  %v4932_v43 = vmul.f32 %v10263_v34, %v4912_v10  ;;  %v4865_v47 = vsub.f32 1.5, %v4864_v48 }
 0xd0d   :  { %v4872_v16 = vmul.f32 %v6515_v3, %v4738_v26  ;;  %v5076_v30 = vmax.f32 %v5040_v8, 0.0  ;;  %v10489_v35 = vadd.f32 %v10281_v49, %v4931_v53  ;;  %vm4878_vm15 = vweird.f32 %v6515_v3 }
 0xd0e   :  { %v10492_v60 = vadd.f32 %v10281_v49, %v4932_v43  ;;  %v4866_v39 = vmul.f32 %v6513_v14, %v4865_v47  ;;  %vm4879_vm3 = vmor %vm4877_vm2, %vm4878_vm15 }
 0xd0f   :  { %v4873_v6 = vmul.f32 %v6515_v3, %v4872_v16 }
 0xd10   :  { %5877 = vmatmul.msk.bf16.gmra.mxu1 %vm159_vm0, %v4961_v15  ;;  %v4962_v63 = vpack.c.bf16 %v10492_v60, %v10489_v35  ;;  %v4870_v0 = vsel %vm4869_vm5, %v6513_v14, %v4866_v39 }
 0xd11   :  { %v4874_v44 = vmul.f32 0.5, %v4873_v6  ;;  %v4913_v26 = vmul.f32 %v4870_v0, %v10349_v57 }
 0xd12   :  { %v5041_v58 = vpop.f32.mrf.mxu1 }
 0xd13   :  { %v5042_v46 = vadd.f32 %v10453_v45, %v5041_v58  ;;  %v4875_v22 = vsub.f32 1.5, %v4874_v44  ;;  %v4933_v27 = vmul.f32 %v10263_v34, %v4913_v26 }
 0xd15   :  { %v5077_v18 = vmax.f32 %v5042_v46, 0.0  ;;  %v4876_v23 = vmul.f32 %v6515_v3, %v4875_v22  ;;  %v10508_v1 = vadd.f32 %v10281_v49, %v4933_v27 }
 0xd17   :  { %v5091_v17 = vpack.c.bf16 %v5077_v18, %v5076_v30  ;;  %v4880_v36 = vsel %vm4879_vm3, %v6515_v3, %v4876_v23 }
 0xd18   :  { %v4914_v12 = vmul.f32 %v4880_v36, %v10364_v21 }
 0xd19   :  { %5179 = vmatmul.bf16.gmra.mxu3 %v5091_v17 }
 0xd1a   :  { %v5044_v7 = vpop.f32.mrf.mxu1  ;;  %v4934_v11 = vmul.f32 %v10263_v34, %v4914_v12 }
 0xd1b   :  { %v5045_v37 = vadd.f32 %v10453_v45, %v5044_v7 }
 0xd1c   :  { %v10505_v38 = vadd.f32 %v10281_v49, %v4934_v11 }
 0xd1d   :  { %v5078_v50 = vmax.f32 %v5045_v37, 0.0 }
 0xd1e   :  { %v4963_v21 = vpack.c.bf16 %v10505_v38, %v10508_v1 }
 0xd20   :  { %5878 = vmatmul.msk.bf16.gmra.mxu1 %vm159_vm0, %v4962_v63 }
 0xd22   :  { %v5046_v13 = vpop.f32.mrf.mxu1 }
 0xd23   :  { %v5047_v4 = vadd.f32 %v10453_v45, %v5046_v13 }
 0xd25   :  { %v5079_v51 = vmax.f32 %v5047_v4, 0.0 }
 0xd27   :  { %v5092_v25 = vpack.c.bf16 %v5079_v51, %v5078_v50 }
 0xd29   :  { %5184 = vmatmul.bf16.gmra.mxu3 %v5092_v25 }
 0xd30   :  { %5879 = vmatmul.msk.bf16.gmra.mxu1 %vm159_vm0, %v4963_v21 }
 0xd33   :  { %v4705_v57 = vpop.xlane.xlu1 %4704 }
 0xd34   :  { %v4723_v14 = vmul.f32 %v4705_v57, %v10132_v40 }
 0xd36   :  { %v4739_v33 = vadd.f32 1e-05, %v4723_v14 }
 0xd38   :  { %6516 = vrsqrt.f32 %v4739_v33  ;;  %vm4887_vm7 = vweird.f32 %v4739_v33 }
 0xd3e   :  { %v6517_v24 = vpop.eup %6516 }
 0xd3f   :  { %v4882_v20 = vmul.f32 %v6517_v24, %v4739_v33  ;;  %vm4888_vm6 = vweird.f32 %v6517_v24 }
 0xd40   :  { %vm4889_vm8 = vmor %vm4887_vm7, %vm4888_vm6 }
 0xd41   :  { %v4883_v3 = vmul.f32 %v6517_v24, %v4882_v20 }
 0xd43   :  { %v4884_v41 = vmul.f32 0.5, %v4883_v3 }
 0xd45   :  { %v4885_v19 = vsub.f32 1.5, %v4884_v41 }
 0xd47   :  { %v4886_v59 = vmul.f32 %v6517_v24, %v4885_v19 }
 0xd49   :  { %v4890_v10 = vsel %vm4889_vm8, %v6517_v24, %v4886_v59 }
 0xd4a   :  { %v4915_v48 = vmul.f32 %v4890_v10, %v10391_v61 }
 0xd4c   :  { %v4935_v22 = vmul.f32 %v10263_v34, %v4915_v48 }
 0xd4e   :  { %v10522_v63 = vadd.f32 %v10281_v49, %v4935_v22 }
 0xd6c   :  { %v4708_v2 = vpop.xlane.xlu2 %4707 }
 0xd6d   :  { %v4724_v16 = vmul.f32 %v4708_v2, %v10132_v40 }
 0xd6f   :  { %v4740_v15 = vadd.f32 1e-05, %v4724_v16 }
 0xd71   :  { %6518 = vrsqrt.f32 %v4740_v15  ;;  %vm4897_vm10 = vweird.f32 %v4740_v15 }
 0xd77   :  { %v6519_v6 = vpop.eup %6518 }
 0xd78   :  { %v4892_v8 = vmul.f32 %v6519_v6, %v4740_v15  ;;  %vm4898_vm9 = vweird.f32 %v6519_v6 }
 0xd79   :  { %vm4899_vm11 = vmor %vm4897_vm10, %vm4898_vm9 }
 0xd7a   :  { %v4893_v56 = vmul.f32 %v6519_v6, %v4892_v8 }
 0xd7c   :  { %v4894_v58 = vmul.f32 0.5, %v4893_v56 }
 0xd7d   :  { %v5049_v44 = vpop.f32.mrf.mxu1 }
 0xd7e   :  { %v4895_v46 = vsub.f32 1.5, %v4894_v58  ;;  %v5050_v43 = vadd.f32 %v10453_v45, %v5049_v44 }
 0xd80   :  { %v4896_v30 = vmul.f32 %v6519_v6, %v4895_v46  ;;  %v5080_v23 = vmax.f32 %v5050_v43, 0.0 }
 0xd82   :  { %v4900_v18 = vsel %vm4899_vm11, %v6519_v6, %v4896_v30 }
 0xd83   :  { %v4916_v53 = vmul.f32 %v4900_v18, %v10428_v31  ;;  %v10530_v31 = vld [vmem:[%s10903_s11] ss:$0 sm:$0xff] }
 0xd85   :  { %v5051_v17 = vpop.f32.mrf.mxu1  ;;  %v4936_v7 = vmul.f32 %v10263_v34, %v4916_v53 }
 0xd86   :  { %v5052_v47 = vadd.f32 %v10453_v45, %v5051_v17 }
 0xd87   :  { %v10525_v61 = vadd.f32 %v10281_v49, %v4936_v7 }
 0xd88   :  { %v5081_v39 = vmax.f32 %v5052_v47, 0.0 }
 0xd89   :  { %v4964_v0 = vpack.c.bf16 %v10525_v61, %v10522_v63 }
 0xd8a   :  { %v5093_v36 = vpack.c.bf16 %v5081_v39, %v5080_v23 }
 0xd8b   :  { %5880 = vmatmul.msk.bf16.gmra.mxu1 %vm159_vm0, %v4964_v0 }
 0xd8c   :  { %v5175_v34 = vpop.f32.mrf.mxu3  ;;  %5189 = vmatmul.bf16.gmra.mxu3 %v5093_v36 }
 0xd8d   :  { %v5176_v37 = vadd.f32 %v10530_v31, %v5175_v34  ;;  %v5054_v12 = vpop.f32.mrf.mxu1 }
 0xd8e   :  { %v5055_v4 = vadd.f32 %v10453_v45, %v5054_v12 }
 0xd8f   :  { %v10537_v13 = vadd.f32 %v5176_v37, %v10310_v28 }
 0xd90   :  { %v5082_v27 = vmax.f32 %v5055_v4, 0.0 }
 0xd91   :  { %v5231_v49 = vsel %vm159_vm0, %v10537_v13, 0.0 }
 0xd92   :  { %5232 = vadd.xlane.f32.xlu0 %v5231_v49 }
 0xd94   :  { %v5177_v26 = vpop.f32.mrf.mxu3 }
 0xd95   :  { %v5178_v50 = vadd.f32 %v10530_v31, %v5177_v26  ;;  %v5056_v51 = vpop.f32.mrf.mxu1 }
 0xd96   :  { %v5057_v11 = vadd.f32 %v10453_v45, %v5056_v51 }
 0xd97   :  { %v10545_v25 = vadd.f32 %v5178_v50, %v10302_v42 }
 0xd98   :  { %v5083_v21 = vmax.f32 %v5057_v11, 0.0 }
 0xd99   :  { %v5234_v28 = vsel %vm159_vm0, %v10545_v25, 0.0 }
 0xd9a   :  { %v5094_v57 = vpack.c.bf16 %v5083_v21, %v5082_v27  ;;  %5235 = vadd.xlane.f32.xlu1 %v5234_v28 }
 0xd9c   :  { %v5180_v14 = vpop.f32.mrf.mxu3  ;;  %5194 = vmatmul.bf16.gmra.mxu3 %v5094_v57 }
 0xd9d   :  { %v5181_v33 = vadd.f32 %v10530_v31, %v5180_v14  ;;  %v5059_v24 = vpop.f32.mrf.mxu1 }
 0xd9e   :  { %v5060_v42 = vadd.f32 %v10453_v45, %v5059_v24 }
 0xd9f   :  { %v10551_v20 = vadd.f32 %v5181_v33, %v10358_v55 }
 0xda0   :  { %v5084_v6 = vmax.f32 %v5060_v42, 0.0 }
 0xda1   :  { %v5237_v3 = vsel %vm159_vm0, %v10551_v20, 0.0 }
 0xda2   :  { %5238 = vadd.xlane.f32.xlu2 %v5237_v3 }
 0xda4   :  { %v5182_v2 = vpop.f32.mrf.mxu3 }
 0xda5   :  { %v5183_v16 = vadd.f32 %v10530_v31, %v5182_v2  ;;  %v5061_v15 = vpop.f32.mrf.mxu1 }
 0xda6   :  { %v5062_v41 = vadd.f32 %v10453_v45, %v5061_v15 }
 0xda7   :  { %v10559_v19 = vadd.f32 %v5183_v16, %v10361_v5 }
 0xda8   :  { %v5085_v59 = vmax.f32 %v5062_v41, 0.0 }
 0xda9   :  { %v5240_v55 = vsel %vm159_vm0, %v10559_v19, 0.0 }
 0xdaa   :  { %v5095_v8 = vpack.c.bf16 %v5085_v59, %v5084_v6  ;;  %5241 = vadd.xlane.f32.xlu0 %v5240_v55 }
 0xdac   :  { %v5185_v56 = vpop.f32.mrf.mxu3  ;;  %5199 = vmatmul.bf16.gmra.mxu3 %v5095_v8 }
 0xdad   :  { %v5186_v10 = vadd.f32 %v10530_v31, %v5185_v56  ;;  %v5064_v58 = vpop.f32.mrf.mxu1 }
 0xdae   :  { %v5065_v5 = vadd.f32 %v10453_v45, %v5064_v58 }
 0xdaf   :  { %v10565_v44 = vadd.f32 %v5186_v10, %v10384_v52 }
 0xdb0   :  { %v5086_v22 = vmax.f32 %v5065_v5, 0.0 }
 0xdb1   :  { %v5243_v46 = vsel %vm159_vm0, %v10565_v44, 0.0 }
 0xdb2   :  { %5244 = vadd.xlane.f32.xlu1 %v5243_v46 }
 0xdb4   :  { %v5187_v48 = vpop.f32.mrf.mxu3 }
 0xdb5   :  { %v5188_v30 = vadd.f32 %v10530_v31, %v5187_v48  ;;  %v5066_v18 = vpop.f32.mrf.mxu1 }
 0xdb6   :  { %v5067_v53 = vadd.f32 %v10453_v45, %v5066_v18 }
 0xdb7   :  { %v10573_v43 = vadd.f32 %v5188_v30, %v10381_v54 }
 0xdb8   :  { %v5087_v17 = vmax.f32 %v5067_v53, 0.0 }
 0xdb9   :  { %v5246_v52 = vsel %vm159_vm0, %v10573_v43, 0.0 }
 0xdba   :  { %v5096_v47 = vpack.c.bf16 %v5087_v17, %v5086_v22  ;;  %5247 = vadd.xlane.f32.xlu2 %v5246_v52 }
 0xdbc   :  { %5204 = vmatmul.bf16.gmra.mxu3 %v5096_v47 }
 0xe05   :  { %v5233_v59 = vpop.xlane.xlu0 %5232 }
 0xe06   :  { %v5279_v8 = vmul.f32 %v5233_v59, %v10132_v40 }
 0xe08   :  { %v5069_v7 = vpop.f32.mrf.mxu1  ;;  %v10621_v10 = vsub.f32 %v10537_v13, %v5279_v8 }
 0xe09   :  { %v5070_v39 = vadd.f32 %v10453_v45, %v5069_v7 }
 0xe0a   :  { %v5311_v5 = vmul.f32 %v10621_v10, %v10621_v10 }
 0xe0b   :  { %v5088_v37 = vmax.f32 %v5070_v39, 0.0 }
 0xe0c   :  { %v5327_v30 = vsel %vm159_vm0, %v5311_v5, 0.0 }
 0xe0d   :  { %v5236_v52 = vpop.xlane.xlu1 %5235 }
 0xe0e   :  { %v5280_v7 = vmul.f32 %v5236_v52, %v10132_v40 }
 0xe0f   :  { %v5190_v23 = vpop.f32.mrf.mxu3 }
 0xe10   :  { %v5191_v36 = vadd.f32 %v10530_v31, %v5190_v23  ;;  %v5071_v0 = vpop.f32.mrf.mxu1 }
 0xe11   :  { %v5072_v54 = vadd.f32 %v10453_v45, %v5071_v0 }
 0xe12   :  { %v5221_v34 = vadd.f32 %v5191_v36, %v10444_v9  ;;  %v10647_v36 = vsub.f32 %v10545_v25, %v5280_v7 }
 0xe13   :  { %v5089_v12 = vmax.f32 %v5072_v54, 0.0 }
 0xe14   :  { %v5249_v49 = vsel %vm159_vm0, %v5221_v34, 0.0  ;;  %v5312_v25 = vmul.f32 %v10647_v36, %v10647_v36 }
 0xe15   :  { %5250 = vadd.xlane.f32.xlu0 %v5249_v49  ;;  %v5097_v4 = vpack.c.bf16 %v5089_v12, %v5088_v37  ;;  %v5239_v54 = vpop.xlane.xlu2 %5238 }
 0xe17   :  { %v5192_v26 = vpop.f32.mrf.mxu3  ;;  %5209 = vmatmul.bf16.gmra.mxu3 %v5097_v4 }
 0xe18   :  { %v5193_v50 = vadd.f32 %v10530_v31, %v5192_v26  ;;  %v5281_v26 = vmul.f32 %v5239_v54, %v10132_v40 }
 0xe1a   :  { %v10584_v51 = vadd.f32 %v5193_v50, %v10448_v29 }
 0xe1c   :  { %v5252_v11 = vsel %vm159_vm0, %v10584_v51, 0.0 }
 0xe1d   :  { %5253 = vadd.xlane.f32.xlu1 %v5252_v11  ;;  %v5242_v58 = vpop.xlane.xlu0 %5241 }
 0xe1e   :  { %v5282_v46 = vmul.f32 %v5242_v58, %v10132_v40 }
 0xe1f   :  { %v5195_v9 = vpop.f32.mrf.mxu3 }
 0xe20   :  { %v5196_v45 = vadd.f32 %v10530_v31, %v5195_v9  ;;  %v10629_v48 = vsub.f32 %v10559_v19, %v5282_v46 }
 0xe22   :  { %v10590_v27 = vadd.f32 %v5196_v45, %v10471_v32 }
 0xe24   :  { %v5255_v21 = vsel %vm159_vm0, %v10590_v27, 0.0 }
 0xe25   :  { %5256 = vadd.xlane.f32.xlu2 %v5255_v21  ;;  %v5245_v37 = vpop.xlane.xlu1 %5244  ;;  %v10666_v21 = vsub.f32 %v10551_v20, %v5281_v26 }
 0xe27   :  { %v5197_v28 = vpop.f32.mrf.mxu3  ;;  %v5313_v20 = vmul.f32 %v10666_v21, %v10666_v21 }
 0xe28   :  { %v5198_v57 = vadd.f32 %v10530_v31, %v5197_v28 }
 0xe2a   :  { %v5224_v29 = vadd.f32 %v5198_v57, %v10474_v62  ;;  %v5330_v57 = vsel %vm159_vm0, %v5312_v25, 0.0 }
 0xe2c   :  { %v5258_v14 = vsel %vm159_vm0, %v5224_v29, 0.0 }
 0xe2d   :  { %5259 = vadd.xlane.f32.xlu0 %v5258_v14 }
 0xe2f   :  { %v5200_v33 = vpop.f32.mrf.mxu3 }
 0xe30   :  { %v5201_v24 = vadd.f32 %v10530_v31, %v5200_v33 }
 0xe32   :  { %v10599_v3 = vadd.f32 %v5201_v24, %v10489_v35 }
 0xe34   :  { %v5261_v32 = vsel %vm159_vm0, %v10599_v3, 0.0 }
 0xe35   :  { %5262 = vadd.xlane.f32.xlu1 %v5261_v32 }
 0xe37   :  { %v5202_v42 = vpop.f32.mrf.mxu3 }
 0xe38   :  { %v5203_v2 = vadd.f32 %v10530_v31, %v5202_v42  ;;  %v5333_v42 = vsel %vm159_vm0, %v5313_v20, 0.0 }
 0xe3a   :  { %v10605_v16 = vadd.f32 %v5203_v2, %v10492_v60 }
 0xe3c   :  { %v5264_v62 = vsel %vm159_vm0, %v10605_v16, 0.0 }
 0xe3d   :  { %5265 = vadd.xlane.f32.xlu2 %v5264_v62 }
 0xe3f   :  { %v5205_v15 = vpop.f32.mrf.mxu3 }
 0xe40   :  { %v5206_v41 = vadd.f32 %v10530_v31, %v5205_v15 }
 0xe42   :  { %v10611_v35 = vadd.f32 %v5206_v41, %v10508_v1 }
 0xe44   :  { %v5267_v6 = vsel %vm159_vm0, %v10611_v35, 0.0 }
 0xe45   :  { %5268 = vadd.xlane.f32.xlu0 %v5267_v6 }
 0xe47   :  { %v5207_v55 = vpop.f32.mrf.mxu3 }
 0xe48   :  { %v5208_v60 = vadd.f32 %v10530_v31, %v5207_v55 }
 0xe4a   :  { %v10618_v56 = vadd.f32 %v5208_v60, %v10505_v38  ;;  %v5314_v38 = vmul.f32 %v10629_v48, %v10629_v48 }
 0xe4c   :  { %v5270_v1 = vsel %vm159_vm0, %v10618_v56, 0.0  ;;  %v5336_v13 = vsel %vm159_vm0, %v5314_v38, 0.0 }
 0xe4d   :  { %5271 = vadd.xlane.f32.xlu1 %v5270_v1 }
 0xe55   :  { %5328 = vadd.xlane.f32.xlu1 %v5327_v30 }
 0xe5d   :  { %5337 = vadd.xlane.f32.xlu1 %v5336_v13 }
 0xe88   :  { %v5251_v18 = vpop.xlane.xlu0 %5250 }
 0xe89   :  { %v5285_v53 = vmul.f32 %v5251_v18, %v10132_v40 }
 0xe8b   :  { %v10636_v22 = vsub.f32 %v5221_v34, %v5285_v53 }
 0xe8d   :  { %v5317_v17 = vmul.f32 %v10636_v22, %v10636_v22 }
 0xe8f   :  { %v5345_v19 = vsel %vm159_vm0, %v5317_v17, 0.0 }
 0xe90   :  { %5346 = vadd.xlane.f32.xlu1 %v5345_v19  ;;  %v5254_v14 = vpop.xlane.xlu1 %5253 }
 0xe91   :  { %v5286_v33 = vmul.f32 %v5254_v14, %v10132_v40 }
 0xe93   :  { %v10684_v32 = vsub.f32 %v10584_v51, %v5286_v33 }
 0xe9a   :  { %v5210_v47 = vpop.f32.mrf.mxu3 }
 0xe9b   :  { %v5211_v23 = vadd.f32 %v10530_v31, %v5210_v47 }
 0xe9d   :  { %v10644_v39 = vadd.f32 %v5211_v23, %v10522_v63  ;;  %v5283_v63 = vmul.f32 %v5245_v37, %v10132_v40 }
 0xe9f   :  { %v5273_v34 = vsel %vm159_vm0, %v10644_v39, 0.0  ;;  %v10669_v28 = vsub.f32 %v10565_v44, %v5283_v63 }
 0xea0   :  { %v5260_v0 = vpop.xlane.xlu0 %5259  ;;  %5274 = vadd.xlane.f32.xlu2 %v5273_v34 }
 0xea1   :  { %v5288_v12 = vmul.f32 %v5260_v0, %v10132_v40  ;;  %v5315_v44 = vmul.f32 %v10669_v28, %v10669_v28 }
 0xea2   :  { %v5212_v4 = vpop.f32.mrf.mxu3 }
 0xea3   :  { %v10652_v49 = vsub.f32 %v5224_v29, %v5288_v12  ;;  %v5213_v50 = vadd.f32 %v10530_v31, %v5212_v4  ;;  %v5248_v29 = vpop.xlane.xlu2 %5247  ;;  %v5339_v2 = vsel %vm159_vm0, %v5315_v44, 0.0 }
 0xea5   :  { %v5320_v11 = vmul.f32 %v10652_v49, %v10652_v49  ;;  %v10662_v9 = vadd.f32 %v5213_v50, %v10525_v61  ;;  %v5284_v61 = vmul.f32 %v5248_v29, %v10132_v40 }
 0xea7   :  { %v5354_v45 = vsel %vm159_vm0, %v5320_v11, 0.0  ;;  %v5276_v31 = vsel %vm159_vm0, %v10662_v9, 0.0  ;;  %v10681_v24 = vsub.f32 %v10573_v43, %v5284_v61  ;;  %v5318_v43 = vmul.f32 %v10684_v32, %v10684_v32  ;;  %v10739_v61 = vld [vmem:[%s10905_s13] ss:$0 sm:$0xff] }
 0xea8   :  { %5355 = vadd.xlane.f32.xlu1 %v5354_v45  ;;  %5277 = vadd.xlane.f32.xlu0 %v5276_v31  ;;  %v5263_v15 = vpop.xlane.xlu1 %5262 }
 0xea9   :  { %5331 = vadd.xlane.f32.xlu2 %v5330_v57  ;;  %v5289_v6 = vmul.f32 %v5263_v15, %v10132_v40  ;;  %v5316_v59 = vmul.f32 %v10681_v24, %v10681_v24  ;;  %v5348_v1 = vsel %vm159_vm0, %v5318_v43, 0.0  ;;  %v10734_v57 = vld [vmem:[%s10904_s12] ss:$0 sm:$0xff] }
 0xeab   :  { %v5257_v62 = vpop.xlane.xlu2 %5256  ;;  %v10698_v55 = vsub.f32 %v10599_v3, %v5289_v6  ;;  %v5342_v60 = vsel %vm159_vm0, %v5316_v59, 0.0 }
 0xeac   :  { %v5287_v41 = vmul.f32 %v5257_v62, %v10132_v40 }
 0xead   :  { %v5321_v3 = vmul.f32 %v10698_v55, %v10698_v55 }
 0xeae   :  { %v10695_v51 = vsub.f32 %v10590_v27, %v5287_v41 }
 0xeaf   :  { %v5357_v53 = vsel %vm159_vm0, %v5321_v3, 0.0 }
 0xeb0   :  { %5334 = vadd.xlane.f32.xlu0 %v5333_v42  ;;  %v5319_v27 = vmul.f32 %v10695_v51, %v10695_v51 }
 0xeb1   :  { %5340 = vadd.xlane.f32.xlu2 %v5339_v2 }
 0xeb3   :  { %v5266_v58 = vpop.xlane.xlu2 %5265 }
 0xeb4   :  { %v5290_v30 = vmul.f32 %v5266_v58, %v10132_v40 }
 0xeb6   :  { %v10715_v18 = vsub.f32 %v10605_v16, %v5290_v30 }
 0xeb8   :  { %v5269_v8 = vpop.xlane.xlu0 %5268  ;;  %5343 = vadd.xlane.f32.xlu0 %v5342_v60  ;;  %v5322_v47 = vmul.f32 %v10715_v18, %v10715_v18 }
 0xeb9   :  { %v5291_v46 = vmul.f32 %v5269_v8, %v10132_v40  ;;  %5349 = vadd.xlane.f32.xlu2 %v5348_v1 }
 0xeba   :  { %v5360_v23 = vsel %vm159_vm0, %v5322_v47, 0.0 }
 0xebb   :  { %v10704_v5 = vsub.f32 %v10611_v35, %v5291_v46  ;;  %v5351_v35 = vsel %vm159_vm0, %v5319_v27, 0.0 }
 0xebd   :  { %v5323_v38 = vmul.f32 %v10704_v5, %v10704_v5 }
 0xebf   :  { %v5363_v13 = vsel %vm159_vm0, %v5323_v38, 0.0 }
 0xec0   :  { %5364 = vadd.xlane.f32.xlu1 %v5363_v13  ;;  %v5272_v17 = vpop.xlane.xlu1 %5271  ;;  %5352 = vadd.xlane.f32.xlu0 %v5351_v35 }
 0xec1   :  { %5358 = vadd.xlane.f32.xlu2 %v5357_v53  ;;  %v5292_v19 = vmul.f32 %v5272_v17, %v10132_v40 }
 0xec3   :  { %v10721_v52 = vsub.f32 %v10618_v56, %v5292_v19 }
 0xec5   :  { %v5324_v16 = vmul.f32 %v10721_v52, %v10721_v52 }
 0xec7   :  { %v5366_v7 = vsel %vm159_vm0, %v5324_v16, 0.0 }
 0xec8   :  { %v5329_v0 = vpop.xlane.xlu1 %5328  ;;  %5361 = vadd.xlane.f32.xlu0 %v5360_v23 }
 0xec9   :  { %5367 = vadd.xlane.f32.xlu2 %v5366_v7  ;;  %v5375_v34 = vmul.f32 %v5329_v0, %v10132_v40 }
 0xecb   :  { %v5391_v54 = vadd.f32 1e-05, %v5375_v34 }
 0xecd   :  { %6520 = vrsqrt.f32 %v5391_v54  ;;  %vm5413_vm13 = vweird.f32 %v5391_v54 }
 0xed0   :  { %v5338_v37 = vpop.xlane.xlu1 %5337 }
 0xed1   :  { %v5378_v56 = vmul.f32 %v5338_v37, %v10132_v40 }
 0xed3   :  { %v6521_v12 = vpop.eup %6520  ;;  %v5394_v4 = vadd.f32 1e-05, %v5378_v56 }
 0xed4   :  { %v5408_v26 = vmul.f32 %v6521_v12, %v5391_v54  ;;  %vm5414_vm12 = vweird.f32 %v6521_v12 }
 0xed5   :  { %6522 = vrsqrt.f32 %v5394_v4  ;;  %vm5415_vm14 = vmor %vm5413_vm13, %vm5414_vm12  ;;  %vm5443_vm1 = vweird.f32 %v5394_v4 }
 0xed6   :  { %v5409_v63 = vmul.f32 %v6521_v12, %v5408_v26 }
 0xed8   :  { %v5410_v50 = vmul.f32 0.5, %v5409_v63 }
 0xeda   :  { %v5411_v25 = vsub.f32 1.5, %v5410_v50 }
 0xedb   :  { %v6523_v11 = vpop.eup %6522 }
 0xedc   :  { %v5412_v45 = vmul.f32 %v6521_v12, %v5411_v25  ;;  %v5438_v31 = vmul.f32 %v6523_v11, %v5394_v4  ;;  %vm5444_vm15 = vweird.f32 %v6523_v11 }
 0xedd   :  { %vm5445_vm2 = vmor %vm5443_vm1, %vm5444_vm15 }
 0xede   :  { %v5416_v29 = vsel %vm5415_vm14, %v6521_v12, %v5412_v45  ;;  %v5439_v14 = vmul.f32 %v6523_v11, %v5438_v31 }
 0xedf   :  { %v5567_v33 = vmul.f32 %v5416_v29, %v10621_v10 }
 0xee0   :  { %v5440_v20 = vmul.f32 0.5, %v5439_v14 }
 0xee1   :  { %v5587_v44 = vmul.f32 %v10734_v57, %v5567_v33 }
 0xee2   :  { %v5441_v42 = vsub.f32 1.5, %v5440_v20 }
 0xee3   :  { %v5607_v2 = vadd.f32 %v10739_v61, %v5587_v44 }
 0xee4   :  { %v5442_v62 = vmul.f32 %v6523_v11, %v5441_v42 }
 0xee5   :  { %5623 = vst.msk [vmem:[#allocation2] sm:$0xff] %vm159_vm0, %v5607_v2 }
 0xee6   :  { %v5446_v15 = vsel %vm5445_vm2, %v6523_v11, %v5442_v62 }
 0xee7   :  { %v5570_v41 = vmul.f32 %v5446_v15, %v10629_v48 }
 0xee9   :  { %v5590_v6 = vmul.f32 %v10734_v57, %v5570_v41 }
 0xeeb   :  { %v5610_v59 = vadd.f32 %v10739_v61, %v5590_v6 }
 0xeed   :  { %5626 = vst.msk [vmem:[#allocation2 + $0x18] sm:$0xff] %vm159_vm0, %v5610_v59 }
 0xf03   :  { %v5347_v10 = vpop.xlane.xlu1 %5346 }
 0xf04   :  { %v5381_v43 = vmul.f32 %v5347_v10, %v10132_v40 }
 0xf06   :  { %v5397_v8 = vadd.f32 1e-05, %v5381_v43 }
 0xf08   :  { %6524 = vrsqrt.f32 %v5397_v8  ;;  %vm5473_vm4 = vweird.f32 %v5397_v8 }
 0xf0e   :  { %v6525_v60 = vpop.eup %6524 }
 0xf0f   :  { %v5468_v1 = vmul.f32 %v6525_v60, %v5397_v8  ;;  %vm5474_vm3 = vweird.f32 %v6525_v60 }
 0xf10   :  { %vm5475_vm5 = vmor %vm5473_vm4, %vm5474_vm3 }
 0xf11   :  { %v5469_v58 = vmul.f32 %v6525_v60, %v5468_v1 }
 0xf13   :  { %v5470_v46 = vmul.f32 0.5, %v5469_v58  ;;  %v5275_v30 = vpop.xlane.xlu2 %5274 }
 0xf14   :  { %v5293_v48 = vmul.f32 %v5275_v30, %v10132_v40 }
 0xf15   :  { %v5471_v27 = vsub.f32 1.5, %v5470_v46 }
 0xf16   :  { %v10752_v38 = vsub.f32 %v10644_v39, %v5293_v48 }
 0xf17   :  { %v5472_v3 = vmul.f32 %v6525_v60, %v5471_v27 }
 0xf18   :  { %v5325_v35 = vmul.f32 %v10752_v38, %v10752_v38 }
 0xf19   :  { %v5476_v13 = vsel %vm5475_vm5, %v6525_v60, %v5472_v3 }
 0xf1a   :  { %v5573_v53 = vmul.f32 %v5476_v13, %v10636_v22  ;;  %v5369_v17 = vsel %vm159_vm0, %v5325_v35, 0.0 }
 0xf1b   :  { %v5356_v19 = vpop.xlane.xlu1 %5355  ;;  %v5278_v16 = vpop.xlane.xlu0 %5277  ;;  %5370 = vadd.xlane.f32.xlu0 %v5369_v17 }
 0xf1c   :  { %v5593_v47 = vmul.f32 %v10734_v57, %v5573_v53  ;;  %v5332_v7 = vpop.xlane.xlu2 %5331  ;;  %v5384_v23 = vmul.f32 %v5356_v19, %v10132_v40  ;;  %v5294_v39 = vmul.f32 %v5278_v16, %v10132_v40 }
 0xf1d   :  { %v5376_v0 = vmul.f32 %v5332_v7, %v10132_v40 }
 0xf1e   :  { %v5613_v34 = vadd.f32 %v10739_v61, %v5593_v47  ;;  %v5400_v54 = vadd.f32 1e-05, %v5384_v23  ;;  %v10764_v37 = vsub.f32 %v10662_v9, %v5294_v39 }
 0xf1f   :  { %v5392_v22 = vadd.f32 1e-05, %v5376_v0 }
 0xf20   :  { %5629 = vst.msk [vmem:[#allocation2 + $0x30] sm:$0xff] %vm159_vm0, %v5613_v34  ;;  %6526 = vrsqrt.f32 %v5400_v54  ;;  %v5326_v56 = vmul.f32 %v10764_v37, %v10764_v37  ;;  %vm5503_vm8 = vweird.f32 %v5400_v54 }
 0xf21   :  { %6528 = vrsqrt.f32 %v5392_v22  ;;  %vm5423_vm9 = vweird.f32 %v5392_v22 }
 0xf22   :  { %v5372_v12 = vsel %vm159_vm0, %v5326_v56, 0.0 }
 0xf23   :  { %5373 = vadd.xlane.f32.xlu1 %v5372_v12  ;;  %v5335_v4 = vpop.xlane.xlu0 %5334 }
 0xf24   :  { %v5341_v26 = vpop.xlane.xlu2 %5340  ;;  %v5377_v63 = vmul.f32 %v5335_v4, %v10132_v40 }
 0xf25   :  { %v5379_v50 = vmul.f32 %v5341_v26, %v10132_v40 }
 0xf26   :  { %v6527_v25 = vpop.eup %6526  ;;  %v10772_v45 = vadd.f32 1e-05, %v5377_v63 }
 0xf27   :  { %v6529_v9 = vpop.eup %6528  ;;  %v5498_v11 = vmul.f32 %v6527_v25, %v5400_v54  ;;  %v10774_v31 = vadd.f32 1e-05, %v5379_v50  ;;  %vm5504_vm6 = vweird.f32 %v6527_v25 }
 0xf28   :  { %v5418_v29 = vmul.f32 %v6529_v9, %v5392_v22  ;;  %6530 = vrsqrt.f32 %v10772_v45  ;;  %vm5424_vm7 = vweird.f32 %v6529_v9  ;;  %vm5505_vm10 = vmor %vm5503_vm8, %vm5504_vm6  ;;  %vm5433_vm14 = vweird.f32 %v10772_v45 }
 0xf29   :  { %v5499_v14 = vmul.f32 %v6527_v25, %v5498_v11  ;;  %6532 = vrsqrt.f32 %v10774_v31  ;;  %vm5425_vm11 = vmor %vm5423_vm9, %vm5424_vm7  ;;  %vm5453_vm1 = vweird.f32 %v10774_v31 }
 0xf2a   :  { %v5419_v33 = vmul.f32 %v6529_v9, %v5418_v29 }
 0xf2b   :  { %v5500_v20 = vmul.f32 0.5, %v5499_v14  ;;  %v5344_v42 = vpop.xlane.xlu0 %5343 }
 0xf2c   :  { %v5420_v44 = vmul.f32 0.5, %v5419_v33  ;;  %v5350_v2 = vpop.xlane.xlu2 %5349  ;;  %v5380_v15 = vmul.f32 %v5344_v42, %v10132_v40 }
 0xf2d   :  { %v5501_v62 = vsub.f32 1.5, %v5500_v20  ;;  %v5382_v41 = vmul.f32 %v5350_v2, %v10132_v40 }
 0xf2e   :  { %v5421_v6 = vsub.f32 1.5, %v5420_v44  ;;  %v6531_v59 = vpop.eup %6530  ;;  %v10780_v43 = vadd.f32 1e-05, %v5380_v15 }
 0xf2f   :  { %v5502_v10 = vmul.f32 %v6527_v25, %v5501_v62  ;;  %v10782_v8 = vadd.f32 1e-05, %v5382_v41  ;;  %v6533_v60 = vpop.eup %6532  ;;  %v5428_v58 = vmul.f32 %v6531_v59, %v10772_v45  ;;  %vm5434_vm12 = vweird.f32 %v6531_v59 }
 0xf30   :  { %v5422_v1 = vmul.f32 %v6529_v9, %v5421_v6  ;;  %v5448_v30 = vmul.f32 %v6533_v60, %v10774_v31  ;;  %6534 = vrsqrt.f32 %v10780_v43  ;;  %vm5454_vm13 = vweird.f32 %v6533_v60  ;;  %vm5435_vm15 = vmor %vm5433_vm14, %vm5434_vm12 }
 0xf31   :  { %v5506_v46 = vsel %vm5505_vm10, %v6527_v25, %v5502_v10  ;;  %v5429_v3 = vmul.f32 %v6531_v59, %v5428_v58  ;;  %6536 = vrsqrt.f32 %v10782_v8  ;;  %vm5455_vm2 = vmor %vm5453_vm1, %vm5454_vm13  ;;  %vm5463_vm3 = vweird.f32 %v10780_v43 }
 0xf32   :  { %v5426_v27 = vsel %vm5425_vm11, %v6529_v9, %v5422_v1  ;;  %v5576_v48 = vmul.f32 %v5506_v46, %v10652_v49  ;;  %v5449_v35 = vmul.f32 %v6533_v60, %v5448_v30  ;;  %vm5483_vm7 = vweird.f32 %v10782_v8 }
 0xf33   :  { %v5568_v13 = vmul.f32 %v5426_v27, %v10647_v36  ;;  %v5365_v53 = vpop.xlane.xlu1 %5364  ;;  %v5430_v19 = vmul.f32 0.5, %v5429_v3  ;;  %v5353_v47 = vpop.xlane.xlu0 %5352 }
 0xf34   :  { %v5596_v17 = vmul.f32 %v10734_v57, %v5576_v48  ;;  %v5359_v16 = vpop.xlane.xlu2 %5358  ;;  %v5387_v7 = vmul.f32 %v5365_v53, %v10132_v40  ;;  %v5450_v39 = vmul.f32 0.5, %v5449_v35  ;;  %v5383_v49 = vmul.f32 %v5353_v47, %v10132_v40 }
 0xf35   :  { %v5588_v23 = vmul.f32 %v10734_v57, %v5568_v13  ;;  %v5385_v0 = vmul.f32 %v5359_v16, %v10132_v40  ;;  %v5431_v34 = vsub.f32 1.5, %v5430_v19 }
 0xf36   :  { %v5616_v36 = vadd.f32 %v10739_v61, %v5596_v17  ;;  %v10796_v54 = vadd.f32 1e-05, %v5387_v7  ;;  %v6535_v22 = vpop.eup %6534  ;;  %v5451_v12 = vsub.f32 1.5, %v5450_v39  ;;  %v10799_v4 = vadd.f32 1e-05, %v5383_v49 }
 0xf37   :  { %v5608_v56 = vadd.f32 %v10739_v61, %v5588_v23  ;;  %v10801_v26 = vadd.f32 1e-05, %v5385_v0  ;;  %v5432_v63 = vmul.f32 %v6531_v59, %v5431_v34  ;;  %v5458_v50 = vmul.f32 %v6535_v22, %v10780_v43  ;;  %v6537_v25 = vpop.eup %6536 }
 0xf38   :  { %5632 = vst.msk [vmem:[#allocation2 + $0x48] sm:$0xff] %vm159_vm0, %v5616_v36  ;;  %6538 = vrsqrt.f32 %v10796_v54  ;;  %v5452_v9 = vmul.f32 %v6533_v60, %v5451_v12  ;;  %v5478_v45 = vmul.f32 %v6537_v25, %v10782_v8  ;;  %vm5464_vm4 = vweird.f32 %v6535_v22 }
 0xf39   :  { %5624 = vst.msk [vmem:[#allocation2 + $0x8] sm:$0xff] %vm159_vm0, %v5608_v56  ;;  %6540 = vrsqrt.f32 %v10799_v4  ;;  %v5436_v11 = vsel %vm5435_vm15, %v6531_v59, %v5432_v63  ;;  %v5459_v29 = vmul.f32 %v6535_v22, %v5458_v50  ;;  %vm5484_vm5 = vweird.f32 %v6537_v25  ;;  %vm5465_vm6 = vmor %vm5463_vm3, %vm5464_vm4 }
 0xf3a   :  { %v5569_v14 = vmul.f32 %v5436_v11, %v10666_v21  ;;  %v5456_v33 = vsel %vm5455_vm2, %v6533_v60, %v5452_v9  ;;  %6542 = vrsqrt.f32 %v10801_v26  ;;  %v5479_v42 = vmul.f32 %v6537_v25, %v5478_v45  ;;  %vm5485_vm8 = vmor %vm5483_vm7, %vm5484_vm5 }
 0xf3b   :  { %v5571_v20 = vmul.f32 %v5456_v33, %v10669_v28  ;;  %v5460_v44 = vmul.f32 0.5, %v5459_v29  ;;  %v5362_v2 = vpop.xlane.xlu0 %5361  ;;  %vm5493_vm10 = vweird.f32 %v10799_v4  ;;  %vm5533_vm12 = vweird.f32 %v10796_v54 }
 0xf3c   :  { %v5368_v62 = vpop.xlane.xlu2 %5367  ;;  %v5589_v31 = vmul.f32 %v10734_v57, %v5569_v14  ;;  %v5386_v15 = vmul.f32 %v5362_v2, %v10132_v40  ;;  %v5480_v59 = vmul.f32 0.5, %v5479_v42  ;;  %vm5513_vm1 = vweird.f32 %v10801_v26 }
 0xf3d   :  { %v5591_v6 = vmul.f32 %v10734_v57, %v5571_v20  ;;  %v5461_v21 = vsub.f32 1.5, %v5460_v44  ;;  %v5388_v58 = vmul.f32 %v5368_v62, %v10132_v40 }
 0xf3e   :  { %v6539_v41 = vpop.eup %6538  ;;  %v5609_v28 = vadd.f32 %v10739_v61, %v5589_v31  ;;  %v10822_v1 = vadd.f32 1e-05, %v5386_v15  ;;  %v5481_v27 = vsub.f32 1.5, %v5480_v59 }
 0xf3f   :  { %v6541_v10 = vpop.eup %6540  ;;  %v5528_v60 = vmul.f32 %v6539_v41, %v10796_v54  ;;  %v5611_v46 = vadd.f32 %v10739_v61, %v5591_v6  ;;  %v5462_v30 = vmul.f32 %v6535_v22, %v5461_v21  ;;  %v10837_v7 = vadd.f32 1e-05, %v5388_v58 }
 0xf40   :  { %v5488_v48 = vmul.f32 %v6541_v10, %v10799_v4  ;;  %v6543_v3 = vpop.eup %6542  ;;  %5625 = vst.msk [vmem:[#allocation2 + $0x10] sm:$0xff] %vm159_vm0, %v5609_v28  ;;  %6544 = vrsqrt.f32 %v10822_v1  ;;  %v5482_v53 = vmul.f32 %v6537_v25, %v5481_v27  ;;  %vm5534_vm9 = vweird.f32 %v6539_v41 }
 0xf41   :  { %v5529_v13 = vmul.f32 %v6539_v41, %v5528_v60  ;;  %5627 = vst.msk [vmem:[#allocation2 + $0x20] sm:$0xff] %vm159_vm0, %v5611_v46  ;;  %v5466_v35 = vsel %vm5465_vm6, %v6535_v22, %v5462_v30  ;;  %v5508_v19 = vmul.f32 %v6543_v3, %v10801_v26  ;;  %6546 = vrsqrt.f32 %v10837_v7  ;;  %vm5535_vm14 = vmor %vm5533_vm12, %vm5534_vm9 }
 0xf42   :  { %v5489_v17 = vmul.f32 %v6541_v10, %v5488_v48  ;;  %v5572_v47 = vmul.f32 %v5466_v35, %v10681_v24  ;;  %v5486_v43 = vsel %vm5485_vm8, %v6537_v25, %v5482_v53  ;;  %vm5494_vm11 = vweird.f32 %v6541_v10 }
 0xf43   :  { %v5530_v16 = vmul.f32 0.5, %v5529_v13  ;;  %v5509_v8 = vmul.f32 %v6543_v3, %v5508_v19  ;;  %v5574_v49 = vmul.f32 %v5486_v43, %v10684_v32  ;;  %vm5514_vm13 = vweird.f32 %v6543_v3  ;;  %vm5495_vm15 = vmor %vm5493_vm10, %vm5494_vm11 }
 0xf44   :  { %v5490_v23 = vmul.f32 0.5, %v5489_v17  ;;  %v5592_v39 = vmul.f32 %v10734_v57, %v5572_v47  ;;  %vm5515_vm2 = vmor %vm5513_vm1, %vm5514_vm13  ;;  %vm5523_vm4 = vweird.f32 %v10822_v1  ;;  %vm5543_vm7 = vweird.f32 %v10837_v7 }
 0xf45   :  { %v5531_v0 = vsub.f32 1.5, %v5530_v16  ;;  %v5510_v24 = vmul.f32 0.5, %v5509_v8  ;;  %v5594_v56 = vmul.f32 %v10734_v57, %v5574_v49 }
 0xf46   :  { %v5491_v36 = vsub.f32 1.5, %v5490_v23  ;;  %v6545_v34 = vpop.eup %6544  ;;  %v5612_v22 = vadd.f32 %v10739_v61, %v5592_v39 }
 0xf47   :  { %v5532_v12 = vmul.f32 %v6539_v41, %v5531_v0  ;;  %v5511_v50 = vsub.f32 1.5, %v5510_v24  ;;  %v5518_v32 = vmul.f32 %v6545_v34, %v10822_v1  ;;  %v5614_v25 = vadd.f32 %v10739_v61, %v5594_v56  ;;  %v6547_v14 = vpop.eup %6546 }
 0xf48   :  { %v5492_v63 = vmul.f32 %v6541_v10, %v5491_v36  ;;  %5628 = vst.msk [vmem:[#allocation2 + $0x28] sm:$0xff] %vm159_vm0, %v5612_v22  ;;  %v5538_v42 = vmul.f32 %v6547_v14, %v10837_v7  ;;  %vm5524_vm3 = vweird.f32 %v6545_v34  ;;  %vm5544_vm6 = vweird.f32 %v6547_v14 }
 0xf49   :  { %v5536_v9 = vsel %vm5535_vm14, %v6539_v41, %v5532_v12  ;;  %v5512_v29 = vmul.f32 %v6543_v3, %v5511_v50  ;;  %v5519_v45 = vmul.f32 %v6545_v34, %v5518_v32  ;;  %5630 = vst.msk [vmem:[#allocation2 + $0x38] sm:$0xff] %vm159_vm0, %v5614_v25  ;;  %vm5525_vm5 = vmor %vm5523_vm4, %vm5524_vm3 }
 0xf4a   :  { %v5496_v11 = vsel %vm5495_vm15, %v6541_v10, %v5492_v63  ;;  %v5579_v54 = vmul.f32 %v5536_v9, %v10704_v5  ;;  %v5539_v31 = vmul.f32 %v6547_v14, %v5538_v42  ;;  %vm5545_vm8 = vmor %vm5543_vm7, %vm5544_vm6 }
 0xf4b   :  { %v5575_v33 = vmul.f32 %v5496_v11, %v10695_v51  ;;  %v5516_v20 = vsel %vm5515_vm2, %v6543_v3, %v5512_v29  ;;  %v5520_v4 = vmul.f32 0.5, %v5519_v45 }
 0xf4c   :  { %v5599_v44 = vmul.f32 %v10734_v57, %v5579_v54  ;;  %v5577_v2 = vmul.f32 %v5516_v20, %v10698_v55  ;;  %v5540_v6 = vmul.f32 0.5, %v5539_v31 }
 0xf4d   :  { %v5595_v26 = vmul.f32 %v10734_v57, %v5575_v33  ;;  %v5521_v62 = vsub.f32 1.5, %v5520_v4 }
 0xf4e   :  { %v5619_v5 = vadd.f32 %v10739_v61, %v5599_v44  ;;  %v5597_v51 = vmul.f32 %v10734_v57, %v5577_v2  ;;  %v5541_v59 = vsub.f32 1.5, %v5540_v6 }
 0xf4f   :  { %v5615_v15 = vadd.f32 %v10739_v61, %v5595_v26  ;;  %v5522_v41 = vmul.f32 %v6545_v34, %v5521_v62 }
 0xf50   :  { %5635 = vst.msk [vmem:[#allocation2 + $0x60] sm:$0xff] %vm159_vm0, %v5619_v5  ;;  %v5617_v21 = vadd.f32 %v10739_v61, %v5597_v51  ;;  %v5542_v28 = vmul.f32 %v6547_v14, %v5541_v59 }
 0xf51   :  { %5631 = vst.msk [vmem:[#allocation2 + $0x40] sm:$0xff] %vm159_vm0, %v5615_v15  ;;  %v5526_v55 = vsel %vm5525_vm5, %v6545_v34, %v5522_v41 }
 0xf52   :  { %5633 = vst.msk [vmem:[#allocation2 + $0x50] sm:$0xff] %vm159_vm0, %v5617_v21  ;;  %v5578_v10 = vmul.f32 %v5526_v55, %v10715_v18  ;;  %v5546_v1 = vsel %vm5545_vm8, %v6547_v14, %v5542_v28 }
 0xf53   :  { %v5580_v46 = vmul.f32 %v5546_v1, %v10721_v52 }
 0xf54   :  { %v5598_v60 = vmul.f32 %v10734_v57, %v5578_v10 }
 0xf55   :  { %v5600_v30 = vmul.f32 %v10734_v57, %v5580_v46 }
 0xf56   :  { %v5618_v58 = vadd.f32 %v10739_v61, %v5598_v60 }
 0xf57   :  { %v5620_v27 = vadd.f32 %v10739_v61, %v5600_v30 }
 0xf58   :  { %5634 = vst.msk [vmem:[#allocation2 + $0x58] sm:$0xff] %vm159_vm0, %v5618_v58 }
 0xf59   :  { %5636 = vst.msk [vmem:[#allocation2 + $0x68] sm:$0xff] %vm159_vm0, %v5620_v27 }
 0xf8e   :  { %v5371_v18 = vpop.xlane.xlu0 %5370 }
 0xf8f   :  { %v5389_v48 = vmul.f32 %v5371_v18, %v10132_v40 }
 0xf91   :  { %v5405_v3 = vadd.f32 1e-05, %v5389_v48 }
 0xf93   :  { %6548 = vrsqrt.f32 %v5405_v3  ;;  %vm5553_vm10 = vweird.f32 %v5405_v3 }
 0xf96   :  { %v5374_v13 = vpop.xlane.xlu1 %5373 }
 0xf97   :  { %v5390_v35 = vmul.f32 %v5374_v13, %v10132_v40 }
 0xf99   :  { %v6549_v53 = vpop.eup %6548  ;;  %v5406_v17 = vadd.f32 1e-05, %v5390_v35 }
 0xf9a   :  { %v5548_v19 = vmul.f32 %v6549_v53, %v5405_v3  ;;  %vm5554_vm9 = vweird.f32 %v6549_v53 }
 0xf9b   :  { %6550 = vrsqrt.f32 %v5406_v17  ;;  %vm5555_vm11 = vmor %vm5553_vm10, %vm5554_vm9  ;;  %vm5563_vm13 = vweird.f32 %v5406_v17 }
 0xf9c   :  { %v5549_v52 = vmul.f32 %v6549_v53, %v5548_v19 }
 0xf9e   :  { %v5550_v47 = vmul.f32 0.5, %v5549_v52 }
 0xfa0   :  { %v5551_v16 = vsub.f32 1.5, %v5550_v47 }
 0xfa1   :  { %v6551_v7 = vpop.eup %6550 }
 0xfa2   :  { %v5552_v43 = vmul.f32 %v6549_v53, %v5551_v16  ;;  %v5558_v23 = vmul.f32 %v6551_v7, %v5406_v17  ;;  %vm5564_vm12 = vweird.f32 %v6551_v7 }
 0xfa3   :  { %vm5565_vm14 = vmor %vm5563_vm13, %vm5564_vm12 }
 0xfa4   :  { %v5556_v8 = vsel %vm5555_vm11, %v6549_v53, %v5552_v43  ;;  %v5559_v39 = vmul.f32 %v6551_v7, %v5558_v23 }
 0xfa5   :  { %v5581_v49 = vmul.f32 %v5556_v8, %v10752_v38 }
 0xfa6   :  { %v5560_v0 = vmul.f32 0.5, %v5559_v39 }
 0xfa7   :  { %v5601_v40 = vmul.f32 %v10734_v57, %v5581_v49 }
 0xfa8   :  { %v5561_v36 = vsub.f32 1.5, %v5560_v0 }
 0xfa9   :  { %v5621_v24 = vadd.f32 %v10739_v61, %v5601_v40 }
 0xfaa   :  { %v5562_v34 = vmul.f32 %v6551_v7, %v5561_v36 }
 0xfab   :  { %5637 = vst.msk [vmem:[#allocation2 + $0x70] sm:$0xff] %vm159_vm0, %v5621_v24 }
 0xfac   :  { %v5566_v22 = vsel %vm5565_vm14, %v6551_v7, %v5562_v34 }
 0xfad   :  { %v5582_v56 = vmul.f32 %v5566_v22, %v10764_v37 }
 0xfaf   :  { %v5602_v38 = vmul.f32 %v10734_v57, %v5582_v56 }
 0xfb1   :  { %v5622_v12 = vadd.f32 %v10739_v61, %v5602_v38 }
 0xfb3   :  { %5638 = vst.msk [vmem:[#allocation2 + $0x78] sm:$0xff] %vm159_vm0, %v5622_v12 }
 0xfb4   :  { %5651 = dma.vmem_to_hbm [thread:$0]  %s5644_s20, 2048, %s5646_s19, [#allocation3], %s6595_s7, %s6595_s7, %s6591_s2  }
 0xfb5   :  { %6576 = dma.done.wait [#allocation3], 2048  }
 0xfb6   :  { %6577 = vsyncadd [#allocation3], 4294965248 }
 0xfb7   :  { %5656 = vsyncpa [#allocation3], 1 }

</bundles_post_ra>
